<compile_context>
chip_gen: v7x
topology: tpu7x:2x2x1
jax: 0.10.0
libtpu: 0.0.40
codegen_flags: <defaults>
</compile_context>

<pallas_src>
import jax
import jax.numpy as jnp
from jax.experimental import pallas as pl
from jax.experimental.pallas import tpu as pltpu

EPS = 1e-5
TARGET_TILE_M = 1024  # rows per grid step; re-derived to also fit v7x VMEM


# ------------------------------ Pallas kernel --------------------------------

def _conv_bn_relu_kernel(p_ref, w_ref, s_ref, b_ref, o_ref):
    # p_ref: (TILE_M, K) bf16 im2col patches, w_ref: (K, Cout) bf16,
    # s_ref/b_ref: (1, Cout) f32 folded BN scale/bias, o_ref: (TILE_M, Cout) bf16.
    acc = jnp.dot(p_ref[...], w_ref[...], preferred_element_type=jnp.float32)
    y = acc * s_ref[...] + b_ref[...]
    o_ref[...] = jnp.maximum(y, 0.0).astype(o_ref.dtype)


def _round_up(x, m):
    return (x + m - 1) // m * m


def _matmul_bn_relu(patches, w, scale, bias):
    """relu((patches @ w) * scale + bias), tiled over rows on the MXU."""
    M, K = patches.shape
    cact = w.shape[1]

    if M > TARGET_TILE_M:
        tile_m = TARGET_TILE_M
        mp = _round_up(M, tile_m)
    else:
        tile_m = M
        mp = M

    p = patches.astype(jnp.bfloat16)
    if mp != M:
        p = jnp.pad(p, ((0, mp - M), (0, 0)))
    wq = w.astype(jnp.bfloat16)
    s2 = scale.reshape(1, cact).astype(jnp.float32)
    b2 = bias.reshape(1, cact).astype(jnp.float32)

    grid_m = mp // tile_m

    # Advisory cost estimate for the XLA scheduler around the custom call.
    cost = pl.CostEstimate(
        flops=2 * mp * K * cact,
        transcendentals=0,
        bytes_accessed=mp * K * 2 + K * cact * 2 + mp * cact * 2
        + 2 * cact * 4 * grid_m,
    )
    # VMEM budget: double-buffered input & output tiles + resident weights.
    block_bytes = 2 * tile_m * (K + cact) * 2 + K * cact * 2 + 2 * cact * 4
    vmem_limit = int(min(max(6 * block_bytes, 16 << 20), 32 << 20))

    out = pl.pallas_call(
        _conv_bn_relu_kernel,
        out_shape=jax.ShapeDtypeStruct((mp, cact), jnp.bfloat16),
        grid=(grid_m,),
        in_specs=[
            pl.BlockSpec((tile_m, K), lambda i: (i, 0)),
            pl.BlockSpec((K, cact), lambda i: (0, 0)),
            pl.BlockSpec((1, cact), lambda i: (0, 0)),
            pl.BlockSpec((1, cact), lambda i: (0, 0)),
        ],
        out_specs=pl.BlockSpec((tile_m, cact), lambda i: (i, 0)),
        compiler_params=pltpu.CompilerParams(
            dimension_semantics=("parallel",),
            vmem_limit_bytes=vmem_limit,
        ),
        cost_estimate=cost,
    )(p, wq, s2, b2)

    if mp != M:
        out = out[:M]
    return out


# ------------------------------ JAX glue --------------------------------------

def _im2col(x, kh, kw, stride, pad):
    """x: (N, H, W, C) -> patches (N*Ho*Wo, kh*kw*C)."""
    N, H, W, C = x.shape
    xp = jnp.pad(x, ((0, 0), (pad, pad), (pad, pad), (0, 0)),
                 constant_values=0.0)
    Hp, Wp = H + 2 * pad, W + 2 * pad
    Ho = (Hp - kh) // stride + 1
    Wo = (Wp - kw) // stride + 1
    cols = []
    for i in range(kh):
        for j in range(kw):
            sl = jax.lax.slice(
                xp,
                (0, i, j, 0),
                (N, i + (Ho - 1) * stride + 1, j + (Wo - 1) * stride + 1, C),
                (1, stride, stride, 1))
            cols.append(sl)
    patches = jnp.concatenate(cols, axis=-1).reshape(N * Ho * Wo, kh * kw * C)
    return patches, (N, Ho, Wo)


def conv_bn_act(x, params, kh, kw, stride, pad):
    """Spatial conv (no bias) + folded BN + ReLU (CReLU pre-folded). x: NHWC."""
    w, scale, bias = params
    patches, (N, Ho, Wo) = _im2col(x, kh, kw, stride, pad)
    out = _matmul_bn_relu(patches, w, scale, bias)
    return out.reshape(N, Ho, Wo, w.shape[1])


def conv1x1_bn_relu(x, params):
    """1x1 conv + folded BN + ReLU. No im2col (zero read amplification)."""
    w, scale, bias = params
    N, H, W, C = x.shape
    out = _matmul_bn_relu(x.reshape(N * H * W, C), w, scale, bias)
    return out.reshape(N, H, W, w.shape[1])


def pool2d(x, mode, stride):
    """3x3 pooling, padding=1, as a fused tap chain (no 9x HBM staging)."""
    N, H, W, C = x.shape
    pad_val = -jnp.inf if mode == "max" else 0.0
    xp = jnp.pad(x, ((0, 0), (1, 1), (1, 1), (0, 0)), constant_values=pad_val)
    Ho = (H + 2 - 3) // stride + 1
    Wo = (W + 2 - 3) // stride + 1
    acc = None
    for i in range(3):
        for j in range(3):
            sl = jax.lax.slice(
                xp,
                (0, i, j, 0),
                (N, i + (Ho - 1) * stride + 1, j + (Wo - 1) * stride + 1, C),
                (1, stride, stride, 1))
            if mode == "max":
                acc = sl if acc is None else jnp.maximum(acc, sl)
            else:  # avg, count_include_pad=True -> always divide by 9
                slf = sl.astype(jnp.float32)
                acc = slf if acc is None else acc + slf
    if mode == "avg":
        acc = (acc * (1.0 / 9.0)).astype(x.dtype)
    return acc


# ------------------------------ parameters ------------------------------------

def make_conv(key, kh, kw, cin, cout):
    # matches init_weights: conv weight ~ N(0, 0.01), BN gamma=1, beta=0,
    # running_mean=0, running_var=1 (eval-mode fold).
    w = 0.01 * jax.random.normal(key, (kh * kw * cin, cout), dtype=jnp.float32)
    gamma = jnp.ones((cout,), jnp.float32)
    beta = jnp.zeros((cout,), jnp.float32)
    rmean = jnp.zeros((cout,), jnp.float32)
    rvar = jnp.ones((cout,), jnp.float32)
    scale = gamma / jnp.sqrt(rvar + EPS)
    bias = beta - rmean * scale
    return (w, scale, bias)


def fold_crelu(params):
    # relu(cat([bn(conv(x)), -bn(conv(x))])) == relu(x @ [W,-W] * [s,s] + [b,-b])
    w, s, b = params
    return (jnp.concatenate([w, -w], axis=1),
            jnp.concatenate([s, s], axis=0),
            jnp.concatenate([b, -b], axis=0))


def fuse_convs(param_list):
    # Fuse several 1x1 convs that consume the same input into one wide matmul.
    ws, ss, bs = zip(*param_list)
    return (jnp.concatenate(ws, axis=1),
            jnp.concatenate(ss, axis=0),
            jnp.concatenate(bs, axis=0))


def make_inception(key):
    ks = jax.random.split(key, 7)
    b1x1 = make_conv(ks[0], 1, 1, 128, 32)
    b1x1_2 = make_conv(ks[1], 1, 1, 128, 32)
    b3x3_red = make_conv(ks[2], 1, 1, 128, 24)
    b3x3 = make_conv(ks[3], 3, 3, 24, 32)
    b3x3_red2 = make_conv(ks[4], 1, 1, 128, 24)
    b3x3_2 = make_conv(ks[5], 3, 3, 24, 32)
    b3x3_3 = make_conv(ks[6], 3, 3, 32, 32)
    return dict(
        fused1x1=fuse_convs([b1x1, b3x3_red, b3x3_red2]),  # 32 + 24 + 24 = 80
        b1x1_2=b1x1_2,
        b3x3=b3x3,
        b3x3_2=b3x3_2,
        b3x3_3=b3x3_3,
    )


def make_params(key):
    ks = jax.random.split(key, 9)
    return dict(
        conv1=fold_crelu(make_conv(ks[0], 7, 7, 3, 24)),    # CReLU -> 48 ch
        conv2=fold_crelu(make_conv(ks[1], 5, 5, 48, 64)),   # CReLU -> 128 ch
        inc1=make_inception(ks[2]),
        inc2=make_inception(ks[3]),
        inc3=make_inception(ks[4]),
        conv3_1=make_conv(ks[5], 1, 1, 128, 128),
        conv3_2=make_conv(ks[6], 3, 3, 128, 256),
        conv4_1=make_conv(ks[7], 1, 1, 256, 128),
        conv4_2=make_conv(ks[8], 3, 3, 128, 256),
    )


# ------------------------------ model ------------------------------------------

def inception(x, q):
    # One fused 128->80 matmul for the three 1x1 branches reading x directly.
    y = conv1x1_bn_relu(x, q["fused1x1"])
    b1 = y[..., 0:32]     # branch1x1
    r3 = y[..., 32:56]    # branch3x3_reduce
    r4 = y[..., 56:80]    # branch3x3_reduce_2

    xp = pool2d(x, "avg", 1)
    b2 = conv1x1_bn_relu(xp, q["b1x1_2"])

    b3 = conv_bn_act(r3, q["b3x3"], 3, 3, 1, 1)

    b4 = conv_bn_act(r4, q["b3x3_2"], 3, 3, 1, 1)
    b4 = conv_bn_act(b4, q["b3x3_3"], 3, 3, 1, 1)

    return jnp.concatenate([b1, b2, b3, b4], axis=-1)  # 4 * 32 = 128 channels


def faceboxes_forward(x_nchw, p):
    x = jnp.transpose(x_nchw, (0, 2, 3, 1)).astype(jnp.bfloat16)  # -> NHWC bf16

    x = conv_bn_act(x, p["conv1"], 7, 7, 4, 3)     # CReLU folded -> 48 ch
    x = pool2d(x, "max", 2)
    x = conv_bn_act(x, p["conv2"], 5, 5, 2, 2)     # CReLU folded -> 128 ch
    x = pool2d(x, "max", 2)
    x = inception(x, p["inc1"])
    x = inception(x, p["inc2"])
    x = inception(x, p["inc3"])
    ds1 = x                                        # 128 ch

    x = conv1x1_bn_relu(x, p["conv3_1"])
    x = conv_bn_act(x, p["conv3_2"], 3, 3, 2, 1)
    ds2 = x                                        # 256 ch

    x = conv1x1_bn_relu(x, p["conv4_1"])
    x = conv_bn_act(x, p["conv4_2"], 3, 3, 2, 1)
    ds3 = x                                        # 256 ch

    # Return NCHW f32 like the PyTorch module.
    return tuple(jnp.transpose(d, (0, 3, 1, 2)).astype(jnp.float32)
                 for d in (ds1, ds2, ds3))


# ------------------------------ main --------------------------------------------

if __name__ == "__main__":
    key = jax.random.PRNGKey(0)
    pkey, xkey = jax.random.split(key)
    params = make_params(pkey)

    # small but downsample-consistent input: 128 /4 /2 /2 /2 -> 4, then 2, then 1
    x = jax.random.normal(xkey, (2, 3, 128, 128), dtype=jnp.float32)

    outs = jax.jit(faceboxes_forward)(x, params)
    outs = jax.block_until_ready(outs)

    assert outs[0].shape == (2, 128, 4, 4), outs[0].shape
    assert outs[1].shape == (2, 256, 2, 2), outs[1].shape
    assert outs[2].shape == (2, 256, 1, 1), outs[2].shape
    assert all(bool(jnp.all(jnp.isfinite(o))) for o in outs)

    print("KERNEL_OK")
</pallas_src>

<mosaic_0001>
module attributes {stable_mosaic.version = 11 : i64} {
  func.func @_conv_bn_relu_kernel(%arg0: i32, %arg1: memref<1024x147xbf16, #tpu.memory_space<vmem>>, %arg2: memref<147x48xbf16, #tpu.memory_space<vmem>>, %arg3: memref<1x48xf32, #tpu.memory_space<vmem>>, %arg4: memref<1x48xf32, #tpu.memory_space<vmem>>, %arg5: memref<1024x48xbf16, #tpu.memory_space<vmem>>) attributes {dimension_semantics = [#tpu.dimension_semantics<parallel>], iteration_bounds = array<i64: 2>, scalar_prefetch = 0 : i64, scratch_operands = 0 : i64, tpu.core_type = #tpu.core_type<tc>, window_params = [{transform_indices = @transform_0, window_bounds = array<i64: 1024, 147>}, {pipeline_mode = #tpu.pipeline_mode<synchronous>, transform_indices = @transform_1, window_bounds = array<i64: 147, 48>}, {pipeline_mode = #tpu.pipeline_mode<synchronous>, transform_indices = @transform_2, window_bounds = array<i64: 1, 48>}, {pipeline_mode = #tpu.pipeline_mode<synchronous>, transform_indices = @transform_3, window_bounds = array<i64: 1, 48>}, {transform_indices = @transform_4, window_bounds = array<i64: 1024, 48>}]} {
    %c0 = arith.constant 0 : index
    %c0_0 = arith.constant 0 : index
    %0 = vector.load %arg1[%c0, %c0_0] : memref<1024x147xbf16, #tpu.memory_space<vmem>>, vector<1024x147xbf16>
    %c0_1 = arith.constant 0 : index
    %c0_2 = arith.constant 0 : index
    %1 = vector.load %arg2[%c0_1, %c0_2] : memref<147x48xbf16, #tpu.memory_space<vmem>>, vector<147x48xbf16>
    %cst = arith.constant dense<0.000000e+00> : vector<1024x48xf32>
    %2 = tpu.matmul %0, %1, %cst {dimension_numbers = #tpu.dot_dimension_numbers<[1], [0], [0], [1], [0, 0, 1, 1], [], []>} : vector<1024x147xbf16>, vector<147x48xbf16>, vector<1024x48xf32> -> vector<1024x48xf32>
    %c0_3 = arith.constant 0 : index
    %c0_4 = arith.constant 0 : index
    %3 = vector.load %arg3[%c0_3, %c0_4] : memref<1x48xf32, #tpu.memory_space<vmem>>, vector<1x48xf32>
    %4 = vector.broadcast %3 : vector<1x48xf32> to vector<1024x48xf32>
    %5 = arith.mulf %2, %4 : vector<1024x48xf32>
    %c0_5 = arith.constant 0 : index
    %c0_6 = arith.constant 0 : index
    %6 = vector.load %arg4[%c0_5, %c0_6] : memref<1x48xf32, #tpu.memory_space<vmem>>, vector<1x48xf32>
    %7 = vector.broadcast %6 : vector<1x48xf32> to vector<1024x48xf32>
    %8 = arith.addf %5, %7 : vector<1024x48xf32>
    %cst_7 = arith.constant 0.000000e+00 : f32
    %9 = vector.broadcast %cst_7 : f32 to vector<1024x48xf32>
    %10 = arith.maximumf %8, %9 : vector<1024x48xf32>
    %11 = arith.truncf %10 : vector<1024x48xf32> to vector<1024x48xbf16>
    %c0_8 = arith.constant 0 : index
    %c0_9 = arith.constant 0 : index
    %12 = vector.load %arg5[%c0_8, %c0_9] : memref<1024x48xbf16, #tpu.memory_space<vmem>>, vector<1024x48xbf16>
    tpu.vector_store %arg5[%c0_8, %c0_9], %11 {strides = array<i32>} : memref<1024x48xbf16, #tpu.memory_space<vmem>>, vector<1024x48xbf16>,
    return
  }
  func.func @transform_0(%arg0: i32) -> (i32, i32) {
    %c0_i32 = arith.constant 0 : i32
    %c0_i32_0 = arith.constant 0 : i32
    return %arg0, %c0_i32 : i32, i32
  }
  func.func @transform_1(%arg0: i32) -> (i32, i32) {
    %c0_i32 = arith.constant 0 : i32
    %c0_i32_0 = arith.constant 0 : i32
    %c0_i32_1 = arith.constant 0 : i32
    return %c0_i32, %c0_i32_0 : i32, i32
  }
  func.func @transform_2(%arg0: i32) -> (i32, i32) {
    %c0_i32 = arith.constant 0 : i32
    %c0_i32_0 = arith.constant 0 : i32
    %c0_i32_1 = arith.constant 0 : i32
    return %c0_i32, %c0_i32_0 : i32, i32
  }
  func.func @transform_3(%arg0: i32) -> (i32, i32) {
    %c0_i32 = arith.constant 0 : i32
    %c0_i32_0 = arith.constant 0 : i32
    %c0_i32_1 = arith.constant 0 : i32
    return %c0_i32, %c0_i32_0 : i32, i32
  }
  func.func @transform_4(%arg0: i32) -> (i32, i32) {
    %c0_i32 = arith.constant 0 : i32
    %c0_i32_0 = arith.constant 0 : i32
    return %arg0, %c0_i32 : i32, i32
  }
}

module attributes {stable_mosaic.version = 11 : i64} {
  func.func @_conv_bn_relu_kernel(%arg0: i32, %arg1: memref<128x1200xbf16, #tpu.memory_space<vmem>>, %arg2: memref<1200x128xbf16, #tpu.memory_space<vmem>>, %arg3: memref<1x128xf32, #tpu.memory_space<vmem>>, %arg4: memref<1x128xf32, #tpu.memory_space<vmem>>, %arg5: memref<128x128xbf16, #tpu.memory_space<vmem>>) attributes {dimension_semantics = [#tpu.dimension_semantics<parallel>], iteration_bounds = array<i64: 1>, scalar_prefetch = 0 : i64, scratch_operands = 0 : i64, tpu.core_type = #tpu.core_type<tc>, window_params = [{transform_indices = @transform_0, window_bounds = array<i64: 128, 1200>}, {pipeline_mode = #tpu.pipeline_mode<synchronous>, transform_indices = @transform_1, window_bounds = array<i64: 1200, 128>}, {pipeline_mode = #tpu.pipeline_mode<synchronous>, transform_indices = @transform_2, window_bounds = array<i64: 1, 128>}, {pipeline_mode = #tpu.pipeline_mode<synchronous>, transform_indices = @transform_3, window_bounds = array<i64: 1, 128>}, {transform_indices = @transform_4, window_bounds = array<i64: 128, 128>}]} {
    %c0 = arith.constant 0 : index
    %c0_0 = arith.constant 0 : index
    %0 = vector.load %arg1[%c0, %c0_0] : memref<128x1200xbf16, #tpu.memory_space<vmem>>, vector<128x1200xbf16>
    %c0_1 = arith.constant 0 : index
    %c0_2 = arith.constant 0 : index
    %1 = vector.load %arg2[%c0_1, %c0_2] : memref<1200x128xbf16, #tpu.memory_space<vmem>>, vector<1200x128xbf16>
    %cst = arith.constant dense<0.000000e+00> : vector<128x128xf32>
    %2 = tpu.matmul %0, %1, %cst {dimension_numbers = #tpu.dot_dimension_numbers<[1], [0], [0], [1], [0, 0, 1, 1], [], []>} : vector<128x1200xbf16>, vector<1200x128xbf16>, vector<128x128xf32> -> vector<128x128xf32>
    %c0_3 = arith.constant 0 : index
    %c0_4 = arith.constant 0 : index
    %3 = vector.load %arg3[%c0_3, %c0_4] : memref<1x128xf32, #tpu.memory_space<vmem>>, vector<1x128xf32>
    %4 = vector.broadcast %3 : vector<1x128xf32> to vector<128x128xf32>
    %5 = arith.mulf %2, %4 : vector<128x128xf32>
    %c0_5 = arith.constant 0 : index
    %c0_6 = arith.constant 0 : index
    %6 = vector.load %arg4[%c0_5, %c0_6] : memref<1x128xf32, #tpu.memory_space<vmem>>, vector<1x128xf32>
    %7 = vector.broadcast %6 : vector<1x128xf32> to vector<128x128xf32>
    %8 = arith.addf %5, %7 : vector<128x128xf32>
    %cst_7 = arith.constant 0.000000e+00 : f32
    %9 = vector.broadcast %cst_7 : f32 to vector<128x128xf32>
    %10 = arith.maximumf %8, %9 : vector<128x128xf32>
    %11 = arith.truncf %10 : vector<128x128xf32> to vector<128x128xbf16>
    %c0_8 = arith.constant 0 : index
    %c0_9 = arith.constant 0 : index
    %12 = vector.load %arg5[%c0_8, %c0_9] : memref<128x128xbf16, #tpu.memory_space<vmem>>, vector<128x128xbf16>
    tpu.vector_store %arg5[%c0_8, %c0_9], %11 {strides = array<i32>} : memref<128x128xbf16, #tpu.memory_space<vmem>>, vector<128x128xbf16>,
    return
  }
  func.func @transform_0(%arg0: i32) -> (i32, i32) {
    %c0_i32 = arith.constant 0 : i32
    %c0_i32_0 = arith.constant 0 : i32
    return %arg0, %c0_i32 : i32, i32
  }
  func.func @transform_1(%arg0: i32) -> (i32, i32) {
    %c0_i32 = arith.constant 0 : i32
    %c0_i32_0 = arith.constant 0 : i32
    %c0_i32_1 = arith.constant 0 : i32
    return %c0_i32, %c0_i32_0 : i32, i32
  }
  func.func @transform_2(%arg0: i32) -> (i32, i32) {
    %c0_i32 = arith.constant 0 : i32
    %c0_i32_0 = arith.constant 0 : i32
    %c0_i32_1 = arith.constant 0 : i32
    return %c0_i32, %c0_i32_0 : i32, i32
  }
  func.func @transform_3(%arg0: i32) -> (i32, i32) {
    %c0_i32 = arith.constant 0 : i32
    %c0_i32_0 = arith.constant 0 : i32
    %c0_i32_1 = arith.constant 0 : i32
    return %c0_i32, %c0_i32_0 : i32, i32
  }
  func.func @transform_4(%arg0: i32) -> (i32, i32) {
    %c0_i32 = arith.constant 0 : i32
    %c0_i32_0 = arith.constant 0 : i32
    return %arg0, %c0_i32 : i32, i32
  }
}

module attributes {stable_mosaic.version = 11 : i64} {
  func.func @_conv_bn_relu_kernel(%arg0: i32, %arg1: memref<32x128xbf16, #tpu.memory_space<vmem>>, %arg2: memref<128x80xbf16, #tpu.memory_space<vmem>>, %arg3: memref<1x80xf32, #tpu.memory_space<vmem>>, %arg4: memref<1x80xf32, #tpu.memory_space<vmem>>, %arg5: memref<32x80xbf16, #tpu.memory_space<vmem>>) attributes {dimension_semantics = [#tpu.dimension_semantics<parallel>], iteration_bounds = array<i64: 1>, scalar_prefetch = 0 : i64, scratch_operands = 0 : i64, tpu.core_type = #tpu.core_type<tc>, window_params = [{transform_indices = @transform_0, window_bounds = array<i64: 32, 128>}, {pipeline_mode = #tpu.pipeline_mode<synchronous>, transform_indices = @transform_1, window_bounds = array<i64: 128, 80>}, {pipeline_mode = #tpu.pipeline_mode<synchronous>, transform_indices = @transform_2, window_bounds = array<i64: 1, 80>}, {pipeline_mode = #tpu.pipeline_mode<synchronous>, transform_indices = @transform_3, window_bounds = array<i64: 1, 80>}, {transform_indices = @transform_4, window_bounds = array<i64: 32, 80>}]} {
    %c0 = arith.constant 0 : index
    %c0_0 = arith.constant 0 : index
    %0 = vector.load %arg1[%c0, %c0_0] : memref<32x128xbf16, #tpu.memory_space<vmem>>, vector<32x128xbf16>
    %c0_1 = arith.constant 0 : index
    %c0_2 = arith.constant 0 : index
    %1 = vector.load %arg2[%c0_1, %c0_2] : memref<128x80xbf16, #tpu.memory_space<vmem>>, vector<128x80xbf16>
    %cst = arith.constant dense<0.000000e+00> : vector<32x80xf32>
    %2 = tpu.matmul %0, %1, %cst {dimension_numbers = #tpu.dot_dimension_numbers<[1], [0], [0], [1], [0, 0, 1, 1], [], []>} : vector<32x128xbf16>, vector<128x80xbf16>, vector<32x80xf32> -> vector<32x80xf32>
    %c0_3 = arith.constant 0 : index
    %c0_4 = arith.constant 0 : index
    %3 = vector.load %arg3[%c0_3, %c0_4] : memref<1x80xf32, #tpu.memory_space<vmem>>, vector<1x80xf32>
    %4 = vector.broadcast %3 : vector<1x80xf32> to vector<32x80xf32>
    %5 = arith.mulf %2, %4 : vector<32x80xf32>
    %c0_5 = arith.constant 0 : index
    %c0_6 = arith.constant 0 : index
    %6 = vector.load %arg4[%c0_5, %c0_6] : memref<1x80xf32, #tpu.memory_space<vmem>>, vector<1x80xf32>
    %7 = vector.broadcast %6 : vector<1x80xf32> to vector<32x80xf32>
    %8 = arith.addf %5, %7 : vector<32x80xf32>
    %cst_7 = arith.constant 0.000000e+00 : f32
    %9 = vector.broadcast %cst_7 : f32 to vector<32x80xf32>
    %10 = arith.maximumf %8, %9 : vector<32x80xf32>
    %11 = arith.truncf %10 : vector<32x80xf32> to vector<32x80xbf16>
    %c0_8 = arith.constant 0 : index
    %c0_9 = arith.constant 0 : index
    %12 = vector.load %arg5[%c0_8, %c0_9] : memref<32x80xbf16, #tpu.memory_space<vmem>>, vector<32x80xbf16>
    tpu.vector_store %arg5[%c0_8, %c0_9], %11 {strides = array<i32>} : memref<32x80xbf16, #tpu.memory_space<vmem>>, vector<32x80xbf16>,
    return
  }
  func.func @transform_0(%arg0: i32) -> (i32, i32) {
    %c0_i32 = arith.constant 0 : i32
    %c0_i32_0 = arith.constant 0 : i32
    return %arg0, %c0_i32 : i32, i32
  }
  func.func @transform_1(%arg0: i32) -> (i32, i32) {
    %c0_i32 = arith.constant 0 : i32
    %c0_i32_0 = arith.constant 0 : i32
    %c0_i32_1 = arith.constant 0 : i32
    return %c0_i32, %c0_i32_0 : i32, i32
  }
  func.func @transform_2(%arg0: i32) -> (i32, i32) {
    %c0_i32 = arith.constant 0 : i32
    %c0_i32_0 = arith.constant 0 : i32
    %c0_i32_1 = arith.constant 0 : i32
    return %c0_i32, %c0_i32_0 : i32, i32
  }
  func.func @transform_3(%arg0: i32) -> (i32, i32) {
    %c0_i32 = arith.constant 0 : i32
    %c0_i32_0 = arith.constant 0 : i32
    %c0_i32_1 = arith.constant 0 : i32
    return %c0_i32, %c0_i32_0 : i32, i32
  }
  func.func @transform_4(%arg0: i32) -> (i32, i32) {
    %c0_i32 = arith.constant 0 : i32
    %c0_i32_0 = arith.constant 0 : i32
    return %arg0, %c0_i32 : i32, i32
  }
}

module attributes {stable_mosaic.version = 11 : i64} {
  func.func @_conv_bn_relu_kernel(%arg0: i32, %arg1: memref<32x216xbf16, #tpu.memory_space<vmem>>, %arg2: memref<216x32xbf16, #tpu.memory_space<vmem>>, %arg3: memref<1x32xf32, #tpu.memory_space<vmem>>, %arg4: memref<1x32xf32, #tpu.memory_space<vmem>>, %arg5: memref<32x32xbf16, #tpu.memory_space<vmem>>) attributes {dimension_semantics = [#tpu.dimension_semantics<parallel>], iteration_bounds = array<i64: 1>, scalar_prefetch = 0 : i64, scratch_operands = 0 : i64, tpu.core_type = #tpu.core_type<tc>, window_params = [{transform_indices = @transform_0, window_bounds = array<i64: 32, 216>}, {pipeline_mode = #tpu.pipeline_mode<synchronous>, transform_indices = @transform_1, window_bounds = array<i64: 216, 32>}, {pipeline_mode = #tpu.pipeline_mode<synchronous>, transform_indices = @transform_2, window_bounds = array<i64: 1, 32>}, {pipeline_mode = #tpu.pipeline_mode<synchronous>, transform_indices = @transform_3, window_bounds = array<i64: 1, 32>}, {transform_indices = @transform_4, window_bounds = array<i64: 32, 32>}]} {
    %c0 = arith.constant 0 : index
    %c0_0 = arith.constant 0 : index
    %0 = vector.load %arg1[%c0, %c0_0] : memref<32x216xbf16, #tpu.memory_space<vmem>>, vector<32x216xbf16>
    %c0_1 = arith.constant 0 : index
    %c0_2 = arith.constant 0 : index
    %1 = vector.load %arg2[%c0_1, %c0_2] : memref<216x32xbf16, #tpu.memory_space<vmem>>, vector<216x32xbf16>
    %cst = arith.constant dense<0.000000e+00> : vector<32x32xf32>
    %2 = tpu.matmul %0, %1, %cst {dimension_numbers = #tpu.dot_dimension_numbers<[1], [0], [0], [1], [0, 0, 1, 1], [], []>} : vector<32x216xbf16>, vector<216x32xbf16>, vector<32x32xf32> -> vector<32x32xf32>
    %c0_3 = arith.constant 0 : index
    %c0_4 = arith.constant 0 : index
    %3 = vector.load %arg3[%c0_3, %c0_4] : memref<1x32xf32, #tpu.memory_space<vmem>>, vector<1x32xf32>
    %4 = vector.broadcast %3 : vector<1x32xf32> to vector<32x32xf32>
    %5 = arith.mulf %2, %4 : vector<32x32xf32>
    %c0_5 = arith.constant 0 : index
    %c0_6 = arith.constant 0 : index
    %6 = vector.load %arg4[%c0_5, %c0_6] : memref<1x32xf32, #tpu.memory_space<vmem>>, vector<1x32xf32>
    %7 = vector.broadcast %6 : vector<1x32xf32> to vector<32x32xf32>
    %8 = arith.addf %5, %7 : vector<32x32xf32>
    %cst_7 = arith.constant 0.000000e+00 : f32
    %9 = vector.broadcast %cst_7 : f32 to vector<32x32xf32>
    %10 = arith.maximumf %8, %9 : vector<32x32xf32>
    %11 = arith.truncf %10 : vector<32x32xf32> to vector<32x32xbf16>
    %c0_8 = arith.constant 0 : index
    %c0_9 = arith.constant 0 : index
    %12 = vector.load %arg5[%c0_8, %c0_9] : memref<32x32xbf16, #tpu.memory_space<vmem>>, vector<32x32xbf16>
    tpu.vector_store %arg5[%c0_8, %c0_9], %11 {strides = array<i32>} : memref<32x32xbf16, #tpu.memory_space<vmem>>, vector<32x32xbf16>,
    return
  }
  func.func @transform_0(%arg0: i32) -> (i32, i32) {
    %c0_i32 = arith.constant 0 : i32
    %c0_i32_0 = arith.constant 0 : i32
    return %arg0, %c0_i32 : i32, i32
  }
  func.func @transform_1(%arg0: i32) -> (i32, i32) {
    %c0_i32 = arith.constant 0 : i32
    %c0_i32_0 = arith.constant 0 : i32
    %c0_i32_1 = arith.constant 0 : i32
    return %c0_i32, %c0_i32_0 : i32, i32
  }
  func.func @transform_2(%arg0: i32) -> (i32, i32) {
    %c0_i32 = arith.constant 0 : i32
    %c0_i32_0 = arith.constant 0 : i32
    %c0_i32_1 = arith.constant 0 : i32
    return %c0_i32, %c0_i32_0 : i32, i32
  }
  func.func @transform_3(%arg0: i32) -> (i32, i32) {
    %c0_i32 = arith.constant 0 : i32
    %c0_i32_0 = arith.constant 0 : i32
    %c0_i32_1 = arith.constant 0 : i32
    return %c0_i32, %c0_i32_0 : i32, i32
  }
  func.func @transform_4(%arg0: i32) -> (i32, i32) {
    %c0_i32 = arith.constant 0 : i32
    %c0_i32_0 = arith.constant 0 : i32
    return %arg0, %c0_i32 : i32, i32
  }
}

module attributes {stable_mosaic.version = 11 : i64} {
  func.func @_conv_bn_relu_kernel(%arg0: i32, %arg1: memref<32x288xbf16, #tpu.memory_space<vmem>>, %arg2: memref<288x32xbf16, #tpu.memory_space<vmem>>, %arg3: memref<1x32xf32, #tpu.memory_space<vmem>>, %arg4: memref<1x32xf32, #tpu.memory_space<vmem>>, %arg5: memref<32x32xbf16, #tpu.memory_space<vmem>>) attributes {dimension_semantics = [#tpu.dimension_semantics<parallel>], iteration_bounds = array<i64: 1>, scalar_prefetch = 0 : i64, scratch_operands = 0 : i64, tpu.core_type = #tpu.core_type<tc>, window_params = [{transform_indices = @transform_0, window_bounds = array<i64: 32, 288>}, {pipeline_mode = #tpu.pipeline_mode<synchronous>, transform_indices = @transform_1, window_bounds = array<i64: 288, 32>}, {pipeline_mode = #tpu.pipeline_mode<synchronous>, transform_indices = @transform_2, window_bounds = array<i64: 1, 32>}, {pipeline_mode = #tpu.pipeline_mode<synchronous>, transform_indices = @transform_3, window_bounds = array<i64: 1, 32>}, {transform_indices = @transform_4, window_bounds = array<i64: 32, 32>}]} {
    %c0 = arith.constant 0 : index
    %c0_0 = arith.constant 0 : index
    %0 = vector.load %arg1[%c0, %c0_0] : memref<32x288xbf16, #tpu.memory_space<vmem>>, vector<32x288xbf16>
    %c0_1 = arith.constant 0 : index
    %c0_2 = arith.constant 0 : index
    %1 = vector.load %arg2[%c0_1, %c0_2] : memref<288x32xbf16, #tpu.memory_space<vmem>>, vector<288x32xbf16>
    %cst = arith.constant dense<0.000000e+00> : vector<32x32xf32>
    %2 = tpu.matmul %0, %1, %cst {dimension_numbers = #tpu.dot_dimension_numbers<[1], [0], [0], [1], [0, 0, 1, 1], [], []>} : vector<32x288xbf16>, vector<288x32xbf16>, vector<32x32xf32> -> vector<32x32xf32>
    %c0_3 = arith.constant 0 : index
    %c0_4 = arith.constant 0 : index
    %3 = vector.load %arg3[%c0_3, %c0_4] : memref<1x32xf32, #tpu.memory_space<vmem>>, vector<1x32xf32>
    %4 = vector.broadcast %3 : vector<1x32xf32> to vector<32x32xf32>
    %5 = arith.mulf %2, %4 : vector<32x32xf32>
    %c0_5 = arith.constant 0 : index
    %c0_6 = arith.constant 0 : index
    %6 = vector.load %arg4[%c0_5, %c0_6] : memref<1x32xf32, #tpu.memory_space<vmem>>, vector<1x32xf32>
    %7 = vector.broadcast %6 : vector<1x32xf32> to vector<32x32xf32>
    %8 = arith.addf %5, %7 : vector<32x32xf32>
    %cst_7 = arith.constant 0.000000e+00 : f32
    %9 = vector.broadcast %cst_7 : f32 to vector<32x32xf32>
    %10 = arith.maximumf %8, %9 : vector<32x32xf32>
    %11 = arith.truncf %10 : vector<32x32xf32> to vector<32x32xbf16>
    %c0_8 = arith.constant 0 : index
    %c0_9 = arith.constant 0 : index
    %12 = vector.load %arg5[%c0_8, %c0_9] : memref<32x32xbf16, #tpu.memory_space<vmem>>, vector<32x32xbf16>
    tpu.vector_store %arg5[%c0_8, %c0_9], %11 {strides = array<i32>} : memref<32x32xbf16, #tpu.memory_space<vmem>>, vector<32x32xbf16>,
    return
  }
  func.func @transform_0(%arg0: i32) -> (i32, i32) {
    %c0_i32 = arith.constant 0 : i32
    %c0_i32_0 = arith.constant 0 : i32
    return %arg0, %c0_i32 : i32, i32
  }
  func.func @transform_1(%arg0: i32) -> (i32, i32) {
    %c0_i32 = arith.constant 0 : i32
    %c0_i32_0 = arith.constant 0 : i32
    %c0_i32_1 = arith.constant 0 : i32
    return %c0_i32, %c0_i32_0 : i32, i32
  }
  func.func @transform_2(%arg0: i32) -> (i32, i32) {
    %c0_i32 = arith.constant 0 : i32
    %c0_i32_0 = arith.constant 0 : i32
    %c0_i32_1 = arith.constant 0 : i32
    return %c0_i32, %c0_i32_0 : i32, i32
  }
  func.func @transform_3(%arg0: i32) -> (i32, i32) {
    %c0_i32 = arith.constant 0 : i32
    %c0_i32_0 = arith.constant 0 : i32
    %c0_i32_1 = arith.constant 0 : i32
    return %c0_i32, %c0_i32_0 : i32, i32
  }
  func.func @transform_4(%arg0: i32) -> (i32, i32) {
    %c0_i32 = arith.constant 0 : i32
    %c0_i32_0 = arith.constant 0 : i32
    return %arg0, %c0_i32 : i32, i32
  }
}

module attributes {stable_mosaic.version = 11 : i64} {
  func.func @_conv_bn_relu_kernel(%arg0: i32, %arg1: memref<32x128xbf16, #tpu.memory_space<vmem>>, %arg2: memref<128x32xbf16, #tpu.memory_space<vmem>>, %arg3: memref<1x32xf32, #tpu.memory_space<vmem>>, %arg4: memref<1x32xf32, #tpu.memory_space<vmem>>, %arg5: memref<32x32xbf16, #tpu.memory_space<vmem>>) attributes {dimension_semantics = [#tpu.dimension_semantics<parallel>], iteration_bounds = array<i64: 1>, scalar_prefetch = 0 : i64, scratch_operands = 0 : i64, tpu.core_type = #tpu.core_type<tc>, window_params = [{transform_indices = @transform_0, window_bounds = array<i64: 32, 128>}, {pipeline_mode = #tpu.pipeline_mode<synchronous>, transform_indices = @transform_1, window_bounds = array<i64: 128, 32>}, {pipeline_mode = #tpu.pipeline_mode<synchronous>, transform_indices = @transform_2, window_bounds = array<i64: 1, 32>}, {pipeline_mode = #tpu.pipeline_mode<synchronous>, transform_indices = @transform_3, window_bounds = array<i64: 1, 32>}, {transform_indices = @transform_4, window_bounds = array<i64: 32, 32>}]} {
    %c0 = arith.constant 0 : index
    %c0_0 = arith.constant 0 : index
    %0 = vector.load %arg1[%c0, %c0_0] : memref<32x128xbf16, #tpu.memory_space<vmem>>, vector<32x128xbf16>
    %c0_1 = arith.constant 0 : index
    %c0_2 = arith.constant 0 : index
    %1 = vector.load %arg2[%c0_1, %c0_2] : memref<128x32xbf16, #tpu.memory_space<vmem>>, vector<128x32xbf16>
    %cst = arith.constant dense<0.000000e+00> : vector<32x32xf32>
    %2 = tpu.matmul %0, %1, %cst {dimension_numbers = #tpu.dot_dimension_numbers<[1], [0], [0], [1], [0, 0, 1, 1], [], []>} : vector<32x128xbf16>, vector<128x32xbf16>, vector<32x32xf32> -> vector<32x32xf32>
    %c0_3 = arith.constant 0 : index
    %c0_4 = arith.constant 0 : index
    %3 = vector.load %arg3[%c0_3, %c0_4] : memref<1x32xf32, #tpu.memory_space<vmem>>, vector<1x32xf32>
    %4 = vector.broadcast %3 : vector<1x32xf32> to vector<32x32xf32>
    %5 = arith.mulf %2, %4 : vector<32x32xf32>
    %c0_5 = arith.constant 0 : index
    %c0_6 = arith.constant 0 : index
    %6 = vector.load %arg4[%c0_5, %c0_6] : memref<1x32xf32, #tpu.memory_space<vmem>>, vector<1x32xf32>
    %7 = vector.broadcast %6 : vector<1x32xf32> to vector<32x32xf32>
    %8 = arith.addf %5, %7 : vector<32x32xf32>
    %cst_7 = arith.constant 0.000000e+00 : f32
    %9 = vector.broadcast %cst_7 : f32 to vector<32x32xf32>
    %10 = arith.maximumf %8, %9 : vector<32x32xf32>
    %11 = arith.truncf %10 : vector<32x32xf32> to vector<32x32xbf16>
    %c0_8 = arith.constant 0 : index
    %c0_9 = arith.constant 0 : index
    %12 = vector.load %arg5[%c0_8, %c0_9] : memref<32x32xbf16, #tpu.memory_space<vmem>>, vector<32x32xbf16>
    tpu.vector_store %arg5[%c0_8, %c0_9], %11 {strides = array<i32>} : memref<32x32xbf16, #tpu.memory_space<vmem>>, vector<32x32xbf16>,
    return
  }
  func.func @transform_0(%arg0: i32) -> (i32, i32) {
    %c0_i32 = arith.constant 0 : i32
    %c0_i32_0 = arith.constant 0 : i32
    return %arg0, %c0_i32 : i32, i32
  }
  func.func @transform_1(%arg0: i32) -> (i32, i32) {
    %c0_i32 = arith.constant 0 : i32
    %c0_i32_0 = arith.constant 0 : i32
    %c0_i32_1 = arith.constant 0 : i32
    return %c0_i32, %c0_i32_0 : i32, i32
  }
  func.func @transform_2(%arg0: i32) -> (i32, i32) {
    %c0_i32 = arith.constant 0 : i32
    %c0_i32_0 = arith.constant 0 : i32
    %c0_i32_1 = arith.constant 0 : i32
    return %c0_i32, %c0_i32_0 : i32, i32
  }
  func.func @transform_3(%arg0: i32) -> (i32, i32) {
    %c0_i32 = arith.constant 0 : i32
    %c0_i32_0 = arith.constant 0 : i32
    %c0_i32_1 = arith.constant 0 : i32
    return %c0_i32, %c0_i32_0 : i32, i32
  }
  func.func @transform_4(%arg0: i32) -> (i32, i32) {
    %c0_i32 = arith.constant 0 : i32
    %c0_i32_0 = arith.constant 0 : i32
    return %arg0, %c0_i32 : i32, i32
  }
}

module attributes {stable_mosaic.version = 11 : i64} {
  func.func @_conv_bn_relu_kernel(%arg0: i32, %arg1: memref<32x288xbf16, #tpu.memory_space<vmem>>, %arg2: memref<288x32xbf16, #tpu.memory_space<vmem>>, %arg3: memref<1x32xf32, #tpu.memory_space<vmem>>, %arg4: memref<1x32xf32, #tpu.memory_space<vmem>>, %arg5: memref<32x32xbf16, #tpu.memory_space<vmem>>) attributes {dimension_semantics = [#tpu.dimension_semantics<parallel>], iteration_bounds = array<i64: 1>, scalar_prefetch = 0 : i64, scratch_operands = 0 : i64, tpu.core_type = #tpu.core_type<tc>, window_params = [{transform_indices = @transform_0, window_bounds = array<i64: 32, 288>}, {pipeline_mode = #tpu.pipeline_mode<synchronous>, transform_indices = @transform_1, window_bounds = array<i64: 288, 32>}, {pipeline_mode = #tpu.pipeline_mode<synchronous>, transform_indices = @transform_2, window_bounds = array<i64: 1, 32>}, {pipeline_mode = #tpu.pipeline_mode<synchronous>, transform_indices = @transform_3, window_bounds = array<i64: 1, 32>}, {transform_indices = @transform_4, window_bounds = array<i64: 32, 32>}]} {
    %c0 = arith.constant 0 : index
    %c0_0 = arith.constant 0 : index
    %0 = vector.load %arg1[%c0, %c0_0] : memref<32x288xbf16, #tpu.memory_space<vmem>>, vector<32x288xbf16>
    %c0_1 = arith.constant 0 : index
    %c0_2 = arith.constant 0 : index
    %1 = vector.load %arg2[%c0_1, %c0_2] : memref<288x32xbf16, #tpu.memory_space<vmem>>, vector<288x32xbf16>
    %cst = arith.constant dense<0.000000e+00> : vector<32x32xf32>
    %2 = tpu.matmul %0, %1, %cst {dimension_numbers = #tpu.dot_dimension_numbers<[1], [0], [0], [1], [0, 0, 1, 1], [], []>} : vector<32x288xbf16>, vector<288x32xbf16>, vector<32x32xf32> -> vector<32x32xf32>
    %c0_3 = arith.constant 0 : index
    %c0_4 = arith.constant 0 : index
    %3 = vector.load %arg3[%c0_3, %c0_4] : memref<1x32xf32, #tpu.memory_space<vmem>>, vector<1x32xf32>
    %4 = vector.broadcast %3 : vector<1x32xf32> to vector<32x32xf32>
    %5 = arith.mulf %2, %4 : vector<32x32xf32>
    %c0_5 = arith.constant 0 : index
    %c0_6 = arith.constant 0 : index
    %6 = vector.load %arg4[%c0_5, %c0_6] : memref<1x32xf32, #tpu.memory_space<vmem>>, vector<1x32xf32>
    %7 = vector.broadcast %6 : vector<1x32xf32> to vector<32x32xf32>
    %8 = arith.addf %5, %7 : vector<32x32xf32>
    %cst_7 = arith.constant 0.000000e+00 : f32
    %9 = vector.broadcast %cst_7 : f32 to vector<32x32xf32>
    %10 = arith.maximumf %8, %9 : vector<32x32xf32>
    %11 = arith.truncf %10 : vector<32x32xf32> to vector<32x32xbf16>
    %c0_8 = arith.constant 0 : index
    %c0_9 = arith.constant 0 : index
    %12 = vector.load %arg5[%c0_8, %c0_9] : memref<32x32xbf16, #tpu.memory_space<vmem>>, vector<32x32xbf16>
    tpu.vector_store %arg5[%c0_8, %c0_9], %11 {strides = array<i32>} : memref<32x32xbf16, #tpu.memory_space<vmem>>, vector<32x32xbf16>,
    return
  }
  func.func @transform_0(%arg0: i32) -> (i32, i32) {
    %c0_i32 = arith.constant 0 : i32
    %c0_i32_0 = arith.constant 0 : i32
    return %arg0, %c0_i32 : i32, i32
  }
  func.func @transform_1(%arg0: i32) -> (i32, i32) {
    %c0_i32 = arith.constant 0 : i32
    %c0_i32_0 = arith.constant 0 : i32
    %c0_i32_1 = arith.constant 0 : i32
    return %c0_i32, %c0_i32_0 : i32, i32
  }
  func.func @transform_2(%arg0: i32) -> (i32, i32) {
    %c0_i32 = arith.constant 0 : i32
    %c0_i32_0 = arith.constant 0 : i32
    %c0_i32_1 = arith.constant 0 : i32
    return %c0_i32, %c0_i32_0 : i32, i32
  }
  func.func @transform_3(%arg0: i32) -> (i32, i32) {
    %c0_i32 = arith.constant 0 : i32
    %c0_i32_0 = arith.constant 0 : i32
    %c0_i32_1 = arith.constant 0 : i32
    return %c0_i32, %c0_i32_0 : i32, i32
  }
  func.func @transform_4(%arg0: i32) -> (i32, i32) {
    %c0_i32 = arith.constant 0 : i32
    %c0_i32_0 = arith.constant 0 : i32
    return %arg0, %c0_i32 : i32, i32
  }
}

module attributes {stable_mosaic.version = 11 : i64} {
  func.func @_conv_bn_relu_kernel(%arg0: i32, %arg1: memref<32x216xbf16, #tpu.memory_space<vmem>>, %arg2: memref<216x32xbf16, #tpu.memory_space<vmem>>, %arg3: memref<1x32xf32, #tpu.memory_space<vmem>>, %arg4: memref<1x32xf32, #tpu.memory_space<vmem>>, %arg5: memref<32x32xbf16, #tpu.memory_space<vmem>>) attributes {dimension_semantics = [#tpu.dimension_semantics<parallel>], iteration_bounds = array<i64: 1>, scalar_prefetch = 0 : i64, scratch_operands = 0 : i64, tpu.core_type = #tpu.core_type<tc>, window_params = [{transform_indices = @transform_0, window_bounds = array<i64: 32, 216>}, {pipeline_mode = #tpu.pipeline_mode<synchronous>, transform_indices = @transform_1, window_bounds = array<i64: 216, 32>}, {pipeline_mode = #tpu.pipeline_mode<synchronous>, transform_indices = @transform_2, window_bounds = array<i64: 1, 32>}, {pipeline_mode = #tpu.pipeline_mode<synchronous>, transform_indices = @transform_3, window_bounds = array<i64: 1, 32>}, {transform_indices = @transform_4, window_bounds = array<i64: 32, 32>}]} {
    %c0 = arith.constant 0 : index
    %c0_0 = arith.constant 0 : index
    %0 = vector.load %arg1[%c0, %c0_0] : memref<32x216xbf16, #tpu.memory_space<vmem>>, vector<32x216xbf16>
    %c0_1 = arith.constant 0 : index
    %c0_2 = arith.constant 0 : index
    %1 = vector.load %arg2[%c0_1, %c0_2] : memref<216x32xbf16, #tpu.memory_space<vmem>>, vector<216x32xbf16>
    %cst = arith.constant dense<0.000000e+00> : vector<32x32xf32>
    %2 = tpu.matmul %0, %1, %cst {dimension_numbers = #tpu.dot_dimension_numbers<[1], [0], [0], [1], [0, 0, 1, 1], [], []>} : vector<32x216xbf16>, vector<216x32xbf16>, vector<32x32xf32> -> vector<32x32xf32>
    %c0_3 = arith.constant 0 : index
    %c0_4 = arith.constant 0 : index
    %3 = vector.load %arg3[%c0_3, %c0_4] : memref<1x32xf32, #tpu.memory_space<vmem>>, vector<1x32xf32>
    %4 = vector.broadcast %3 : vector<1x32xf32> to vector<32x32xf32>
    %5 = arith.mulf %2, %4 : vector<32x32xf32>
    %c0_5 = arith.constant 0 : index
    %c0_6 = arith.constant 0 : index
    %6 = vector.load %arg4[%c0_5, %c0_6] : memref<1x32xf32, #tpu.memory_space<vmem>>, vector<1x32xf32>
    %7 = vector.broadcast %6 : vector<1x32xf32> to vector<32x32xf32>
    %8 = arith.addf %5, %7 : vector<32x32xf32>
    %cst_7 = arith.constant 0.000000e+00 : f32
    %9 = vector.broadcast %cst_7 : f32 to vector<32x32xf32>
    %10 = arith.maximumf %8, %9 : vector<32x32xf32>
    %11 = arith.truncf %10 : vector<32x32xf32> to vector<32x32xbf16>
    %c0_8 = arith.constant 0 : index
    %c0_9 = arith.constant 0 : index
    %12 = vector.load %arg5[%c0_8, %c0_9] : memref<32x32xbf16, #tpu.memory_space<vmem>>, vector<32x32xbf16>
    tpu.vector_store %arg5[%c0_8, %c0_9], %11 {strides = array<i32>} : memref<32x32xbf16, #tpu.memory_space<vmem>>, vector<32x32xbf16>,
    return
  }
  func.func @transform_0(%arg0: i32) -> (i32, i32) {
    %c0_i32 = arith.constant 0 : i32
    %c0_i32_0 = arith.constant 0 : i32
    return %arg0, %c0_i32 : i32, i32
  }
  func.func @transform_1(%arg0: i32) -> (i32, i32) {
    %c0_i32 = arith.constant 0 : i32
    %c0_i32_0 = arith.constant 0 : i32
    %c0_i32_1 = arith.constant 0 : i32
    return %c0_i32, %c0_i32_0 : i32, i32
  }
  func.func @transform_2(%arg0: i32) -> (i32, i32) {
    %c0_i32 = arith.constant 0 : i32
    %c0_i32_0 = arith.constant 0 : i32
    %c0_i32_1 = arith.constant 0 : i32
    return %c0_i32, %c0_i32_0 : i32, i32
  }
  func.func @transform_3(%arg0: i32) -> (i32, i32) {
    %c0_i32 = arith.constant 0 : i32
    %c0_i32_0 = arith.constant 0 : i32
    %c0_i32_1 = arith.constant 0 : i32
    return %c0_i32, %c0_i32_0 : i32, i32
  }
  func.func @transform_4(%arg0: i32) -> (i32, i32) {
    %c0_i32 = arith.constant 0 : i32
    %c0_i32_0 = arith.constant 0 : i32
    return %arg0, %c0_i32 : i32, i32
  }
}

module attributes {stable_mosaic.version = 11 : i64} {
  func.func @_conv_bn_relu_kernel(%arg0: i32, %arg1: memref<32x128xbf16, #tpu.memory_space<vmem>>, %arg2: memref<128x80xbf16, #tpu.memory_space<vmem>>, %arg3: memref<1x80xf32, #tpu.memory_space<vmem>>, %arg4: memref<1x80xf32, #tpu.memory_space<vmem>>, %arg5: memref<32x80xbf16, #tpu.memory_space<vmem>>) attributes {dimension_semantics = [#tpu.dimension_semantics<parallel>], iteration_bounds = array<i64: 1>, scalar_prefetch = 0 : i64, scratch_operands = 0 : i64, tpu.core_type = #tpu.core_type<tc>, window_params = [{transform_indices = @transform_0, window_bounds = array<i64: 32, 128>}, {pipeline_mode = #tpu.pipeline_mode<synchronous>, transform_indices = @transform_1, window_bounds = array<i64: 128, 80>}, {pipeline_mode = #tpu.pipeline_mode<synchronous>, transform_indices = @transform_2, window_bounds = array<i64: 1, 80>}, {pipeline_mode = #tpu.pipeline_mode<synchronous>, transform_indices = @transform_3, window_bounds = array<i64: 1, 80>}, {transform_indices = @transform_4, window_bounds = array<i64: 32, 80>}]} {
    %c0 = arith.constant 0 : index
    %c0_0 = arith.constant 0 : index
    %0 = vector.load %arg1[%c0, %c0_0] : memref<32x128xbf16, #tpu.memory_space<vmem>>, vector<32x128xbf16>
    %c0_1 = arith.constant 0 : index
    %c0_2 = arith.constant 0 : index
    %1 = vector.load %arg2[%c0_1, %c0_2] : memref<128x80xbf16, #tpu.memory_space<vmem>>, vector<128x80xbf16>
    %cst = arith.constant dense<0.000000e+00> : vector<32x80xf32>
    %2 = tpu.matmul %0, %1, %cst {dimension_numbers = #tpu.dot_dimension_numbers<[1], [0], [0], [1], [0, 0, 1, 1], [], []>} : vector<32x128xbf16>, vector<128x80xbf16>, vector<32x80xf32> -> vector<32x80xf32>
    %c0_3 = arith.constant 0 : index
    %c0_4 = arith.constant 0 : index
    %3 = vector.load %arg3[%c0_3, %c0_4] : memref<1x80xf32, #tpu.memory_space<vmem>>, vector<1x80xf32>
    %4 = vector.broadcast %3 : vector<1x80xf32> to vector<32x80xf32>
    %5 = arith.mulf %2, %4 : vector<32x80xf32>
    %c0_5 = arith.constant 0 : index
    %c0_6 = arith.constant 0 : index
    %6 = vector.load %arg4[%c0_5, %c0_6] : memref<1x80xf32, #tpu.memory_space<vmem>>, vector<1x80xf32>
    %7 = vector.broadcast %6 : vector<1x80xf32> to vector<32x80xf32>
    %8 = arith.addf %5, %7 : vector<32x80xf32>
    %cst_7 = arith.constant 0.000000e+00 : f32
    %9 = vector.broadcast %cst_7 : f32 to vector<32x80xf32>
    %10 = arith.maximumf %8, %9 : vector<32x80xf32>
    %11 = arith.truncf %10 : vector<32x80xf32> to vector<32x80xbf16>
    %c0_8 = arith.constant 0 : index
    %c0_9 = arith.constant 0 : index
    %12 = vector.load %arg5[%c0_8, %c0_9] : memref<32x80xbf16, #tpu.memory_space<vmem>>, vector<32x80xbf16>
    tpu.vector_store %arg5[%c0_8, %c0_9], %11 {strides = array<i32>} : memref<32x80xbf16, #tpu.memory_space<vmem>>, vector<32x80xbf16>,
    return
  }
  func.func @transform_0(%arg0: i32) -> (i32, i32) {
    %c0_i32 = arith.constant 0 : i32
    %c0_i32_0 = arith.constant 0 : i32
    return %arg0, %c0_i32 : i32, i32
  }
  func.func @transform_1(%arg0: i32) -> (i32, i32) {
    %c0_i32 = arith.constant 0 : i32
    %c0_i32_0 = arith.constant 0 : i32
    %c0_i32_1 = arith.constant 0 : i32
    return %c0_i32, %c0_i32_0 : i32, i32
  }
  func.func @transform_2(%arg0: i32) -> (i32, i32) {
    %c0_i32 = arith.constant 0 : i32
    %c0_i32_0 = arith.constant 0 : i32
    %c0_i32_1 = arith.constant 0 : i32
    return %c0_i32, %c0_i32_0 : i32, i32
  }
  func.func @transform_3(%arg0: i32) -> (i32, i32) {
    %c0_i32 = arith.constant 0 : i32
    %c0_i32_0 = arith.constant 0 : i32
    %c0_i32_1 = arith.constant 0 : i32
    return %c0_i32, %c0_i32_0 : i32, i32
  }
  func.func @transform_4(%arg0: i32) -> (i32, i32) {
    %c0_i32 = arith.constant 0 : i32
    %c0_i32_0 = arith.constant 0 : i32
    return %arg0, %c0_i32 : i32, i32
  }
}

module attributes {stable_mosaic.version = 11 : i64} {
  func.func @_conv_bn_relu_kernel(%arg0: i32, %arg1: memref<32x128xbf16, #tpu.memory_space<vmem>>, %arg2: memref<128x32xbf16, #tpu.memory_space<vmem>>, %arg3: memref<1x32xf32, #tpu.memory_space<vmem>>, %arg4: memref<1x32xf32, #tpu.memory_space<vmem>>, %arg5: memref<32x32xbf16, #tpu.memory_space<vmem>>) attributes {dimension_semantics = [#tpu.dimension_semantics<parallel>], iteration_bounds = array<i64: 1>, scalar_prefetch = 0 : i64, scratch_operands = 0 : i64, tpu.core_type = #tpu.core_type<tc>, window_params = [{transform_indices = @transform_0, window_bounds = array<i64: 32, 128>}, {pipeline_mode = #tpu.pipeline_mode<synchronous>, transform_indices = @transform_1, window_bounds = array<i64: 128, 32>}, {pipeline_mode = #tpu.pipeline_mode<synchronous>, transform_indices = @transform_2, window_bounds = array<i64: 1, 32>}, {pipeline_mode = #tpu.pipeline_mode<synchronous>, transform_indices = @transform_3, window_bounds = array<i64: 1, 32>}, {transform_indices = @transform_4, window_bounds = array<i64: 32, 32>}]} {
    %c0 = arith.constant 0 : index
    %c0_0 = arith.constant 0 : index
    %0 = vector.load %arg1[%c0, %c0_0] : memref<32x128xbf16, #tpu.memory_space<vmem>>, vector<32x128xbf16>
    %c0_1 = arith.constant 0 : index
    %c0_2 = arith.constant 0 : index
    %1 = vector.load %arg2[%c0_1, %c0_2] : memref<128x32xbf16, #tpu.memory_space<vmem>>, vector<128x32xbf16>
    %cst = arith.constant dense<0.000000e+00> : vector<32x32xf32>
    %2 = tpu.matmul %0, %1, %cst {dimension_numbers = #tpu.dot_dimension_numbers<[1], [0], [0], [1], [0, 0, 1, 1], [], []>} : vector<32x128xbf16>, vector<128x32xbf16>, vector<32x32xf32> -> vector<32x32xf32>
    %c0_3 = arith.constant 0 : index
    %c0_4 = arith.constant 0 : index
    %3 = vector.load %arg3[%c0_3, %c0_4] : memref<1x32xf32, #tpu.memory_space<vmem>>, vector<1x32xf32>
    %4 = vector.broadcast %3 : vector<1x32xf32> to vector<32x32xf32>
    %5 = arith.mulf %2, %4 : vector<32x32xf32>
    %c0_5 = arith.constant 0 : index
    %c0_6 = arith.constant 0 : index
    %6 = vector.load %arg4[%c0_5, %c0_6] : memref<1x32xf32, #tpu.memory_space<vmem>>, vector<1x32xf32>
    %7 = vector.broadcast %6 : vector<1x32xf32> to vector<32x32xf32>
    %8 = arith.addf %5, %7 : vector<32x32xf32>
    %cst_7 = arith.constant 0.000000e+00 : f32
    %9 = vector.broadcast %cst_7 : f32 to vector<32x32xf32>
    %10 = arith.maximumf %8, %9 : vector<32x32xf32>
    %11 = arith.truncf %10 : vector<32x32xf32> to vector<32x32xbf16>
    %c0_8 = arith.constant 0 : index
    %c0_9 = arith.constant 0 : index
    %12 = vector.load %arg5[%c0_8, %c0_9] : memref<32x32xbf16, #tpu.memory_space<vmem>>, vector<32x32xbf16>
    tpu.vector_store %arg5[%c0_8, %c0_9], %11 {strides = array<i32>} : memref<32x32xbf16, #tpu.memory_space<vmem>>, vector<32x32xbf16>,
    return
  }
  func.func @transform_0(%arg0: i32) -> (i32, i32) {
    %c0_i32 = arith.constant 0 : i32
    %c0_i32_0 = arith.constant 0 : i32
    return %arg0, %c0_i32 : i32, i32
  }
  func.func @transform_1(%arg0: i32) -> (i32, i32) {
    %c0_i32 = arith.constant 0 : i32
    %c0_i32_0 = arith.constant 0 : i32
    %c0_i32_1 = arith.constant 0 : i32
    return %c0_i32, %c0_i32_0 : i32, i32
  }
  func.func @transform_2(%arg0: i32) -> (i32, i32) {
    %c0_i32 = arith.constant 0 : i32
    %c0_i32_0 = arith.constant 0 : i32
    %c0_i32_1 = arith.constant 0 : i32
    return %c0_i32, %c0_i32_0 : i32, i32
  }
  func.func @transform_3(%arg0: i32) -> (i32, i32) {
    %c0_i32 = arith.constant 0 : i32
    %c0_i32_0 = arith.constant 0 : i32
    %c0_i32_1 = arith.constant 0 : i32
    return %c0_i32, %c0_i32_0 : i32, i32
  }
  func.func @transform_4(%arg0: i32) -> (i32, i32) {
    %c0_i32 = arith.constant 0 : i32
    %c0_i32_0 = arith.constant 0 : i32
    return %arg0, %c0_i32 : i32, i32
  }
}

module attributes {stable_mosaic.version = 11 : i64} {
  func.func @_conv_bn_relu_kernel(%arg0: i32, %arg1: memref<32x128xbf16, #tpu.memory_space<vmem>>, %arg2: memref<128x128xbf16, #tpu.memory_space<vmem>>, %arg3: memref<1x128xf32, #tpu.memory_space<vmem>>, %arg4: memref<1x128xf32, #tpu.memory_space<vmem>>, %arg5: memref<32x128xbf16, #tpu.memory_space<vmem>>) attributes {dimension_semantics = [#tpu.dimension_semantics<parallel>], iteration_bounds = array<i64: 1>, scalar_prefetch = 0 : i64, scratch_operands = 0 : i64, tpu.core_type = #tpu.core_type<tc>, window_params = [{transform_indices = @transform_0, window_bounds = array<i64: 32, 128>}, {pipeline_mode = #tpu.pipeline_mode<synchronous>, transform_indices = @transform_1, window_bounds = array<i64: 128, 128>}, {pipeline_mode = #tpu.pipeline_mode<synchronous>, transform_indices = @transform_2, window_bounds = array<i64: 1, 128>}, {pipeline_mode = #tpu.pipeline_mode<synchronous>, transform_indices = @transform_3, window_bounds = array<i64: 1, 128>}, {transform_indices = @transform_4, window_bounds = array<i64: 32, 128>}]} {
    %c0 = arith.constant 0 : index
    %c0_0 = arith.constant 0 : index
    %0 = vector.load %arg1[%c0, %c0_0] : memref<32x128xbf16, #tpu.memory_space<vmem>>, vector<32x128xbf16>
    %c0_1 = arith.constant 0 : index
    %c0_2 = arith.constant 0 : index
    %1 = vector.load %arg2[%c0_1, %c0_2] : memref<128x128xbf16, #tpu.memory_space<vmem>>, vector<128x128xbf16>
    %cst = arith.constant dense<0.000000e+00> : vector<32x128xf32>
    %2 = tpu.matmul %0, %1, %cst {dimension_numbers = #tpu.dot_dimension_numbers<[1], [0], [0], [1], [0, 0, 1, 1], [], []>} : vector<32x128xbf16>, vector<128x128xbf16>, vector<32x128xf32> -> vector<32x128xf32>
    %c0_3 = arith.constant 0 : index
    %c0_4 = arith.constant 0 : index
    %3 = vector.load %arg3[%c0_3, %c0_4] : memref<1x128xf32, #tpu.memory_space<vmem>>, vector<1x128xf32>
    %4 = vector.broadcast %3 : vector<1x128xf32> to vector<32x128xf32>
    %5 = arith.mulf %2, %4 : vector<32x128xf32>
    %c0_5 = arith.constant 0 : index
    %c0_6 = arith.constant 0 : index
    %6 = vector.load %arg4[%c0_5, %c0_6] : memref<1x128xf32, #tpu.memory_space<vmem>>, vector<1x128xf32>
    %7 = vector.broadcast %6 : vector<1x128xf32> to vector<32x128xf32>
    %8 = arith.addf %5, %7 : vector<32x128xf32>
    %cst_7 = arith.constant 0.000000e+00 : f32
    %9 = vector.broadcast %cst_7 : f32 to vector<32x128xf32>
    %10 = arith.maximumf %8, %9 : vector<32x128xf32>
    %11 = arith.truncf %10 : vector<32x128xf32> to vector<32x128xbf16>
    %c0_8 = arith.constant 0 : index
    %c0_9 = arith.constant 0 : index
    %12 = vector.load %arg5[%c0_8, %c0_9] : memref<32x128xbf16, #tpu.memory_space<vmem>>, vector<32x128xbf16>
    tpu.vector_store %arg5[%c0_8, %c0_9], %11 {strides = array<i32>} : memref<32x128xbf16, #tpu.memory_space<vmem>>, vector<32x128xbf16>,
    return
  }
  func.func @transform_0(%arg0: i32) -> (i32, i32) {
    %c0_i32 = arith.constant 0 : i32
    %c0_i32_0 = arith.constant 0 : i32
    return %arg0, %c0_i32 : i32, i32
  }
  func.func @transform_1(%arg0: i32) -> (i32, i32) {
    %c0_i32 = arith.constant 0 : i32
    %c0_i32_0 = arith.constant 0 : i32
    %c0_i32_1 = arith.constant 0 : i32
    return %c0_i32, %c0_i32_0 : i32, i32
  }
  func.func @transform_2(%arg0: i32) -> (i32, i32) {
    %c0_i32 = arith.constant 0 : i32
    %c0_i32_0 = arith.constant 0 : i32
    %c0_i32_1 = arith.constant 0 : i32
    return %c0_i32, %c0_i32_0 : i32, i32
  }
  func.func @transform_3(%arg0: i32) -> (i32, i32) {
    %c0_i32 = arith.constant 0 : i32
    %c0_i32_0 = arith.constant 0 : i32
    %c0_i32_1 = arith.constant 0 : i32
    return %c0_i32, %c0_i32_0 : i32, i32
  }
  func.func @transform_4(%arg0: i32) -> (i32, i32) {
    %c0_i32 = arith.constant 0 : i32
    %c0_i32_0 = arith.constant 0 : i32
    return %arg0, %c0_i32 : i32, i32
  }
}

module attributes {stable_mosaic.version = 11 : i64} {
  func.func @_conv_bn_relu_kernel(%arg0: i32, %arg1: memref<8x1152xbf16, #tpu.memory_space<vmem>>, %arg2: memref<1152x256xbf16, #tpu.memory_space<vmem>>, %arg3: memref<1x256xf32, #tpu.memory_space<vmem>>, %arg4: memref<1x256xf32, #tpu.memory_space<vmem>>, %arg5: memref<8x256xbf16, #tpu.memory_space<vmem>>) attributes {dimension_semantics = [#tpu.dimension_semantics<parallel>], iteration_bounds = array<i64: 1>, scalar_prefetch = 0 : i64, scratch_operands = 0 : i64, tpu.core_type = #tpu.core_type<tc>, window_params = [{transform_indices = @transform_0, window_bounds = array<i64: 8, 1152>}, {pipeline_mode = #tpu.pipeline_mode<synchronous>, transform_indices = @transform_1, window_bounds = array<i64: 1152, 256>}, {pipeline_mode = #tpu.pipeline_mode<synchronous>, transform_indices = @transform_2, window_bounds = array<i64: 1, 256>}, {pipeline_mode = #tpu.pipeline_mode<synchronous>, transform_indices = @transform_3, window_bounds = array<i64: 1, 256>}, {transform_indices = @transform_4, window_bounds = array<i64: 8, 256>}]} {
    %c0 = arith.constant 0 : index
    %c0_0 = arith.constant 0 : index
    %0 = vector.load %arg1[%c0, %c0_0] : memref<8x1152xbf16, #tpu.memory_space<vmem>>, vector<8x1152xbf16>
    %c0_1 = arith.constant 0 : index
    %c0_2 = arith.constant 0 : index
    %1 = vector.load %arg2[%c0_1, %c0_2] : memref<1152x256xbf16, #tpu.memory_space<vmem>>, vector<1152x256xbf16>
    %cst = arith.constant dense<0.000000e+00> : vector<8x256xf32>
    %2 = tpu.matmul %0, %1, %cst {dimension_numbers = #tpu.dot_dimension_numbers<[1], [0], [0], [1], [0, 0, 1, 1], [], []>} : vector<8x1152xbf16>, vector<1152x256xbf16>, vector<8x256xf32> -> vector<8x256xf32>
    %c0_3 = arith.constant 0 : index
    %c0_4 = arith.constant 0 : index
    %3 = vector.load %arg3[%c0_3, %c0_4] : memref<1x256xf32, #tpu.memory_space<vmem>>, vector<1x256xf32>
    %4 = vector.broadcast %3 : vector<1x256xf32> to vector<8x256xf32>
    %5 = arith.mulf %2, %4 : vector<8x256xf32>
    %c0_5 = arith.constant 0 : index
    %c0_6 = arith.constant 0 : index
    %6 = vector.load %arg4[%c0_5, %c0_6] : memref<1x256xf32, #tpu.memory_space<vmem>>, vector<1x256xf32>
    %7 = vector.broadcast %6 : vector<1x256xf32> to vector<8x256xf32>
    %8 = arith.addf %5, %7 : vector<8x256xf32>
    %cst_7 = arith.constant 0.000000e+00 : f32
    %9 = vector.broadcast %cst_7 : f32 to vector<8x256xf32>
    %10 = arith.maximumf %8, %9 : vector<8x256xf32>
    %11 = arith.truncf %10 : vector<8x256xf32> to vector<8x256xbf16>
    %c0_8 = arith.constant 0 : index
    %c0_9 = arith.constant 0 : index
    %12 = vector.load %arg5[%c0_8, %c0_9] : memref<8x256xbf16, #tpu.memory_space<vmem>>, vector<8x256xbf16>
    tpu.vector_store %arg5[%c0_8, %c0_9], %11 {strides = array<i32>} : memref<8x256xbf16, #tpu.memory_space<vmem>>, vector<8x256xbf16>,
    return
  }
  func.func @transform_0(%arg0: i32) -> (i32, i32) {
    %c0_i32 = arith.constant 0 : i32
    %c0_i32_0 = arith.constant 0 : i32
    return %arg0, %c0_i32 : i32, i32
  }
  func.func @transform_1(%arg0: i32) -> (i32, i32) {
    %c0_i32 = arith.constant 0 : i32
    %c0_i32_0 = arith.constant 0 : i32
    %c0_i32_1 = arith.constant 0 : i32
    return %c0_i32, %c0_i32_0 : i32, i32
  }
  func.func @transform_2(%arg0: i32) -> (i32, i32) {
    %c0_i32 = arith.constant 0 : i32
    %c0_i32_0 = arith.constant 0 : i32
    %c0_i32_1 = arith.constant 0 : i32
    return %c0_i32, %c0_i32_0 : i32, i32
  }
  func.func @transform_3(%arg0: i32) -> (i32, i32) {
    %c0_i32 = arith.constant 0 : i32
    %c0_i32_0 = arith.constant 0 : i32
    %c0_i32_1 = arith.constant 0 : i32
    return %c0_i32, %c0_i32_0 : i32, i32
  }
  func.func @transform_4(%arg0: i32) -> (i32, i32) {
    %c0_i32 = arith.constant 0 : i32
    %c0_i32_0 = arith.constant 0 : i32
    return %arg0, %c0_i32 : i32, i32
  }
}

module attributes {stable_mosaic.version = 11 : i64} {
  func.func @_conv_bn_relu_kernel(%arg0: i32, %arg1: memref<8x256xbf16, #tpu.memory_space<vmem>>, %arg2: memref<256x128xbf16, #tpu.memory_space<vmem>>, %arg3: memref<1x128xf32, #tpu.memory_space<vmem>>, %arg4: memref<1x128xf32, #tpu.memory_space<vmem>>, %arg5: memref<8x128xbf16, #tpu.memory_space<vmem>>) attributes {dimension_semantics = [#tpu.dimension_semantics<parallel>], iteration_bounds = array<i64: 1>, scalar_prefetch = 0 : i64, scratch_operands = 0 : i64, tpu.core_type = #tpu.core_type<tc>, window_params = [{transform_indices = @transform_0, window_bounds = array<i64: 8, 256>}, {pipeline_mode = #tpu.pipeline_mode<synchronous>, transform_indices = @transform_1, window_bounds = array<i64: 256, 128>}, {pipeline_mode = #tpu.pipeline_mode<synchronous>, transform_indices = @transform_2, window_bounds = array<i64: 1, 128>}, {pipeline_mode = #tpu.pipeline_mode<synchronous>, transform_indices = @transform_3, window_bounds = array<i64: 1, 128>}, {transform_indices = @transform_4, window_bounds = array<i64: 8, 128>}]} {
    %c0 = arith.constant 0 : index
    %c0_0 = arith.constant 0 : index
    %0 = vector.load %arg1[%c0, %c0_0] : memref<8x256xbf16, #tpu.memory_space<vmem>>, vector<8x256xbf16>
    %c0_1 = arith.constant 0 : index
    %c0_2 = arith.constant 0 : index
    %1 = vector.load %arg2[%c0_1, %c0_2] : memref<256x128xbf16, #tpu.memory_space<vmem>>, vector<256x128xbf16>
    %cst = arith.constant dense<0.000000e+00> : vector<8x128xf32>
    %2 = tpu.matmul %0, %1, %cst {dimension_numbers = #tpu.dot_dimension_numbers<[1], [0], [0], [1], [0, 0, 1, 1], [], []>} : vector<8x256xbf16>, vector<256x128xbf16>, vector<8x128xf32> -> vector<8x128xf32>
    %c0_3 = arith.constant 0 : index
    %c0_4 = arith.constant 0 : index
    %3 = vector.load %arg3[%c0_3, %c0_4] : memref<1x128xf32, #tpu.memory_space<vmem>>, vector<1x128xf32>
    %4 = vector.broadcast %3 : vector<1x128xf32> to vector<8x128xf32>
    %5 = arith.mulf %2, %4 : vector<8x128xf32>
    %c0_5 = arith.constant 0 : index
    %c0_6 = arith.constant 0 : index
    %6 = vector.load %arg4[%c0_5, %c0_6] : memref<1x128xf32, #tpu.memory_space<vmem>>, vector<1x128xf32>
    %7 = vector.broadcast %6 : vector<1x128xf32> to vector<8x128xf32>
    %8 = arith.addf %5, %7 : vector<8x128xf32>
    %cst_7 = arith.constant 0.000000e+00 : f32
    %9 = vector.broadcast %cst_7 : f32 to vector<8x128xf32>
    %10 = arith.maximumf %8, %9 : vector<8x128xf32>
    %11 = arith.truncf %10 : vector<8x128xf32> to vector<8x128xbf16>
    %c0_8 = arith.constant 0 : index
    %c0_9 = arith.constant 0 : index
    %12 = vector.load %arg5[%c0_8, %c0_9] : memref<8x128xbf16, #tpu.memory_space<vmem>>, vector<8x128xbf16>
    tpu.vector_store %arg5[%c0_8, %c0_9], %11 {strides = array<i32>} : memref<8x128xbf16, #tpu.memory_space<vmem>>, vector<8x128xbf16>,
    return
  }
  func.func @transform_0(%arg0: i32) -> (i32, i32) {
    %c0_i32 = arith.constant 0 : i32
    %c0_i32_0 = arith.constant 0 : i32
    return %arg0, %c0_i32 : i32, i32
  }
  func.func @transform_1(%arg0: i32) -> (i32, i32) {
    %c0_i32 = arith.constant 0 : i32
    %c0_i32_0 = arith.constant 0 : i32
    %c0_i32_1 = arith.constant 0 : i32
    return %c0_i32, %c0_i32_0 : i32, i32
  }
  func.func @transform_2(%arg0: i32) -> (i32, i32) {
    %c0_i32 = arith.constant 0 : i32
    %c0_i32_0 = arith.constant 0 : i32
    %c0_i32_1 = arith.constant 0 : i32
    return %c0_i32, %c0_i32_0 : i32, i32
  }
  func.func @transform_3(%arg0: i32) -> (i32, i32) {
    %c0_i32 = arith.constant 0 : i32
    %c0_i32_0 = arith.constant 0 : i32
    %c0_i32_1 = arith.constant 0 : i32
    return %c0_i32, %c0_i32_0 : i32, i32
  }
  func.func @transform_4(%arg0: i32) -> (i32, i32) {
    %c0_i32 = arith.constant 0 : i32
    %c0_i32_0 = arith.constant 0 : i32
    return %arg0, %c0_i32 : i32, i32
  }
}

module attributes {stable_mosaic.version = 11 : i64} {
  func.func @_conv_bn_relu_kernel(%arg0: i32, %arg1: memref<2x1152xbf16, #tpu.memory_space<vmem>>, %arg2: memref<1152x256xbf16, #tpu.memory_space<vmem>>, %arg3: memref<1x256xf32, #tpu.memory_space<vmem>>, %arg4: memref<1x256xf32, #tpu.memory_space<vmem>>, %arg5: memref<2x256xbf16, #tpu.memory_space<vmem>>) attributes {dimension_semantics = [#tpu.dimension_semantics<parallel>], iteration_bounds = array<i64: 1>, scalar_prefetch = 0 : i64, scratch_operands = 0 : i64, tpu.core_type = #tpu.core_type<tc>, window_params = [{transform_indices = @transform_0, window_bounds = array<i64: 2, 1152>}, {pipeline_mode = #tpu.pipeline_mode<synchronous>, transform_indices = @transform_1, window_bounds = array<i64: 1152, 256>}, {pipeline_mode = #tpu.pipeline_mode<synchronous>, transform_indices = @transform_2, window_bounds = array<i64: 1, 256>}, {pipeline_mode = #tpu.pipeline_mode<synchronous>, transform_indices = @transform_3, window_bounds = array<i64: 1, 256>}, {transform_indices = @transform_4, window_bounds = array<i64: 2, 256>}]} {
    %c0 = arith.constant 0 : index
    %c0_0 = arith.constant 0 : index
    %0 = vector.load %arg1[%c0, %c0_0] : memref<2x1152xbf16, #tpu.memory_space<vmem>>, vector<2x1152xbf16>
    %c0_1 = arith.constant 0 : index
    %c0_2 = arith.constant 0 : index
    %1 = vector.load %arg2[%c0_1, %c0_2] : memref<1152x256xbf16, #tpu.memory_space<vmem>>, vector<1152x256xbf16>
    %cst = arith.constant dense<0.000000e+00> : vector<2x256xf32>
    %2 = tpu.matmul %0, %1, %cst {dimension_numbers = #tpu.dot_dimension_numbers<[1], [0], [0], [1], [0, 0, 1, 1], [], []>} : vector<2x1152xbf16>, vector<1152x256xbf16>, vector<2x256xf32> -> vector<2x256xf32>
    %c0_3 = arith.constant 0 : index
    %c0_4 = arith.constant 0 : index
    %3 = vector.load %arg3[%c0_3, %c0_4] : memref<1x256xf32, #tpu.memory_space<vmem>>, vector<1x256xf32>
    %4 = vector.broadcast %3 : vector<1x256xf32> to vector<2x256xf32>
    %5 = arith.mulf %2, %4 : vector<2x256xf32>
    %c0_5 = arith.constant 0 : index
    %c0_6 = arith.constant 0 : index
    %6 = vector.load %arg4[%c0_5, %c0_6] : memref<1x256xf32, #tpu.memory_space<vmem>>, vector<1x256xf32>
    %7 = vector.broadcast %6 : vector<1x256xf32> to vector<2x256xf32>
    %8 = arith.addf %5, %7 : vector<2x256xf32>
    %cst_7 = arith.constant 0.000000e+00 : f32
    %9 = vector.broadcast %cst_7 : f32 to vector<2x256xf32>
    %10 = arith.maximumf %8, %9 : vector<2x256xf32>
    %11 = arith.truncf %10 : vector<2x256xf32> to vector<2x256xbf16>
    %c0_8 = arith.constant 0 : index
    %c0_9 = arith.constant 0 : index
    %12 = vector.load %arg5[%c0_8, %c0_9] : memref<2x256xbf16, #tpu.memory_space<vmem>>, vector<2x256xbf16>
    tpu.vector_store %arg5[%c0_8, %c0_9], %11 {strides = array<i32>} : memref<2x256xbf16, #tpu.memory_space<vmem>>, vector<2x256xbf16>,
    return
  }
  func.func @transform_0(%arg0: i32) -> (i32, i32) {
    %c0_i32 = arith.constant 0 : i32
    %c0_i32_0 = arith.constant 0 : i32
    return %arg0, %c0_i32 : i32, i32
  }
  func.func @transform_1(%arg0: i32) -> (i32, i32) {
    %c0_i32 = arith.constant 0 : i32
    %c0_i32_0 = arith.constant 0 : i32
    %c0_i32_1 = arith.constant 0 : i32
    return %c0_i32, %c0_i32_0 : i32, i32
  }
  func.func @transform_2(%arg0: i32) -> (i32, i32) {
    %c0_i32 = arith.constant 0 : i32
    %c0_i32_0 = arith.constant 0 : i32
    %c0_i32_1 = arith.constant 0 : i32
    return %c0_i32, %c0_i32_0 : i32, i32
  }
  func.func @transform_3(%arg0: i32) -> (i32, i32) {
    %c0_i32 = arith.constant 0 : i32
    %c0_i32_0 = arith.constant 0 : i32
    %c0_i32_1 = arith.constant 0 : i32
    return %c0_i32, %c0_i32_0 : i32, i32
  }
  func.func @transform_4(%arg0: i32) -> (i32, i32) {
    %c0_i32 = arith.constant 0 : i32
    %c0_i32_0 = arith.constant 0 : i32
    return %arg0, %c0_i32 : i32, i32
  }
}

</mosaic_0001>

<bundles_post_ra>
// kernel: faceboxes_forward.21
= control target key start
LH: loop header
LB: loop body
LE: loop exit
PB: predicated region body
PF: predicated region fallthrough
CT: control target
= control target key end

     0   :  { %s3567_s15 = smov 0   ;;  %s4346_s0 = inlined_call_operand.vmem [shape: bf16[2048,147], index: 0, kind: input, shape index: {}]   ;;  %s4347_s1 = inlined_call_operand.vmem [shape: bf16[147,48], index: 1, kind: input, shape index: {}]   ;;  %s4348_s2 = inlined_call_operand.vmem [shape: f32[1,48], index: 2, kind: input, shape index: {}]   ;;  %s4349_s3 = inlined_call_operand.vmem [shape: f32[1,48], index: 3, kind: input, shape index: {}]   ;;  %s4350_s4 = inlined_call_operand.vmem [shape: bf16[2048,48], index: 4, kind: output, shape index: {}]  }
   0x1 LB: > { %s2825_s16 = sadd.s32 4294967295, %s3538_s15   ;;  %p2829_p0 = scmp.ge.s32.totalorder %s3538_s15, 1  ;;  %s3538_s15 = sphi %s3567_s15, %s14_s15  }
   0x2   : > { %p164_p1 = scmp.lt.s32.totalorder %s3538_s15, 3 }
   0x4   : > { %p165_p2 = pnand %p2829_p0, %p164_p1 }
   0x5   : > { %v3328_v0 = vld [vmem:[%s4347_s1] sm:$0xff] (!%p165_p2)   ;;  %v3540_v1 = vmov (!%p165_p2), 0   ;;  %v3329_v2 = vld [vmem:[%s4347_s1 + $0x8] sm:$0xff] (!%p165_p2)   ;;  %v3330_v3 = vld [vmem:[%s4347_s1 + $0x10] sm:$0xff] (!%p165_p2)   ;;  %s2830_s23 = sshll.u32 (!%p165_p2), %s2825_s16, 7  ;;  %vm985_vm0 = vcmask (!%p165_p2), 154624  }
   0x6   : > { %168 = sbr.rel (%p165_p2) target bundleno = 517 (0x205), region = 36  ;;  %1185 = vmatprep.subr.bf16.mxu0 (!%p165_p2), %v3540_v1  ;;  %3298 = vmatprep.subr.bf16.mxu1 (!%p165_p2), %v3540_v1  ;;  %p192_p3 = scmp.lt.s32.totalorder (!%p165_p2), %s2830_s23, 255  ;;  %v3331_v4 = vld [vmem:[%s4347_s1 + $0x18] sm:$0xff] (!%p165_p2)   ;;  %v3332_v5 = vld [vmem:[%s4347_s1 + $0x20] sm:$0xff] (!%p165_p2)   ;;  %v3333_v8 = vld [vmem:[%s4347_s1 + $0x28] sm:$0xff] (!%p165_p2)   ;;  %vm1178_vm1 = vcmask (!%p165_p2), 1040384  }
   0x7   : > { %1186 = vmatpush1.bf16.msra.mxu0 (!%p165_p2), %v3328_v0  ;;  %3308 = vmatpush1.bf16.msra.mxu1 (!%p165_p2), %v3328_v0  ;;  %v3334_v9 = vld [vmem:[%s4347_s1 + $0x30] sm:$0xff] (!%p165_p2)   ;;  %v3335_v10 = vld [vmem:[%s4347_s1 + $0x38] sm:$0xff] (!%p165_p2)   ;;  %vm1179_vm2 = vcmask (!%p165_p2), 1041408   ;;  %v3541_v11 = vmov (!%p165_p2), 65535   ;;  %v3336_v13 = vld [vmem:[%s4347_s1 + $0x40] sm:$0xff] (!%p165_p2)   ;;  %vm2640_vm3 = vcmask (!%p165_p2), 388096  }
   0x8   : > { %1187 = vmatprep.subr.bf16.mxu0 (!%p165_p2), %v3540_v1  ;;  %3299 = vmatprep.subr.bf16.mxu1 (!%p165_p2), %v3540_v1  ;;  %v1180_v12 = vsel (!%p165_p2), %vm1178_vm1, 4294967295, %v3541_v11  ;;  %v3337_v14 = vld [vmem:[%s4347_s1 + $0x48] ss:$0 sps:$4 sm:$0x33] (!%p165_p2)  }
   0x9   : > { %v1181_v15 = vsel (!%p165_p2), %vm1179_vm2, %v1180_v12, 0 }
   0xa   : > { %v1183_v16 = vand.u32 (!%p165_p2), %v3337_v14, %v1181_v15 }
   0xb   : > { %1188 = vmatpush1.bf16.msra.mxu0 (!%p165_p2), %v3329_v2  ;;  %3309 = vmatpush1.bf16.msra.mxu1 (!%p165_p2), %v3329_v2 }
   0xc   : > { %1189 = vmatprep.subr.bf16.mxu0 (!%p165_p2), %v3540_v1  ;;  %3300 = vmatprep.subr.bf16.mxu1 (!%p165_p2), %v3540_v1 }
   0xd   : > { %s4352_s23 = smov (!%p192_p3, %s2830_s23), 255 }
   0xe   : > { %s3169_s26 = sshll.u32 %s4352_s23, 3  ;;  %s2834_s21 = sshll.u32 %s4352_s23, 2 }
   0xf   : > { %1190 = vmatpush1.bf16.msra.mxu0 %v3330_v3  ;;  %3310 = vmatpush1.bf16.msra.mxu1 %v3330_v3  ;;  %s3593_s29 = scalar_lea.vmem %s4346_s0, %s3169_s26  ;;  %s3805_s24 = scalar_lea.vmem %s4350_s4, %s2834_s21 }
  0x10   : > { %1191 = vmatprep.subr.bf16.mxu0 %v3540_v1  ;;  %3301 = vmatprep.subr.bf16.mxu1 %v3540_v1  ;;  %v3340_v6 = vld [vmem:[%s3593_s29 + $0x4] ss:$8 sps:$4 sm:$0xff]   ;;  %v3338_v17 = vld [vmem:[%s3593_s29] ss:$8 sps:$4 sm:$0xff]   ;;  %v3344_v19 = vld [vmem:[%s3593_s29 + $0x14] ss:$8 sps:$4 sm:$0xff]  }
  0x11   : > { %v3343_v7 = vld [vmem:[%s3593_s29 + $0x204] ss:$8 sps:$4 sm:$0xff]   ;;  %2973 = vmatprep.mubr.msk.bf16.mxu0 %vm985_vm0, %v3340_v6  ;;  %v3341_v18 = vld [vmem:[%s3593_s29 + $0x200] ss:$8 sps:$4 sm:$0xff]   ;;  %v3346_v20 = vld [vmem:[%s3593_s29 + $0x214] ss:$8 sps:$4 sm:$0xff]  }
  0x12   : > { %3005 = vmatprep.mubr.msk.bf16.mxu1 %vm985_vm0, %v3343_v7  ;;  %v3348_v21 = vld [vmem:[%s3593_s29 + $0x10] ss:$8 sps:$4 sm:$0xff]   ;;  %v3350_v23 = vld [vmem:[%s3593_s29 + $0x24] ss:$8 sps:$4 sm:$0xff]   ;;  %v3354_v25 = vld [vmem:[%s3593_s29 + $0x20] ss:$8 sps:$4 sm:$0xff]  }
  0x13   : > { %1192 = vmatpush1.bf16.msra.mxu0 %v3331_v4  ;;  %3311 = vmatpush1.bf16.msra.mxu1 %v3331_v4  ;;  %v3349_v22 = vld [vmem:[%s3593_s29 + $0x210] ss:$8 sps:$4 sm:$0xff]   ;;  %v3352_v24 = vld [vmem:[%s3593_s29 + $0x224] ss:$8 sps:$4 sm:$0xff]   ;;  %v3355_v26 = vld [vmem:[%s3593_s29 + $0x220] ss:$8 sps:$4 sm:$0xff]  }
  0x14   : > { %1193 = vmatprep.subr.bf16.mxu0 %v3540_v1  ;;  %3302 = vmatprep.subr.bf16.mxu1 %v3540_v1  ;;  %v3356_v27 = vld [vmem:[%s3593_s29 + $0x34] ss:$8 sps:$4 sm:$0xff]   ;;  %v3360_v29 = vld [vmem:[%s3593_s29 + $0x30] ss:$8 sps:$4 sm:$0xff]   ;;  %v3362_v31 = vld [vmem:[%s3593_s29 + $0x44] ss:$8 sps:$4 sm:$0xff]  }
  0x15   : > { %v3358_v28 = vld [vmem:[%s3593_s29 + $0x234] ss:$8 sps:$4 sm:$0xff]   ;;  %v3361_v30 = vld [vmem:[%s3593_s29 + $0x230] ss:$8 sps:$4 sm:$0xff]   ;;  %v3364_v32 = vld [vmem:[%s3593_s29 + $0x244] ss:$8 sps:$4 sm:$0xff]  }
  0x16   : > { %v3366_v33 = vld [vmem:[%s3593_s29 + $0x40] ss:$8 sps:$4 sm:$0xff]   ;;  %v3368_v35 = vld [vmem:[%s3593_s29 + $0x54] ss:$8 sps:$4 sm:$0xff]   ;;  %v3372_v37 = vld [vmem:[%s3593_s29 + $0x50] ss:$8 sps:$4 sm:$0xff]  }
  0x17   : > { %1194 = vmatpush1.bf16.msra.mxu0 %v3332_v5  ;;  %3312 = vmatpush1.bf16.msra.mxu1 %v3332_v5  ;;  %v3367_v34 = vld [vmem:[%s3593_s29 + $0x240] ss:$8 sps:$4 sm:$0xff]   ;;  %v3370_v36 = vld [vmem:[%s3593_s29 + $0x254] ss:$8 sps:$4 sm:$0xff]   ;;  %v3373_v38 = vld [vmem:[%s3593_s29 + $0x250] ss:$8 sps:$4 sm:$0xff]  }
  0x18   : > { %1195 = vmatprep.subr.bf16.mxu0 %v3540_v1  ;;  %3303 = vmatprep.subr.bf16.mxu1 %v3540_v1  ;;  %v3374_v39 = vld [vmem:[%s3593_s29 + $0x64] ss:$8 sps:$4 sm:$0xff]   ;;  %v3378_v41 = vld [vmem:[%s3593_s29 + $0x60] ss:$8 sps:$4 sm:$0xff]   ;;  %v3380_v43 = vld [vmem:[%s3593_s29 + $0x74] ss:$8 sps:$4 sm:$0xff]  }
  0x19   : > { %v3376_v40 = vld [vmem:[%s3593_s29 + $0x264] ss:$8 sps:$4 sm:$0xff]   ;;  %v3379_v42 = vld [vmem:[%s3593_s29 + $0x260] ss:$8 sps:$4 sm:$0xff]   ;;  %v3382_v44 = vld [vmem:[%s3593_s29 + $0x274] ss:$8 sps:$4 sm:$0xff]  }
  0x1a   : > { %v3384_v45 = vld [vmem:[%s3593_s29 + $0x70] ss:$8 sps:$4 sm:$0xff]   ;;  %v3386_v47 = vld [vmem:[%s3593_s29 + $0x84] ss:$8 sps:$4 sm:$0xff]   ;;  %v3390_v49 = vld [vmem:[%s3593_s29 + $0x80] ss:$8 sps:$4 sm:$0xff]  }
  0x1b   : > { %1196 = vmatpush1.bf16.msra.mxu0 %v3333_v8  ;;  %3313 = vmatpush1.bf16.msra.mxu1 %v3333_v8  ;;  %v3385_v46 = vld [vmem:[%s3593_s29 + $0x270] ss:$8 sps:$4 sm:$0xff]   ;;  %v3388_v48 = vld [vmem:[%s3593_s29 + $0x284] ss:$8 sps:$4 sm:$0xff]   ;;  %v3391_v50 = vld [vmem:[%s3593_s29 + $0x280] ss:$8 sps:$4 sm:$0xff]  }
  0x1c   : > { %1197 = vmatprep.subr.bf16.mxu0 %v3540_v1  ;;  %3304 = vmatprep.subr.bf16.mxu1 %v3540_v1  ;;  %v3392_v51 = vld [vmem:[%s3593_s29 + $0x94] ss:$8 sps:$4 sm:$0xff]   ;;  %v3396_v53 = vld [vmem:[%s3593_s29 + $0x90] ss:$8 sps:$4 sm:$0xff]   ;;  %v3398_v55 = vld [vmem:[%s3593_s29 + $0xa4] ss:$8 sps:$4 sm:$0xff]  }
  0x1d   : > { %v3394_v52 = vld [vmem:[%s3593_s29 + $0x294] ss:$8 sps:$4 sm:$0xff]   ;;  %v3397_v54 = vld [vmem:[%s3593_s29 + $0x290] ss:$8 sps:$4 sm:$0xff]   ;;  %v3400_v56 = vld [vmem:[%s3593_s29 + $0x2a4] ss:$8 sps:$4 sm:$0xff]  }
  0x1e   : > { %v3402_v57 = vld [vmem:[%s3593_s29 + $0xa0] ss:$8 sps:$4 sm:$0xff]   ;;  %v3404_v59 = vld [vmem:[%s3593_s29 + $0xb4] ss:$8 sps:$4 sm:$0xff]   ;;  %v3408_v61 = vld [vmem:[%s3593_s29 + $0xb0] ss:$8 sps:$4 sm:$0xff]  }
  0x1f   : > { %1198 = vmatpush1.bf16.msra.mxu0 %v3334_v9  ;;  %3314 = vmatpush1.bf16.msra.mxu1 %v3334_v9  ;;  %v3403_v58 = vld [vmem:[%s3593_s29 + $0x2a0] ss:$8 sps:$4 sm:$0xff]   ;;  %v3406_v60 = vld [vmem:[%s3593_s29 + $0x2b4] ss:$8 sps:$4 sm:$0xff]   ;;  %v3409_v62 = vld [vmem:[%s3593_s29 + $0x2b0] ss:$8 sps:$4 sm:$0xff]  }
  0x20   : > { %1199 = vmatprep.subr.bf16.mxu0 %v3540_v1  ;;  %3305 = vmatprep.subr.bf16.mxu1 %v3540_v1  ;;  %v3410_v63 = vld [vmem:[%s3593_s29 + $0xc4] ss:$8 sps:$4 sm:$0xff]   ;;  %v3415_v2 = vld [vmem:[%s3593_s29 + $0x2c0] ss:$8 sps:$4 sm:$0xff]   ;;  %v3416_v3 = vld [vmem:[%s3593_s29 + $0xd4] ss:$8 sps:$4 sm:$0xff]  }
  0x21   : > { %v3412_v0 = vld [vmem:[%s3593_s29 + $0x2c4] ss:$8 sps:$4 sm:$0xff]   ;;  %v3418_v4 = vld [vmem:[%s3593_s29 + $0x2d4] ss:$8 sps:$4 sm:$0xff]   ;;  %v3420_v5 = vld [vmem:[%s3593_s29 + $0xd0] ss:$8 sps:$4 sm:$0xff]  }
  0x22   : > { %v3421_v6 = vld [vmem:[%s3593_s29 + $0x2d0] ss:$8 sps:$4 sm:$0xff]   ;;  %v3422_v7 = vld [vmem:[%s3593_s29 + $0xe4] ss:$8 sps:$4 sm:$0xff]   ;;  %v3426_v9 = vld [vmem:[%s3593_s29 + $0xe0] ss:$8 sps:$4 sm:$0xff]  }
  0x23   : > { %1200 = vmatpush1.bf16.msra.mxu0 %v3335_v10  ;;  %3315 = vmatpush1.bf16.msra.mxu1 %v3335_v10  ;;  %v3424_v8 = vld [vmem:[%s3593_s29 + $0x2e4] ss:$8 sps:$4 sm:$0xff]   ;;  %v3427_v10 = vld [vmem:[%s3593_s29 + $0x2e0] ss:$8 sps:$4 sm:$0xff]   ;;  %v3428_v11 = vld [vmem:[%s3593_s29 + $0xf4] ss:$8 sps:$4 sm:$0xff]  }
  0x24   : > { %1201 = vmatprep.subr.bf16.mxu0 %v3540_v1  ;;  %3306 = vmatprep.subr.bf16.mxu1 %v3540_v1  ;;  %v3430_v12 = vld [vmem:[%s3593_s29 + $0x2f4] ss:$8 sps:$4 sm:$0xff]   ;;  %v3433_v14 = vld [vmem:[%s3593_s29 + $0x2f0] ss:$8 sps:$4 sm:$0xff]   ;;  %v3434_v15 = vld [vmem:[%s3593_s29 + $0x104] ss:$8 sps:$4 sm:$0xff]  }
  0x27   : > { %1202 = vmatpush1.bf16.msra.mxu0 %v3336_v13  ;;  %3316 = vmatpush1.bf16.msra.mxu1 %v3336_v13  ;;  %v3432_v13 = vld [vmem:[%s3593_s29 + $0xf0] ss:$8 sps:$4 sm:$0xff]  }
  0x28   : > { %1203 = vmatprep.subr.bf16.mxu0 %v3540_v1  ;;  %3307 = vmatprep.subr.bf16.mxu1 %v3540_v1  ;;  %v3414_v1 = vld [vmem:[%s3593_s29 + $0xc0] ss:$8 sps:$4 sm:$0xff]  }
  0x2b   : > { %1204 = vmatpush1.bf16.msra.mxu0 %v1183_v16  ;;  %3317 = vmatpush1.bf16.msra.mxu1 %v1183_v16  ;;  %v3436_v16 = vld [vmem:[%s3593_s29 + $0x304] ss:$8 sps:$4 sm:$0xff]  }
  0x2e   : > { %1218 = vmatmul.mubr.bf16.vlgmr.msra.gmra.mrb[0].mxu0 %v3338_v17  ;;  %1474 = vmatmul.mubr.bf16.vlgmr.msra.gmra.mrb[0].mxu1 %v3341_v18  ;;  %v3438_v17 = vld [vmem:[%s3593_s29 + $0x100] ss:$8 sps:$4 sm:$0xff]  }
  0x2f   : > { %2974 = vmatprep.mubr.msk.bf16.mxu0 %vm985_vm0, %v3344_v19  ;;  %3006 = vmatprep.mubr.msk.bf16.mxu1 %vm985_vm0, %v3346_v20  ;;  %v3439_v18 = vld [vmem:[%s3593_s29 + $0x300] ss:$8 sps:$4 sm:$0xff]   ;;  %v3440_v19 = vld [vmem:[%s3593_s29 + $0x114] ss:$8 sps:$4 sm:$0xff]  }
  0x30   : > { %v3442_v20 = vld [vmem:[%s3593_s29 + $0x314] ss:$8 sps:$4 sm:$0xff]  }
  0x36   : > { %1226 = vmatmul.mubr.bf16.gmra.mrb[4].mxu0 %v3348_v21  ;;  %1482 = vmatmul.mubr.bf16.gmra.mrb[4].mxu1 %v3349_v22  ;;  %v3444_v21 = vld [vmem:[%s3593_s29 + $0x110] ss:$8 sps:$4 sm:$0xff]  }
  0x37   : > { %2975 = vmatprep.mubr.msk.bf16.mxu0 %vm985_vm0, %v3350_v23  ;;  %3007 = vmatprep.mubr.msk.bf16.mxu1 %vm985_vm0, %v3352_v24  ;;  %v3445_v22 = vld [vmem:[%s3593_s29 + $0x310] ss:$8 sps:$4 sm:$0xff]   ;;  %v3446_v23 = vld [vmem:[%s3593_s29 + $0x124] ss:$8 sps:$4 sm:$0xff]  }
  0x38   : > { %v3448_v24 = vld [vmem:[%s3593_s29 + $0x324] ss:$8 sps:$4 sm:$0xff]  }
  0x3e   : > { %1234 = vmatmul.mubr.bf16.gmra.mrb[8].mxu0 %v3354_v25  ;;  %1490 = vmatmul.mubr.bf16.gmra.mrb[8].mxu1 %v3355_v26  ;;  %v3450_v25 = vld [vmem:[%s3593_s29 + $0x120] ss:$8 sps:$4 sm:$0xff]  }
  0x3f   : > { %2976 = vmatprep.mubr.msk.bf16.mxu0 %vm985_vm0, %v3356_v27  ;;  %3008 = vmatprep.mubr.msk.bf16.mxu1 %vm985_vm0, %v3358_v28  ;;  %v3451_v26 = vld [vmem:[%s3593_s29 + $0x320] ss:$8 sps:$4 sm:$0xff]   ;;  %v3452_v27 = vld [vmem:[%s3593_s29 + $0x134] ss:$8 sps:$4 sm:$0xff]  }
  0x40   : > { %v3454_v28 = vld [vmem:[%s3593_s29 + $0x334] ss:$8 sps:$4 sm:$0xff]  }
  0x46   : > { %1242 = vmatmul.mubr.bf16.gmra.mrb[12].mxu0 %v3360_v29  ;;  %1498 = vmatmul.mubr.bf16.gmra.mrb[12].mxu1 %v3361_v30  ;;  %v3456_v29 = vld [vmem:[%s3593_s29 + $0x130] ss:$8 sps:$4 sm:$0xff]  }
  0x47   : > { %2977 = vmatprep.mubr.msk.bf16.mxu0 %vm985_vm0, %v3362_v31  ;;  %3009 = vmatprep.mubr.msk.bf16.mxu1 %vm985_vm0, %v3364_v32  ;;  %v3457_v30 = vld [vmem:[%s3593_s29 + $0x330] ss:$8 sps:$4 sm:$0xff]   ;;  %v3458_v31 = vld [vmem:[%s3593_s29 + $0x144] ss:$8 sps:$4 sm:$0xff]  }
  0x48   : > { %v3460_v32 = vld [vmem:[%s3593_s29 + $0x344] ss:$8 sps:$4 sm:$0xff]  }
  0x4e   : > { %1250 = vmatmul.mubr.bf16.gmra.mrb[16].mxu0 %v3366_v33  ;;  %1506 = vmatmul.mubr.bf16.gmra.mrb[16].mxu1 %v3367_v34  ;;  %v3462_v33 = vld [vmem:[%s3593_s29 + $0x140] ss:$8 sps:$4 sm:$0xff]  }
  0x4f   : > { %2978 = vmatprep.mubr.msk.bf16.mxu0 %vm985_vm0, %v3368_v35  ;;  %3010 = vmatprep.mubr.msk.bf16.mxu1 %vm985_vm0, %v3370_v36  ;;  %v3463_v34 = vld [vmem:[%s3593_s29 + $0x340] ss:$8 sps:$4 sm:$0xff]   ;;  %v3464_v35 = vld [vmem:[%s3593_s29 + $0x154] ss:$8 sps:$4 sm:$0xff]  }
  0x50   : > { %v3466_v36 = vld [vmem:[%s3593_s29 + $0x354] ss:$8 sps:$4 sm:$0xff]  }
  0x56   : > { %1258 = vmatmul.mubr.bf16.gmra.mrb[20].mxu0 %v3372_v37  ;;  %1514 = vmatmul.mubr.bf16.gmra.mrb[20].mxu1 %v3373_v38  ;;  %v3468_v37 = vld [vmem:[%s3593_s29 + $0x150] ss:$8 sps:$4 sm:$0xff]  }
  0x57   : > { %2979 = vmatprep.mubr.msk.bf16.mxu0 %vm985_vm0, %v3374_v39  ;;  %3011 = vmatprep.mubr.msk.bf16.mxu1 %vm985_vm0, %v3376_v40  ;;  %v3469_v38 = vld [vmem:[%s3593_s29 + $0x350] ss:$8 sps:$4 sm:$0xff]   ;;  %v3470_v39 = vld [vmem:[%s3593_s29 + $0x164] ss:$8 sps:$4 sm:$0xff]  }
  0x58   : > { %v3472_v40 = vld [vmem:[%s3593_s29 + $0x364] ss:$8 sps:$4 sm:$0xff]  }
  0x5e   : > { %1266 = vmatmul.mubr.bf16.gmra.mrb[24].mxu0 %v3378_v41  ;;  %1522 = vmatmul.mubr.bf16.gmra.mrb[24].mxu1 %v3379_v42  ;;  %v3474_v41 = vld [vmem:[%s3593_s29 + $0x160] ss:$8 sps:$4 sm:$0xff]  }
  0x5f   : > { %2980 = vmatprep.mubr.msk.bf16.mxu0 %vm985_vm0, %v3380_v43  ;;  %3012 = vmatprep.mubr.msk.bf16.mxu1 %vm985_vm0, %v3382_v44  ;;  %v3475_v42 = vld [vmem:[%s3593_s29 + $0x360] ss:$8 sps:$4 sm:$0xff]   ;;  %v3476_v43 = vld [vmem:[%s3593_s29 + $0x174] ss:$8 sps:$4 sm:$0xff]  }
  0x60   : > { %v3478_v44 = vld [vmem:[%s3593_s29 + $0x374] ss:$8 sps:$4 sm:$0xff]  }
  0x66   : > { %1274 = vmatmul.mubr.bf16.gmra.mrb[28].mxu0 %v3384_v45  ;;  %1530 = vmatmul.mubr.bf16.gmra.mrb[28].mxu1 %v3385_v46  ;;  %v3480_v45 = vld [vmem:[%s3593_s29 + $0x170] ss:$8 sps:$4 sm:$0xff]  }
  0x67   : > { %2981 = vmatprep.mubr.msk.bf16.mxu0 %vm985_vm0, %v3386_v47  ;;  %3013 = vmatprep.mubr.msk.bf16.mxu1 %vm985_vm0, %v3388_v48  ;;  %v3481_v46 = vld [vmem:[%s3593_s29 + $0x370] ss:$8 sps:$4 sm:$0xff]   ;;  %v3482_v47 = vld [vmem:[%s3593_s29 + $0x184] ss:$8 sps:$4 sm:$0xff]  }
  0x68   : > { %v3484_v48 = vld [vmem:[%s3593_s29 + $0x384] ss:$8 sps:$4 sm:$0xff]  }
  0x6e   : > { %1282 = vmatmul.mubr.bf16.gmra.mrb[32].mxu0 %v3390_v49  ;;  %1538 = vmatmul.mubr.bf16.gmra.mrb[32].mxu1 %v3391_v50  ;;  %v3486_v49 = vld [vmem:[%s3593_s29 + $0x180] ss:$8 sps:$4 sm:$0xff]  }
  0x6f   : > { %2982 = vmatprep.mubr.msk.bf16.mxu0 %vm985_vm0, %v3392_v51  ;;  %3014 = vmatprep.mubr.msk.bf16.mxu1 %vm985_vm0, %v3394_v52  ;;  %v3487_v50 = vld [vmem:[%s3593_s29 + $0x380] ss:$8 sps:$4 sm:$0xff]   ;;  %v3488_v51 = vld [vmem:[%s3593_s29 + $0x194] ss:$8 sps:$4 sm:$0xff]  }
  0x70   : > { %v3490_v52 = vld [vmem:[%s3593_s29 + $0x394] ss:$8 sps:$4 sm:$0xff]  }
  0x76   : > { %1290 = vmatmul.mubr.bf16.gmra.mrb[36].mxu0 %v3396_v53  ;;  %1546 = vmatmul.mubr.bf16.gmra.mrb[36].mxu1 %v3397_v54  ;;  %v3492_v53 = vld [vmem:[%s3593_s29 + $0x190] ss:$8 sps:$4 sm:$0xff]  }
  0x77   : > { %2983 = vmatprep.mubr.msk.bf16.mxu0 %vm985_vm0, %v3398_v55  ;;  %3015 = vmatprep.mubr.msk.bf16.mxu1 %vm985_vm0, %v3400_v56  ;;  %v3493_v54 = vld [vmem:[%s3593_s29 + $0x390] ss:$8 sps:$4 sm:$0xff]   ;;  %v3494_v55 = vld [vmem:[%s3593_s29 + $0x1a4] ss:$8 sps:$4 sm:$0xff]  }
  0x78   : > { %v3496_v56 = vld [vmem:[%s3593_s29 + $0x3a4] ss:$8 sps:$4 sm:$0xff]  }
  0x7e   : > { %1298 = vmatmul.mubr.bf16.gmra.mrb[40].mxu0 %v3402_v57  ;;  %1554 = vmatmul.mubr.bf16.gmra.mrb[40].mxu1 %v3403_v58  ;;  %v3498_v57 = vld [vmem:[%s3593_s29 + $0x1a0] ss:$8 sps:$4 sm:$0xff]  }
  0x7f   : > { %2984 = vmatprep.mubr.msk.bf16.mxu0 %vm985_vm0, %v3404_v59  ;;  %3016 = vmatprep.mubr.msk.bf16.mxu1 %vm985_vm0, %v3406_v60  ;;  %v3499_v58 = vld [vmem:[%s3593_s29 + $0x3a0] ss:$8 sps:$4 sm:$0xff]   ;;  %v3500_v59 = vld [vmem:[%s3593_s29 + $0x1b4] ss:$8 sps:$4 sm:$0xff]  }
  0x80   : > { %v3502_v60 = vld [vmem:[%s3593_s29 + $0x3b4] ss:$8 sps:$4 sm:$0xff]  }
  0x86   : > { %1306 = vmatmul.mubr.bf16.gmra.mrb[44].mxu0 %v3408_v61  ;;  %1562 = vmatmul.mubr.bf16.gmra.mrb[44].mxu1 %v3409_v62  ;;  %v3780_v61 = vld [vmem:[%s4348_s2] ss:$0 sm:$0xff] }
  0x87   : > { %2985 = vmatprep.mubr.msk.bf16.mxu0 %vm985_vm0, %v3410_v63  ;;  %3017 = vmatprep.mubr.msk.bf16.mxu1 %vm985_vm0, %v3412_v0  ;;  %v3787_v63 = vld [vmem:[%s4349_s3] ss:$0 sm:$0xff] }
  0x8e   : > { %1314 = vmatmul.mubr.bf16.gmra.mrb[48].mxu0 %v3414_v1  ;;  %1570 = vmatmul.mubr.bf16.gmra.mrb[48].mxu1 %v3415_v2 }
  0x8f   : > { %2986 = vmatprep.mubr.msk.bf16.mxu0 %vm985_vm0, %v3416_v3  ;;  %3018 = vmatprep.mubr.msk.bf16.mxu1 %vm985_vm0, %v3418_v4 }
  0x96   : > { %1322 = vmatmul.mubr.bf16.gmra.mrb[52].mxu0 %v3420_v5  ;;  %1578 = vmatmul.mubr.bf16.gmra.mrb[52].mxu1 %v3421_v6  ;;  %v3504_v5 = vld [vmem:[%s3593_s29 + $0x1b0] ss:$8 sps:$4 sm:$0xff]  }
  0x97   : > { %2987 = vmatprep.mubr.msk.bf16.mxu0 %vm985_vm0, %v3422_v7  ;;  %3019 = vmatprep.mubr.msk.bf16.mxu1 %vm985_vm0, %v3424_v8  ;;  %v3505_v6 = vld [vmem:[%s3593_s29 + $0x3b0] ss:$8 sps:$4 sm:$0xff]  }
  0x9e   : > { %1330 = vmatmul.mubr.bf16.gmra.mrb[56].mxu0 %v3426_v9  ;;  %1586 = vmatmul.mubr.bf16.gmra.mrb[56].mxu1 %v3427_v10  ;;  %v3506_v9 = vld [vmem:[%s3593_s29 + $0x1c4] ss:$8 sps:$4 sm:$0xff]  }
  0x9f   : > { %2988 = vmatprep.mubr.msk.bf16.mxu0 %vm985_vm0, %v3428_v11  ;;  %3020 = vmatprep.mubr.msk.bf16.mxu1 %vm985_vm0, %v3430_v12  ;;  %v3508_v10 = vld [vmem:[%s3593_s29 + $0x3c4] ss:$8 sps:$4 sm:$0xff]  }
  0xa6   : > { %1338 = vmatmul.mubr.bf16.gmra.mrb[60].mxu0 %v3432_v13  ;;  %1594 = vmatmul.mubr.bf16.gmra.mrb[60].mxu1 %v3433_v14 }
  0xa7   : > { %2989 = vmatprep.mubr.msk.bf16.mxu0 %vm985_vm0, %v3434_v15  ;;  %3021 = vmatprep.mubr.msk.bf16.mxu1 %vm985_vm0, %v3436_v16 }
  0xae   : > { %1346 = vmatmul.mubr.bf16.gmra.mrb[64].mxu0 %v3438_v17  ;;  %1602 = vmatmul.mubr.bf16.gmra.mrb[64].mxu1 %v3439_v18 }
  0xaf   : > { %2990 = vmatprep.mubr.msk.bf16.mxu0 %vm985_vm0, %v3440_v19  ;;  %3022 = vmatprep.mubr.msk.bf16.mxu1 %vm985_vm0, %v3442_v20 }
  0xb6   : > { %1354 = vmatmul.mubr.bf16.gmra.mrb[68].mxu0 %v3444_v21  ;;  %1610 = vmatmul.mubr.bf16.gmra.mrb[68].mxu1 %v3445_v22 }
  0xb7   : > { %2991 = vmatprep.mubr.msk.bf16.mxu0 %vm985_vm0, %v3446_v23  ;;  %3023 = vmatprep.mubr.msk.bf16.mxu1 %vm985_vm0, %v3448_v24 }
  0xbe   : > { %1362 = vmatmul.mubr.bf16.gmra.mrb[72].mxu0 %v3450_v25  ;;  %1618 = vmatmul.mubr.bf16.gmra.mrb[72].mxu1 %v3451_v26 }
  0xbf   : > { %2992 = vmatprep.mubr.msk.bf16.mxu0 %vm985_vm0, %v3452_v27  ;;  %3024 = vmatprep.mubr.msk.bf16.mxu1 %vm985_vm0, %v3454_v28 }
  0xc6   : > { %1370 = vmatmul.mubr.bf16.gmra.mrb[76].mxu0 %v3456_v29  ;;  %1626 = vmatmul.mubr.bf16.gmra.mrb[76].mxu1 %v3457_v30 }
  0xc7   : > { %2993 = vmatprep.mubr.msk.bf16.mxu0 %vm985_vm0, %v3458_v31  ;;  %3025 = vmatprep.mubr.msk.bf16.mxu1 %vm985_vm0, %v3460_v32 }
  0xce   : > { %1378 = vmatmul.mubr.bf16.gmra.mrb[80].mxu0 %v3462_v33  ;;  %1634 = vmatmul.mubr.bf16.gmra.mrb[80].mxu1 %v3463_v34  ;;  %v3510_v33 = vld [vmem:[%s3593_s29 + $0x1c0] ss:$8 sps:$4 sm:$0xff]  }
  0xcf   : > { %2994 = vmatprep.mubr.msk.bf16.mxu0 %vm985_vm0, %v3464_v35  ;;  %3026 = vmatprep.mubr.msk.bf16.mxu1 %vm985_vm0, %v3466_v36  ;;  %v3511_v34 = vld [vmem:[%s3593_s29 + $0x3c0] ss:$8 sps:$4 sm:$0xff]  }
  0xd6   : > { %1386 = vmatmul.mubr.bf16.gmra.mrb[84].mxu0 %v3468_v37  ;;  %1642 = vmatmul.mubr.bf16.gmra.mrb[84].mxu1 %v3469_v38  ;;  %v3512_v37 = vld [vmem:[%s3593_s29 + $0x1d4] ss:$8 sps:$4 sm:$0xff]  }
  0xd7   : > { %2995 = vmatprep.mubr.msk.bf16.mxu0 %vm985_vm0, %v3470_v39  ;;  %3027 = vmatprep.mubr.msk.bf16.mxu1 %vm985_vm0, %v3472_v40  ;;  %v3514_v38 = vld [vmem:[%s3593_s29 + $0x3d4] ss:$8 sps:$4 sm:$0xff]  }
  0xde   : > { %1394 = vmatmul.mubr.bf16.gmra.mrb[88].mxu0 %v3474_v41  ;;  %1650 = vmatmul.mubr.bf16.gmra.mrb[88].mxu1 %v3475_v42 }
  0xdf   : > { %2996 = vmatprep.mubr.msk.bf16.mxu0 %vm985_vm0, %v3476_v43  ;;  %3028 = vmatprep.mubr.msk.bf16.mxu1 %vm985_vm0, %v3478_v44 }
  0xe6   : > { %1402 = vmatmul.mubr.bf16.gmra.mrb[92].mxu0 %v3480_v45  ;;  %1658 = vmatmul.mubr.bf16.gmra.mrb[92].mxu1 %v3481_v46 }
  0xe7   : > { %2997 = vmatprep.mubr.msk.bf16.mxu0 %vm985_vm0, %v3482_v47  ;;  %3029 = vmatprep.mubr.msk.bf16.mxu1 %vm985_vm0, %v3484_v48 }
  0xee   : > { %1410 = vmatmul.mubr.bf16.gmra.mrb[96].mxu0 %v3486_v49  ;;  %1666 = vmatmul.mubr.bf16.gmra.mrb[96].mxu1 %v3487_v50 }
  0xef   : > { %2998 = vmatprep.mubr.msk.bf16.mxu0 %vm985_vm0, %v3488_v51  ;;  %3030 = vmatprep.mubr.msk.bf16.mxu1 %vm985_vm0, %v3490_v52 }
  0xf6   : > { %1418 = vmatmul.mubr.bf16.gmra.mrb[100].mxu0 %v3492_v53  ;;  %1674 = vmatmul.mubr.bf16.gmra.mrb[100].mxu1 %v3493_v54 }
  0xf7   : > { %2999 = vmatprep.mubr.msk.bf16.mxu0 %vm985_vm0, %v3494_v55  ;;  %3031 = vmatprep.mubr.msk.bf16.mxu1 %vm985_vm0, %v3496_v56 }
  0xfe   : > { %1426 = vmatmul.mubr.bf16.gmra.mrb[104].mxu0 %v3498_v57  ;;  %1682 = vmatmul.mubr.bf16.gmra.mrb[104].mxu1 %v3499_v58 }
  0xff   : > { %3000 = vmatprep.mubr.msk.bf16.mxu0 %vm985_vm0, %v3500_v59  ;;  %3032 = vmatprep.mubr.msk.bf16.mxu1 %vm985_vm0, %v3502_v60 }
 0x101   : > { %v1219_v62 = vpop.f32.mrb[0].mxu0  ;;  %v1475_v0 = vpop.f32.mrb[0].mxu1 }
 0x102   : > { %v1737_v1 = vmul.f32 %v3780_v61, %v1219_v62  ;;  %v1801_v2 = vmul.f32 %v3780_v61, %v1475_v0  ;;  %v1221_v3 = vpop.f32.mrb[1].mxu0  ;;  %v1477_v4 = vpop.f32.mrb[1].mxu1  ;;  %v3516_v62 = vld [vmem:[%s3593_s29 + $0x1d0] ss:$8 sps:$4 sm:$0xff]  }
 0x103   : > { %v1222_v7 = vpop.f32.mrb[2].mxu0  ;;  %v1478_v8 = vpop.f32.mrb[2].mxu1  ;;  %v3517_v0 = vld [vmem:[%s3593_s29 + $0x3d0] ss:$8 sps:$4 sm:$0xff]   ;;  %v3518_v3 = vld [vmem:[%s3593_s29 + $0x1e4] ss:$8 sps:$4 sm:$0xff]  }
 0x104   : > { %v1872_v11 = vadd.f32 %v3787_v63, %v1737_v1  ;;  %v1936_v12 = vadd.f32 %v3787_v63, %v1801_v2  ;;  %v1738_v13 = vmul.f32 %v3780_v61, %v1222_v7  ;;  %v1802_v14 = vmul.f32 %v3780_v61, %v1478_v8  ;;  %v1224_v15 = vpop.f32.mrb[3].mxu0  ;;  %v1480_v16 = vpop.f32.mrb[3].mxu1  ;;  %v3520_v4 = vld [vmem:[%s3593_s29 + $0x3e4] ss:$8 sps:$4 sm:$0xff]  }
 0x106   : > { %v2000_v17 = vmax.f32 %v1872_v11, 0.0  ;;  %v2064_v18 = vmax.f32 %v1936_v12, 0.0  ;;  %v1873_v19 = vadd.f32 %v3787_v63, %v1738_v13  ;;  %v1937_v20 = vadd.f32 %v3787_v63, %v1802_v14  ;;  %1434 = vmatmul.mubr.bf16.gmra.mrb[108].mxu0 %v3504_v5  ;;  %1690 = vmatmul.mubr.bf16.gmra.mrb[108].mxu1 %v3505_v6 }
 0x107   : > { %3001 = vmatprep.mubr.msk.bf16.mxu0 %vm985_vm0, %v3506_v9  ;;  %3033 = vmatprep.mubr.msk.bf16.mxu1 %vm985_vm0, %v3508_v10 }
 0x108   : > { %v3170_v21 = vpack.c.bf16 %v2000_v17, %v2000_v17  ;;  %v3234_v22 = vpack.c.bf16 %v2064_v18, %v2064_v18  ;;  %v2001_v23 = vmax.f32 %v1873_v19, 0.0  ;;  %v2065_v24 = vmax.f32 %v1937_v20, 0.0 }
 0x109   : > { %v1227_v25 = vpop.f32.mrb[4].mxu0  ;;  %v1483_v26 = vpop.f32.mrb[4].mxu1 }
 0x10a   : > { %2641 = vst.msk [vmem:[%s3805_s24] sm:$0xf] %vm2640_vm3, %v3170_v21  ;;  %2705 = vst.msk [vmem:[%s3805_s24 + $0x100] sm:$0xf] %vm2640_vm3, %v3234_v22  ;;  %v3171_v27 = vpack.c.bf16 %v2001_v23, %v2001_v23  ;;  %v3235_v28 = vpack.c.bf16 %v2065_v24, %v2065_v24  ;;  %v1739_v29 = vmul.f32 %v3780_v61, %v1227_v25  ;;  %v1229_v31 = vpop.f32.mrb[5].mxu0  ;;  %v1485_v32 = vpop.f32.mrb[5].mxu1 }
 0x10b   : > { %v1803_v30 = vmul.f32 %v3780_v61, %v1483_v26  ;;  %v1230_v35 = vpop.f32.mrb[6].mxu0  ;;  %v1486_v36 = vpop.f32.mrb[6].mxu1  ;;  %v3524_v31 = vld [vmem:[%s3593_s29 + $0x1f4] ss:$8 sps:$4 sm:$0xff]  }
 0x10c   : > { %2642 = vst.msk [vmem:[%s3805_s24 + $0x4] sm:$0xf] %vm2640_vm3, %v3171_v27  ;;  %2706 = vst.msk [vmem:[%s3805_s24 + $0x104] sm:$0xf] %vm2640_vm3, %v3235_v28  ;;  %v1874_v39 = vadd.f32 %v3787_v63, %v1739_v29  ;;  %v1740_v41 = vmul.f32 %v3780_v61, %v1230_v35  ;;  %v1804_v42 = vmul.f32 %v3780_v61, %v1486_v36  ;;  %v1232_v43 = vpop.f32.mrb[7].mxu0  ;;  %v1488_v44 = vpop.f32.mrb[7].mxu1 }
 0x10d   : > { %v1938_v40 = vadd.f32 %v3787_v63, %v1803_v30  ;;  %v3522_v27 = vld [vmem:[%s3593_s29 + $0x1e0] ss:$8 sps:$4 sm:$0xff]   ;;  %v3526_v32 = vld [vmem:[%s3593_s29 + $0x3f4] ss:$8 sps:$4 sm:$0xff]  }
 0x10e   : > { %v2002_v45 = vmax.f32 %v1874_v39, 0.0  ;;  %v1875_v47 = vadd.f32 %v3787_v63, %v1740_v41  ;;  %v1939_v48 = vadd.f32 %v3787_v63, %v1804_v42  ;;  %1442 = vmatmul.mubr.bf16.gmra.mrb[112].mxu0 %v3510_v33  ;;  %1698 = vmatmul.mubr.bf16.gmra.mrb[112].mxu1 %v3511_v34  ;;  %v3523_v28 = vld [vmem:[%s3593_s29 + $0x3e0] ss:$8 sps:$4 sm:$0xff]  }
 0x10f   : > { %v2066_v46 = vmax.f32 %v1938_v40, 0.0  ;;  %3002 = vmatprep.mubr.msk.bf16.mxu0 %vm985_vm0, %v3512_v37  ;;  %3034 = vmatprep.mubr.msk.bf16.mxu1 %vm985_vm0, %v3514_v38 }
 0x110   : > { %v3172_v49 = vpack.c.bf16 %v2002_v45, %v2002_v45  ;;  %v2003_v51 = vmax.f32 %v1875_v47, 0.0  ;;  %v2067_v52 = vmax.f32 %v1939_v48, 0.0 }
 0x111   : > { %v3236_v50 = vpack.c.bf16 %v2066_v46, %v2066_v46  ;;  %v1235_v53 = vpop.f32.mrb[8].mxu0  ;;  %v1491_v54 = vpop.f32.mrb[8].mxu1 }
 0x112   : > { %2643 = vst.msk [vmem:[%s3805_s24 + $0x8] sm:$0xf] %vm2640_vm3, %v3172_v49  ;;  %v3173_v55 = vpack.c.bf16 %v2003_v51, %v2003_v51  ;;  %v3237_v56 = vpack.c.bf16 %v2067_v52, %v2067_v52  ;;  %v1741_v57 = vmul.f32 %v3780_v61, %v1235_v53  ;;  %v1805_v58 = vmul.f32 %v3780_v61, %v1491_v54  ;;  %v1237_v59 = vpop.f32.mrb[9].mxu0  ;;  %v1493_v60 = vpop.f32.mrb[9].mxu1 }
 0x113   : > { %2707 = vst.msk [vmem:[%s3805_s24 + $0x108] sm:$0xf] %vm2640_vm3, %v3236_v50  ;;  %v1238_v1 = vpop.f32.mrb[10].mxu0  ;;  %v1494_v2 = vpop.f32.mrb[10].mxu1 }
 0x114   : > { %2644 = vst.msk [vmem:[%s3805_s24 + $0xc] sm:$0xf] %vm2640_vm3, %v3173_v55  ;;  %2708 = vst.msk [vmem:[%s3805_s24 + $0x10c] sm:$0xf] %vm2640_vm3, %v3237_v56  ;;  %v1876_v5 = vadd.f32 %v3787_v63, %v1741_v57  ;;  %v1940_v6 = vadd.f32 %v3787_v63, %v1805_v58  ;;  %v1742_v7 = vmul.f32 %v3780_v61, %v1238_v1  ;;  %v1240_v9 = vpop.f32.mrb[11].mxu0  ;;  %v1496_v10 = vpop.f32.mrb[11].mxu1 }
 0x115   : > { %v1806_v8 = vmul.f32 %v3780_v61, %v1494_v2  ;;  %v3528_v55 = vld [vmem:[%s3593_s29 + $0x1f0] ss:$8 sps:$4 sm:$0xff]  }
 0x116   : > { %v2004_v11 = vmax.f32 %v1876_v5, 0.0  ;;  %v2068_v12 = vmax.f32 %v1940_v6, 0.0  ;;  %v1877_v13 = vadd.f32 %v3787_v63, %v1742_v7  ;;  %1450 = vmatmul.mubr.bf16.gmra.mrb[116].mxu0 %v3516_v62  ;;  %1706 = vmatmul.mubr.bf16.gmra.mrb[116].mxu1 %v3517_v0  ;;  %v3529_v56 = vld [vmem:[%s3593_s29 + $0x3f0] ss:$8 sps:$4 sm:$0xff]  }
 0x117   : > { %v1941_v14 = vadd.f32 %v3787_v63, %v1806_v8  ;;  %3003 = vmatprep.mubr.msk.bf16.mxu0 %vm985_vm0, %v3518_v3  ;;  %3035 = vmatprep.mubr.msk.bf16.mxu1 %vm985_vm0, %v3520_v4 }
 0x118   : > { %v3174_v15 = vpack.c.bf16 %v2004_v11, %v2004_v11  ;;  %v3238_v16 = vpack.c.bf16 %v2068_v12, %v2068_v12  ;;  %v2005_v17 = vmax.f32 %v1877_v13, 0.0 }
 0x119   : > { %v2069_v18 = vmax.f32 %v1941_v14, 0.0  ;;  %v1243_v19 = vpop.f32.mrb[12].mxu0  ;;  %v1499_v20 = vpop.f32.mrb[12].mxu1 }
 0x11a   : > { %2645 = vst.msk [vmem:[%s3805_s24 + $0x10] sm:$0xf] %vm2640_vm3, %v3174_v15  ;;  %2709 = vst.msk [vmem:[%s3805_s24 + $0x110] sm:$0xf] %vm2640_vm3, %v3238_v16  ;;  %v3175_v21 = vpack.c.bf16 %v2005_v17, %v2005_v17  ;;  %v1743_v23 = vmul.f32 %v3780_v61, %v1243_v19  ;;  %v1807_v24 = vmul.f32 %v3780_v61, %v1499_v20  ;;  %v1245_v25 = vpop.f32.mrb[13].mxu0  ;;  %v1501_v26 = vpop.f32.mrb[13].mxu1 }
 0x11b   : > { %v3239_v22 = vpack.c.bf16 %v2069_v18, %v2069_v18  ;;  %v1246_v29 = vpop.f32.mrb[14].mxu0  ;;  %v1502_v30 = vpop.f32.mrb[14].mxu1 }
 0x11c   : > { %2646 = vst.msk [vmem:[%s3805_s24 + $0x14] sm:$0xf] %vm2640_vm3, %v3175_v21  ;;  %v1878_v33 = vadd.f32 %v3787_v63, %v1743_v23  ;;  %v1942_v34 = vadd.f32 %v3787_v63, %v1807_v24  ;;  %v1744_v35 = vmul.f32 %v3780_v61, %v1246_v29  ;;  %v1808_v36 = vmul.f32 %v3780_v61, %v1502_v30  ;;  %v1248_v37 = vpop.f32.mrb[15].mxu0  ;;  %v1504_v38 = vpop.f32.mrb[15].mxu1 }
 0x11d   : > { %2710 = vst.msk [vmem:[%s3805_s24 + $0x114] sm:$0xf] %vm2640_vm3, %v3239_v22 }
 0x11e   : > { %v2006_v39 = vmax.f32 %v1878_v33, 0.0  ;;  %v2070_v40 = vmax.f32 %v1942_v34, 0.0  ;;  %v1879_v41 = vadd.f32 %v3787_v63, %v1744_v35  ;;  %v1943_v42 = vadd.f32 %v3787_v63, %v1808_v36  ;;  %1458 = vmatmul.mubr.bf16.gmra.mrb[120].mxu0 %v3522_v27  ;;  %1714 = vmatmul.mubr.bf16.gmra.mrb[120].mxu1 %v3523_v28 }
 0x11f   : > { %3004 = vmatprep.mubr.msk.bf16.mxu0 %vm985_vm0, %v3524_v31  ;;  %3036 = vmatprep.mubr.msk.bf16.mxu1 %vm985_vm0, %v3526_v32 }
 0x120   : > { %v3176_v43 = vpack.c.bf16 %v2006_v39, %v2006_v39  ;;  %v3240_v44 = vpack.c.bf16 %v2070_v40, %v2070_v40  ;;  %v2007_v45 = vmax.f32 %v1879_v41, 0.0  ;;  %v2071_v46 = vmax.f32 %v1943_v42, 0.0 }
 0x121   : > { %v1251_v47 = vpop.f32.mrb[16].mxu0  ;;  %v1507_v48 = vpop.f32.mrb[16].mxu1 }
 0x122   : > { %2647 = vst.msk [vmem:[%s3805_s24 + $0x18] sm:$0xf] %vm2640_vm3, %v3176_v43  ;;  %2711 = vst.msk [vmem:[%s3805_s24 + $0x118] sm:$0xf] %vm2640_vm3, %v3240_v44  ;;  %v3177_v49 = vpack.c.bf16 %v2007_v45, %v2007_v45  ;;  %v3241_v50 = vpack.c.bf16 %v2071_v46, %v2071_v46  ;;  %v1745_v51 = vmul.f32 %v3780_v61, %v1251_v47  ;;  %v1253_v53 = vpop.f32.mrb[17].mxu0  ;;  %v1509_v54 = vpop.f32.mrb[17].mxu1 }
 0x123   : > { %v1809_v52 = vmul.f32 %v3780_v61, %v1507_v48  ;;  %v1254_v57 = vpop.f32.mrb[18].mxu0  ;;  %v1510_v58 = vpop.f32.mrb[18].mxu1 }
 0x124   : > { %2648 = vst.msk [vmem:[%s3805_s24 + $0x1c] sm:$0xf] %vm2640_vm3, %v3177_v49  ;;  %2712 = vst.msk [vmem:[%s3805_s24 + $0x11c] sm:$0xf] %vm2640_vm3, %v3241_v50  ;;  %v1880_v59 = vadd.f32 %v3787_v63, %v1745_v51  ;;  %v1746_v62 = vmul.f32 %v3780_v61, %v1254_v57  ;;  %v1810_v0 = vmul.f32 %v3780_v61, %v1510_v58  ;;  %v1256_v1 = vpop.f32.mrb[19].mxu0  ;;  %v1512_v2 = vpop.f32.mrb[19].mxu1 }
 0x125   : > { %v1944_v60 = vadd.f32 %v3787_v63, %v1809_v52 }
 0x126   : > { %v2008_v3 = vmax.f32 %v1880_v59, 0.0  ;;  %v1881_v5 = vadd.f32 %v3787_v63, %v1746_v62  ;;  %v1945_v6 = vadd.f32 %v3787_v63, %v1810_v0  ;;  %1466 = vmatmul.mubr.bf16.gmra.mrb[124].mxu0 %v3528_v55  ;;  %1722 = vmatmul.mubr.bf16.gmra.mrb[124].mxu1 %v3529_v56 }
 0x127   : > { %v2072_v4 = vmax.f32 %v1944_v60, 0.0 }
 0x128   : > { %v3178_v7 = vpack.c.bf16 %v2008_v3, %v2008_v3  ;;  %v2009_v9 = vmax.f32 %v1881_v5, 0.0  ;;  %v2073_v10 = vmax.f32 %v1945_v6, 0.0 }
 0x129   : > { %v3242_v8 = vpack.c.bf16 %v2072_v4, %v2072_v4  ;;  %v1259_v11 = vpop.f32.mrb[20].mxu0  ;;  %v1515_v12 = vpop.f32.mrb[20].mxu1 }
 0x12a   : > { %2649 = vst.msk [vmem:[%s3805_s24 + $0x20] sm:$0xf] %vm2640_vm3, %v3178_v7  ;;  %v3179_v13 = vpack.c.bf16 %v2009_v9, %v2009_v9  ;;  %v3243_v14 = vpack.c.bf16 %v2073_v10, %v2073_v10  ;;  %v1747_v15 = vmul.f32 %v3780_v61, %v1259_v11  ;;  %v1811_v16 = vmul.f32 %v3780_v61, %v1515_v12  ;;  %v1261_v17 = vpop.f32.mrb[21].mxu0  ;;  %v1517_v18 = vpop.f32.mrb[21].mxu1 }
 0x12b   : > { %2713 = vst.msk [vmem:[%s3805_s24 + $0x120] sm:$0xf] %vm2640_vm3, %v3242_v8  ;;  %v1262_v19 = vpop.f32.mrb[22].mxu0  ;;  %v1518_v20 = vpop.f32.mrb[22].mxu1 }
 0x12c   : > { %2650 = vst.msk [vmem:[%s3805_s24 + $0x24] sm:$0xf] %vm2640_vm3, %v3179_v13  ;;  %2714 = vst.msk [vmem:[%s3805_s24 + $0x124] sm:$0xf] %vm2640_vm3, %v3243_v14  ;;  %v1882_v21 = vadd.f32 %v3787_v63, %v1747_v15  ;;  %v1946_v22 = vadd.f32 %v3787_v63, %v1811_v16  ;;  %v1748_v23 = vmul.f32 %v3780_v61, %v1262_v19  ;;  %v1264_v25 = vpop.f32.mrb[23].mxu0  ;;  %v1520_v26 = vpop.f32.mrb[23].mxu1 }
 0x12d   : > { %v1812_v24 = vmul.f32 %v3780_v61, %v1518_v20 }
 0x12e   : > { %v2010_v27 = vmax.f32 %v1882_v21, 0.0  ;;  %v2074_v28 = vmax.f32 %v1946_v22, 0.0  ;;  %v1883_v29 = vadd.f32 %v3787_v63, %v1748_v23 }
 0x12f   : > { %v1947_v30 = vadd.f32 %v3787_v63, %v1812_v24 }
 0x130   : > { %v3180_v31 = vpack.c.bf16 %v2010_v27, %v2010_v27  ;;  %v3244_v32 = vpack.c.bf16 %v2074_v28, %v2074_v28  ;;  %v2011_v33 = vmax.f32 %v1883_v29, 0.0 }
 0x131   : > { %v2075_v34 = vmax.f32 %v1947_v30, 0.0  ;;  %v1267_v35 = vpop.f32.mrb[24].mxu0  ;;  %v1523_v36 = vpop.f32.mrb[24].mxu1 }
 0x132   : > { %2651 = vst.msk [vmem:[%s3805_s24 + $0x28] sm:$0xf] %vm2640_vm3, %v3180_v31  ;;  %2715 = vst.msk [vmem:[%s3805_s24 + $0x128] sm:$0xf] %vm2640_vm3, %v3244_v32  ;;  %v3181_v37 = vpack.c.bf16 %v2011_v33, %v2011_v33  ;;  %v1749_v39 = vmul.f32 %v3780_v61, %v1267_v35  ;;  %v1813_v40 = vmul.f32 %v3780_v61, %v1523_v36  ;;  %v1269_v41 = vpop.f32.mrb[25].mxu0  ;;  %v1525_v42 = vpop.f32.mrb[25].mxu1 }
 0x133   : > { %v3245_v38 = vpack.c.bf16 %v2075_v34, %v2075_v34  ;;  %v1270_v43 = vpop.f32.mrb[26].mxu0  ;;  %v1526_v44 = vpop.f32.mrb[26].mxu1 }
 0x134   : > { %2652 = vst.msk [vmem:[%s3805_s24 + $0x2c] sm:$0xf] %vm2640_vm3, %v3181_v37  ;;  %v1884_v45 = vadd.f32 %v3787_v63, %v1749_v39  ;;  %v1948_v46 = vadd.f32 %v3787_v63, %v1813_v40  ;;  %v1750_v47 = vmul.f32 %v3780_v61, %v1270_v43  ;;  %v1814_v48 = vmul.f32 %v3780_v61, %v1526_v44  ;;  %v1272_v49 = vpop.f32.mrb[27].mxu0  ;;  %v1528_v50 = vpop.f32.mrb[27].mxu1 }
 0x135   : > { %2716 = vst.msk [vmem:[%s3805_s24 + $0x12c] sm:$0xf] %vm2640_vm3, %v3245_v38 }
 0x136   : > { %v2012_v51 = vmax.f32 %v1884_v45, 0.0  ;;  %v2076_v52 = vmax.f32 %v1948_v46, 0.0  ;;  %v1885_v53 = vadd.f32 %v3787_v63, %v1750_v47  ;;  %v1949_v54 = vadd.f32 %v3787_v63, %v1814_v48 }
 0x138   : > { %v3182_v55 = vpack.c.bf16 %v2012_v51, %v2012_v51  ;;  %v3246_v56 = vpack.c.bf16 %v2076_v52, %v2076_v52  ;;  %v2013_v57 = vmax.f32 %v1885_v53, 0.0  ;;  %v2077_v58 = vmax.f32 %v1949_v54, 0.0 }
 0x139   : > { %v1275_v59 = vpop.f32.mrb[28].mxu0  ;;  %v1531_v60 = vpop.f32.mrb[28].mxu1 }
 0x13a   : > { %2653 = vst.msk [vmem:[%s3805_s24 + $0x30] sm:$0xf] %vm2640_vm3, %v3182_v55  ;;  %2717 = vst.msk [vmem:[%s3805_s24 + $0x130] sm:$0xf] %vm2640_vm3, %v3246_v56  ;;  %v3183_v62 = vpack.c.bf16 %v2013_v57, %v2013_v57  ;;  %v3247_v0 = vpack.c.bf16 %v2077_v58, %v2077_v58  ;;  %v1751_v1 = vmul.f32 %v3780_v61, %v1275_v59  ;;  %v1277_v3 = vpop.f32.mrb[29].mxu0  ;;  %v1533_v4 = vpop.f32.mrb[29].mxu1 }
 0x13b   : > { %v1815_v2 = vmul.f32 %v3780_v61, %v1531_v60  ;;  %v1278_v5 = vpop.f32.mrb[30].mxu0  ;;  %v1534_v6 = vpop.f32.mrb[30].mxu1 }
 0x13c   : > { %2654 = vst.msk [vmem:[%s3805_s24 + $0x34] sm:$0xf] %vm2640_vm3, %v3183_v62  ;;  %2718 = vst.msk [vmem:[%s3805_s24 + $0x134] sm:$0xf] %vm2640_vm3, %v3247_v0  ;;  %v1886_v7 = vadd.f32 %v3787_v63, %v1751_v1  ;;  %v1752_v9 = vmul.f32 %v3780_v61, %v1278_v5  ;;  %v1816_v10 = vmul.f32 %v3780_v61, %v1534_v6  ;;  %v1280_v11 = vpop.f32.mrb[31].mxu0  ;;  %v1536_v12 = vpop.f32.mrb[31].mxu1 }
 0x13d   : > { %v1950_v8 = vadd.f32 %v3787_v63, %v1815_v2 }
 0x13e   : > { %v2014_v13 = vmax.f32 %v1886_v7, 0.0  ;;  %v1887_v15 = vadd.f32 %v3787_v63, %v1752_v9  ;;  %v1951_v16 = vadd.f32 %v3787_v63, %v1816_v10 }
 0x13f   : > { %v2078_v14 = vmax.f32 %v1950_v8, 0.0 }
 0x140   : > { %v3184_v17 = vpack.c.bf16 %v2014_v13, %v2014_v13  ;;  %v2015_v19 = vmax.f32 %v1887_v15, 0.0  ;;  %v2079_v20 = vmax.f32 %v1951_v16, 0.0 }
 0x141   : > { %v3248_v18 = vpack.c.bf16 %v2078_v14, %v2078_v14  ;;  %v1283_v21 = vpop.f32.mrb[32].mxu0  ;;  %v1539_v22 = vpop.f32.mrb[32].mxu1 }
 0x142   : > { %2655 = vst.msk [vmem:[%s3805_s24 + $0x38] sm:$0xf] %vm2640_vm3, %v3184_v17  ;;  %v3185_v23 = vpack.c.bf16 %v2015_v19, %v2015_v19  ;;  %v3249_v24 = vpack.c.bf16 %v2079_v20, %v2079_v20  ;;  %v1753_v25 = vmul.f32 %v3780_v61, %v1283_v21  ;;  %v1817_v26 = vmul.f32 %v3780_v61, %v1539_v22  ;;  %v1285_v27 = vpop.f32.mrb[33].mxu0  ;;  %v1541_v28 = vpop.f32.mrb[33].mxu1 }
 0x143   : > { %2719 = vst.msk [vmem:[%s3805_s24 + $0x138] sm:$0xf] %vm2640_vm3, %v3248_v18  ;;  %v1286_v29 = vpop.f32.mrb[34].mxu0  ;;  %v1542_v30 = vpop.f32.mrb[34].mxu1 }
 0x144   : > { %2656 = vst.msk [vmem:[%s3805_s24 + $0x3c] sm:$0xf] %vm2640_vm3, %v3185_v23  ;;  %2720 = vst.msk [vmem:[%s3805_s24 + $0x13c] sm:$0xf] %vm2640_vm3, %v3249_v24  ;;  %v1888_v31 = vadd.f32 %v3787_v63, %v1753_v25  ;;  %v1952_v32 = vadd.f32 %v3787_v63, %v1817_v26  ;;  %v1754_v33 = vmul.f32 %v3780_v61, %v1286_v29  ;;  %v1288_v35 = vpop.f32.mrb[35].mxu0  ;;  %v1544_v36 = vpop.f32.mrb[35].mxu1 }
 0x145   : > { %v1818_v34 = vmul.f32 %v3780_v61, %v1542_v30 }
 0x146   : > { %v2016_v37 = vmax.f32 %v1888_v31, 0.0  ;;  %v2080_v38 = vmax.f32 %v1952_v32, 0.0  ;;  %v1889_v39 = vadd.f32 %v3787_v63, %v1754_v33 }
 0x147   : > { %v1953_v40 = vadd.f32 %v3787_v63, %v1818_v34 }
 0x148   : > { %v3186_v41 = vpack.c.bf16 %v2016_v37, %v2016_v37  ;;  %v3250_v42 = vpack.c.bf16 %v2080_v38, %v2080_v38  ;;  %v2017_v43 = vmax.f32 %v1889_v39, 0.0 }
 0x149   : > { %v2081_v44 = vmax.f32 %v1953_v40, 0.0  ;;  %v1291_v45 = vpop.f32.mrb[36].mxu0  ;;  %v1547_v46 = vpop.f32.mrb[36].mxu1 }
 0x14a   : > { %2657 = vst.msk [vmem:[%s3805_s24 + $0x40] sm:$0xf] %vm2640_vm3, %v3186_v41  ;;  %2721 = vst.msk [vmem:[%s3805_s24 + $0x140] sm:$0xf] %vm2640_vm3, %v3250_v42  ;;  %v3187_v47 = vpack.c.bf16 %v2017_v43, %v2017_v43  ;;  %v1755_v49 = vmul.f32 %v3780_v61, %v1291_v45  ;;  %v1819_v50 = vmul.f32 %v3780_v61, %v1547_v46  ;;  %v1293_v51 = vpop.f32.mrb[37].mxu0  ;;  %v1549_v52 = vpop.f32.mrb[37].mxu1 }
 0x14b   : > { %v3251_v48 = vpack.c.bf16 %v2081_v44, %v2081_v44  ;;  %v1294_v53 = vpop.f32.mrb[38].mxu0  ;;  %v1550_v54 = vpop.f32.mrb[38].mxu1 }
 0x14c   : > { %2658 = vst.msk [vmem:[%s3805_s24 + $0x44] sm:$0xf] %vm2640_vm3, %v3187_v47  ;;  %v1890_v55 = vadd.f32 %v3787_v63, %v1755_v49  ;;  %v1954_v56 = vadd.f32 %v3787_v63, %v1819_v50  ;;  %v1756_v57 = vmul.f32 %v3780_v61, %v1294_v53  ;;  %v1820_v58 = vmul.f32 %v3780_v61, %v1550_v54  ;;  %v1296_v59 = vpop.f32.mrb[39].mxu0  ;;  %v1552_v60 = vpop.f32.mrb[39].mxu1 }
 0x14d   : > { %2722 = vst.msk [vmem:[%s3805_s24 + $0x144] sm:$0xf] %vm2640_vm3, %v3251_v48 }
 0x14e   : > { %v2018_v62 = vmax.f32 %v1890_v55, 0.0  ;;  %v2082_v0 = vmax.f32 %v1954_v56, 0.0  ;;  %v1891_v1 = vadd.f32 %v3787_v63, %v1756_v57  ;;  %v1955_v2 = vadd.f32 %v3787_v63, %v1820_v58 }
 0x150   : > { %v3188_v3 = vpack.c.bf16 %v2018_v62, %v2018_v62  ;;  %v3252_v4 = vpack.c.bf16 %v2082_v0, %v2082_v0  ;;  %v2019_v5 = vmax.f32 %v1891_v1, 0.0  ;;  %v2083_v6 = vmax.f32 %v1955_v2, 0.0 }
 0x151   : > { %v1299_v7 = vpop.f32.mrb[40].mxu0  ;;  %v1555_v8 = vpop.f32.mrb[40].mxu1 }
 0x152   : > { %2659 = vst.msk [vmem:[%s3805_s24 + $0x48] sm:$0xf] %vm2640_vm3, %v3188_v3  ;;  %2723 = vst.msk [vmem:[%s3805_s24 + $0x148] sm:$0xf] %vm2640_vm3, %v3252_v4  ;;  %v3189_v9 = vpack.c.bf16 %v2019_v5, %v2019_v5  ;;  %v3253_v10 = vpack.c.bf16 %v2083_v6, %v2083_v6  ;;  %v1757_v11 = vmul.f32 %v3780_v61, %v1299_v7  ;;  %v1301_v13 = vpop.f32.mrb[41].mxu0  ;;  %v1557_v14 = vpop.f32.mrb[41].mxu1 }
 0x153   : > { %v1821_v12 = vmul.f32 %v3780_v61, %v1555_v8  ;;  %v1302_v15 = vpop.f32.mrb[42].mxu0  ;;  %v1558_v16 = vpop.f32.mrb[42].mxu1 }
 0x154   : > { %2660 = vst.msk [vmem:[%s3805_s24 + $0x4c] sm:$0xf] %vm2640_vm3, %v3189_v9  ;;  %2724 = vst.msk [vmem:[%s3805_s24 + $0x14c] sm:$0xf] %vm2640_vm3, %v3253_v10  ;;  %v1892_v17 = vadd.f32 %v3787_v63, %v1757_v11  ;;  %v1758_v19 = vmul.f32 %v3780_v61, %v1302_v15  ;;  %v1822_v20 = vmul.f32 %v3780_v61, %v1558_v16  ;;  %v1304_v21 = vpop.f32.mrb[43].mxu0  ;;  %v1560_v22 = vpop.f32.mrb[43].mxu1 }
 0x155   : > { %v1956_v18 = vadd.f32 %v3787_v63, %v1821_v12 }
 0x156   : > { %v2020_v23 = vmax.f32 %v1892_v17, 0.0  ;;  %v1893_v25 = vadd.f32 %v3787_v63, %v1758_v19  ;;  %v1957_v26 = vadd.f32 %v3787_v63, %v1822_v20 }
 0x157   : > { %v2084_v24 = vmax.f32 %v1956_v18, 0.0 }
 0x158   : > { %v3190_v27 = vpack.c.bf16 %v2020_v23, %v2020_v23  ;;  %v2021_v29 = vmax.f32 %v1893_v25, 0.0  ;;  %v2085_v30 = vmax.f32 %v1957_v26, 0.0 }
 0x159   : > { %v3254_v28 = vpack.c.bf16 %v2084_v24, %v2084_v24  ;;  %v1307_v31 = vpop.f32.mrb[44].mxu0  ;;  %v1563_v32 = vpop.f32.mrb[44].mxu1 }
 0x15a   : > { %2661 = vst.msk [vmem:[%s3805_s24 + $0x50] sm:$0xf] %vm2640_vm3, %v3190_v27  ;;  %v3191_v33 = vpack.c.bf16 %v2021_v29, %v2021_v29  ;;  %v3255_v34 = vpack.c.bf16 %v2085_v30, %v2085_v30  ;;  %v1759_v35 = vmul.f32 %v3780_v61, %v1307_v31  ;;  %v1823_v36 = vmul.f32 %v3780_v61, %v1563_v32  ;;  %v1309_v37 = vpop.f32.mrb[45].mxu0  ;;  %v1565_v38 = vpop.f32.mrb[45].mxu1 }
 0x15b   : > { %2725 = vst.msk [vmem:[%s3805_s24 + $0x150] sm:$0xf] %vm2640_vm3, %v3254_v28  ;;  %v1310_v39 = vpop.f32.mrb[46].mxu0  ;;  %v1566_v40 = vpop.f32.mrb[46].mxu1 }
 0x15c   : > { %2662 = vst.msk [vmem:[%s3805_s24 + $0x54] sm:$0xf] %vm2640_vm3, %v3191_v33  ;;  %2726 = vst.msk [vmem:[%s3805_s24 + $0x154] sm:$0xf] %vm2640_vm3, %v3255_v34  ;;  %v1894_v41 = vadd.f32 %v3787_v63, %v1759_v35  ;;  %v1958_v42 = vadd.f32 %v3787_v63, %v1823_v36  ;;  %v1760_v43 = vmul.f32 %v3780_v61, %v1310_v39  ;;  %v1312_v45 = vpop.f32.mrb[47].mxu0  ;;  %v1568_v46 = vpop.f32.mrb[47].mxu1 }
 0x15d   : > { %v1824_v44 = vmul.f32 %v3780_v61, %v1566_v40 }
 0x15e   : > { %v2022_v47 = vmax.f32 %v1894_v41, 0.0  ;;  %v2086_v48 = vmax.f32 %v1958_v42, 0.0  ;;  %v1895_v49 = vadd.f32 %v3787_v63, %v1760_v43 }
 0x15f   : > { %v1959_v50 = vadd.f32 %v3787_v63, %v1824_v44 }
 0x160   : > { %v3192_v51 = vpack.c.bf16 %v2022_v47, %v2022_v47  ;;  %v3256_v52 = vpack.c.bf16 %v2086_v48, %v2086_v48  ;;  %v2023_v53 = vmax.f32 %v1895_v49, 0.0 }
 0x161   : > { %v2087_v54 = vmax.f32 %v1959_v50, 0.0  ;;  %v1315_v55 = vpop.f32.mrb[48].mxu0  ;;  %v1571_v56 = vpop.f32.mrb[48].mxu1 }
 0x162   : > { %2663 = vst.msk [vmem:[%s3805_s24 + $0x58] sm:$0xf] %vm2640_vm3, %v3192_v51  ;;  %2727 = vst.msk [vmem:[%s3805_s24 + $0x158] sm:$0xf] %vm2640_vm3, %v3256_v52  ;;  %v3193_v57 = vpack.c.bf16 %v2023_v53, %v2023_v53  ;;  %v1761_v59 = vmul.f32 %v3780_v61, %v1315_v55  ;;  %v1825_v60 = vmul.f32 %v3780_v61, %v1571_v56  ;;  %v1317_v62 = vpop.f32.mrb[49].mxu0  ;;  %v1573_v0 = vpop.f32.mrb[49].mxu1 }
 0x163   : > { %v3257_v58 = vpack.c.bf16 %v2087_v54, %v2087_v54  ;;  %v1318_v1 = vpop.f32.mrb[50].mxu0  ;;  %v1574_v2 = vpop.f32.mrb[50].mxu1 }
 0x164   : > { %2664 = vst.msk [vmem:[%s3805_s24 + $0x5c] sm:$0xf] %vm2640_vm3, %v3193_v57  ;;  %v1896_v3 = vadd.f32 %v3787_v63, %v1761_v59  ;;  %v1960_v4 = vadd.f32 %v3787_v63, %v1825_v60  ;;  %v1762_v5 = vmul.f32 %v3780_v61, %v1318_v1  ;;  %v1826_v6 = vmul.f32 %v3780_v61, %v1574_v2  ;;  %v1320_v7 = vpop.f32.mrb[51].mxu0  ;;  %v1576_v8 = vpop.f32.mrb[51].mxu1 }
 0x165   : > { %2728 = vst.msk [vmem:[%s3805_s24 + $0x15c] sm:$0xf] %vm2640_vm3, %v3257_v58 }
 0x166   : > { %v2024_v9 = vmax.f32 %v1896_v3, 0.0  ;;  %v2088_v10 = vmax.f32 %v1960_v4, 0.0  ;;  %v1897_v11 = vadd.f32 %v3787_v63, %v1762_v5  ;;  %v1961_v12 = vadd.f32 %v3787_v63, %v1826_v6 }
 0x168   : > { %v3194_v13 = vpack.c.bf16 %v2024_v9, %v2024_v9  ;;  %v3258_v14 = vpack.c.bf16 %v2088_v10, %v2088_v10  ;;  %v2025_v15 = vmax.f32 %v1897_v11, 0.0  ;;  %v2089_v16 = vmax.f32 %v1961_v12, 0.0 }
 0x169   : > { %v1323_v17 = vpop.f32.mrb[52].mxu0  ;;  %v1579_v18 = vpop.f32.mrb[52].mxu1 }
 0x16a   : > { %2665 = vst.msk [vmem:[%s3805_s24 + $0x60] sm:$0xf] %vm2640_vm3, %v3194_v13  ;;  %2729 = vst.msk [vmem:[%s3805_s24 + $0x160] sm:$0xf] %vm2640_vm3, %v3258_v14  ;;  %v3195_v19 = vpack.c.bf16 %v2025_v15, %v2025_v15  ;;  %v3259_v20 = vpack.c.bf16 %v2089_v16, %v2089_v16  ;;  %v1763_v21 = vmul.f32 %v3780_v61, %v1323_v17  ;;  %v1325_v23 = vpop.f32.mrb[53].mxu0  ;;  %v1581_v24 = vpop.f32.mrb[53].mxu1 }
 0x16b   : > { %v1827_v22 = vmul.f32 %v3780_v61, %v1579_v18  ;;  %v1326_v25 = vpop.f32.mrb[54].mxu0  ;;  %v1582_v26 = vpop.f32.mrb[54].mxu1 }
 0x16c   : > { %2666 = vst.msk [vmem:[%s3805_s24 + $0x64] sm:$0xf] %vm2640_vm3, %v3195_v19  ;;  %2730 = vst.msk [vmem:[%s3805_s24 + $0x164] sm:$0xf] %vm2640_vm3, %v3259_v20  ;;  %v1898_v27 = vadd.f32 %v3787_v63, %v1763_v21  ;;  %v1764_v29 = vmul.f32 %v3780_v61, %v1326_v25  ;;  %v1828_v30 = vmul.f32 %v3780_v61, %v1582_v26  ;;  %v1328_v31 = vpop.f32.mrb[55].mxu0  ;;  %v1584_v32 = vpop.f32.mrb[55].mxu1 }
 0x16d   : > { %v1962_v28 = vadd.f32 %v3787_v63, %v1827_v22 }
 0x16e   : > { %v2026_v33 = vmax.f32 %v1898_v27, 0.0  ;;  %v1899_v35 = vadd.f32 %v3787_v63, %v1764_v29  ;;  %v1963_v36 = vadd.f32 %v3787_v63, %v1828_v30 }
 0x16f   : > { %v2090_v34 = vmax.f32 %v1962_v28, 0.0 }
 0x170   : > { %v3196_v37 = vpack.c.bf16 %v2026_v33, %v2026_v33  ;;  %v2027_v39 = vmax.f32 %v1899_v35, 0.0  ;;  %v2091_v40 = vmax.f32 %v1963_v36, 0.0 }
 0x171   : > { %v3260_v38 = vpack.c.bf16 %v2090_v34, %v2090_v34  ;;  %v1331_v41 = vpop.f32.mrb[56].mxu0  ;;  %v1587_v42 = vpop.f32.mrb[56].mxu1 }
 0x172   : > { %2667 = vst.msk [vmem:[%s3805_s24 + $0x68] sm:$0xf] %vm2640_vm3, %v3196_v37  ;;  %v3197_v43 = vpack.c.bf16 %v2027_v39, %v2027_v39  ;;  %v3261_v44 = vpack.c.bf16 %v2091_v40, %v2091_v40  ;;  %v1765_v45 = vmul.f32 %v3780_v61, %v1331_v41  ;;  %v1829_v46 = vmul.f32 %v3780_v61, %v1587_v42  ;;  %v1333_v47 = vpop.f32.mrb[57].mxu0  ;;  %v1589_v48 = vpop.f32.mrb[57].mxu1 }
 0x173   : > { %2731 = vst.msk [vmem:[%s3805_s24 + $0x168] sm:$0xf] %vm2640_vm3, %v3260_v38  ;;  %v1334_v49 = vpop.f32.mrb[58].mxu0  ;;  %v1590_v50 = vpop.f32.mrb[58].mxu1 }
 0x174   : > { %2668 = vst.msk [vmem:[%s3805_s24 + $0x6c] sm:$0xf] %vm2640_vm3, %v3197_v43  ;;  %2732 = vst.msk [vmem:[%s3805_s24 + $0x16c] sm:$0xf] %vm2640_vm3, %v3261_v44  ;;  %v1900_v51 = vadd.f32 %v3787_v63, %v1765_v45  ;;  %v1964_v52 = vadd.f32 %v3787_v63, %v1829_v46  ;;  %v1766_v53 = vmul.f32 %v3780_v61, %v1334_v49  ;;  %v1336_v55 = vpop.f32.mrb[59].mxu0  ;;  %v1592_v56 = vpop.f32.mrb[59].mxu1 }
 0x175   : > { %v1830_v54 = vmul.f32 %v3780_v61, %v1590_v50 }
 0x176   : > { %v2028_v57 = vmax.f32 %v1900_v51, 0.0  ;;  %v2092_v58 = vmax.f32 %v1964_v52, 0.0  ;;  %v1901_v59 = vadd.f32 %v3787_v63, %v1766_v53 }
 0x177   : > { %v1965_v60 = vadd.f32 %v3787_v63, %v1830_v54  ;;  %v4092_v54 = vld [vmem:[%s4348_s2] ss:$0 sm:$0xff] }
 0x178   : > { %v3198_v62 = vpack.c.bf16 %v2028_v57, %v2028_v57  ;;  %v3262_v0 = vpack.c.bf16 %v2092_v58, %v2092_v58  ;;  %v2029_v1 = vmax.f32 %v1901_v59, 0.0 }
 0x179   : > { %v2093_v2 = vmax.f32 %v1965_v60, 0.0  ;;  %v1339_v3 = vpop.f32.mrb[60].mxu0  ;;  %v1595_v4 = vpop.f32.mrb[60].mxu1  ;;  %v4103_v60 = vld [vmem:[%s4349_s3] ss:$0 sm:$0xff] }
 0x17a   : > { %2669 = vst.msk [vmem:[%s3805_s24 + $0x70] sm:$0xf] %vm2640_vm3, %v3198_v62  ;;  %2733 = vst.msk [vmem:[%s3805_s24 + $0x170] sm:$0xf] %vm2640_vm3, %v3262_v0  ;;  %v3199_v5 = vpack.c.bf16 %v2029_v1, %v2029_v1  ;;  %v1767_v7 = vmul.f32 %v3780_v61, %v1339_v3  ;;  %v1831_v8 = vmul.f32 %v3780_v61, %v1595_v4  ;;  %v1341_v9 = vpop.f32.mrb[61].mxu0  ;;  %v1597_v10 = vpop.f32.mrb[61].mxu1 }
 0x17b   : > { %v3263_v6 = vpack.c.bf16 %v2093_v2, %v2093_v2  ;;  %v1342_v11 = vpop.f32.mrb[62].mxu0  ;;  %v1598_v12 = vpop.f32.mrb[62].mxu1 }
 0x17c   : > { %2670 = vst.msk [vmem:[%s3805_s24 + $0x74] sm:$0xf] %vm2640_vm3, %v3199_v5  ;;  %v1902_v13 = vadd.f32 %v3787_v63, %v1767_v7  ;;  %v1966_v14 = vadd.f32 %v3787_v63, %v1831_v8  ;;  %v1768_v15 = vmul.f32 %v3780_v61, %v1342_v11  ;;  %v1832_v16 = vmul.f32 %v3780_v61, %v1598_v12  ;;  %v1344_v17 = vpop.f32.mrb[63].mxu0  ;;  %v1600_v18 = vpop.f32.mrb[63].mxu1 }
 0x17d   : > { %2734 = vst.msk [vmem:[%s3805_s24 + $0x174] sm:$0xf] %vm2640_vm3, %v3263_v6 }
 0x17e   : > { %v2030_v19 = vmax.f32 %v1902_v13, 0.0  ;;  %v2094_v20 = vmax.f32 %v1966_v14, 0.0  ;;  %v1903_v21 = vadd.f32 %v3787_v63, %v1768_v15  ;;  %v1967_v22 = vadd.f32 %v3787_v63, %v1832_v16 }
 0x180   : > { %v3200_v23 = vpack.c.bf16 %v2030_v19, %v2030_v19  ;;  %v3264_v24 = vpack.c.bf16 %v2094_v20, %v2094_v20  ;;  %v2031_v25 = vmax.f32 %v1903_v21, 0.0  ;;  %v2095_v26 = vmax.f32 %v1967_v22, 0.0 }
 0x181   : > { %v1347_v27 = vpop.f32.mrb[64].mxu0  ;;  %v1603_v28 = vpop.f32.mrb[64].mxu1 }
 0x182   : > { %2671 = vst.msk [vmem:[%s3805_s24 + $0x78] sm:$0xf] %vm2640_vm3, %v3200_v23  ;;  %2735 = vst.msk [vmem:[%s3805_s24 + $0x178] sm:$0xf] %vm2640_vm3, %v3264_v24  ;;  %v3201_v29 = vpack.c.bf16 %v2031_v25, %v2031_v25  ;;  %v3265_v30 = vpack.c.bf16 %v2095_v26, %v2095_v26  ;;  %v1769_v31 = vmul.f32 %v3780_v61, %v1347_v27  ;;  %v1349_v33 = vpop.f32.mrb[65].mxu0  ;;  %v1605_v34 = vpop.f32.mrb[65].mxu1 }
 0x183   : > { %v1833_v32 = vmul.f32 %v3780_v61, %v1603_v28  ;;  %v1350_v35 = vpop.f32.mrb[66].mxu0  ;;  %v1606_v36 = vpop.f32.mrb[66].mxu1 }
 0x184   : > { %2672 = vst.msk [vmem:[%s3805_s24 + $0x7c] sm:$0xf] %vm2640_vm3, %v3201_v29  ;;  %2736 = vst.msk [vmem:[%s3805_s24 + $0x17c] sm:$0xf] %vm2640_vm3, %v3265_v30  ;;  %v1904_v37 = vadd.f32 %v3787_v63, %v1769_v31  ;;  %v1770_v39 = vmul.f32 %v3780_v61, %v1350_v35  ;;  %v1834_v40 = vmul.f32 %v3780_v61, %v1606_v36  ;;  %v1352_v41 = vpop.f32.mrb[67].mxu0  ;;  %v1608_v42 = vpop.f32.mrb[67].mxu1 }
 0x185   : > { %v1968_v38 = vadd.f32 %v3787_v63, %v1833_v32 }
 0x186   : > { %v2032_v43 = vmax.f32 %v1904_v37, 0.0  ;;  %v1905_v45 = vadd.f32 %v3787_v63, %v1770_v39  ;;  %v1969_v46 = vadd.f32 %v3787_v63, %v1834_v40 }
 0x187   : > { %v2096_v44 = vmax.f32 %v1968_v38, 0.0 }
 0x188   : > { %v3202_v47 = vpack.c.bf16 %v2032_v43, %v2032_v43  ;;  %v2033_v49 = vmax.f32 %v1905_v45, 0.0  ;;  %v2097_v50 = vmax.f32 %v1969_v46, 0.0 }
 0x189   : > { %v3266_v48 = vpack.c.bf16 %v2096_v44, %v2096_v44  ;;  %v1355_v51 = vpop.f32.mrb[68].mxu0  ;;  %v1611_v52 = vpop.f32.mrb[68].mxu1 }
 0x18a   : > { %2673 = vst.msk [vmem:[%s3805_s24 + $0x80] sm:$0xf] %vm2640_vm3, %v3202_v47  ;;  %v3203_v61 = vpack.c.bf16 %v2033_v49, %v2033_v49  ;;  %v3267_v53 = vpack.c.bf16 %v2097_v50, %v2097_v50  ;;  %v1771_v63 = vmul.f32 %v4092_v54, %v1355_v51  ;;  %v1835_v55 = vmul.f32 %v4092_v54, %v1611_v52  ;;  %v1357_v56 = vpop.f32.mrb[69].mxu0  ;;  %v1613_v57 = vpop.f32.mrb[69].mxu1 }
 0x18b   : > { %2737 = vst.msk [vmem:[%s3805_s24 + $0x180] sm:$0xf] %vm2640_vm3, %v3266_v48  ;;  %v1358_v58 = vpop.f32.mrb[70].mxu0  ;;  %v1614_v59 = vpop.f32.mrb[70].mxu1 }
 0x18c   : > { %2674 = vst.msk [vmem:[%s3805_s24 + $0x84] sm:$0xf] %vm2640_vm3, %v3203_v61  ;;  %2738 = vst.msk [vmem:[%s3805_s24 + $0x184] sm:$0xf] %vm2640_vm3, %v3267_v53  ;;  %v1906_v62 = vadd.f32 %v4103_v60, %v1771_v63  ;;  %v1970_v0 = vadd.f32 %v4103_v60, %v1835_v55  ;;  %v1772_v1 = vmul.f32 %v4092_v54, %v1358_v58  ;;  %v1360_v3 = vpop.f32.mrb[71].mxu0  ;;  %v1616_v4 = vpop.f32.mrb[71].mxu1 }
 0x18d   : > { %v1836_v2 = vmul.f32 %v4092_v54, %v1614_v59 }
 0x18e   : > { %v2034_v5 = vmax.f32 %v1906_v62, 0.0  ;;  %v2098_v6 = vmax.f32 %v1970_v0, 0.0  ;;  %v1907_v7 = vadd.f32 %v4103_v60, %v1772_v1 }
 0x18f   : > { %v1971_v8 = vadd.f32 %v4103_v60, %v1836_v2 }
 0x190   : > { %v3204_v9 = vpack.c.bf16 %v2034_v5, %v2034_v5  ;;  %v3268_v10 = vpack.c.bf16 %v2098_v6, %v2098_v6  ;;  %v2035_v11 = vmax.f32 %v1907_v7, 0.0 }
 0x191   : > { %v2099_v12 = vmax.f32 %v1971_v8, 0.0  ;;  %v1363_v13 = vpop.f32.mrb[72].mxu0  ;;  %v1619_v14 = vpop.f32.mrb[72].mxu1 }
 0x192   : > { %2675 = vst.msk [vmem:[%s3805_s24 + $0x88] sm:$0xf] %vm2640_vm3, %v3204_v9  ;;  %2739 = vst.msk [vmem:[%s3805_s24 + $0x188] sm:$0xf] %vm2640_vm3, %v3268_v10  ;;  %v3205_v15 = vpack.c.bf16 %v2035_v11, %v2035_v11  ;;  %v1773_v17 = vmul.f32 %v4092_v54, %v1363_v13  ;;  %v1837_v18 = vmul.f32 %v4092_v54, %v1619_v14  ;;  %v1365_v19 = vpop.f32.mrb[73].mxu0  ;;  %v1621_v20 = vpop.f32.mrb[73].mxu1 }
 0x193   : > { %v3269_v16 = vpack.c.bf16 %v2099_v12, %v2099_v12  ;;  %v1366_v21 = vpop.f32.mrb[74].mxu0  ;;  %v1622_v22 = vpop.f32.mrb[74].mxu1 }
 0x194   : > { %2676 = vst.msk [vmem:[%s3805_s24 + $0x8c] sm:$0xf] %vm2640_vm3, %v3205_v15  ;;  %v1908_v23 = vadd.f32 %v4103_v60, %v1773_v17  ;;  %v1972_v24 = vadd.f32 %v4103_v60, %v1837_v18  ;;  %v1774_v25 = vmul.f32 %v4092_v54, %v1366_v21  ;;  %v1838_v26 = vmul.f32 %v4092_v54, %v1622_v22  ;;  %v1368_v27 = vpop.f32.mrb[75].mxu0  ;;  %v1624_v28 = vpop.f32.mrb[75].mxu1 }
 0x195   : > { %2740 = vst.msk [vmem:[%s3805_s24 + $0x18c] sm:$0xf] %vm2640_vm3, %v3269_v16 }
 0x196   : > { %v2036_v29 = vmax.f32 %v1908_v23, 0.0  ;;  %v2100_v30 = vmax.f32 %v1972_v24, 0.0  ;;  %v1909_v31 = vadd.f32 %v4103_v60, %v1774_v25  ;;  %v1973_v32 = vadd.f32 %v4103_v60, %v1838_v26 }
 0x198   : > { %v3206_v33 = vpack.c.bf16 %v2036_v29, %v2036_v29  ;;  %v3270_v34 = vpack.c.bf16 %v2100_v30, %v2100_v30  ;;  %v2037_v35 = vmax.f32 %v1909_v31, 0.0  ;;  %v2101_v36 = vmax.f32 %v1973_v32, 0.0 }
 0x199   : > { %v1371_v37 = vpop.f32.mrb[76].mxu0  ;;  %v1627_v38 = vpop.f32.mrb[76].mxu1 }
 0x19a   : > { %2677 = vst.msk [vmem:[%s3805_s24 + $0x90] sm:$0xf] %vm2640_vm3, %v3206_v33  ;;  %2741 = vst.msk [vmem:[%s3805_s24 + $0x190] sm:$0xf] %vm2640_vm3, %v3270_v34  ;;  %v3207_v39 = vpack.c.bf16 %v2037_v35, %v2037_v35  ;;  %v3271_v40 = vpack.c.bf16 %v2101_v36, %v2101_v36  ;;  %v1775_v41 = vmul.f32 %v4092_v54, %v1371_v37  ;;  %v1373_v43 = vpop.f32.mrb[77].mxu0  ;;  %v1629_v44 = vpop.f32.mrb[77].mxu1 }
 0x19b   : > { %v1839_v42 = vmul.f32 %v4092_v54, %v1627_v38  ;;  %v1374_v45 = vpop.f32.mrb[78].mxu0  ;;  %v1630_v46 = vpop.f32.mrb[78].mxu1 }
 0x19c   : > { %2678 = vst.msk [vmem:[%s3805_s24 + $0x94] sm:$0xf] %vm2640_vm3, %v3207_v39  ;;  %2742 = vst.msk [vmem:[%s3805_s24 + $0x194] sm:$0xf] %vm2640_vm3, %v3271_v40  ;;  %v1910_v47 = vadd.f32 %v4103_v60, %v1775_v41  ;;  %v1776_v49 = vmul.f32 %v4092_v54, %v1374_v45  ;;  %v1840_v50 = vmul.f32 %v4092_v54, %v1630_v46  ;;  %v1376_v51 = vpop.f32.mrb[79].mxu0  ;;  %v1632_v52 = vpop.f32.mrb[79].mxu1 }
 0x19d   : > { %v1974_v48 = vadd.f32 %v4103_v60, %v1839_v42 }
 0x19e   : > { %v2038_v61 = vmax.f32 %v1910_v47, 0.0  ;;  %v1911_v63 = vadd.f32 %v4103_v60, %v1776_v49  ;;  %v1975_v55 = vadd.f32 %v4103_v60, %v1840_v50 }
 0x19f   : > { %v2102_v53 = vmax.f32 %v1974_v48, 0.0 }
 0x1a0   : > { %v3208_v56 = vpack.c.bf16 %v2038_v61, %v2038_v61  ;;  %v2039_v58 = vmax.f32 %v1911_v63, 0.0  ;;  %v2103_v59 = vmax.f32 %v1975_v55, 0.0 }
 0x1a1   : > { %v3272_v57 = vpack.c.bf16 %v2102_v53, %v2102_v53  ;;  %v1379_v62 = vpop.f32.mrb[80].mxu0  ;;  %v1635_v0 = vpop.f32.mrb[80].mxu1 }
 0x1a2   : > { %2679 = vst.msk [vmem:[%s3805_s24 + $0x98] sm:$0xf] %vm2640_vm3, %v3208_v56  ;;  %v3209_v1 = vpack.c.bf16 %v2039_v58, %v2039_v58  ;;  %v3273_v2 = vpack.c.bf16 %v2103_v59, %v2103_v59  ;;  %v1777_v3 = vmul.f32 %v4092_v54, %v1379_v62  ;;  %v1841_v4 = vmul.f32 %v4092_v54, %v1635_v0  ;;  %v1381_v5 = vpop.f32.mrb[81].mxu0  ;;  %v1637_v6 = vpop.f32.mrb[81].mxu1 }
 0x1a3   : > { %2743 = vst.msk [vmem:[%s3805_s24 + $0x198] sm:$0xf] %vm2640_vm3, %v3272_v57  ;;  %v1382_v7 = vpop.f32.mrb[82].mxu0  ;;  %v1638_v8 = vpop.f32.mrb[82].mxu1 }
 0x1a4   : > { %2680 = vst.msk [vmem:[%s3805_s24 + $0x9c] sm:$0xf] %vm2640_vm3, %v3209_v1  ;;  %2744 = vst.msk [vmem:[%s3805_s24 + $0x19c] sm:$0xf] %vm2640_vm3, %v3273_v2  ;;  %v1912_v9 = vadd.f32 %v4103_v60, %v1777_v3  ;;  %v1976_v10 = vadd.f32 %v4103_v60, %v1841_v4  ;;  %v1778_v11 = vmul.f32 %v4092_v54, %v1382_v7  ;;  %v1384_v13 = vpop.f32.mrb[83].mxu0  ;;  %v1640_v14 = vpop.f32.mrb[83].mxu1 }
 0x1a5   : > { %v1842_v12 = vmul.f32 %v4092_v54, %v1638_v8 }
 0x1a6   : > { %v2040_v15 = vmax.f32 %v1912_v9, 0.0  ;;  %v2104_v16 = vmax.f32 %v1976_v10, 0.0  ;;  %v1913_v17 = vadd.f32 %v4103_v60, %v1778_v11 }
 0x1a7   : > { %v1977_v18 = vadd.f32 %v4103_v60, %v1842_v12 }
 0x1a8   : > { %v3210_v19 = vpack.c.bf16 %v2040_v15, %v2040_v15  ;;  %v3274_v20 = vpack.c.bf16 %v2104_v16, %v2104_v16  ;;  %v2041_v21 = vmax.f32 %v1913_v17, 0.0 }
 0x1a9   : > { %v2105_v22 = vmax.f32 %v1977_v18, 0.0  ;;  %v1387_v23 = vpop.f32.mrb[84].mxu0  ;;  %v1643_v24 = vpop.f32.mrb[84].mxu1 }
 0x1aa   : > { %2681 = vst.msk [vmem:[%s3805_s24 + $0xa0] sm:$0xf] %vm2640_vm3, %v3210_v19  ;;  %2745 = vst.msk [vmem:[%s3805_s24 + $0x1a0] sm:$0xf] %vm2640_vm3, %v3274_v20  ;;  %v3211_v25 = vpack.c.bf16 %v2041_v21, %v2041_v21  ;;  %v1779_v27 = vmul.f32 %v4092_v54, %v1387_v23  ;;  %v1843_v28 = vmul.f32 %v4092_v54, %v1643_v24  ;;  %v1389_v29 = vpop.f32.mrb[85].mxu0  ;;  %v1645_v30 = vpop.f32.mrb[85].mxu1 }
 0x1ab   : > { %v3275_v26 = vpack.c.bf16 %v2105_v22, %v2105_v22  ;;  %v1390_v31 = vpop.f32.mrb[86].mxu0  ;;  %v1646_v32 = vpop.f32.mrb[86].mxu1 }
 0x1ac   : > { %2682 = vst.msk [vmem:[%s3805_s24 + $0xa4] sm:$0xf] %vm2640_vm3, %v3211_v25  ;;  %v1914_v33 = vadd.f32 %v4103_v60, %v1779_v27  ;;  %v1978_v34 = vadd.f32 %v4103_v60, %v1843_v28  ;;  %v1780_v35 = vmul.f32 %v4092_v54, %v1390_v31  ;;  %v1844_v36 = vmul.f32 %v4092_v54, %v1646_v32  ;;  %v1392_v37 = vpop.f32.mrb[87].mxu0  ;;  %v1648_v38 = vpop.f32.mrb[87].mxu1 }
 0x1ad   : > { %2746 = vst.msk [vmem:[%s3805_s24 + $0x1a4] sm:$0xf] %vm2640_vm3, %v3275_v26 }
 0x1ae   : > { %v2042_v39 = vmax.f32 %v1914_v33, 0.0  ;;  %v2106_v40 = vmax.f32 %v1978_v34, 0.0  ;;  %v1915_v41 = vadd.f32 %v4103_v60, %v1780_v35  ;;  %v1979_v42 = vadd.f32 %v4103_v60, %v1844_v36 }
 0x1b0   : > { %v3212_v43 = vpack.c.bf16 %v2042_v39, %v2042_v39  ;;  %v3276_v44 = vpack.c.bf16 %v2106_v40, %v2106_v40  ;;  %v2043_v45 = vmax.f32 %v1915_v41, 0.0  ;;  %v2107_v46 = vmax.f32 %v1979_v42, 0.0 }
 0x1b1   : > { %v1395_v47 = vpop.f32.mrb[88].mxu0  ;;  %v1651_v48 = vpop.f32.mrb[88].mxu1 }
 0x1b2   : > { %2683 = vst.msk [vmem:[%s3805_s24 + $0xa8] sm:$0xf] %vm2640_vm3, %v3212_v43  ;;  %2747 = vst.msk [vmem:[%s3805_s24 + $0x1a8] sm:$0xf] %vm2640_vm3, %v3276_v44  ;;  %v3213_v49 = vpack.c.bf16 %v2043_v45, %v2043_v45  ;;  %v3277_v50 = vpack.c.bf16 %v2107_v46, %v2107_v46  ;;  %v1781_v51 = vmul.f32 %v4092_v54, %v1395_v47  ;;  %v1397_v61 = vpop.f32.mrb[89].mxu0  ;;  %v1653_v53 = vpop.f32.mrb[89].mxu1 }
 0x1b3   : > { %v1845_v52 = vmul.f32 %v4092_v54, %v1651_v48  ;;  %v1398_v63 = vpop.f32.mrb[90].mxu0  ;;  %v1654_v55 = vpop.f32.mrb[90].mxu1 }
 0x1b4   : > { %2684 = vst.msk [vmem:[%s3805_s24 + $0xac] sm:$0xf] %vm2640_vm3, %v3213_v49  ;;  %2748 = vst.msk [vmem:[%s3805_s24 + $0x1ac] sm:$0xf] %vm2640_vm3, %v3277_v50  ;;  %v1916_v56 = vadd.f32 %v4103_v60, %v1781_v51  ;;  %v1782_v58 = vmul.f32 %v4092_v54, %v1398_v63  ;;  %v1846_v59 = vmul.f32 %v4092_v54, %v1654_v55  ;;  %v1400_v62 = vpop.f32.mrb[91].mxu0  ;;  %v1656_v0 = vpop.f32.mrb[91].mxu1 }
 0x1b5   : > { %v1980_v57 = vadd.f32 %v4103_v60, %v1845_v52 }
 0x1b6   : > { %v2044_v1 = vmax.f32 %v1916_v56, 0.0  ;;  %v1917_v3 = vadd.f32 %v4103_v60, %v1782_v58  ;;  %v1981_v4 = vadd.f32 %v4103_v60, %v1846_v59 }
 0x1b7   : > { %v2108_v2 = vmax.f32 %v1980_v57, 0.0 }
 0x1b8   : > { %v3214_v5 = vpack.c.bf16 %v2044_v1, %v2044_v1  ;;  %v2045_v7 = vmax.f32 %v1917_v3, 0.0  ;;  %v2109_v8 = vmax.f32 %v1981_v4, 0.0 }
 0x1b9   : > { %v3278_v6 = vpack.c.bf16 %v2108_v2, %v2108_v2  ;;  %v1403_v9 = vpop.f32.mrb[92].mxu0  ;;  %v1659_v10 = vpop.f32.mrb[92].mxu1 }
 0x1ba   : > { %2685 = vst.msk [vmem:[%s3805_s24 + $0xb0] sm:$0xf] %vm2640_vm3, %v3214_v5  ;;  %v3215_v11 = vpack.c.bf16 %v2045_v7, %v2045_v7  ;;  %v3279_v12 = vpack.c.bf16 %v2109_v8, %v2109_v8  ;;  %v1783_v13 = vmul.f32 %v4092_v54, %v1403_v9  ;;  %v1847_v14 = vmul.f32 %v4092_v54, %v1659_v10  ;;  %v1405_v15 = vpop.f32.mrb[93].mxu0  ;;  %v1661_v16 = vpop.f32.mrb[93].mxu1 }
 0x1bb   : > { %2749 = vst.msk [vmem:[%s3805_s24 + $0x1b0] sm:$0xf] %vm2640_vm3, %v3278_v6  ;;  %v1406_v17 = vpop.f32.mrb[94].mxu0  ;;  %v1662_v18 = vpop.f32.mrb[94].mxu1 }
 0x1bc   : > { %2686 = vst.msk [vmem:[%s3805_s24 + $0xb4] sm:$0xf] %vm2640_vm3, %v3215_v11  ;;  %2750 = vst.msk [vmem:[%s3805_s24 + $0x1b4] sm:$0xf] %vm2640_vm3, %v3279_v12  ;;  %v1918_v19 = vadd.f32 %v4103_v60, %v1783_v13  ;;  %v1982_v20 = vadd.f32 %v4103_v60, %v1847_v14  ;;  %v1784_v21 = vmul.f32 %v4092_v54, %v1406_v17  ;;  %v1408_v23 = vpop.f32.mrb[95].mxu0  ;;  %v1664_v24 = vpop.f32.mrb[95].mxu1 }
 0x1bd   : > { %v1848_v22 = vmul.f32 %v4092_v54, %v1662_v18 }
 0x1be   : > { %v2046_v25 = vmax.f32 %v1918_v19, 0.0  ;;  %v2110_v26 = vmax.f32 %v1982_v20, 0.0  ;;  %v1919_v27 = vadd.f32 %v4103_v60, %v1784_v21 }
 0x1bf   : > { %v1983_v28 = vadd.f32 %v4103_v60, %v1848_v22 }
 0x1c0   : > { %v3216_v29 = vpack.c.bf16 %v2046_v25, %v2046_v25  ;;  %v3280_v30 = vpack.c.bf16 %v2110_v26, %v2110_v26  ;;  %v2047_v31 = vmax.f32 %v1919_v27, 0.0 }
 0x1c1   : > { %v2111_v32 = vmax.f32 %v1983_v28, 0.0  ;;  %v1411_v33 = vpop.f32.mrb[96].mxu0  ;;  %v1667_v34 = vpop.f32.mrb[96].mxu1 }
 0x1c2   : > { %2687 = vst.msk [vmem:[%s3805_s24 + $0xb8] sm:$0xf] %vm2640_vm3, %v3216_v29  ;;  %2751 = vst.msk [vmem:[%s3805_s24 + $0x1b8] sm:$0xf] %vm2640_vm3, %v3280_v30  ;;  %v3217_v35 = vpack.c.bf16 %v2047_v31, %v2047_v31  ;;  %v1785_v37 = vmul.f32 %v4092_v54, %v1411_v33  ;;  %v1849_v38 = vmul.f32 %v4092_v54, %v1667_v34  ;;  %v1413_v39 = vpop.f32.mrb[97].mxu0  ;;  %v1669_v40 = vpop.f32.mrb[97].mxu1 }
 0x1c3   : > { %v3281_v36 = vpack.c.bf16 %v2111_v32, %v2111_v32  ;;  %v1414_v41 = vpop.f32.mrb[98].mxu0  ;;  %v1670_v42 = vpop.f32.mrb[98].mxu1 }
 0x1c4   : > { %2688 = vst.msk [vmem:[%s3805_s24 + $0xbc] sm:$0xf] %vm2640_vm3, %v3217_v35  ;;  %v1920_v43 = vadd.f32 %v4103_v60, %v1785_v37  ;;  %v1984_v44 = vadd.f32 %v4103_v60, %v1849_v38  ;;  %v1786_v45 = vmul.f32 %v4092_v54, %v1414_v41  ;;  %v1850_v46 = vmul.f32 %v4092_v54, %v1670_v42  ;;  %v1416_v47 = vpop.f32.mrb[99].mxu0  ;;  %v1672_v48 = vpop.f32.mrb[99].mxu1 }
 0x1c5   : > { %2752 = vst.msk [vmem:[%s3805_s24 + $0x1bc] sm:$0xf] %vm2640_vm3, %v3281_v36 }
 0x1c6   : > { %v2048_v49 = vmax.f32 %v1920_v43, 0.0  ;;  %v2112_v50 = vmax.f32 %v1984_v44, 0.0  ;;  %v1921_v51 = vadd.f32 %v4103_v60, %v1786_v45  ;;  %v1985_v52 = vadd.f32 %v4103_v60, %v1850_v46 }
 0x1c8   : > { %v3218_v61 = vpack.c.bf16 %v2048_v49, %v2048_v49  ;;  %v3282_v53 = vpack.c.bf16 %v2112_v50, %v2112_v50  ;;  %v2049_v63 = vmax.f32 %v1921_v51, 0.0  ;;  %v2113_v55 = vmax.f32 %v1985_v52, 0.0 }
 0x1c9   : > { %v1419_v56 = vpop.f32.mrb[100].mxu0  ;;  %v1675_v57 = vpop.f32.mrb[100].mxu1 }
 0x1ca   : > { %2689 = vst.msk [vmem:[%s3805_s24 + $0xc0] sm:$0xf] %vm2640_vm3, %v3218_v61  ;;  %2753 = vst.msk [vmem:[%s3805_s24 + $0x1c0] sm:$0xf] %vm2640_vm3, %v3282_v53  ;;  %v3219_v58 = vpack.c.bf16 %v2049_v63, %v2049_v63  ;;  %v3283_v59 = vpack.c.bf16 %v2113_v55, %v2113_v55  ;;  %v1787_v62 = vmul.f32 %v4092_v54, %v1419_v56  ;;  %v1421_v1 = vpop.f32.mrb[101].mxu0  ;;  %v1677_v2 = vpop.f32.mrb[101].mxu1 }
 0x1cb   : > { %v1851_v0 = vmul.f32 %v4092_v54, %v1675_v57  ;;  %v1422_v3 = vpop.f32.mrb[102].mxu0  ;;  %v1678_v4 = vpop.f32.mrb[102].mxu1 }
 0x1cc   : > { %2690 = vst.msk [vmem:[%s3805_s24 + $0xc4] sm:$0xf] %vm2640_vm3, %v3219_v58  ;;  %2754 = vst.msk [vmem:[%s3805_s24 + $0x1c4] sm:$0xf] %vm2640_vm3, %v3283_v59  ;;  %v1922_v5 = vadd.f32 %v4103_v60, %v1787_v62  ;;  %v1788_v7 = vmul.f32 %v4092_v54, %v1422_v3  ;;  %v1852_v8 = vmul.f32 %v4092_v54, %v1678_v4  ;;  %v1424_v9 = vpop.f32.mrb[103].mxu0  ;;  %v1680_v10 = vpop.f32.mrb[103].mxu1 }
 0x1cd   : > { %v1986_v6 = vadd.f32 %v4103_v60, %v1851_v0 }
 0x1ce   : > { %v2050_v11 = vmax.f32 %v1922_v5, 0.0  ;;  %v1923_v13 = vadd.f32 %v4103_v60, %v1788_v7  ;;  %v1987_v14 = vadd.f32 %v4103_v60, %v1852_v8 }
 0x1cf   : > { %v2114_v12 = vmax.f32 %v1986_v6, 0.0 }
 0x1d0   : > { %v3220_v15 = vpack.c.bf16 %v2050_v11, %v2050_v11  ;;  %v2051_v17 = vmax.f32 %v1923_v13, 0.0  ;;  %v2115_v18 = vmax.f32 %v1987_v14, 0.0 }
 0x1d1   : > { %v3284_v16 = vpack.c.bf16 %v2114_v12, %v2114_v12  ;;  %v1427_v19 = vpop.f32.mrb[104].mxu0  ;;  %v1683_v20 = vpop.f32.mrb[104].mxu1 }
 0x1d2   : > { %2691 = vst.msk [vmem:[%s3805_s24 + $0xc8] sm:$0xf] %vm2640_vm3, %v3220_v15  ;;  %v3221_v21 = vpack.c.bf16 %v2051_v17, %v2051_v17  ;;  %v3285_v22 = vpack.c.bf16 %v2115_v18, %v2115_v18  ;;  %v1789_v23 = vmul.f32 %v4092_v54, %v1427_v19  ;;  %v1853_v24 = vmul.f32 %v4092_v54, %v1683_v20  ;;  %v1429_v25 = vpop.f32.mrb[105].mxu0  ;;  %v1685_v26 = vpop.f32.mrb[105].mxu1 }
 0x1d3   : > { %2755 = vst.msk [vmem:[%s3805_s24 + $0x1c8] sm:$0xf] %vm2640_vm3, %v3284_v16  ;;  %v1430_v27 = vpop.f32.mrb[106].mxu0  ;;  %v1686_v28 = vpop.f32.mrb[106].mxu1 }
 0x1d4   : > { %2692 = vst.msk [vmem:[%s3805_s24 + $0xcc] sm:$0xf] %vm2640_vm3, %v3221_v21  ;;  %2756 = vst.msk [vmem:[%s3805_s24 + $0x1cc] sm:$0xf] %vm2640_vm3, %v3285_v22  ;;  %v1924_v29 = vadd.f32 %v4103_v60, %v1789_v23  ;;  %v1988_v30 = vadd.f32 %v4103_v60, %v1853_v24  ;;  %v1790_v31 = vmul.f32 %v4092_v54, %v1430_v27  ;;  %v1432_v33 = vpop.f32.mrb[107].mxu0  ;;  %v1688_v34 = vpop.f32.mrb[107].mxu1 }
 0x1d5   : > { %v1854_v32 = vmul.f32 %v4092_v54, %v1686_v28 }
 0x1d6   : > { %v2052_v35 = vmax.f32 %v1924_v29, 0.0  ;;  %v2116_v36 = vmax.f32 %v1988_v30, 0.0  ;;  %v1925_v37 = vadd.f32 %v4103_v60, %v1790_v31 }
 0x1d7   : > { %v1989_v38 = vadd.f32 %v4103_v60, %v1854_v32 }
 0x1d8   : > { %v3222_v39 = vpack.c.bf16 %v2052_v35, %v2052_v35  ;;  %v3286_v40 = vpack.c.bf16 %v2116_v36, %v2116_v36  ;;  %v2053_v41 = vmax.f32 %v1925_v37, 0.0 }
 0x1d9   : > { %v2117_v42 = vmax.f32 %v1989_v38, 0.0  ;;  %v1435_v43 = vpop.f32.mrb[108].mxu0  ;;  %v1691_v44 = vpop.f32.mrb[108].mxu1 }
 0x1da   : > { %2693 = vst.msk [vmem:[%s3805_s24 + $0xd0] sm:$0xf] %vm2640_vm3, %v3222_v39  ;;  %2757 = vst.msk [vmem:[%s3805_s24 + $0x1d0] sm:$0xf] %vm2640_vm3, %v3286_v40  ;;  %v3223_v45 = vpack.c.bf16 %v2053_v41, %v2053_v41  ;;  %v1791_v47 = vmul.f32 %v4092_v54, %v1435_v43  ;;  %v1855_v48 = vmul.f32 %v4092_v54, %v1691_v44  ;;  %v1437_v49 = vpop.f32.mrb[109].mxu0  ;;  %v1693_v50 = vpop.f32.mrb[109].mxu1 }
 0x1db   : > { %v3287_v46 = vpack.c.bf16 %v2117_v42, %v2117_v42  ;;  %v1438_v51 = vpop.f32.mrb[110].mxu0  ;;  %v1694_v52 = vpop.f32.mrb[110].mxu1 }
 0x1dc   : > { %2694 = vst.msk [vmem:[%s3805_s24 + $0xd4] sm:$0xf] %vm2640_vm3, %v3223_v45  ;;  %v1926_v61 = vadd.f32 %v4103_v60, %v1791_v47  ;;  %v1990_v53 = vadd.f32 %v4103_v60, %v1855_v48  ;;  %v1792_v63 = vmul.f32 %v4092_v54, %v1438_v51  ;;  %v1856_v55 = vmul.f32 %v4092_v54, %v1694_v52  ;;  %v1440_v56 = vpop.f32.mrb[111].mxu0  ;;  %v1696_v57 = vpop.f32.mrb[111].mxu1 }
 0x1dd   : > { %2758 = vst.msk [vmem:[%s3805_s24 + $0x1d4] sm:$0xf] %vm2640_vm3, %v3287_v46 }
 0x1de   : > { %v2054_v58 = vmax.f32 %v1926_v61, 0.0  ;;  %v2118_v59 = vmax.f32 %v1990_v53, 0.0  ;;  %v1927_v62 = vadd.f32 %v4103_v60, %v1792_v63  ;;  %v1991_v0 = vadd.f32 %v4103_v60, %v1856_v55 }
 0x1e0   : > { %v3224_v1 = vpack.c.bf16 %v2054_v58, %v2054_v58  ;;  %v3288_v2 = vpack.c.bf16 %v2118_v59, %v2118_v59  ;;  %v2055_v3 = vmax.f32 %v1927_v62, 0.0  ;;  %v2119_v4 = vmax.f32 %v1991_v0, 0.0 }
 0x1e1   : > { %v1443_v5 = vpop.f32.mrb[112].mxu0  ;;  %v1699_v6 = vpop.f32.mrb[112].mxu1 }
 0x1e2   : > { %2695 = vst.msk [vmem:[%s3805_s24 + $0xd8] sm:$0xf] %vm2640_vm3, %v3224_v1  ;;  %2759 = vst.msk [vmem:[%s3805_s24 + $0x1d8] sm:$0xf] %vm2640_vm3, %v3288_v2  ;;  %v3225_v7 = vpack.c.bf16 %v2055_v3, %v2055_v3  ;;  %v3289_v8 = vpack.c.bf16 %v2119_v4, %v2119_v4  ;;  %v1793_v9 = vmul.f32 %v4092_v54, %v1443_v5  ;;  %v1445_v11 = vpop.f32.mrb[113].mxu0  ;;  %v1701_v12 = vpop.f32.mrb[113].mxu1 }
 0x1e3   : > { %v1857_v10 = vmul.f32 %v4092_v54, %v1699_v6  ;;  %v1446_v13 = vpop.f32.mrb[114].mxu0  ;;  %v1702_v14 = vpop.f32.mrb[114].mxu1 }
 0x1e4   : > { %2696 = vst.msk [vmem:[%s3805_s24 + $0xdc] sm:$0xf] %vm2640_vm3, %v3225_v7  ;;  %2760 = vst.msk [vmem:[%s3805_s24 + $0x1dc] sm:$0xf] %vm2640_vm3, %v3289_v8  ;;  %v1928_v15 = vadd.f32 %v4103_v60, %v1793_v9  ;;  %v1794_v17 = vmul.f32 %v4092_v54, %v1446_v13  ;;  %v1858_v18 = vmul.f32 %v4092_v54, %v1702_v14  ;;  %v1448_v19 = vpop.f32.mrb[115].mxu0  ;;  %v1704_v20 = vpop.f32.mrb[115].mxu1 }
 0x1e5   : > { %v1992_v16 = vadd.f32 %v4103_v60, %v1857_v10 }
 0x1e6   : > { %v2056_v21 = vmax.f32 %v1928_v15, 0.0  ;;  %v1929_v23 = vadd.f32 %v4103_v60, %v1794_v17  ;;  %v1993_v24 = vadd.f32 %v4103_v60, %v1858_v18 }
 0x1e7   : > { %v2120_v22 = vmax.f32 %v1992_v16, 0.0 }
 0x1e8   : > { %v3226_v25 = vpack.c.bf16 %v2056_v21, %v2056_v21  ;;  %v2057_v27 = vmax.f32 %v1929_v23, 0.0  ;;  %v2121_v28 = vmax.f32 %v1993_v24, 0.0 }
 0x1e9   : > { %v3290_v26 = vpack.c.bf16 %v2120_v22, %v2120_v22  ;;  %v1451_v29 = vpop.f32.mrb[116].mxu0  ;;  %v1707_v30 = vpop.f32.mrb[116].mxu1 }
 0x1ea   : > { %2697 = vst.msk [vmem:[%s3805_s24 + $0xe0] sm:$0xf] %vm2640_vm3, %v3226_v25  ;;  %v3227_v31 = vpack.c.bf16 %v2057_v27, %v2057_v27  ;;  %v3291_v32 = vpack.c.bf16 %v2121_v28, %v2121_v28  ;;  %v1795_v33 = vmul.f32 %v4092_v54, %v1451_v29  ;;  %v1859_v34 = vmul.f32 %v4092_v54, %v1707_v30  ;;  %v1453_v35 = vpop.f32.mrb[117].mxu0  ;;  %v1709_v36 = vpop.f32.mrb[117].mxu1 }
 0x1eb   : > { %2761 = vst.msk [vmem:[%s3805_s24 + $0x1e0] sm:$0xf] %vm2640_vm3, %v3290_v26  ;;  %v1454_v37 = vpop.f32.mrb[118].mxu0  ;;  %v1710_v38 = vpop.f32.mrb[118].mxu1 }
 0x1ec   : > { %2698 = vst.msk [vmem:[%s3805_s24 + $0xe4] sm:$0xf] %vm2640_vm3, %v3227_v31  ;;  %2762 = vst.msk [vmem:[%s3805_s24 + $0x1e4] sm:$0xf] %vm2640_vm3, %v3291_v32  ;;  %v1930_v39 = vadd.f32 %v4103_v60, %v1795_v33  ;;  %v1994_v40 = vadd.f32 %v4103_v60, %v1859_v34  ;;  %v1796_v41 = vmul.f32 %v4092_v54, %v1454_v37  ;;  %v1456_v43 = vpop.f32.mrb[119].mxu0  ;;  %v1712_v44 = vpop.f32.mrb[119].mxu1 }
 0x1ed   : > { %v1860_v42 = vmul.f32 %v4092_v54, %v1710_v38 }
 0x1ee   : > { %v2058_v45 = vmax.f32 %v1930_v39, 0.0  ;;  %v2122_v46 = vmax.f32 %v1994_v40, 0.0  ;;  %v1931_v47 = vadd.f32 %v4103_v60, %v1796_v41 }
 0x1ef   : > { %v1995_v48 = vadd.f32 %v4103_v60, %v1860_v42 }
 0x1f0   : > { %v3228_v49 = vpack.c.bf16 %v2058_v45, %v2058_v45  ;;  %v3292_v50 = vpack.c.bf16 %v2122_v46, %v2122_v46  ;;  %v2059_v51 = vmax.f32 %v1931_v47, 0.0 }
 0x1f1   : > { %v2123_v52 = vmax.f32 %v1995_v48, 0.0  ;;  %v1459_v61 = vpop.f32.mrb[120].mxu0  ;;  %v1715_v53 = vpop.f32.mrb[120].mxu1 }
 0x1f2   : > { %2699 = vst.msk [vmem:[%s3805_s24 + $0xe8] sm:$0xf] %vm2640_vm3, %v3228_v49  ;;  %2763 = vst.msk [vmem:[%s3805_s24 + $0x1e8] sm:$0xf] %vm2640_vm3, %v3292_v50  ;;  %v3229_v63 = vpack.c.bf16 %v2059_v51, %v2059_v51  ;;  %v1797_v56 = vmul.f32 %v4092_v54, %v1459_v61  ;;  %v1861_v57 = vmul.f32 %v4092_v54, %v1715_v53  ;;  %v1461_v58 = vpop.f32.mrb[121].mxu0  ;;  %v1717_v59 = vpop.f32.mrb[121].mxu1 }
 0x1f3   : > { %v3293_v55 = vpack.c.bf16 %v2123_v52, %v2123_v52  ;;  %v1462_v62 = vpop.f32.mrb[122].mxu0  ;;  %v1718_v0 = vpop.f32.mrb[122].mxu1 }
 0x1f4   : > { %2700 = vst.msk [vmem:[%s3805_s24 + $0xec] sm:$0xf] %vm2640_vm3, %v3229_v63  ;;  %v1932_v1 = vadd.f32 %v4103_v60, %v1797_v56  ;;  %v1996_v2 = vadd.f32 %v4103_v60, %v1861_v57  ;;  %v1798_v3 = vmul.f32 %v4092_v54, %v1462_v62  ;;  %v1862_v4 = vmul.f32 %v4092_v54, %v1718_v0  ;;  %v1464_v5 = vpop.f32.mrb[123].mxu0  ;;  %v1720_v6 = vpop.f32.mrb[123].mxu1 }
 0x1f5   : > { %2764 = vst.msk [vmem:[%s3805_s24 + $0x1ec] sm:$0xf] %vm2640_vm3, %v3293_v55 }
 0x1f6   : > { %v2060_v7 = vmax.f32 %v1932_v1, 0.0  ;;  %v2124_v8 = vmax.f32 %v1996_v2, 0.0  ;;  %v1933_v9 = vadd.f32 %v4103_v60, %v1798_v3  ;;  %v1997_v10 = vadd.f32 %v4103_v60, %v1862_v4 }
 0x1f8   : > { %v3230_v11 = vpack.c.bf16 %v2060_v7, %v2060_v7  ;;  %v3294_v12 = vpack.c.bf16 %v2124_v8, %v2124_v8  ;;  %v2061_v13 = vmax.f32 %v1933_v9, 0.0  ;;  %v2125_v14 = vmax.f32 %v1997_v10, 0.0 }
 0x1f9   : > { %v1467_v15 = vpop.f32.mrb[124].mxu0  ;;  %v1723_v16 = vpop.f32.mrb[124].mxu1 }
 0x1fa   : > { %2701 = vst.msk [vmem:[%s3805_s24 + $0xf0] sm:$0xf] %vm2640_vm3, %v3230_v11  ;;  %2765 = vst.msk [vmem:[%s3805_s24 + $0x1f0] sm:$0xf] %vm2640_vm3, %v3294_v12  ;;  %v3231_v17 = vpack.c.bf16 %v2061_v13, %v2061_v13  ;;  %v3295_v18 = vpack.c.bf16 %v2125_v14, %v2125_v14  ;;  %v1799_v19 = vmul.f32 %v4092_v54, %v1467_v15  ;;  %v1469_v21 = vpop.f32.mrb[125].mxu0  ;;  %v1725_v22 = vpop.f32.mrb[125].mxu1 }
 0x1fb   : > { %v1863_v20 = vmul.f32 %v4092_v54, %v1723_v16  ;;  %v1470_v23 = vpop.f32.mrb[126].mxu0  ;;  %v1726_v24 = vpop.f32.mrb[126].mxu1 }
 0x1fc   : > { %2702 = vst.msk [vmem:[%s3805_s24 + $0xf4] sm:$0xf] %vm2640_vm3, %v3231_v17  ;;  %2766 = vst.msk [vmem:[%s3805_s24 + $0x1f4] sm:$0xf] %vm2640_vm3, %v3295_v18  ;;  %v1934_v25 = vadd.f32 %v4103_v60, %v1799_v19  ;;  %v1800_v27 = vmul.f32 %v4092_v54, %v1470_v23  ;;  %v1864_v28 = vmul.f32 %v4092_v54, %v1726_v24  ;;  %v1472_v29 = vpop.f32.mrb[127].mxu0  ;;  %v1728_v30 = vpop.f32.mrb[127].mxu1 }
 0x1fd   : > { %v1998_v26 = vadd.f32 %v4103_v60, %v1863_v20 }
 0x1fe   : > { %v2062_v31 = vmax.f32 %v1934_v25, 0.0  ;;  %v1935_v33 = vadd.f32 %v4103_v60, %v1800_v27  ;;  %v1999_v34 = vadd.f32 %v4103_v60, %v1864_v28 }
 0x1ff   : > { %v2126_v32 = vmax.f32 %v1998_v26, 0.0 }
 0x200   : > { %v3232_v35 = vpack.c.bf16 %v2062_v31, %v2062_v31  ;;  %v2063_v37 = vmax.f32 %v1935_v33, 0.0  ;;  %v2127_v38 = vmax.f32 %v1999_v34, 0.0 }
 0x201   : > { %v3296_v36 = vpack.c.bf16 %v2126_v32, %v2126_v32 }
 0x202   : > { %2703 = vst.msk [vmem:[%s3805_s24 + $0xf8] sm:$0xf] %vm2640_vm3, %v3232_v35  ;;  %v3233_v39 = vpack.c.bf16 %v2063_v37, %v2063_v37  ;;  %v3297_v40 = vpack.c.bf16 %v2127_v38, %v2127_v38 }
 0x203   : > { %2767 = vst.msk [vmem:[%s3805_s24 + $0x1f8] sm:$0xf] %vm2640_vm3, %v3296_v36 }
 0x204   : > { %2704 = vst.msk [vmem:[%s3805_s24 + $0xfc] sm:$0xf] %vm2640_vm3, %v3233_v39  ;;  %2768 = vst.msk [vmem:[%s3805_s24 + $0x1fc] sm:$0xf] %vm2640_vm3, %v3297_v40 }
 0x205 PF: > { %s14_s15 = sadd.s32 1, %s3538_s15  }
 0x206   : > { %p11_p4 = scmp.ge.s32.totalorder %s14_s15, 4  }
 0x208   :  { %13 = sbr.rel (!%p11_p4) target bundleno = 1 (0x1), region = 66 }

// kernel: faceboxes_forward.23
= control target key start
LH: loop header
LB: loop body
LE: loop exit
PB: predicated region body
PF: predicated region fallthrough
CT: control target
= control target key end

     0   :  { %vm189_vm0 = vcmask 650240   ;;  %s331_s1 = inlined_call_operand.vmem [shape: bf16[128,80], index: 1, kind: input, shape index: {}]   ;;  %s332_s0 = inlined_call_operand.vmem [shape: bf16[32,128], index: 0, kind: input, shape index: {}]   ;;  %s333_s2 = inlined_call_operand.vmem [shape: f32[1,80], index: 2, kind: input, shape index: {}]   ;;  %s334_s3 = inlined_call_operand.vmem [shape: f32[1,80], index: 3, kind: input, shape index: {}]   ;;  %s335_s4 = inlined_call_operand.vmem [shape: bf16[32,80], index: 4, kind: output, shape index: {}]  }
   0x1   :  { %v248_v0 = vld [vmem:[%s331_s1] sm:$0xff]   ;;  %v249_v1 = vld [vmem:[%s331_s1 + $0x8] sm:$0xff]   ;;  %v250_v2 = vld [vmem:[%s331_s1 + $0x10] sm:$0xff]  }
   0x2   :  { %228 = vmatprep.subr.bf16.mxu0 %v248_v0  ;;  %v251_v3 = vld [vmem:[%s331_s1 + $0x18] sm:$0xff]   ;;  %v256_v4 = vld [vmem:[%s332_s0] sm:$0xff]   ;;  %v253_v6 = vld [vmem:[%s331_s1 + $0x28] sm:$0xff]  }
   0x3   :  { %229 = vmatpush3.bf16.msra.mxu0 %v248_v0  ;;  %244 = vmatprep.mubr.bf16.mxu0 %v256_v4  ;;  %v252_v5 = vld [vmem:[%s331_s1 + $0x20] sm:$0xff]   ;;  %v254_v7 = vld [vmem:[%s331_s1 + $0x30] sm:$0xff]   ;;  %v255_v8 = vld [vmem:[%s331_s1 + $0x38] sm:$0xff]  }
   0x4   :  { %230 = vmatprep.subr.bf16.mxu0 %v249_v1  ;;  %v257_v9 = vld [vmem:[%s332_s0 + $0x8] sm:$0xff]   ;;  %v208_v10 = vld [vmem:[%s333_s2] ss:$0 sm:$0xff] }
   0x5   :  { %v209_v12 = vld [vmem:[%s334_s3] ss:$0 sm:$0xff] }
   0x7   :  { %231 = vmatpush3.bf16.msra.mxu0 %v249_v1 }
   0x8   :  { %232 = vmatprep.subr.bf16.mxu0 %v250_v2 }
   0xb   :  { %233 = vmatpush3.bf16.msra.mxu0 %v250_v2 }
   0xc   :  { %234 = vmatprep.subr.bf16.mxu0 %v251_v3 }
   0xf   :  { %235 = vmatpush3.bf16.msra.mxu0 %v251_v3 }
  0x10   :  { %236 = vmatprep.subr.bf16.mxu0 %v252_v5 }
  0x13   :  { %237 = vmatpush3.bf16.msra.mxu0 %v252_v5 }
  0x14   :  { %238 = vmatprep.subr.bf16.mxu0 %v253_v6 }
  0x17   :  { %239 = vmatpush3.bf16.msra.mxu0 %v253_v6 }
  0x18   :  { %240 = vmatprep.subr.bf16.mxu0 %v254_v7 }
  0x1b   :  { %241 = vmatpush3.bf16.msra.mxu0 %v254_v7 }
  0x1c   :  { %242 = vmatprep.subr.bf16.mxu0 %v255_v8 }
  0x1f   :  { %243 = vmatpush3.bf16.msra.mxu0 %v255_v8 }
  0x22   :  { %245 = vmatmul.mubr.bf16.vlgmr.msra.gmra.mrb[0].mxu0 %v257_v9 }
  0xf5   :  { %v246_v11 = vpop.f32.mrb[0].mxu0 }
  0xf6   :  { %v156_v13 = vmul.f32 %v246_v11, %v208_v10  ;;  %v132_v14 = vpop.f32.mrb[1].mxu0 }
  0xf7   :  { %v154_v15 = vmul.f32 %v208_v10, %v132_v14  ;;  %v247_v16 = vpop.f32.mrb[2].mxu0 }
  0xf8   :  { %v167_v17 = vadd.f32 %v209_v12, %v156_v13  ;;  %v157_v18 = vmul.f32 %v247_v16, %v208_v10  ;;  %v135_v19 = vpop.f32.mrb[3].mxu0 }
  0xf9   :  { %v165_v20 = vadd.f32 %v209_v12, %v154_v15  ;;  %v155_v21 = vmul.f32 %v208_v10, %v135_v19 }
  0xfa   :  { %v171_v22 = vmax.f32 %v167_v17, 0.0  ;;  %v168_v23 = vadd.f32 %v209_v12, %v157_v18 }
  0xfb   :  { %v169_v24 = vmax.f32 %v165_v20, 0.0  ;;  %v166_v25 = vadd.f32 %v209_v12, %v155_v21 }
  0xfc   :  { %v216_v26 = vpack.c.bf16 %v171_v22, %v171_v22  ;;  %v172_v27 = vmax.f32 %v168_v23, 0.0 }
  0xfd   :  { %v214_v28 = vpack.c.bf16 %v169_v24, %v169_v24  ;;  %v170_v29 = vmax.f32 %v166_v25, 0.0 }
  0xfe   :  { %192 = vst.msk [vmem:[%s335_s4 + $0x8] sm:$0xf] %vm189_vm0, %v216_v26  ;;  %v217_v30 = vpack.c.bf16 %v172_v27, %v172_v27 }
  0xff   :  { %190 = vst.msk [vmem:[%s335_s4] sm:$0xf] %vm189_vm0, %v214_v28  ;;  %v215_v31 = vpack.c.bf16 %v170_v29, %v170_v29 }
 0x100   :  { %193 = vst.msk [vmem:[%s335_s4 + $0xc] sm:$0xf] %vm189_vm0, %v217_v30 }
 0x101   :  { %191 = vst.msk [vmem:[%s335_s4 + $0x4] sm:$0xf] %vm189_vm0, %v215_v31 }

// kernel: faceboxes_forward.22
= control target key start
LH: loop header
LB: loop body
LE: loop exit
PB: predicated region body
PF: predicated region fallthrough
CT: control target
= control target key end

     0   :  { %9 = vsyncpa [#allocation3], 0  ;;  %s3205_s0 = inlined_call_operand.vmem [shape: bf16[128,1200], index: 0, kind: input, shape index: {}]   ;;  %s3206_s1 = inlined_call_operand.vmem [shape: bf16[1200,128], index: 1, kind: input, shape index: {}]   ;;  %s3207_s2 = inlined_call_operand.hbm [shape: f32[1,128], index: 2, kind: input, shape index: {}]   ;;  %s3208_s3 = inlined_call_operand.hbm [shape: f32[1,128], index: 3, kind: input, shape index: {}]   ;;  %s3209_s4 = inlined_call_operand.vmem [shape: bf16[128,128], index: 4, kind: output, shape index: {}]  }
   0x1   :  { %10 = vsyncpa [#allocation5], 0  ;;  %s2534_s15 = smov [#allocation2]   ;;  %s2535_s17 = smov [#allocation4]  }
   0x2   :  { %s21_s16 = sshll.u32 %s2534_s15, 4  ;;  %s31_s18 = sshll.u32 %s2535_s17, 4  ;;  %s22_s16 = int_to_ptr.vmem [resolvable:$true] %s21_s16  ;;  %s32_s18 = int_to_ptr.vmem [resolvable:$true] %s31_s18 }
   0x3   :  { %s2486_s21 = scalar_lea.hbm %s3207_s2, 16 }
   0x4   :  { %p2487_p0 = scmp.ne.s32.totalorder %s3207_s2, %s2486_s21  ;;  %p2490_p1 = scmp.lt.u32.totalorder %s2486_s21, %s3207_s2 }
   0x6   :  { %p2492_p2 = pnand %p2490_p1, %p2487_p0 }
   0x8   :  { %2495 = shalt.err (!%p2492_p2)
}
   0x9   :  { %s2496_s26 = scalar_lea.vmem %s22_s16, 16  ;;  %s2500_s27 = scalar_lea.vmem %s22_s16, 32 }
   0xa   :  { %p2497_p3 = scmp.ne.s32.totalorder %s22_s16, %s2496_s26  ;;  %p2501_p4 = scmp.lt.s32.totalorder %s22_s16, %s22_s16 }
   0xb   :  { %p2502_p5 = scmp.lt.s32.totalorder %s2500_s27, %s2496_s26 }
   0xd   :  { %p2503_p6 = por %p2502_p5, %p2501_p4 }
   0xf   :  { %p2504_p7 = pnand %p2503_p6, %p2497_p3 }
  0x11   :  { %2507 = shalt.err (!%p2504_p7)
}
  0x12   :  { %24 = dma.hbm_to_vmem [thread:$0]  %s3207_s2, 16, %s22_s16, [#allocation3]  }
  0x13   :  { %s2508_s6 = scalar_lea.hbm %s3208_s3, 16 }
  0x14   :  { %p2509_p8 = scmp.ne.s32.totalorder %s3208_s3, %s2508_s6  ;;  %p2512_p9 = scmp.lt.u32.totalorder %s2508_s6, %s3208_s3 }
  0x16   :  { %p2514_p10 = pnand %p2512_p9, %p2509_p8 }
  0x18   :  { %2517 = shalt.err (!%p2514_p10)
}
  0x19   :  { %s2518_s11 = scalar_lea.vmem %s32_s18, 16  ;;  %s2522_s12 = scalar_lea.vmem %s32_s18, 32 }
  0x1a   :  { %p2519_p11 = scmp.ne.s32.totalorder %s32_s18, %s2518_s11  ;;  %p2523_p12 = scmp.lt.s32.totalorder %s32_s18, %s32_s18 }
  0x1b   :  { %p2524_p13 = scmp.lt.s32.totalorder %s2522_s12, %s2518_s11 }
  0x1d   :  { %p2525_p0 = por %p2524_p13, %p2523_p12 }
  0x1f   :  { %p2526_p1 = pnand %p2525_p0, %p2519_p11 }
  0x21   :  { %2529 = shalt.err (!%p2526_p1)
}
  0x22   :  { %34 = dma.hbm_to_vmem [thread:$0]  %s3208_s3, 16, %s32_s18, [#allocation5]  }
  0x23   :  { %2530 = dma.done.wait [#allocation3], 16  }
  0x24   :  { %2531 = vsyncadd [#allocation3], 4294967280 }
  0x25   :  { %2532 = dma.done.wait [#allocation5], 16  }
  0x26   :  { %2533 = vsyncadd [#allocation5], 4294967280  ;;  %v2291_v0 = vld [vmem:[%s3206_s1 + $0x40] sm:$0xff]   ;;  %v2293_v2 = vld [vmem:[%s3206_s1 + $0x48] sm:$0xff]   ;;  %vm1114_vm0 = vcmask 392192  }
  0x27   :  { %v2292_v1 = vld [vmem:[%s3206_s1] sm:$0xff]   ;;  %2272 = vmatprep.subr.bf16.mxu1 %v2291_v0  ;;  %2016 = vmatprep.subr.bf16.mxu0 %v2291_v0  ;;  %v2294_v3 = vld [vmem:[%s3206_s1 + $0x8] sm:$0xff]   ;;  %v2295_v4 = vld [vmem:[%s3206_s1 + $0x50] sm:$0xff]  }
  0x28   :  { %2280 = vmatpush3.bf16.msra.mxu1 %v2292_v1  ;;  %2017 = vmatpush3.bf16.msra.mxu0 %v2292_v1  ;;  %v2296_v5 = vld [vmem:[%s3206_s1 + $0x10] sm:$0xff]   ;;  %v2297_v6 = vld [vmem:[%s3206_s1 + $0x58] sm:$0xff]   ;;  %v2299_v8 = vld [vmem:[%s3206_s1 + $0x60] sm:$0xff]  }
  0x29   :  { %2273 = vmatprep.subr.bf16.mxu1 %v2293_v2  ;;  %2018 = vmatprep.subr.bf16.mxu0 %v2293_v2  ;;  %v2298_v7 = vld [vmem:[%s3206_s1 + $0x18] sm:$0xff]   ;;  %v2300_v9 = vld [vmem:[%s3206_s1 + $0x20] sm:$0xff]   ;;  %v2301_v10 = vld [vmem:[%s3206_s1 + $0x68] sm:$0xff]  }
  0x2a   :  { %v2309_v11 = vld [vmem:[%s3205_s0 + $0x144] ss:$40 sps:$4 sm:$0xff]   ;;  %v2303_v14 = vld [vmem:[%s3206_s1 + $0x70] sm:$0xff]   ;;  %v2305_v16 = vld [vmem:[%s3206_s1 + $0x78] sm:$0xff]  }
  0x2b   :  { %v2302_v12 = vld [vmem:[%s3206_s1 + $0x28] sm:$0xff]   ;;  %1203 = vmatprep.mubr.bf16.mxu1 %v2309_v11  ;;  %v2304_v15 = vld [vmem:[%s3206_s1 + $0x30] sm:$0xff]   ;;  %v2306_v17 = vld [vmem:[%s3206_s1 + $0x38] sm:$0xff]  }
  0x2c   :  { %2281 = vmatpush3.bf16.msra.mxu1 %v2294_v3  ;;  %2019 = vmatpush3.bf16.msra.mxu0 %v2294_v3  ;;  %v2313_v13 = vld [vmem:[%s3205_s0 + $0x4] ss:$40 sps:$4 sm:$0xff]   ;;  %v2307_v19 = vld [vmem:[%s3205_s0 + $0x140] ss:$40 sps:$4 sm:$0xff]   ;;  %v2320_v26 = vld [vmem:[%s3205_s0 + $0x194] ss:$40 sps:$4 sm:$0xff]  }
  0x2d   :  { %2274 = vmatprep.subr.bf16.mxu1 %v2295_v4  ;;  %2020 = vmatprep.subr.bf16.mxu0 %v2295_v4  ;;  %v2310_v18 = vld [vmem:[%s3206_s1 + $0xc0] sm:$0xff]   ;;  %v2317_v24 = vld [vmem:[%s3206_s1 + $0xc8] sm:$0xff]   ;;  %v2325_v28 = vld [vmem:[%s3205_s0 + $0x54] ss:$40 sps:$4 sm:$0xff]  }
  0x2e   :  { %1171 = vmatprep.mubr.bf16.mxu0 %v2313_v13  ;;  %v2311_v20 = vld [vmem:[%s3205_s0] ss:$40 sps:$4 sm:$0xff]   ;;  %v2324_v30 = vld [vmem:[%s3206_s1 + $0xd0] sm:$0xff]   ;;  %v2331_v36 = vld [vmem:[%s3206_s1 + $0xd8] sm:$0xff]  }
  0x2f   :  { %v2315_v21 = vld [vmem:[%s3206_s1 + $0x140] sm:$0xff]   ;;  %v2319_v25 = vld [vmem:[%s3206_s1 + $0x148] sm:$0xff]   ;;  %v2323_v31 = vld [vmem:[%s3205_s0 + $0x190] ss:$40 sps:$4 sm:$0xff]  }
  0x30   :  { %2282 = vmatpush3.bf16.msra.mxu1 %v2296_v5  ;;  %2021 = vmatpush3.bf16.msra.mxu0 %v2296_v5  ;;  %v2314_v22 = vld [vmem:[%s3206_s1 + $0x80] sm:$0xff]   ;;  %v2318_v27 = vld [vmem:[%s3206_s1 + $0x88] sm:$0xff]   ;;  %v2329_v32 = vld [vmem:[%s3206_s1 + $0x150] sm:$0xff]  }
  0x31   :  { %2275 = vmatprep.subr.bf16.mxu1 %v2297_v6  ;;  %2022 = vmatprep.subr.bf16.mxu0 %v2297_v6  ;;  %v2316_v23 = vld [vmem:[%s3206_s1 + $0x100] sm:$0xff]   ;;  %v2322_v29 = vld [vmem:[%s3206_s1 + $0x108] sm:$0xff]   ;;  %v2327_v33 = vld [vmem:[%s3206_s1 + $0x90] sm:$0xff]  }
  0x32   :  { %v2328_v34 = vld [vmem:[%s3205_s0 + $0x50] ss:$40 sps:$4 sm:$0xff]   ;;  %v2334_v39 = vld [vmem:[%s3205_s0 + $0x1e4] ss:$40 sps:$4 sm:$0xff]   ;;  %v2337_v43 = vld [vmem:[%s3205_s0 + $0x1e0] ss:$40 sps:$4 sm:$0xff]  }
  0x33   :  { %v2330_v35 = vld [vmem:[%s3206_s1 + $0x110] sm:$0xff]   ;;  %v2333_v37 = vld [vmem:[%s3206_s1 + $0x158] sm:$0xff]   ;;  %v2339_v40 = vld [vmem:[%s3205_s0 + $0xa4] ss:$40 sps:$4 sm:$0xff]  }
  0x34   :  { %2283 = vmatpush3.bf16.msra.mxu1 %v2298_v7  ;;  %2023 = vmatpush3.bf16.msra.mxu0 %v2298_v7  ;;  %v2332_v38 = vld [vmem:[%s3206_s1 + $0x98] sm:$0xff]   ;;  %v2338_v42 = vld [vmem:[%s3206_s1 + $0xe0] sm:$0xff]   ;;  %v2345_v48 = vld [vmem:[%s3206_s1 + $0xe8] sm:$0xff]   ;;  %v2536_v7 = vmov 0  }
  0x35   :  { %2276 = vmatprep.subr.bf16.mxu1 %v2299_v8  ;;  %2024 = vmatprep.subr.bf16.mxu0 %v2299_v8  ;;  %v2336_v41 = vld [vmem:[%s3206_s1 + $0x118] sm:$0xff]   ;;  %v2343_v44 = vld [vmem:[%s3206_s1 + $0x160] sm:$0xff]   ;;  %v2347_v49 = vld [vmem:[%s3206_s1 + $0x168] sm:$0xff]  }
  0x36   :  { %v2341_v45 = vld [vmem:[%s3206_s1 + $0xa0] sm:$0xff]   ;;  %v2346_v50 = vld [vmem:[%s3206_s1 + $0xa8] sm:$0xff]   ;;  %v2348_v51 = vld [vmem:[%s3205_s0 + $0x234] ss:$40 sps:$4 sm:$0xff]  }
  0x37   :  { %v2342_v46 = vld [vmem:[%s3205_s0 + $0xa0] ss:$40 sps:$4 sm:$0xff]   ;;  %v2353_v53 = vld [vmem:[%s3205_s0 + $0xf4] ss:$40 sps:$4 sm:$0xff]   ;;  %v2351_v54 = vld [vmem:[%s3205_s0 + $0x230] ss:$40 sps:$4 sm:$0xff]  }
  0x38   :  { %2284 = vmatpush3.bf16.msra.mxu1 %v2300_v9  ;;  %2025 = vmatpush3.bf16.msra.mxu0 %v2300_v9  ;;  %v2344_v47 = vld [vmem:[%s3206_s1 + $0x120] sm:$0xff]   ;;  %v2350_v52 = vld [vmem:[%s3206_s1 + $0x128] sm:$0xff]   ;;  %v2352_v55 = vld [vmem:[%s3206_s1 + $0xf0] sm:$0xff]  }
  0x39   :  { %2277 = vmatprep.subr.bf16.mxu1 %v2301_v10  ;;  %2026 = vmatprep.subr.bf16.mxu0 %v2301_v10  ;;  %v2355_v56 = vld [vmem:[%s3206_s1 + $0xb0] sm:$0xff]   ;;  %v2359_v60 = vld [vmem:[%s3206_s1 + $0xf8] sm:$0xff]   ;;  %v2366_v2 = vld [vmem:[%s3206_s1 + $0x1c0] sm:$0xff]  }
  0x3a   :  { %v2357_v57 = vld [vmem:[%s3206_s1 + $0x170] sm:$0xff]   ;;  %v2361_v61 = vld [vmem:[%s3206_s1 + $0x178] sm:$0xff]   ;;  %v2370_v5 = vld [vmem:[%s3206_s1 + $0x180] sm:$0xff]  }
  0x3b   :  { %v2356_v58 = vld [vmem:[%s3205_s0 + $0xf0] ss:$40 sps:$4 sm:$0xff]   ;;  %v2364_v63 = vld [vmem:[%s3205_s0 + $0xc] ss:$40 sps:$4 sm:$0xff]   ;;  %v2371_v6 = vld [vmem:[%s3206_s1 + $0x200] sm:$0xff]  }
  0x3c   :  { %2285 = vmatpush3.bf16.msra.mxu1 %v2302_v12  ;;  %2027 = vmatpush3.bf16.msra.mxu0 %v2302_v12  ;;  %v2358_v59 = vld [vmem:[%s3206_s1 + $0x130] sm:$0xff]   ;;  %v2360_v62 = vld [vmem:[%s3206_s1 + $0xb8] sm:$0xff]   ;;  %v2375_v9 = vld [vmem:[%s3206_s1 + $0x1c8] sm:$0xff]  }
  0x3d   :  { %2278 = vmatprep.subr.bf16.mxu1 %v2303_v14  ;;  %2028 = vmatprep.subr.bf16.mxu0 %v2303_v14  ;;  %v2365_v0 = vld [vmem:[%s3206_s1 + $0x138] sm:$0xff]   ;;  %v2362_v1 = vld [vmem:[%s3205_s0 + $0x8] ss:$40 sps:$4 sm:$0xff]   ;;  %v2376_v10 = vld [vmem:[%s3205_s0 + $0x64] ss:$40 sps:$4 sm:$0xff]  }
  0x3e   :  { %v2367_v3 = vld [vmem:[%s3205_s0 + $0x10] ss:$40 sps:$4 sm:$0xff]   ;;  %v2369_v4 = vld [vmem:[%s3205_s0 + $0x14] ss:$40 sps:$4 sm:$0xff]   ;;  %v2378_v12 = vld [vmem:[%s3206_s1 + $0x188] sm:$0xff]  }
  0x3f   :  { %v2372_v8 = vld [vmem:[%s3205_s0 + $0x5c] ss:$40 sps:$4 sm:$0xff]   ;;  %v2374_v11 = vld [vmem:[%s3205_s0 + $0x58] ss:$40 sps:$4 sm:$0xff]   ;;  %v2380_v13 = vld [vmem:[%s3206_s1 + $0x208] sm:$0xff]  }
  0x40   :  { %2286 = vmatpush3.bf16.msra.mxu1 %v2304_v15  ;;  %2029 = vmatpush3.bf16.msra.mxu0 %v2304_v15  ;;  %v2379_v14 = vld [vmem:[%s3205_s0 + $0x60] ss:$40 sps:$4 sm:$0xff]   ;;  %v2381_v15 = vld [vmem:[%s3205_s0 + $0xac] ss:$40 sps:$4 sm:$0xff]  }
  0x41   :  { %2279 = vmatprep.subr.bf16.mxu1 %v2305_v16  ;;  %2030 = vmatprep.subr.bf16.mxu0 %v2305_v16  ;;  %v2384_v16 = vld [vmem:[%s3206_s1 + $0x1d0] sm:$0xff]  }
  0x44   :  { %2287 = vmatpush3.bf16.msra.mxu1 %v2306_v17  ;;  %2031 = vmatpush3.bf16.msra.mxu0 %v2306_v17  ;;  %v2385_v17 = vld [vmem:[%s3205_s0 + $0xb4] ss:$40 sps:$4 sm:$0xff]  }
  0x45   :  { %2080 = vmatprep.subr.bf16.mxu1 %v2310_v18  ;;  %2144 = vmatprep.subr.bf16.mxu0 %v2315_v21  ;;  %v2387_v18 = vld [vmem:[%s3206_s1 + $0x190] sm:$0xff]  }
  0x46   :  { %v2388_v21 = vld [vmem:[%s3205_s0 + $0xb0] ss:$40 sps:$4 sm:$0xff]  }
  0x47   :  { %1204 = vmatmul.mubr.bf16.vlgmr.msra.gmra.mrb[0].mxu1 %v2307_v19  ;;  %1172 = vmatmul.mubr.bf16.vlgmr.msra.gmra.mrb[0].mxu0 %v2311_v20  ;;  %v2389_v19 = vld [vmem:[%s3206_s1 + $0x210] sm:$0xff]  }
  0x48   :  { %2081 = vmatpush3.bf16.msra.mxu1 %v2314_v22  ;;  %2145 = vmatpush3.bf16.msra.mxu0 %v2316_v23  ;;  %v2383_v20 = vld [vmem:[%s3205_s0 + $0xa8] ss:$40 sps:$4 sm:$0xff]   ;;  %v2390_v22 = vld [vmem:[%s3205_s0 + $0xfc] ss:$40 sps:$4 sm:$0xff]  }
  0x49   :  { %2082 = vmatprep.subr.bf16.mxu1 %v2317_v24  ;;  %2146 = vmatprep.subr.bf16.mxu0 %v2319_v25  ;;  %v2393_v23 = vld [vmem:[%s3206_s1 + $0x1d8] sm:$0xff]   ;;  %v2395_v25 = vld [vmem:[%s3205_s0 + $0x104] ss:$40 sps:$4 sm:$0xff]  }
  0x4a   :  { %1211 = vmatprep.mubr.bf16.mxu1 %v2320_v26  ;;  %1179 = vmatprep.mubr.bf16.mxu0 %v2325_v28  ;;  %v2394_v24 = vld [vmem:[%s3206_s1 + $0x218] sm:$0xff]  }
  0x4b   :  { %v2397_v26 = vld [vmem:[%s3206_s1 + $0x198] sm:$0xff]  }
  0x4c   :  { %2083 = vmatpush3.bf16.msra.mxu1 %v2318_v27  ;;  %2147 = vmatpush3.bf16.msra.mxu0 %v2322_v29  ;;  %v2399_v27 = vld [vmem:[%s3206_s1 + $0x220] sm:$0xff]  }
  0x4d   :  { %2084 = vmatprep.subr.bf16.mxu1 %v2324_v30  ;;  %2148 = vmatprep.subr.bf16.mxu0 %v2329_v32  ;;  %v2392_v28 = vld [vmem:[%s3205_s0 + $0xf8] ss:$40 sps:$4 sm:$0xff]   ;;  %v2404_v32 = vld [vmem:[%s3205_s0 + $0x154] ss:$40 sps:$4 sm:$0xff]  }
  0x4e   :  { %v2398_v29 = vld [vmem:[%s3205_s0 + $0x100] ss:$40 sps:$4 sm:$0xff]  }
  0x4f   :  { %1212 = vmatmul.mubr.bf16.gmra.mrb[4].mxu1 %v2323_v31  ;;  %1180 = vmatmul.mubr.bf16.gmra.mrb[4].mxu0 %v2328_v34  ;;  %v2403_v30 = vld [vmem:[%s3206_s1 + $0x1e0] sm:$0xff]   ;;  %v2400_v31 = vld [vmem:[%s3205_s0 + $0x14c] ss:$40 sps:$4 sm:$0xff]  }
  0x50   :  { %2085 = vmatpush3.bf16.msra.mxu1 %v2327_v33  ;;  %2149 = vmatpush3.bf16.msra.mxu0 %v2330_v35  ;;  %v2406_v33 = vld [vmem:[%s3206_s1 + $0x1a0] sm:$0xff]   ;;  %v2408_v34 = vld [vmem:[%s3206_s1 + $0x228] sm:$0xff]  }
  0x51   :  { %2086 = vmatprep.subr.bf16.mxu1 %v2331_v36  ;;  %2150 = vmatprep.subr.bf16.mxu0 %v2333_v37  ;;  %v2412_v35 = vld [vmem:[%s3206_s1 + $0x1e8] sm:$0xff]  }
  0x52   :  { %1219 = vmatprep.mubr.bf16.mxu1 %v2334_v39  ;;  %1187 = vmatprep.mubr.bf16.mxu0 %v2339_v40  ;;  %v2402_v36 = vld [vmem:[%s3205_s0 + $0x148] ss:$40 sps:$4 sm:$0xff]   ;;  %v2409_v40 = vld [vmem:[%s3205_s0 + $0x19c] ss:$40 sps:$4 sm:$0xff]  }
  0x53   :  { %v2415_v37 = vld [vmem:[%s3206_s1 + $0x1a8] sm:$0xff]   ;;  %v2416_v39 = vld [vmem:[%s3206_s1 + $0x230] sm:$0xff]  }
  0x54   :  { %2087 = vmatpush3.bf16.msra.mxu1 %v2332_v38  ;;  %2151 = vmatpush3.bf16.msra.mxu0 %v2336_v41  ;;  %v2407_v38 = vld [vmem:[%s3205_s0 + $0x150] ss:$40 sps:$4 sm:$0xff]   ;;  %v2413_v41 = vld [vmem:[%s3205_s0 + $0x1a4] ss:$40 sps:$4 sm:$0xff]  }
  0x55   :  { %2088 = vmatprep.subr.bf16.mxu1 %v2338_v42  ;;  %2152 = vmatprep.subr.bf16.mxu0 %v2343_v44  ;;  %v2420_v42 = vld [vmem:[%s3206_s1 + $0x238] sm:$0xff]   ;;  %v2425_v44 = vld [vmem:[%s3206_s1 + $0x1b0] sm:$0xff]  }
  0x57   :  { %1220 = vmatmul.mubr.bf16.gmra.mrb[8].mxu1 %v2337_v43  ;;  %1188 = vmatmul.mubr.bf16.gmra.mrb[8].mxu0 %v2342_v46  ;;  %v2422_v43 = vld [vmem:[%s3206_s1 + $0x1f0] sm:$0xff]   ;;  %v2427_v46 = vld [vmem:[%s3206_s1 + $0x240] sm:$0xff]  }
  0x58   :  { %2089 = vmatpush3.bf16.msra.mxu1 %v2341_v45  ;;  %2153 = vmatpush3.bf16.msra.mxu0 %v2344_v47  ;;  %v2411_v45 = vld [vmem:[%s3205_s0 + $0x198] ss:$40 sps:$4 sm:$0xff]  }
  0x59   :  { %2090 = vmatprep.subr.bf16.mxu1 %v2345_v48  ;;  %2154 = vmatprep.subr.bf16.mxu0 %v2347_v49  ;;  %v2417_v47 = vld [vmem:[%s3205_s0 + $0x1a0] ss:$40 sps:$4 sm:$0xff]   ;;  %v2418_v48 = vld [vmem:[%s3205_s0 + $0x1ec] ss:$40 sps:$4 sm:$0xff]   ;;  %v2431_v49 = vld [vmem:[%s3206_s1 + $0x1f8] sm:$0xff]  }
  0x5a   :  { %1227 = vmatprep.mubr.bf16.mxu1 %v2348_v51  ;;  %1195 = vmatprep.mubr.bf16.mxu0 %v2353_v53  ;;  %v2434_v51 = vld [vmem:[%s3206_s1 + $0x1b8] sm:$0xff]   ;;  %v2440_v53 = vld [vmem:[%s3206_s1 + $0x250] sm:$0xff]  }
  0x5c   :  { %2091 = vmatpush3.bf16.msra.mxu1 %v2346_v50  ;;  %2155 = vmatpush3.bf16.msra.mxu0 %v2350_v52  ;;  %v2423_v50 = vld [vmem:[%s3205_s0 + $0x1f4] ss:$40 sps:$4 sm:$0xff]   ;;  %v2436_v52 = vld [vmem:[%s3206_s1 + $0x248] sm:$0xff]  }
  0x5d   :  { %2092 = vmatprep.subr.bf16.mxu1 %v2352_v55  ;;  %2156 = vmatprep.subr.bf16.mxu0 %v2357_v57  ;;  %v2426_v55 = vld [vmem:[%s3205_s0 + $0x1f0] ss:$40 sps:$4 sm:$0xff]   ;;  %v2432_v57 = vld [vmem:[%s3205_s0 + $0x244] ss:$40 sps:$4 sm:$0xff]  }
  0x5f   :  { %1228 = vmatmul.mubr.bf16.gmra.mrb[12].mxu1 %v2351_v54  ;;  %1196 = vmatmul.mubr.bf16.gmra.mrb[12].mxu0 %v2356_v58  ;;  %v2421_v54 = vld [vmem:[%s3205_s0 + $0x1e8] ss:$40 sps:$4 sm:$0xff]   ;;  %v2430_v58 = vld [vmem:[%s3205_s0 + $0x238] ss:$40 sps:$4 sm:$0xff]  }
  0x60   :  { %2093 = vmatpush3.bf16.msra.mxu1 %v2355_v56  ;;  %2157 = vmatpush3.bf16.msra.mxu0 %v2358_v59  ;;  %v2428_v56 = vld [vmem:[%s3205_s0 + $0x23c] ss:$40 sps:$4 sm:$0xff]   ;;  %v2435_v59 = vld [vmem:[%s3205_s0 + $0x240] ss:$40 sps:$4 sm:$0xff]  }
  0x61   :  { %2094 = vmatprep.subr.bf16.mxu1 %v2359_v60  ;;  %2158 = vmatprep.subr.bf16.mxu0 %v2361_v61  ;;  %v2439_v60 = vld [vmem:[%s3205_s0 + $0x1c] ss:$40 sps:$4 sm:$0xff]  }
  0x62   :  { %1268 = vmatprep.mubr.bf16.mxu1 %v2364_v63  ;;  %1365 = vmatprep.mubr.bf16.mxu0 %v2369_v4  ;;  %v2443_v61 = vld [vmem:[%s3205_s0 + $0x24] ss:$40 sps:$4 sm:$0xff]   ;;  %v2441_v63 = vld [vmem:[%s3205_s0 + $0x20] ss:$40 sps:$4 sm:$0xff]  }
  0x63   :  { %v2450_v4 = vld [vmem:[%s3205_s0 + $0xbc] ss:$40 sps:$4 sm:$0xff]  }
  0x64   :  { %2095 = vmatpush3.bf16.msra.mxu1 %v2360_v62  ;;  %2159 = vmatpush3.bf16.msra.mxu0 %v2365_v0  ;;  %v2437_v62 = vld [vmem:[%s3205_s0 + $0x18] ss:$40 sps:$4 sm:$0xff]   ;;  %v2444_v0 = vld [vmem:[%s3205_s0 + $0x6c] ss:$40 sps:$4 sm:$0xff]  }
  0x65   :  { %2208 = vmatprep.subr.bf16.mxu1 %v2366_v2  ;;  %1527 = vmatprep.subr.bf16.mxu0 %v2536_v7  ;;  %v2446_v2 = vld [vmem:[%s3205_s0 + $0x68] ss:$40 sps:$4 sm:$0xff]  }
  0x67   :  { %1269 = vmatmul.mubr.bf16.vlgmr.msra.gmra.mrb[16].mxu1 %v2362_v1  ;;  %1366 = vmatmul.mubr.bf16.vlgmr.msra.gmra.mrb[16].mxu0 %v2367_v3  ;;  %v2447_v1 = vld [vmem:[%s3205_s0 + $0x74] ss:$40 sps:$4 sm:$0xff]   ;;  %v2449_v3 = vld [vmem:[%s3205_s0 + $0x70] ss:$40 sps:$4 sm:$0xff]  }
  0x68   :  { %2209 = vmatpush3.bf16.msra.mxu1 %v2370_v5  ;;  %1528 = vmatpush1.bf16.msra.mxu0 %v2371_v6  ;;  %v2453_v5 = vld [vmem:[%s3205_s0 + $0xc4] ss:$40 sps:$4 sm:$0xff]   ;;  %v2452_v6 = vld [vmem:[%s3205_s0 + $0xb8] ss:$40 sps:$4 sm:$0xff]  }
  0x69   :  { %1276 = vmatprep.mubr.bf16.mxu1 %v2372_v8  ;;  %2210 = vmatprep.subr.bf16.mxu1 %v2375_v9  ;;  %v2456_v8 = vld [vmem:[%s3205_s0 + $0x10c] ss:$40 sps:$4 sm:$0xff]  }
  0x6a   :  { %1373 = vmatprep.mubr.bf16.mxu0 %v2376_v10  ;;  %1529 = vmatprep.subr.bf16.mxu0 %v2536_v7  ;;  %v2459_v9 = vld [vmem:[%s3205_s0 + $0x114] ss:$40 sps:$4 sm:$0xff]   ;;  %v2458_v10 = vld [vmem:[%s3205_s0 + $0x108] ss:$40 sps:$4 sm:$0xff]  }
  0x6c   :  { %2211 = vmatpush3.bf16.msra.mxu1 %v2378_v12  ;;  %1530 = vmatpush1.bf16.msra.mxu0 %v2380_v13  ;;  %v2462_v12 = vld [vmem:[%s3205_s0 + $0x15c] ss:$40 sps:$4 sm:$0xff]  }
  0x6d   :  { %1531 = vmatprep.subr.bf16.mxu0 %v2536_v7  ;;  %2212 = vmatprep.subr.bf16.mxu1 %v2384_v16  ;;  %v2465_v13 = vld [vmem:[%s3205_s0 + $0x164] ss:$40 sps:$4 sm:$0xff]  }
  0x6e   :  { %v2468_v16 = vld [vmem:[%s3205_s0 + $0x1ac] ss:$40 sps:$4 sm:$0xff]  }
  0x6f   :  { %1277 = vmatmul.mubr.bf16.gmra.mrb[20].mxu1 %v2374_v11  ;;  %1374 = vmatmul.mubr.bf16.gmra.mrb[20].mxu0 %v2379_v14  ;;  %v2461_v11 = vld [vmem:[%s3205_s0 + $0x110] ss:$40 sps:$4 sm:$0xff]  }
  0x70   :  { %1284 = vmatprep.mubr.bf16.mxu1 %v2381_v15  ;;  %1381 = vmatprep.mubr.bf16.mxu0 %v2385_v17  ;;  %v2464_v14 = vld [vmem:[%s3205_s0 + $0x158] ss:$40 sps:$4 sm:$0xff]   ;;  %v2471_v17 = vld [vmem:[%s3205_s0 + $0x1b4] ss:$40 sps:$4 sm:$0xff]  }
  0x71   :  { %2213 = vmatpush3.bf16.msra.mxu1 %v2387_v18  ;;  %1532 = vmatpush1.bf16.msra.mxu0 %v2389_v19  ;;  %v2467_v15 = vld [vmem:[%s3205_s0 + $0x160] ss:$40 sps:$4 sm:$0xff]   ;;  %v2473_v19 = vld [vmem:[%s3205_s0 + $0x1b0] ss:$40 sps:$4 sm:$0xff]  }
  0x72   :  { %1533 = vmatprep.subr.bf16.mxu0 %v2536_v7  ;;  %2214 = vmatprep.subr.bf16.mxu1 %v2393_v23  ;;  %v2470_v18 = vld [vmem:[%s3205_s0 + $0x1a8] ss:$40 sps:$4 sm:$0xff]  }
  0x73   :  { %v2479_v23 = vld [vmem:[%s3205_s0 + $0x200] ss:$40 sps:$4 sm:$0xff]  }
  0x75   :  { %1534 = vmatpush1.bf16.msra.mxu0 %v2394_v24  ;;  %2215 = vmatpush3.bf16.msra.mxu1 %v2397_v26  ;;  %v2480_v24 = vld [vmem:[%s3205_s0 + $0x24c] ss:$40 sps:$4 sm:$0xff]   ;;  %v2482_v26 = vld [vmem:[%s3205_s0 + $0x248] ss:$40 sps:$4 sm:$0xff]  }
  0x76   :  { %1535 = vmatprep.subr.bf16.mxu0 %v2536_v7  ;;  %2216 = vmatprep.subr.bf16.mxu1 %v2403_v30 }
  0x77   :  { %1285 = vmatmul.mubr.bf16.gmra.mrb[24].mxu1 %v2383_v20  ;;  %1382 = vmatmul.mubr.bf16.gmra.mrb[24].mxu0 %v2388_v21  ;;  %v2474_v20 = vld [vmem:[%s3205_s0 + $0x1fc] ss:$40 sps:$4 sm:$0xff]  }
  0x78   :  { %1292 = vmatprep.mubr.bf16.mxu1 %v2390_v22  ;;  %1389 = vmatprep.mubr.bf16.mxu0 %v2395_v25  ;;  %v2477_v21 = vld [vmem:[%s3205_s0 + $0x204] ss:$40 sps:$4 sm:$0xff]   ;;  %v2476_v22 = vld [vmem:[%s3205_s0 + $0x1f8] ss:$40 sps:$4 sm:$0xff]   ;;  %v2483_v25 = vld [vmem:[%s3205_s0 + $0x254] ss:$40 sps:$4 sm:$0xff]  }
  0x79   :  { %1536 = vmatpush1.bf16.msra.mxu0 %v2399_v27  ;;  %2217 = vmatpush3.bf16.msra.mxu1 %v2406_v33  ;;  %v2485_v27 = vld [vmem:[%s3205_s0 + $0x250] ss:$40 sps:$4 sm:$0xff]  }
  0x7a   :  { %1537 = vmatprep.subr.bf16.mxu0 %v2536_v7  ;;  %2218 = vmatprep.subr.bf16.mxu1 %v2412_v35 }
  0x7d   :  { %1538 = vmatpush1.bf16.msra.mxu0 %v2408_v34  ;;  %2219 = vmatpush3.bf16.msra.mxu1 %v2415_v37 }
  0x7e   :  { %1539 = vmatprep.subr.bf16.mxu0 %v2536_v7  ;;  %2220 = vmatprep.subr.bf16.mxu1 %v2422_v43 }
  0x7f   :  { %1293 = vmatmul.mubr.bf16.gmra.mrb[28].mxu1 %v2392_v28  ;;  %1390 = vmatmul.mubr.bf16.gmra.mrb[28].mxu0 %v2398_v29 }
  0x80   :  { %1300 = vmatprep.mubr.bf16.mxu1 %v2400_v31  ;;  %1397 = vmatprep.mubr.bf16.mxu0 %v2404_v32 }
  0x81   :  { %1540 = vmatpush1.bf16.msra.mxu0 %v2416_v39  ;;  %2221 = vmatpush3.bf16.msra.mxu1 %v2425_v44 }
  0x82   :  { %1541 = vmatprep.subr.bf16.mxu0 %v2536_v7  ;;  %2222 = vmatprep.subr.bf16.mxu1 %v2431_v49 }
  0x85   :  { %1542 = vmatpush1.bf16.msra.mxu0 %v2420_v42  ;;  %2223 = vmatpush3.bf16.msra.mxu1 %v2434_v51 }
  0x86   :  { %1543 = vmatprep.subr.bf16.mxu0 %v2536_v7 }
  0x87   :  { %1301 = vmatmul.mubr.bf16.gmra.mrb[32].mxu1 %v2402_v36  ;;  %1398 = vmatmul.mubr.bf16.gmra.mrb[32].mxu0 %v2407_v38 }
  0x88   :  { %1308 = vmatprep.mubr.bf16.mxu1 %v2409_v40  ;;  %1405 = vmatprep.mubr.bf16.mxu0 %v2413_v41 }
  0x89   :  { %1544 = vmatpush1.bf16.msra.mxu0 %v2427_v46 }
  0x8a   :  { %1545 = vmatprep.subr.bf16.mxu0 %v2536_v7 }
  0x8d   :  { %1546 = vmatpush1.bf16.msra.mxu0 %v2436_v52 }
  0x8e   :  { %1547 = vmatprep.subr.bf16.mxu0 %v2536_v7  ;;  %v2455_v7 = vld [vmem:[%s3205_s0 + $0xc0] ss:$40 sps:$4 sm:$0xff]  }
  0x8f   :  { %1309 = vmatmul.mubr.bf16.gmra.mrb[36].mxu1 %v2411_v45  ;;  %1406 = vmatmul.mubr.bf16.gmra.mrb[36].mxu0 %v2417_v47 }
  0x90   :  { %1316 = vmatprep.mubr.bf16.mxu1 %v2418_v48  ;;  %1413 = vmatprep.mubr.bf16.mxu0 %v2423_v50 }
  0x91   :  { %1548 = vmatpush1.bf16.msra.mxu0 %v2440_v53 }
  0x97   :  { %1317 = vmatmul.mubr.bf16.gmra.mrb[40].mxu1 %v2421_v54  ;;  %1414 = vmatmul.mubr.bf16.gmra.mrb[40].mxu0 %v2426_v55 }
  0x98   :  { %1324 = vmatprep.mubr.bf16.mxu1 %v2428_v56  ;;  %1421 = vmatprep.mubr.bf16.mxu0 %v2432_v57 }
  0x9f   :  { %1325 = vmatmul.mubr.bf16.gmra.mrb[44].mxu1 %v2430_v58  ;;  %1422 = vmatmul.mubr.bf16.gmra.mrb[44].mxu0 %v2435_v59 }
  0xa0   :  { %1462 = vmatprep.mubr.bf16.mxu1 %v2439_v60  ;;  %1927 = vmatprep.mubr.msk.bf16.mxu0 %vm1114_vm0, %v2443_v61 }
  0xa7   :  { %1463 = vmatmul.mubr.bf16.vlgmr.msra.gmra.mrb[48].mxu1 %v2437_v62  ;;  %1560 = vmatmul.mubr.bf16.vlgmr.msra.gmra.mrb[48].mxu0 %v2441_v63 }
  0xa8   :  { %1470 = vmatprep.mubr.bf16.mxu1 %v2444_v0  ;;  %1928 = vmatprep.mubr.msk.bf16.mxu0 %vm1114_vm0, %v2447_v1 }
  0xaf   :  { %1471 = vmatmul.mubr.bf16.gmra.mrb[52].mxu1 %v2446_v2  ;;  %1568 = vmatmul.mubr.bf16.gmra.mrb[52].mxu0 %v2449_v3 }
  0xb0   :  { %1478 = vmatprep.mubr.bf16.mxu1 %v2450_v4  ;;  %1929 = vmatprep.mubr.msk.bf16.mxu0 %vm1114_vm0, %v2453_v5 }
  0xb7   :  { %1479 = vmatmul.mubr.bf16.gmra.mrb[56].mxu1 %v2452_v6  ;;  %1576 = vmatmul.mubr.bf16.gmra.mrb[56].mxu0 %v2455_v7 }
  0xb8   :  { %1486 = vmatprep.mubr.bf16.mxu1 %v2456_v8  ;;  %1930 = vmatprep.mubr.msk.bf16.mxu0 %vm1114_vm0, %v2459_v9 }
  0xbf   :  { %1487 = vmatmul.mubr.bf16.gmra.mrb[60].mxu1 %v2458_v10  ;;  %1584 = vmatmul.mubr.bf16.gmra.mrb[60].mxu0 %v2461_v11 }
  0xc0   :  { %1494 = vmatprep.mubr.bf16.mxu1 %v2462_v12  ;;  %1931 = vmatprep.mubr.msk.bf16.mxu0 %vm1114_vm0, %v2465_v13 }
  0xc7   :  { %1495 = vmatmul.mubr.bf16.gmra.mrb[64].mxu1 %v2464_v14  ;;  %1592 = vmatmul.mubr.bf16.gmra.mrb[64].mxu0 %v2467_v15 }
  0xc8   :  { %1502 = vmatprep.mubr.bf16.mxu1 %v2468_v16  ;;  %1932 = vmatprep.mubr.msk.bf16.mxu0 %vm1114_vm0, %v2471_v17 }
  0xcf   :  { %1503 = vmatmul.mubr.bf16.gmra.mrb[68].mxu1 %v2470_v18  ;;  %1600 = vmatmul.mubr.bf16.gmra.mrb[68].mxu0 %v2473_v19 }
  0xd0   :  { %1510 = vmatprep.mubr.bf16.mxu1 %v2474_v20  ;;  %1933 = vmatprep.mubr.msk.bf16.mxu0 %vm1114_vm0, %v2477_v21 }
  0xd7   :  { %1511 = vmatmul.mubr.bf16.gmra.mrb[72].mxu1 %v2476_v22  ;;  %1608 = vmatmul.mubr.bf16.gmra.mrb[72].mxu0 %v2479_v23 }
  0xd8   :  { %1518 = vmatprep.mubr.bf16.mxu1 %v2480_v24  ;;  %1934 = vmatprep.mubr.msk.bf16.mxu0 %vm1114_vm0, %v2483_v25 }
  0xdf   :  { %1519 = vmatmul.mubr.bf16.gmra.mrb[76].mxu1 %v2482_v26  ;;  %1616 = vmatmul.mubr.bf16.gmra.mrb[76].mxu0 %v2485_v27 }
 0x11a   :  { %v2056_v28 = vpop.f32.mrb[0].mxu1  ;;  %v2032_v29 = vpop.f32.mrb[0].mxu0 }
 0x11b   :  { %v2057_v30 = vpop.f32.mrb[1].mxu1  ;;  %v2033_v31 = vpop.f32.mrb[1].mxu0 }
 0x11c   :  { %v3070_v32 = vadd.f32 %v2057_v30, %v2056_v28  ;;  %v2059_v33 = vpop.f32.mrb[2].mxu1  ;;  %v2034_v34 = vadd.f32 %v2033_v31, %v2032_v29  ;;  %v2035_v35 = vpop.f32.mrb[2].mxu0 }
 0x11d   :  { %v2060_v36 = vpop.f32.mrb[3].mxu1  ;;  %v2036_v37 = vpop.f32.mrb[3].mxu0 }
 0x11e   :  { %v3072_v38 = vadd.f32 %v2060_v36, %v2059_v33  ;;  %v2037_v39 = vadd.f32 %v2036_v37, %v2035_v35 }
 0x122   :  { %v2062_v40 = vpop.f32.mrb[4].mxu1  ;;  %v2038_v41 = vpop.f32.mrb[4].mxu0 }
 0x123   :  { %v2063_v42 = vpop.f32.mrb[5].mxu1  ;;  %v2039_v43 = vpop.f32.mrb[5].mxu0 }
 0x124   :  { %v3074_v44 = vadd.f32 %v2063_v42, %v2062_v40  ;;  %v2065_v45 = vpop.f32.mrb[6].mxu1  ;;  %v2040_v46 = vadd.f32 %v2039_v43, %v2038_v41  ;;  %v2041_v47 = vpop.f32.mrb[6].mxu0 }
 0x125   :  { %v2066_v48 = vpop.f32.mrb[7].mxu1  ;;  %v2042_v49 = vpop.f32.mrb[7].mxu0 }
 0x126   :  { %v3076_v50 = vadd.f32 %v2066_v48, %v2065_v45  ;;  %v2043_v51 = vadd.f32 %v2042_v49, %v2041_v47 }
 0x12a   :  { %v2068_v52 = vpop.f32.mrb[8].mxu1  ;;  %v2044_v53 = vpop.f32.mrb[8].mxu0 }
 0x12b   :  { %v2069_v54 = vpop.f32.mrb[9].mxu1  ;;  %v2045_v55 = vpop.f32.mrb[9].mxu0 }
 0x12c   :  { %v3078_v56 = vadd.f32 %v2069_v54, %v2068_v52  ;;  %v2071_v57 = vpop.f32.mrb[10].mxu1  ;;  %v2046_v58 = vadd.f32 %v2045_v55, %v2044_v53  ;;  %v2047_v59 = vpop.f32.mrb[10].mxu0 }
 0x12d   :  { %v2072_v60 = vpop.f32.mrb[11].mxu1  ;;  %v2048_v61 = vpop.f32.mrb[11].mxu0 }
 0x12e   :  { %v3080_v62 = vadd.f32 %v2072_v60, %v2071_v57  ;;  %v2049_v63 = vadd.f32 %v2048_v61, %v2047_v59 }
 0x132   :  { %v2074_v0 = vpop.f32.mrb[12].mxu1  ;;  %v2050_v1 = vpop.f32.mrb[12].mxu0 }
 0x133   :  { %v2075_v2 = vpop.f32.mrb[13].mxu1  ;;  %v2051_v3 = vpop.f32.mrb[13].mxu0 }
 0x134   :  { %v3082_v4 = vadd.f32 %v2075_v2, %v2074_v0  ;;  %v2077_v5 = vpop.f32.mrb[14].mxu1  ;;  %v3084_v6 = vadd.f32 %v2051_v3, %v2050_v1  ;;  %v2053_v7 = vpop.f32.mrb[14].mxu0 }
 0x135   :  { %v2078_v8 = vpop.f32.mrb[15].mxu1  ;;  %v2054_v9 = vpop.f32.mrb[15].mxu0 }
 0x136   :  { %v3086_v10 = vadd.f32 %v2078_v8, %v2077_v5  ;;  %v2055_v11 = vadd.f32 %v2054_v9, %v2053_v7 }
 0x13a   :  { %v2096_v12 = vpop.f32.mrb[16].mxu1  ;;  %v2160_v13 = vpop.f32.mrb[16].mxu0 }
 0x13b   :  { %v2097_v14 = vpop.f32.mrb[17].mxu1  ;;  %v2161_v15 = vpop.f32.mrb[17].mxu0 }
 0x13c   :  { %v2098_v16 = vadd.f32 %v2097_v14, %v2096_v12  ;;  %v2099_v17 = vpop.f32.mrb[18].mxu1  ;;  %v2162_v18 = vadd.f32 %v2161_v15, %v2160_v13  ;;  %v2163_v19 = vpop.f32.mrb[18].mxu0 }
 0x13d   :  { %v2100_v20 = vpop.f32.mrb[19].mxu1  ;;  %v2164_v21 = vpop.f32.mrb[19].mxu0 }
 0x13e   :  { %v1271_v22 = vadd.f32 %v2098_v16, %v2034_v34  ;;  %v2101_v23 = vadd.f32 %v2100_v20, %v2099_v17  ;;  %v2165_v24 = vadd.f32 %v2164_v21, %v2163_v19 }
 0x140   :  { %v1274_v25 = vadd.f32 %v2101_v23, %v2037_v39  ;;  %v3088_v26 = vadd.f32 %v2162_v18, %v1271_v22 }
 0x142   :  { %v3090_v27 = vadd.f32 %v2165_v24, %v1274_v25  ;;  %v2102_v28 = vpop.f32.mrb[20].mxu1  ;;  %v2166_v29 = vpop.f32.mrb[20].mxu0 }
 0x143   :  { %v2103_v30 = vpop.f32.mrb[21].mxu1  ;;  %v2167_v31 = vpop.f32.mrb[21].mxu0 }
 0x144   :  { %v2104_v33 = vadd.f32 %v2103_v30, %v2102_v28  ;;  %v2105_v35 = vpop.f32.mrb[22].mxu1  ;;  %v2168_v36 = vadd.f32 %v2167_v31, %v2166_v29  ;;  %v2169_v37 = vpop.f32.mrb[22].mxu0 }
 0x145   :  { %v2106_v40 = vpop.f32.mrb[23].mxu1  ;;  %v2170_v41 = vpop.f32.mrb[23].mxu0 }
 0x146   :  { %v1279_v42 = vadd.f32 %v2104_v33, %v2040_v46  ;;  %v2107_v43 = vadd.f32 %v2106_v40, %v2105_v35  ;;  %v2171_v34 = vadd.f32 %v2170_v41, %v2169_v37 }
 0x148   :  { %v1282_v45 = vadd.f32 %v2107_v43, %v2043_v51  ;;  %v3092_v47 = vadd.f32 %v2168_v36, %v1279_v42 }
 0x14a   :  { %v3094_v39 = vadd.f32 %v2171_v34, %v1282_v45  ;;  %v2108_v48 = vpop.f32.mrb[24].mxu1  ;;  %v2172_v49 = vpop.f32.mrb[24].mxu0 }
 0x14b   :  { %v2109_v52 = vpop.f32.mrb[25].mxu1  ;;  %v2173_v53 = vpop.f32.mrb[25].mxu0 }
 0x14c   :  { %v2110_v54 = vadd.f32 %v2109_v52, %v2108_v48  ;;  %v2111_v55 = vpop.f32.mrb[26].mxu1  ;;  %v2174_v57 = vadd.f32 %v2173_v53, %v2172_v49  ;;  %v2175_v59 = vpop.f32.mrb[26].mxu0 }
 0x14d   :  { %v2112_v60 = vpop.f32.mrb[27].mxu1  ;;  %v2176_v61 = vpop.f32.mrb[27].mxu0 }
 0x14e   :  { %v1287_v0 = vadd.f32 %v2110_v54, %v2046_v58  ;;  %v2113_v1 = vadd.f32 %v2112_v60, %v2111_v55  ;;  %v2177_v46 = vadd.f32 %v2176_v61, %v2175_v59 }
 0x150   :  { %v1290_v2 = vadd.f32 %v2113_v1, %v2049_v63  ;;  %v3096_v3 = vadd.f32 %v2174_v57, %v1287_v0 }
 0x152   :  { %v3098_v51 = vadd.f32 %v2177_v46, %v1290_v2  ;;  %v2114_v5 = vpop.f32.mrb[28].mxu1  ;;  %v2178_v7 = vpop.f32.mrb[28].mxu0 }
 0x153   :  { %v2115_v8 = vpop.f32.mrb[29].mxu1  ;;  %v2179_v9 = vpop.f32.mrb[29].mxu0 }
 0x154   :  { %v2116_v12 = vadd.f32 %v2115_v8, %v2114_v5  ;;  %v2117_v13 = vpop.f32.mrb[30].mxu1  ;;  %v2180_v14 = vadd.f32 %v2179_v9, %v2178_v7  ;;  %v2181_v15 = vpop.f32.mrb[30].mxu0 }
 0x155   :  { %v2118_v16 = vpop.f32.mrb[31].mxu1  ;;  %v2182_v17 = vpop.f32.mrb[31].mxu0 }
 0x156   :  { %v1295_v18 = vadd.f32 %v2116_v12, %v3084_v6  ;;  %v2119_v58 = vadd.f32 %v2118_v16, %v2117_v13  ;;  %v2183_v19 = vadd.f32 %v2182_v17, %v2181_v15 }
 0x158   :  { %v1298_v20 = vadd.f32 %v2119_v58, %v2055_v11  ;;  %v3101_v63 = vadd.f32 %v2180_v14, %v1295_v18 }
 0x15a   :  { %v3103_v21 = vadd.f32 %v2183_v19, %v1298_v20  ;;  %v2120_v22 = vpop.f32.mrb[32].mxu1  ;;  %v2184_v23 = vpop.f32.mrb[32].mxu0 }
 0x15b   :  { %v2121_v24 = vpop.f32.mrb[33].mxu1  ;;  %v2185_v25 = vpop.f32.mrb[33].mxu0 }
 0x15c   :  { %v2122_v28 = vadd.f32 %v2121_v24, %v2120_v22  ;;  %v2123_v29 = vpop.f32.mrb[34].mxu1  ;;  %v2186_v30 = vadd.f32 %v2185_v25, %v2184_v23  ;;  %v2187_v31 = vpop.f32.mrb[34].mxu0 }
 0x15d   :  { %v2124_v33 = vpop.f32.mrb[35].mxu1  ;;  %v2188_v35 = vpop.f32.mrb[35].mxu0 }
 0x15e   :  { %v1303_v36 = vadd.f32 %v2122_v28, %v3070_v32  ;;  %v2125_v6 = vadd.f32 %v2124_v33, %v2123_v29  ;;  %v2189_v37 = vadd.f32 %v2188_v35, %v2187_v31 }
 0x160   :  { %v1306_v11 = vadd.f32 %v2125_v6, %v3072_v38  ;;  %v3107_v40 = vadd.f32 %v2186_v30, %v1303_v36 }
 0x162   :  { %v3109_v41 = vadd.f32 %v2189_v37, %v1306_v11  ;;  %v2126_v42 = vpop.f32.mrb[36].mxu1  ;;  %v2190_v43 = vpop.f32.mrb[36].mxu0 }
 0x163   :  { %v2127_v34 = vpop.f32.mrb[37].mxu1  ;;  %v2191_v45 = vpop.f32.mrb[37].mxu0 }
 0x164   :  { %v2128_v48 = vadd.f32 %v2127_v34, %v2126_v42  ;;  %v2129_v49 = vpop.f32.mrb[38].mxu1  ;;  %v2192_v52 = vadd.f32 %v2191_v45, %v2190_v43  ;;  %v2193_v53 = vpop.f32.mrb[38].mxu0 }
 0x165   :  { %v2130_v54 = vpop.f32.mrb[39].mxu1  ;;  %v2194_v55 = vpop.f32.mrb[39].mxu0 }
 0x166   :  { %v1311_v32 = vadd.f32 %v2128_v48, %v3074_v44  ;;  %v2131_v57 = vadd.f32 %v2130_v54, %v2129_v49  ;;  %v2195_v59 = vadd.f32 %v2194_v55, %v2193_v53  ;;  %v3133_v54 = vld [vmem:[#allocation4] ss:$0 sm:$0xff] }
 0x168   :  { %v1314_v38 = vadd.f32 %v2131_v57, %v3076_v50  ;;  %v3113_v60 = vadd.f32 %v2192_v52, %v1311_v32  ;;  %v3130_v52 = vld [vmem:[#allocation2] ss:$0 sm:$0xff] }
 0x16a   :  { %v3115_v61 = vadd.f32 %v2195_v59, %v1314_v38  ;;  %v2132_v0 = vpop.f32.mrb[40].mxu1  ;;  %v2196_v1 = vpop.f32.mrb[40].mxu0 }
 0x16b   :  { %v2133_v46 = vpop.f32.mrb[41].mxu1  ;;  %v2197_v2 = vpop.f32.mrb[41].mxu0 }
 0x16c   :  { %v2134_v5 = vadd.f32 %v2133_v46, %v2132_v0  ;;  %v2135_v7 = vpop.f32.mrb[42].mxu1  ;;  %v2198_v8 = vadd.f32 %v2197_v2, %v2196_v1  ;;  %v2199_v9 = vpop.f32.mrb[42].mxu0 }
 0x16d   :  { %v2136_v12 = vpop.f32.mrb[43].mxu1  ;;  %v2200_v13 = vpop.f32.mrb[43].mxu0 }
 0x16e   :  { %v1319_v44 = vadd.f32 %v2134_v5, %v3078_v56  ;;  %v2137_v14 = vadd.f32 %v2136_v12, %v2135_v7  ;;  %v2201_v15 = vadd.f32 %v2200_v13, %v2199_v9 }
 0x170   :  { %v1322_v50 = vadd.f32 %v2137_v14, %v3080_v62  ;;  %v3119_v16 = vadd.f32 %v2198_v8, %v1319_v44 }
 0x172   :  { %v3121_v17 = vadd.f32 %v2201_v15, %v1322_v50  ;;  %v2138_v18 = vpop.f32.mrb[44].mxu1  ;;  %v2202_v58 = vpop.f32.mrb[44].mxu0 }
 0x173   :  { %v2139_v19 = vpop.f32.mrb[45].mxu1  ;;  %v2203_v20 = vpop.f32.mrb[45].mxu0 }
 0x174   :  { %v2140_v22 = vadd.f32 %v2139_v19, %v2138_v18  ;;  %v2141_v23 = vpop.f32.mrb[46].mxu1  ;;  %v2204_v24 = vadd.f32 %v2203_v20, %v2202_v58  ;;  %v2205_v25 = vpop.f32.mrb[46].mxu0 }
 0x175   :  { %v2142_v28 = vpop.f32.mrb[47].mxu1  ;;  %v2206_v29 = vpop.f32.mrb[47].mxu0 }
 0x176   :  { %v1327_v56 = vadd.f32 %v2140_v22, %v3082_v4  ;;  %v2143_v30 = vadd.f32 %v2142_v28, %v2141_v23  ;;  %v2207_v31 = vadd.f32 %v2206_v29, %v2205_v25 }
 0x178   :  { %v1330_v62 = vadd.f32 %v2143_v30, %v3086_v10  ;;  %v3125_v33 = vadd.f32 %v2204_v24, %v1327_v56 }
 0x17a   :  { %v3127_v35 = vadd.f32 %v2207_v31, %v1330_v62  ;;  %v2224_v36 = vpop.f32.mrb[48].mxu1  ;;  %v1561_v6 = vpop.f32.mrb[48].mxu0 }
 0x17b   :  { %v2225_v37 = vpop.f32.mrb[49].mxu1  ;;  %v1563_v11 = vpop.f32.mrb[49].mxu0 }
 0x17c   :  { %v2226_v42 = vadd.f32 %v2225_v37, %v2224_v36  ;;  %v2227_v43 = vpop.f32.mrb[50].mxu1  ;;  %v1564_v34 = vpop.f32.mrb[50].mxu0 }
 0x17d   :  { %v2228_v45 = vpop.f32.mrb[51].mxu1  ;;  %v1566_v48 = vpop.f32.mrb[51].mxu0 }
 0x17e   :  { %v2229_v49 = vadd.f32 %v2228_v45, %v2227_v43  ;;  %v1465_v4 = vadd.f32 %v2226_v42, %v3088_v26 }
 0x180   :  { %v1562_v53 = vadd.f32 %v1561_v6, %v1465_v4  ;;  %v1468_v10 = vadd.f32 %v2229_v49, %v3090_v27 }
 0x182   :  { %v1631_v55 = vmul.f32 %v3130_v52, %v1562_v53  ;;  %v1565_v32 = vadd.f32 %v1564_v34, %v1468_v10  ;;  %v2230_v57 = vpop.f32.mrb[52].mxu1  ;;  %v1569_v59 = vpop.f32.mrb[52].mxu0 }
 0x183   :  { %v2231_v38 = vpop.f32.mrb[53].mxu1  ;;  %v1571_v0 = vpop.f32.mrb[53].mxu0 }
 0x184   :  { %v1654_v1 = vadd.f32 %v3133_v54, %v1631_v55  ;;  %v1632_v46 = vmul.f32 %v3130_v52, %v1565_v32  ;;  %v2232_v2 = vadd.f32 %v2231_v38, %v2230_v57  ;;  %v2233_v26 = vpop.f32.mrb[54].mxu1  ;;  %v1572_v5 = vpop.f32.mrb[54].mxu0 }
 0x185   :  { %v2234_v7 = vpop.f32.mrb[55].mxu1  ;;  %v1574_v8 = vpop.f32.mrb[55].mxu0 }
 0x186   :  { %v1655_v27 = vadd.f32 %v3133_v54, %v1632_v46  ;;  %v2235_v9 = vadd.f32 %v2234_v7, %v2233_v26  ;;  %v1473_v12 = vadd.f32 %v2232_v2, %v3092_v47  ;;  %v1670_v13 = vmax.f32 %v1654_v1, 0.0 }
 0x188   :  { %v1671_v44 = vmax.f32 %v1655_v27, 0.0  ;;  %v1570_v14 = vadd.f32 %v1569_v59, %v1473_v12  ;;  %v1476_v15 = vadd.f32 %v2235_v9, %v3094_v39 }
 0x18a   :  { %v1972_v50 = vpack.c.bf16 %v1671_v44, %v1670_v13  ;;  %v1633_v18 = vmul.f32 %v3130_v52, %v1570_v14  ;;  %v1573_v58 = vadd.f32 %v1572_v5, %v1476_v15  ;;  %v2236_v19 = vpop.f32.mrb[56].mxu1  ;;  %v1577_v20 = vpop.f32.mrb[56].mxu0 }
 0x18b   :  { %v2237_v22 = vpop.f32.mrb[57].mxu1  ;;  %v1579_v23 = vpop.f32.mrb[57].mxu0 }
 0x18c   :  { %1973 = vst [vmem:[%s3209_s4] sm:$0xff] %v1972_v50   ;;  %v1656_v24 = vadd.f32 %v3133_v54, %v1633_v18  ;;  %v1634_v47 = vmul.f32 %v3130_v52, %v1573_v58  ;;  %v2238_v25 = vadd.f32 %v2237_v22, %v2236_v19  ;;  %v2239_v28 = vpop.f32.mrb[58].mxu1  ;;  %v1580_v29 = vpop.f32.mrb[58].mxu0 }
 0x18d   :  { %v2240_v39 = vpop.f32.mrb[59].mxu1  ;;  %v1582_v56 = vpop.f32.mrb[59].mxu0 }
 0x18e   :  { %v1657_v30 = vadd.f32 %v3133_v54, %v1634_v47  ;;  %v2241_v31 = vadd.f32 %v2240_v39, %v2239_v28  ;;  %v1481_v62 = vadd.f32 %v2238_v25, %v3096_v3  ;;  %v1672_v36 = vmax.f32 %v1656_v24, 0.0 }
 0x190   :  { %v1673_v6 = vmax.f32 %v1657_v30, 0.0  ;;  %v1578_v37 = vadd.f32 %v1577_v20, %v1481_v62  ;;  %v1484_v11 = vadd.f32 %v2241_v31, %v3098_v51 }
 0x192   :  { %v1977_v42 = vpack.c.bf16 %v1673_v6, %v1672_v36  ;;  %v1635_v43 = vmul.f32 %v3130_v52, %v1578_v37  ;;  %v1581_v34 = vadd.f32 %v1580_v29, %v1484_v11  ;;  %v2242_v45 = vpop.f32.mrb[60].mxu1  ;;  %v1585_v48 = vpop.f32.mrb[60].mxu0 }
 0x193   :  { %v2243_v49 = vpop.f32.mrb[61].mxu1  ;;  %v1587_v4 = vpop.f32.mrb[61].mxu0 }
 0x194   :  { %2009 = vst [vmem:[%s3209_s4 + $0x8] sm:$0xff] %v1977_v42   ;;  %v1658_v53 = vadd.f32 %v3133_v54, %v1635_v43  ;;  %v1636_v3 = vmul.f32 %v3130_v52, %v1581_v34  ;;  %v2244_v10 = vadd.f32 %v2243_v49, %v2242_v45  ;;  %v2245_v55 = vpop.f32.mrb[62].mxu1  ;;  %v1588_v32 = vpop.f32.mrb[62].mxu0 }
 0x195   :  { %v2246_v51 = vpop.f32.mrb[63].mxu1  ;;  %v1590_v57 = vpop.f32.mrb[63].mxu0 }
 0x196   :  { %v1659_v59 = vadd.f32 %v3133_v54, %v1636_v3  ;;  %v2247_v38 = vadd.f32 %v2246_v51, %v2245_v55  ;;  %v1489_v0 = vadd.f32 %v2244_v10, %v3101_v63  ;;  %v1674_v1 = vmax.f32 %v1658_v53, 0.0 }
 0x198   :  { %v1675_v46 = vmax.f32 %v1659_v59, 0.0  ;;  %v1586_v2 = vadd.f32 %v1585_v48, %v1489_v0  ;;  %v1492_v26 = vadd.f32 %v2247_v38, %v3103_v21 }
 0x19a   :  { %v1982_v5 = vpack.c.bf16 %v1675_v46, %v1674_v1  ;;  %v1637_v7 = vmul.f32 %v3130_v52, %v1586_v2  ;;  %v1589_v8 = vadd.f32 %v1588_v32, %v1492_v26  ;;  %v2248_v27 = vpop.f32.mrb[64].mxu1  ;;  %v1593_v9 = vpop.f32.mrb[64].mxu0 }
 0x19b   :  { %v2249_v12 = vpop.f32.mrb[65].mxu1  ;;  %v1595_v13 = vpop.f32.mrb[65].mxu0 }
 0x19c   :  { %2010 = vst [vmem:[%s3209_s4 + $0x10] sm:$0xff] %v1982_v5   ;;  %v1660_v44 = vadd.f32 %v3133_v54, %v1637_v7  ;;  %v1638_v63 = vmul.f32 %v3130_v52, %v1589_v8  ;;  %v2250_v14 = vadd.f32 %v2249_v12, %v2248_v27  ;;  %v2251_v15 = vpop.f32.mrb[66].mxu1  ;;  %v1596_v50 = vpop.f32.mrb[66].mxu0 }
 0x19d   :  { %v2252_v21 = vpop.f32.mrb[67].mxu1  ;;  %v1598_v18 = vpop.f32.mrb[67].mxu0 }
 0x19e   :  { %v1661_v58 = vadd.f32 %v3133_v54, %v1638_v63  ;;  %v2253_v19 = vadd.f32 %v2252_v21, %v2251_v15  ;;  %v1497_v20 = vadd.f32 %v2250_v14, %v3107_v40  ;;  %v1676_v22 = vmax.f32 %v1660_v44, 0.0 }
 0x1a0   :  { %v1677_v23 = vmax.f32 %v1661_v58, 0.0  ;;  %v1594_v24 = vadd.f32 %v1593_v9, %v1497_v20  ;;  %v1500_v47 = vadd.f32 %v2253_v19, %v3109_v41 }
 0x1a2   :  { %v1987_v25 = vpack.c.bf16 %v1677_v23, %v1676_v22  ;;  %v1639_v28 = vmul.f32 %v3130_v52, %v1594_v24  ;;  %v1597_v29 = vadd.f32 %v1596_v50, %v1500_v47  ;;  %v2254_v39 = vpop.f32.mrb[68].mxu1  ;;  %v1601_v56 = vpop.f32.mrb[68].mxu0 }
 0x1a3   :  { %v2255_v30 = vpop.f32.mrb[69].mxu1  ;;  %v1603_v31 = vpop.f32.mrb[69].mxu0 }
 0x1a4   :  { %2011 = vst [vmem:[%s3209_s4 + $0x18] sm:$0xff] %v1987_v25   ;;  %v1662_v62 = vadd.f32 %v3133_v54, %v1639_v28  ;;  %v1640_v40 = vmul.f32 %v3130_v52, %v1597_v29  ;;  %v2256_v36 = vadd.f32 %v2255_v30, %v2254_v39  ;;  %v2257_v6 = vpop.f32.mrb[70].mxu1  ;;  %v1604_v37 = vpop.f32.mrb[70].mxu0 }
 0x1a5   :  { %v2258_v41 = vpop.f32.mrb[71].mxu1  ;;  %v1606_v11 = vpop.f32.mrb[71].mxu0 }
 0x1a6   :  { %v1663_v42 = vadd.f32 %v3133_v54, %v1640_v40  ;;  %v2259_v43 = vadd.f32 %v2258_v41, %v2257_v6  ;;  %v1505_v34 = vadd.f32 %v2256_v36, %v3113_v60  ;;  %v1678_v45 = vmax.f32 %v1662_v62, 0.0 }
 0x1a8   :  { %v1679_v48 = vmax.f32 %v1663_v42, 0.0  ;;  %v1602_v49 = vadd.f32 %v1601_v56, %v1505_v34  ;;  %v1508_v4 = vadd.f32 %v2259_v43, %v3115_v61 }
 0x1aa   :  { %v1992_v53 = vpack.c.bf16 %v1679_v48, %v1678_v45  ;;  %v1641_v3 = vmul.f32 %v3130_v52, %v1602_v49  ;;  %v1605_v10 = vadd.f32 %v1604_v37, %v1508_v4  ;;  %v2260_v55 = vpop.f32.mrb[72].mxu1  ;;  %v1609_v32 = vpop.f32.mrb[72].mxu0 }
 0x1ab   :  { %v2261_v51 = vpop.f32.mrb[73].mxu1  ;;  %v1611_v57 = vpop.f32.mrb[73].mxu0 }
 0x1ac   :  { %2012 = vst [vmem:[%s3209_s4 + $0x20] sm:$0xff] %v1992_v53   ;;  %v1664_v59 = vadd.f32 %v3133_v54, %v1641_v3  ;;  %v1642_v60 = vmul.f32 %v3130_v52, %v1605_v10  ;;  %v2262_v38 = vadd.f32 %v2261_v51, %v2260_v55  ;;  %v2263_v0 = vpop.f32.mrb[74].mxu1  ;;  %v1612_v1 = vpop.f32.mrb[74].mxu0 }
 0x1ad   :  { %v2264_v61 = vpop.f32.mrb[75].mxu1  ;;  %v1614_v46 = vpop.f32.mrb[75].mxu0 }
 0x1ae   :  { %v1665_v2 = vadd.f32 %v3133_v54, %v1642_v60  ;;  %v2265_v26 = vadd.f32 %v2264_v61, %v2263_v0  ;;  %v1513_v5 = vadd.f32 %v2262_v38, %v3119_v16  ;;  %v1680_v7 = vmax.f32 %v1664_v59, 0.0 }
 0x1b0   :  { %v1681_v8 = vmax.f32 %v1665_v2, 0.0  ;;  %v1610_v27 = vadd.f32 %v1609_v32, %v1513_v5  ;;  %v1516_v9 = vadd.f32 %v2265_v26, %v3121_v17 }
 0x1b2   :  { %v1997_v12 = vpack.c.bf16 %v1681_v8, %v1680_v7  ;;  %v1643_v13 = vmul.f32 %v3130_v52, %v1610_v27  ;;  %v1613_v44 = vadd.f32 %v1612_v1, %v1516_v9  ;;  %v2266_v63 = vpop.f32.mrb[76].mxu1  ;;  %v1617_v14 = vpop.f32.mrb[76].mxu0 }
 0x1b3   :  { %v2267_v15 = vpop.f32.mrb[77].mxu1  ;;  %v1619_v50 = vpop.f32.mrb[77].mxu0 }
 0x1b4   :  { %2013 = vst [vmem:[%s3209_s4 + $0x28] sm:$0xff] %v1997_v12   ;;  %v1666_v21 = vadd.f32 %v3133_v54, %v1643_v13  ;;  %v1644_v16 = vmul.f32 %v3130_v52, %v1613_v44  ;;  %v2268_v18 = vadd.f32 %v2267_v15, %v2266_v63  ;;  %v2269_v58 = vpop.f32.mrb[78].mxu1  ;;  %v1620_v19 = vpop.f32.mrb[78].mxu0 }
 0x1b5   :  { %v2270_v17 = vpop.f32.mrb[79].mxu1  ;;  %v1622_v20 = vpop.f32.mrb[79].mxu0 }
 0x1b6   :  { %v1667_v22 = vadd.f32 %v3133_v54, %v1644_v16  ;;  %v2271_v23 = vadd.f32 %v2270_v17, %v2269_v58  ;;  %v1521_v24 = vadd.f32 %v2268_v18, %v3125_v33  ;;  %v1682_v47 = vmax.f32 %v1666_v21, 0.0 }
 0x1b8   :  { %v1683_v25 = vmax.f32 %v1667_v22, 0.0  ;;  %v1618_v28 = vadd.f32 %v1617_v14, %v1521_v24  ;;  %v1524_v29 = vadd.f32 %v2271_v23, %v3127_v35 }
 0x1ba   :  { %v2002_v39 = vpack.c.bf16 %v1683_v25, %v1682_v47  ;;  %v1645_v56 = vmul.f32 %v3130_v52, %v1618_v28  ;;  %v1621_v30 = vadd.f32 %v1620_v19, %v1524_v29 }
 0x1bc   :  { %2014 = vst [vmem:[%s3209_s4 + $0x30] sm:$0xff] %v2002_v39   ;;  %v1668_v31 = vadd.f32 %v3133_v54, %v1645_v56  ;;  %v1646_v62 = vmul.f32 %v3130_v52, %v1621_v30 }
 0x1be   :  { %v1669_v40 = vadd.f32 %v3133_v54, %v1646_v62  ;;  %v1684_v33 = vmax.f32 %v1668_v31, 0.0 }
 0x1c0   :  { %v1685_v36 = vmax.f32 %v1669_v40, 0.0 }
 0x1c2   :  { %v2007_v6 = vpack.c.bf16 %v1685_v36, %v1684_v33 }
 0x1c4   :  { %2015 = vst [vmem:[%s3209_s4 + $0x38] sm:$0xff] %v2007_v6  }
 0x1c5   :  { %1770 = vsyncpa [#allocation3], 1 }
 0x1c6   :  { %1771 = vsyncpa [#allocation5], 1 }

// kernel: faceboxes_forward.25
= control target key start
LH: loop header
LB: loop body
LE: loop exit
PB: predicated region body
PF: predicated region fallthrough
CT: control target
= control target key end

     0   :  { %v338_v0 = vmov 0   ;;  %vm148_vm0 = vcmask 719872   ;;  %vm155_vm1 = vcmask 1043456   ;;  %vm250_vm2 = vcmask 257024   ;;  %s464_s1 = inlined_call_operand.vmem [shape: bf16[216,32], index: 1, kind: input, shape index: {}]   ;;  %s465_s0 = inlined_call_operand.vmem [shape: bf16[32,216], index: 0, kind: input, shape index: {}]   ;;  %s466_s2 = inlined_call_operand.vmem [shape: f32[1,32], index: 2, kind: input, shape index: {}]   ;;  %s467_s3 = inlined_call_operand.vmem [shape: f32[1,32], index: 3, kind: input, shape index: {}]   ;;  %s468_s4 = inlined_call_operand.vmem [shape: bf16[32,32], index: 4, kind: output, shape index: {}]  }
   0x1   :  { %159 = vmatprep.subr.bf16.mxu0 %v338_v0  ;;  %289 = vmatprep.subr.bf16.mxu1 %v338_v0  ;;  %v318_v1 = vld [vmem:[%s464_s1] sm:$0xff]   ;;  %v319_v2 = vld [vmem:[%s464_s1 + $0x8] sm:$0xff]   ;;  %v320_v3 = vld [vmem:[%s464_s1 + $0x10] sm:$0xff]  }
   0x2   :  { %160 = vmatpush1.bf16.msra.mxu0 %v318_v1  ;;  %303 = vmatpush1.bf16.msra.mxu1 %v318_v1  ;;  %v321_v4 = vld [vmem:[%s464_s1 + $0x18] sm:$0xff]   ;;  %v322_v5 = vld [vmem:[%s464_s1 + $0x20] sm:$0xff]   ;;  %v323_v8 = vld [vmem:[%s464_s1 + $0x28] sm:$0xff]  }
   0x3   :  { %161 = vmatprep.subr.bf16.mxu0 %v338_v0  ;;  %290 = vmatprep.subr.bf16.mxu1 %v338_v0  ;;  %v334_v6 = vld [vmem:[%s465_s0 + $0x4] ss:$8 sps:$4 sm:$0xff]   ;;  %v337_v7 = vld [vmem:[%s465_s0 + $0x14] ss:$8 sps:$4 sm:$0xff]   ;;  %v331_v16 = vld [vmem:[%s464_s1 + $0x68] ss:$0 sps:$4 sm:$0xff]  }
   0x4   :  { %277 = vmatprep.mubr.msk.bf16.mxu0 %vm148_vm0, %v334_v6  ;;  %278 = vmatprep.mubr.msk.bf16.mxu1 %vm148_vm0, %v337_v7  ;;  %v324_v9 = vld [vmem:[%s464_s1 + $0x30] sm:$0xff]   ;;  %v325_v10 = vld [vmem:[%s464_s1 + $0x38] sm:$0xff]   ;;  %v326_v11 = vld [vmem:[%s464_s1 + $0x40] sm:$0xff]   ;;  %v157_v17 = vsel %vm155_vm1, %v331_v16, 0 }
   0x5   :  { %v327_v12 = vld [vmem:[%s464_s1 + $0x48] sm:$0xff]   ;;  %v328_v13 = vld [vmem:[%s464_s1 + $0x50] sm:$0xff]   ;;  %v329_v14 = vld [vmem:[%s464_s1 + $0x58] sm:$0xff]  }
   0x6   :  { %162 = vmatpush1.bf16.msra.mxu0 %v319_v2  ;;  %304 = vmatpush1.bf16.msra.mxu1 %v319_v2  ;;  %v330_v15 = vld [vmem:[%s464_s1 + $0x60] sm:$0xff]   ;;  %v335_v19 = vld [vmem:[%s465_s0 + $0x10] ss:$8 sps:$4 sm:$0xff]  }
   0x7   :  { %163 = vmatprep.subr.bf16.mxu0 %v338_v0  ;;  %291 = vmatprep.subr.bf16.mxu1 %v338_v0  ;;  %v332_v18 = vld [vmem:[%s465_s0] ss:$8 sps:$4 sm:$0xff]  }
   0x8   :  { %v279_v20 = vld [vmem:[%s466_s2] ss:$0 sm:$0xff] }
   0x9   :  { %v280_v22 = vld [vmem:[%s467_s3] ss:$0 sm:$0xff] }
   0xa   :  { %164 = vmatpush1.bf16.msra.mxu0 %v320_v3  ;;  %305 = vmatpush1.bf16.msra.mxu1 %v320_v3 }
   0xb   :  { %165 = vmatprep.subr.bf16.mxu0 %v338_v0  ;;  %292 = vmatprep.subr.bf16.mxu1 %v338_v0 }
   0xe   :  { %166 = vmatpush1.bf16.msra.mxu0 %v321_v4  ;;  %306 = vmatpush1.bf16.msra.mxu1 %v321_v4 }
   0xf   :  { %167 = vmatprep.subr.bf16.mxu0 %v338_v0  ;;  %293 = vmatprep.subr.bf16.mxu1 %v338_v0 }
  0x12   :  { %168 = vmatpush1.bf16.msra.mxu0 %v322_v5  ;;  %307 = vmatpush1.bf16.msra.mxu1 %v322_v5 }
  0x13   :  { %169 = vmatprep.subr.bf16.mxu0 %v338_v0  ;;  %294 = vmatprep.subr.bf16.mxu1 %v338_v0 }
  0x16   :  { %170 = vmatpush1.bf16.msra.mxu0 %v323_v8  ;;  %308 = vmatpush1.bf16.msra.mxu1 %v323_v8 }
  0x17   :  { %171 = vmatprep.subr.bf16.mxu0 %v338_v0  ;;  %295 = vmatprep.subr.bf16.mxu1 %v338_v0 }
  0x1a   :  { %172 = vmatpush1.bf16.msra.mxu0 %v324_v9  ;;  %309 = vmatpush1.bf16.msra.mxu1 %v324_v9 }
  0x1b   :  { %173 = vmatprep.subr.bf16.mxu0 %v338_v0  ;;  %296 = vmatprep.subr.bf16.mxu1 %v338_v0 }
  0x1e   :  { %174 = vmatpush1.bf16.msra.mxu0 %v325_v10  ;;  %310 = vmatpush1.bf16.msra.mxu1 %v325_v10 }
  0x1f   :  { %175 = vmatprep.subr.bf16.mxu0 %v338_v0  ;;  %297 = vmatprep.subr.bf16.mxu1 %v338_v0 }
  0x22   :  { %176 = vmatpush1.bf16.msra.mxu0 %v326_v11  ;;  %311 = vmatpush1.bf16.msra.mxu1 %v326_v11 }
  0x23   :  { %177 = vmatprep.subr.bf16.mxu0 %v338_v0  ;;  %298 = vmatprep.subr.bf16.mxu1 %v338_v0 }
  0x26   :  { %178 = vmatpush1.bf16.msra.mxu0 %v327_v12  ;;  %312 = vmatpush1.bf16.msra.mxu1 %v327_v12 }
  0x27   :  { %179 = vmatprep.subr.bf16.mxu0 %v338_v0  ;;  %299 = vmatprep.subr.bf16.mxu1 %v338_v0 }
  0x2a   :  { %180 = vmatpush1.bf16.msra.mxu0 %v328_v13  ;;  %313 = vmatpush1.bf16.msra.mxu1 %v328_v13 }
  0x2b   :  { %181 = vmatprep.subr.bf16.mxu0 %v338_v0  ;;  %300 = vmatprep.subr.bf16.mxu1 %v338_v0 }
  0x2e   :  { %182 = vmatpush1.bf16.msra.mxu0 %v329_v14  ;;  %314 = vmatpush1.bf16.msra.mxu1 %v329_v14 }
  0x2f   :  { %183 = vmatprep.subr.bf16.mxu0 %v338_v0  ;;  %301 = vmatprep.subr.bf16.mxu1 %v338_v0 }
  0x32   :  { %184 = vmatpush1.bf16.msra.mxu0 %v330_v15  ;;  %315 = vmatpush1.bf16.msra.mxu1 %v330_v15 }
  0x33   :  { %185 = vmatprep.subr.bf16.mxu0 %v338_v0  ;;  %302 = vmatprep.subr.bf16.mxu1 %v338_v0 }
  0x36   :  { %186 = vmatpush1.bf16.msra.mxu0 %v157_v17  ;;  %316 = vmatpush1.bf16.msra.mxu1 %v157_v17 }
  0x39   :  { %192 = vmatmul.mubr.bf16.vlgmr.msra.gmra.mrb[0].mxu0 %v332_v18  ;;  %200 = vmatmul.mubr.bf16.vlgmr.msra.gmra.mrb[0].mxu1 %v335_v19 }
 0x10c   :  { %v193_v21 = vpop.f32.mrb[0].mxu0  ;;  %v201_v23 = vpop.f32.mrb[0].mxu1 }
 0x10d   :  { %v215_v24 = vmul.f32 %v279_v20, %v193_v21  ;;  %v217_v25 = vmul.f32 %v279_v20, %v201_v23  ;;  %v195_v26 = vpop.f32.mrb[1].mxu0  ;;  %v203_v27 = vpop.f32.mrb[1].mxu1 }
 0x10e   :  { %v196_v28 = vpop.f32.mrb[2].mxu0  ;;  %v204_v29 = vpop.f32.mrb[2].mxu1 }
 0x10f   :  { %v226_v30 = vadd.f32 %v280_v22, %v215_v24  ;;  %v228_v31 = vadd.f32 %v280_v22, %v217_v25  ;;  %v216_v32 = vmul.f32 %v279_v20, %v196_v28  ;;  %v218_v33 = vmul.f32 %v279_v20, %v204_v29  ;;  %v198_v34 = vpop.f32.mrb[3].mxu0  ;;  %v206_v35 = vpop.f32.mrb[3].mxu1 }
 0x111   :  { %v230_v36 = vmax.f32 %v226_v30, 0.0  ;;  %v232_v37 = vmax.f32 %v228_v31, 0.0  ;;  %v227_v38 = vadd.f32 %v280_v22, %v216_v32  ;;  %v229_v39 = vadd.f32 %v280_v22, %v218_v33 }
 0x113   :  { %v285_v40 = vpack.c.bf16 %v230_v36, %v230_v36  ;;  %v287_v41 = vpack.c.bf16 %v232_v37, %v232_v37  ;;  %v231_v42 = vmax.f32 %v227_v38, 0.0  ;;  %v233_v43 = vmax.f32 %v229_v39, 0.0 }
 0x115   :  { %251 = vst.msk [vmem:[%s468_s4] sm:$0xf] %vm250_vm2, %v285_v40  ;;  %253 = vst.msk [vmem:[%s468_s4 + $0x8] sm:$0xf] %vm250_vm2, %v287_v41  ;;  %v286_v44 = vpack.c.bf16 %v231_v42, %v231_v42  ;;  %v288_v45 = vpack.c.bf16 %v233_v43, %v233_v43 }
 0x117   :  { %252 = vst.msk [vmem:[%s468_s4 + $0x4] sm:$0xf] %vm250_vm2, %v286_v44  ;;  %254 = vst.msk [vmem:[%s468_s4 + $0xc] sm:$0xf] %vm250_vm2, %v288_v45 }

// kernel: faceboxes_forward.27
= control target key start
LH: loop header
LB: loop body
LE: loop exit
PB: predicated region body
PF: predicated region fallthrough
CT: control target
= control target key end

     0   :  { %vm200_vm0 = vcmask 261120   ;;  %vm347_vm1 = vcmask 257024   ;;  %s577_s1 = inlined_call_operand.vmem [shape: bf16[288,32], index: 1, kind: input, shape index: {}]   ;;  %s578_s0 = inlined_call_operand.vmem [shape: bf16[32,288], index: 0, kind: input, shape index: {}]   ;;  %s579_s2 = inlined_call_operand.vmem [shape: f32[1,32], index: 2, kind: input, shape index: {}]   ;;  %s580_s3 = inlined_call_operand.vmem [shape: f32[1,32], index: 3, kind: input, shape index: {}]   ;;  %s581_s4 = inlined_call_operand.vmem [shape: bf16[32,32], index: 4, kind: output, shape index: {}]  }
   0x1   :  { %v432_v0 = vld [vmem:[%s577_s1 + $0x40] sm:$0xff]   ;;  %v434_v2 = vld [vmem:[%s577_s1 + $0x48] sm:$0xff]   ;;  %v436_v4 = vld [vmem:[%s577_s1 + $0x50] sm:$0xff]  }
   0x2   :  { %v433_v1 = vld [vmem:[%s577_s1] sm:$0xff]   ;;  %392 = vmatprep.subr.bf16.mxu0 %v432_v0  ;;  %v435_v3 = vld [vmem:[%s577_s1 + $0x8] sm:$0xff]   ;;  %v437_v5 = vld [vmem:[%s577_s1 + $0x10] sm:$0xff]  }
   0x3   :  { %393 = vmatpush3.bf16.msra.mxu0 %v433_v1  ;;  %v438_v6 = vld [vmem:[%s577_s1 + $0x58] sm:$0xff]   ;;  %v440_v8 = vld [vmem:[%s577_s1 + $0x60] sm:$0xff]   ;;  %v442_v11 = vld [vmem:[%s577_s1 + $0x68] sm:$0xff]  }
   0x4   :  { %394 = vmatprep.subr.bf16.mxu0 %v434_v2  ;;  %v439_v7 = vld [vmem:[%s577_s1 + $0x18] sm:$0xff]   ;;  %v446_v9 = vld [vmem:[%s577_s1 + $0x80] sm:$0xff]   ;;  %v443_v12 = vld [vmem:[%s577_s1 + $0x28] sm:$0xff]  }
   0x5   :  { %v441_v10 = vld [vmem:[%s577_s1 + $0x20] sm:$0xff]   ;;  %424 = vmatprep.subr.bf16.mxu1 %v446_v9  ;;  %v449_v13 = vld [vmem:[%s577_s1 + $0x88] sm:$0xff]   ;;  %v444_v14 = vld [vmem:[%s577_s1 + $0x70] sm:$0xff]  }
   0x6   :  { %425 = vmatpush3.bf16.msra.mxu1 %v446_v9  ;;  %v452_v15 = vld [vmem:[%s578_s0 + $0x4] ss:$12 sps:$4 sm:$0xff]   ;;  %v453_v16 = vld [vmem:[%s578_s0 + $0x8] ss:$12 sps:$4 sm:$0xff]   ;;  %v454_v17 = vld [vmem:[%s578_s0 + $0x20] ss:$12 sps:$4 sm:$0xff]  }
   0x7   :  { %395 = vmatpush3.bf16.msra.mxu0 %v435_v3  ;;  %426 = vmatprep.subr.bf16.mxu1 %v449_v13  ;;  %v445_v18 = vld [vmem:[%s577_s1 + $0x30] sm:$0xff]   ;;  %v447_v19 = vld [vmem:[%s577_s1 + $0x78] sm:$0xff]   ;;  %v450_v21 = vld [vmem:[%s578_s0] ss:$12 sps:$4 sm:$0xff]  }
   0x8   :  { %396 = vmatprep.subr.bf16.mxu0 %v436_v4  ;;  %239 = vmatprep.mubr.bf16.mxu0 %v452_v15  ;;  %v448_v20 = vld [vmem:[%s577_s1 + $0x38] sm:$0xff]   ;;  %v382_v33 = vld [vmem:[%s579_s2] ss:$0 sm:$0xff] }
   0x9   :  { %428 = vmatprep.mubr.msk.bf16.mxu1 %vm200_vm0, %v453_v16  ;;  %v455_v22 = vld [vmem:[%s578_s0 + $0x1c] ss:$12 sps:$4 sm:$0xff]   ;;  %v457_v23 = vld [vmem:[%s578_s0 + $0x18] ss:$12 sps:$4 sm:$0xff]   ;;  %v383_v36 = vld [vmem:[%s580_s3] ss:$0 sm:$0xff] }
   0xa   :  { %427 = vmatpush3.bf16.msra.mxu1 %v449_v13 }
   0xb   :  { %397 = vmatpush3.bf16.msra.mxu0 %v437_v5 }
   0xc   :  { %398 = vmatprep.subr.bf16.mxu0 %v438_v6 }
   0xd   :  { %429 = vmatmul.mubr.msk.bf16.vlgmr.msra.gmra.mrb[0].mxu1 %vm200_vm0, %v454_v17 }
   0xf   :  { %399 = vmatpush3.bf16.msra.mxu0 %v439_v7 }
  0x10   :  { %400 = vmatprep.subr.bf16.mxu0 %v440_v8 }
  0x13   :  { %401 = vmatpush3.bf16.msra.mxu0 %v441_v10 }
  0x14   :  { %402 = vmatprep.subr.bf16.mxu0 %v442_v11 }
  0x17   :  { %403 = vmatpush3.bf16.msra.mxu0 %v443_v12 }
  0x18   :  { %404 = vmatprep.subr.bf16.mxu0 %v444_v14 }
  0x1b   :  { %405 = vmatpush3.bf16.msra.mxu0 %v445_v18 }
  0x1c   :  { %406 = vmatprep.subr.bf16.mxu0 %v447_v19 }
  0x1f   :  { %407 = vmatpush3.bf16.msra.mxu0 %v448_v20 }
  0x22   :  { %240 = vmatmul.mubr.bf16.vlgmr.msra.gmra.mrb[0].mxu0 %v450_v21 }
  0x23   :  { %247 = vmatprep.mubr.bf16.mxu0 %v455_v22 }
  0x2a   :  { %248 = vmatmul.mubr.bf16.gmra.mrb[4].mxu0 %v457_v23 }
  0xe0   :  { %v430_v24 = vpop.f32.mrb[0].mxu1 }
  0xe1   :  { %v290_v25 = vpop.f32.mrb[1].mxu1 }
  0xe2   :  { %v431_v26 = vpop.f32.mrb[2].mxu1 }
  0xe3   :  { %v293_v27 = vpop.f32.mrb[3].mxu1 }
  0xf5   :  { %v408_v28 = vpop.f32.mrb[0].mxu0 }
  0xf6   :  { %v409_v29 = vpop.f32.mrb[1].mxu0 }
  0xf7   :  { %v410_v30 = vadd.f32 %v409_v29, %v408_v28  ;;  %v411_v31 = vpop.f32.mrb[2].mxu0 }
  0xf8   :  { %v412_v32 = vpop.f32.mrb[3].mxu0 }
  0xf9   :  { %v413_v34 = vadd.f32 %v412_v32, %v411_v31  ;;  %v291_v35 = vadd.f32 %v410_v30, %v290_v25 }
  0xfb   :  { %v312_v37 = vmul.f32 %v382_v33, %v291_v35  ;;  %v294_v38 = vadd.f32 %v413_v34, %v293_v27 }
  0xfd   :  { %v323_v39 = vadd.f32 %v383_v36, %v312_v37  ;;  %v313_v40 = vmul.f32 %v382_v33, %v294_v38  ;;  %v414_v41 = vpop.f32.mrb[4].mxu0 }
  0xfe   :  { %v415_v42 = vpop.f32.mrb[5].mxu0 }
  0xff   :  { %v327_v43 = vmax.f32 %v323_v39, 0.0  ;;  %v324_v44 = vadd.f32 %v383_v36, %v313_v40  ;;  %v416_v45 = vadd.f32 %v415_v42, %v414_v41  ;;  %v417_v46 = vpop.f32.mrb[6].mxu0 }
 0x100   :  { %v418_v47 = vpop.f32.mrb[7].mxu0 }
 0x101   :  { %v388_v48 = vpack.c.bf16 %v327_v43, %v327_v43  ;;  %v328_v49 = vmax.f32 %v324_v44, 0.0  ;;  %v299_v50 = vadd.f32 %v430_v24, %v416_v45  ;;  %v419_v51 = vadd.f32 %v418_v47, %v417_v46 }
 0x103   :  { %348 = vst.msk [vmem:[%s581_s4] sm:$0xf] %vm347_vm1, %v388_v48  ;;  %v389_v52 = vpack.c.bf16 %v328_v49, %v328_v49  ;;  %v314_v53 = vmul.f32 %v382_v33, %v299_v50  ;;  %v302_v54 = vadd.f32 %v431_v26, %v419_v51 }
 0x105   :  { %349 = vst.msk [vmem:[%s581_s4 + $0x4] sm:$0xf] %vm347_vm1, %v389_v52  ;;  %v325_v55 = vadd.f32 %v383_v36, %v314_v53  ;;  %v315_v56 = vmul.f32 %v382_v33, %v302_v54 }
 0x107   :  { %v329_v57 = vmax.f32 %v325_v55, 0.0  ;;  %v326_v58 = vadd.f32 %v383_v36, %v315_v56 }
 0x109   :  { %v390_v59 = vpack.c.bf16 %v329_v57, %v329_v57  ;;  %v330_v60 = vmax.f32 %v326_v58, 0.0 }
 0x10b   :  { %350 = vst.msk [vmem:[%s581_s4 + $0x8] sm:$0xf] %vm347_vm1, %v390_v59  ;;  %v391_v61 = vpack.c.bf16 %v330_v60, %v330_v60 }
 0x10d   :  { %351 = vst.msk [vmem:[%s581_s4 + $0xc] sm:$0xf] %vm347_vm1, %v391_v61 }

// kernel: faceboxes_forward.24
= control target key start
LH: loop header
LB: loop body
LE: loop exit
PB: predicated region body
PF: predicated region fallthrough
CT: control target
= control target key end

     0   :  { %vm189_vm0 = vcmask 257024   ;;  %s331_s1 = inlined_call_operand.vmem [shape: bf16[128,32], index: 1, kind: input, shape index: {}]   ;;  %s332_s0 = inlined_call_operand.vmem [shape: bf16[32,128], index: 0, kind: input, shape index: {}]   ;;  %s333_s2 = inlined_call_operand.vmem [shape: f32[1,32], index: 2, kind: input, shape index: {}]   ;;  %s334_s3 = inlined_call_operand.vmem [shape: f32[1,32], index: 3, kind: input, shape index: {}]   ;;  %s335_s4 = inlined_call_operand.vmem [shape: bf16[32,32], index: 4, kind: output, shape index: {}]  }
   0x1   :  { %v248_v0 = vld [vmem:[%s331_s1] sm:$0xff]   ;;  %v249_v1 = vld [vmem:[%s331_s1 + $0x8] sm:$0xff]   ;;  %v250_v2 = vld [vmem:[%s331_s1 + $0x10] sm:$0xff]  }
   0x2   :  { %228 = vmatprep.subr.bf16.mxu0 %v248_v0  ;;  %v251_v3 = vld [vmem:[%s331_s1 + $0x18] sm:$0xff]   ;;  %v256_v4 = vld [vmem:[%s332_s0] sm:$0xff]   ;;  %v253_v6 = vld [vmem:[%s331_s1 + $0x28] sm:$0xff]  }
   0x3   :  { %229 = vmatpush3.bf16.msra.mxu0 %v248_v0  ;;  %244 = vmatprep.mubr.bf16.mxu0 %v256_v4  ;;  %v252_v5 = vld [vmem:[%s331_s1 + $0x20] sm:$0xff]   ;;  %v254_v7 = vld [vmem:[%s331_s1 + $0x30] sm:$0xff]   ;;  %v255_v8 = vld [vmem:[%s331_s1 + $0x38] sm:$0xff]  }
   0x4   :  { %230 = vmatprep.subr.bf16.mxu0 %v249_v1  ;;  %v257_v9 = vld [vmem:[%s332_s0 + $0x8] sm:$0xff]   ;;  %v208_v10 = vld [vmem:[%s333_s2] ss:$0 sm:$0xff] }
   0x5   :  { %v209_v12 = vld [vmem:[%s334_s3] ss:$0 sm:$0xff] }
   0x7   :  { %231 = vmatpush3.bf16.msra.mxu0 %v249_v1 }
   0x8   :  { %232 = vmatprep.subr.bf16.mxu0 %v250_v2 }
   0xb   :  { %233 = vmatpush3.bf16.msra.mxu0 %v250_v2 }
   0xc   :  { %234 = vmatprep.subr.bf16.mxu0 %v251_v3 }
   0xf   :  { %235 = vmatpush3.bf16.msra.mxu0 %v251_v3 }
  0x10   :  { %236 = vmatprep.subr.bf16.mxu0 %v252_v5 }
  0x13   :  { %237 = vmatpush3.bf16.msra.mxu0 %v252_v5 }
  0x14   :  { %238 = vmatprep.subr.bf16.mxu0 %v253_v6 }
  0x17   :  { %239 = vmatpush3.bf16.msra.mxu0 %v253_v6 }
  0x18   :  { %240 = vmatprep.subr.bf16.mxu0 %v254_v7 }
  0x1b   :  { %241 = vmatpush3.bf16.msra.mxu0 %v254_v7 }
  0x1c   :  { %242 = vmatprep.subr.bf16.mxu0 %v255_v8 }
  0x1f   :  { %243 = vmatpush3.bf16.msra.mxu0 %v255_v8 }
  0x22   :  { %245 = vmatmul.mubr.bf16.vlgmr.msra.gmra.mrb[0].mxu0 %v257_v9 }
  0xf5   :  { %v246_v11 = vpop.f32.mrb[0].mxu0 }
  0xf6   :  { %v156_v13 = vmul.f32 %v246_v11, %v208_v10  ;;  %v132_v14 = vpop.f32.mrb[1].mxu0 }
  0xf7   :  { %v154_v15 = vmul.f32 %v208_v10, %v132_v14  ;;  %v247_v16 = vpop.f32.mrb[2].mxu0 }
  0xf8   :  { %v167_v17 = vadd.f32 %v209_v12, %v156_v13  ;;  %v157_v18 = vmul.f32 %v247_v16, %v208_v10  ;;  %v135_v19 = vpop.f32.mrb[3].mxu0 }
  0xf9   :  { %v165_v20 = vadd.f32 %v209_v12, %v154_v15  ;;  %v155_v21 = vmul.f32 %v208_v10, %v135_v19 }
  0xfa   :  { %v171_v22 = vmax.f32 %v167_v17, 0.0  ;;  %v168_v23 = vadd.f32 %v209_v12, %v157_v18 }
  0xfb   :  { %v169_v24 = vmax.f32 %v165_v20, 0.0  ;;  %v166_v25 = vadd.f32 %v209_v12, %v155_v21 }
  0xfc   :  { %v216_v26 = vpack.c.bf16 %v171_v22, %v171_v22  ;;  %v172_v27 = vmax.f32 %v168_v23, 0.0 }
  0xfd   :  { %v214_v28 = vpack.c.bf16 %v169_v24, %v169_v24  ;;  %v170_v29 = vmax.f32 %v166_v25, 0.0 }
  0xfe   :  { %192 = vst.msk [vmem:[%s335_s4 + $0x8] sm:$0xf] %vm189_vm0, %v216_v26  ;;  %v217_v30 = vpack.c.bf16 %v172_v27, %v172_v27 }
  0xff   :  { %190 = vst.msk [vmem:[%s335_s4] sm:$0xf] %vm189_vm0, %v214_v28  ;;  %v215_v31 = vpack.c.bf16 %v170_v29, %v170_v29 }
 0x100   :  { %193 = vst.msk [vmem:[%s335_s4 + $0xc] sm:$0xf] %vm189_vm0, %v217_v30 }
 0x101   :  { %191 = vst.msk [vmem:[%s335_s4 + $0x4] sm:$0xf] %vm189_vm0, %v215_v31 }

// kernel: faceboxes_forward.32
= control target key start
LH: loop header
LB: loop body
LE: loop exit
PB: predicated region body
PF: predicated region fallthrough
CT: control target
= control target key end

     0   :  { %9 = vsyncpa [#allocation3], 0  ;;  %s673_s0 = inlined_call_operand.vmem [shape: bf16[32,288], index: 0, kind: input, shape index: {}]   ;;  %s674_s1 = inlined_call_operand.vmem [shape: bf16[288,32], index: 1, kind: input, shape index: {}]   ;;  %s675_s2 = inlined_call_operand.hbm [shape: f32[1,32], index: 2, kind: input, shape index: {}]   ;;  %s676_s3 = inlined_call_operand.hbm [shape: f32[1,32], index: 3, kind: input, shape index: {}]   ;;  %s677_s4 = inlined_call_operand.vmem [shape: bf16[32,32], index: 4, kind: output, shape index: {}]  }
   0x1   :  { %10 = vsyncpa [#allocation5], 0  ;;  %s534_s15 = smov [#allocation2]   ;;  %s535_s17 = smov [#allocation4]  }
   0x2   :  { %s21_s16 = sshll.u32 %s534_s15, 4  ;;  %s31_s18 = sshll.u32 %s535_s17, 4  ;;  %s22_s16 = int_to_ptr.vmem [resolvable:$true] %s21_s16  ;;  %s32_s18 = int_to_ptr.vmem [resolvable:$true] %s31_s18 }
   0x3   :  { %s486_s21 = scalar_lea.hbm %s675_s2, 16 }
   0x4   :  { %p487_p0 = scmp.ne.s32.totalorder %s675_s2, %s486_s21  ;;  %p490_p1 = scmp.lt.u32.totalorder %s486_s21, %s675_s2 }
   0x6   :  { %p492_p2 = pnand %p490_p1, %p487_p0 }
   0x8   :  { %495 = shalt.err (!%p492_p2)
}
   0x9   :  { %s496_s26 = scalar_lea.vmem %s22_s16, 16  ;;  %s500_s27 = scalar_lea.vmem %s22_s16, 32 }
   0xa   :  { %p497_p3 = scmp.ne.s32.totalorder %s22_s16, %s496_s26  ;;  %p501_p4 = scmp.lt.s32.totalorder %s22_s16, %s22_s16 }
   0xb   :  { %p502_p5 = scmp.lt.s32.totalorder %s500_s27, %s496_s26 }
   0xd   :  { %p503_p6 = por %p502_p5, %p501_p4 }
   0xf   :  { %p504_p7 = pnand %p503_p6, %p497_p3 }
  0x11   :  { %507 = shalt.err (!%p504_p7)
}
  0x12   :  { %24 = dma.hbm_to_vmem [thread:$0]  %s675_s2, 16, %s22_s16, [#allocation3]  }
  0x13   :  { %s508_s6 = scalar_lea.hbm %s676_s3, 16 }
  0x14   :  { %p509_p8 = scmp.ne.s32.totalorder %s676_s3, %s508_s6  ;;  %p512_p9 = scmp.lt.u32.totalorder %s508_s6, %s676_s3 }
  0x16   :  { %p514_p10 = pnand %p512_p9, %p509_p8 }
  0x18   :  { %517 = shalt.err (!%p514_p10)
}
  0x19   :  { %s518_s11 = scalar_lea.vmem %s32_s18, 16  ;;  %s522_s12 = scalar_lea.vmem %s32_s18, 32 }
  0x1a   :  { %p519_p11 = scmp.ne.s32.totalorder %s32_s18, %s518_s11  ;;  %p523_p12 = scmp.lt.s32.totalorder %s32_s18, %s32_s18 }
  0x1b   :  { %p524_p13 = scmp.lt.s32.totalorder %s522_s12, %s518_s11 }
  0x1d   :  { %p525_p0 = por %p524_p13, %p523_p12 }
  0x1f   :  { %p526_p1 = pnand %p525_p0, %p519_p11 }
  0x21   :  { %529 = shalt.err (!%p526_p1)
}
  0x22   :  { %34 = dma.hbm_to_vmem [thread:$0]  %s676_s3, 16, %s32_s18, [#allocation5]  }
  0x23   :  { %530 = dma.done.wait [#allocation3], 16  }
  0x24   :  { %531 = vsyncadd [#allocation3], 4294967280 }
  0x25   :  { %532 = dma.done.wait [#allocation5], 16  }
  0x26   :  { %533 = vsyncadd [#allocation5], 4294967280  ;;  %v460_v0 = vld [vmem:[%s674_s1 + $0x40] sm:$0xff]   ;;  %v462_v2 = vld [vmem:[%s674_s1 + $0x48] sm:$0xff]   ;;  %vm224_vm0 = vcmask 261120   ;;  %vm371_vm1 = vcmask 257024  }
  0x27   :  { %v461_v1 = vld [vmem:[%s674_s1] sm:$0xff]   ;;  %418 = vmatprep.subr.bf16.mxu0 %v460_v0  ;;  %v463_v3 = vld [vmem:[%s674_s1 + $0x8] sm:$0xff]   ;;  %v464_v4 = vld [vmem:[%s674_s1 + $0x50] sm:$0xff]  }
  0x28   :  { %419 = vmatpush3.bf16.msra.mxu0 %v461_v1  ;;  %v465_v5 = vld [vmem:[%s674_s1 + $0x10] sm:$0xff]   ;;  %v466_v6 = vld [vmem:[%s674_s1 + $0x58] sm:$0xff]   ;;  %v468_v8 = vld [vmem:[%s674_s1 + $0x60] sm:$0xff]  }
  0x29   :  { %420 = vmatprep.subr.bf16.mxu0 %v462_v2  ;;  %v467_v7 = vld [vmem:[%s674_s1 + $0x18] sm:$0xff]   ;;  %v474_v9 = vld [vmem:[%s674_s1 + $0x80] sm:$0xff]   ;;  %v470_v11 = vld [vmem:[%s674_s1 + $0x68] sm:$0xff]  }
  0x2a   :  { %v469_v10 = vld [vmem:[%s674_s1 + $0x20] sm:$0xff]   ;;  %450 = vmatprep.subr.bf16.mxu1 %v474_v9  ;;  %v471_v12 = vld [vmem:[%s674_s1 + $0x28] sm:$0xff]   ;;  %v472_v14 = vld [vmem:[%s674_s1 + $0x70] sm:$0xff]  }
  0x2b   :  { %451 = vmatpush3.bf16.msra.mxu1 %v474_v9  ;;  %v477_v13 = vld [vmem:[%s674_s1 + $0x88] sm:$0xff]   ;;  %v480_v15 = vld [vmem:[%s673_s0 + $0x4] ss:$12 sps:$4 sm:$0xff]   ;;  %v475_v19 = vld [vmem:[%s674_s1 + $0x78] sm:$0xff]  }
  0x2c   :  { %421 = vmatpush3.bf16.msra.mxu0 %v463_v3  ;;  %452 = vmatprep.subr.bf16.mxu1 %v477_v13  ;;  %v481_v16 = vld [vmem:[%s673_s0 + $0x8] ss:$12 sps:$4 sm:$0xff]   ;;  %v482_v17 = vld [vmem:[%s673_s0 + $0x20] ss:$12 sps:$4 sm:$0xff]   ;;  %v476_v20 = vld [vmem:[%s674_s1 + $0x38] sm:$0xff]  }
  0x2d   :  { %422 = vmatprep.subr.bf16.mxu0 %v464_v4  ;;  %263 = vmatprep.mubr.bf16.mxu0 %v480_v15  ;;  %v473_v18 = vld [vmem:[%s674_s1 + $0x30] sm:$0xff]   ;;  %v478_v21 = vld [vmem:[%s673_s0] ss:$12 sps:$4 sm:$0xff]   ;;  %v483_v22 = vld [vmem:[%s673_s0 + $0x1c] ss:$12 sps:$4 sm:$0xff]  }
  0x2e   :  { %454 = vmatprep.mubr.msk.bf16.mxu1 %vm224_vm0, %v481_v16  ;;  %v485_v23 = vld [vmem:[%s673_s0 + $0x18] ss:$12 sps:$4 sm:$0xff]   ;;  %v408_v33 = vld [vmem:[#allocation2] ss:$0 sm:$0xff]  ;;  %v409_v36 = vld [vmem:[#allocation4] ss:$0 sm:$0xff] }
  0x2f   :  { %453 = vmatpush3.bf16.msra.mxu1 %v477_v13 }
  0x30   :  { %423 = vmatpush3.bf16.msra.mxu0 %v465_v5 }
  0x31   :  { %424 = vmatprep.subr.bf16.mxu0 %v466_v6 }
  0x32   :  { %455 = vmatmul.mubr.msk.bf16.vlgmr.msra.gmra.mrb[0].mxu1 %vm224_vm0, %v482_v17 }
  0x34   :  { %425 = vmatpush3.bf16.msra.mxu0 %v467_v7 }
  0x35   :  { %426 = vmatprep.subr.bf16.mxu0 %v468_v8 }
  0x38   :  { %427 = vmatpush3.bf16.msra.mxu0 %v469_v10 }
  0x39   :  { %428 = vmatprep.subr.bf16.mxu0 %v470_v11 }
  0x3c   :  { %429 = vmatpush3.bf16.msra.mxu0 %v471_v12 }
  0x3d   :  { %430 = vmatprep.subr.bf16.mxu0 %v472_v14 }
  0x40   :  { %431 = vmatpush3.bf16.msra.mxu0 %v473_v18 }
  0x41   :  { %432 = vmatprep.subr.bf16.mxu0 %v475_v19 }
  0x44   :  { %433 = vmatpush3.bf16.msra.mxu0 %v476_v20 }
  0x47   :  { %264 = vmatmul.mubr.bf16.vlgmr.msra.gmra.mrb[0].mxu0 %v478_v21 }
  0x48   :  { %271 = vmatprep.mubr.bf16.mxu0 %v483_v22 }
  0x4f   :  { %272 = vmatmul.mubr.bf16.gmra.mrb[4].mxu0 %v485_v23 }
 0x105   :  { %v456_v24 = vpop.f32.mrb[0].mxu1 }
 0x106   :  { %v314_v25 = vpop.f32.mrb[1].mxu1 }
 0x107   :  { %v457_v26 = vpop.f32.mrb[2].mxu1 }
 0x108   :  { %v317_v27 = vpop.f32.mrb[3].mxu1 }
 0x11a   :  { %v434_v28 = vpop.f32.mrb[0].mxu0 }
 0x11b   :  { %v435_v29 = vpop.f32.mrb[1].mxu0 }
 0x11c   :  { %v436_v30 = vadd.f32 %v435_v29, %v434_v28  ;;  %v437_v31 = vpop.f32.mrb[2].mxu0 }
 0x11d   :  { %v438_v32 = vpop.f32.mrb[3].mxu0 }
 0x11e   :  { %v439_v34 = vadd.f32 %v438_v32, %v437_v31  ;;  %v315_v35 = vadd.f32 %v436_v30, %v314_v25 }
 0x120   :  { %v336_v37 = vmul.f32 %v408_v33, %v315_v35  ;;  %v318_v38 = vadd.f32 %v439_v34, %v317_v27 }
 0x122   :  { %v347_v39 = vadd.f32 %v409_v36, %v336_v37  ;;  %v337_v40 = vmul.f32 %v408_v33, %v318_v38  ;;  %v440_v41 = vpop.f32.mrb[4].mxu0 }
 0x123   :  { %v441_v42 = vpop.f32.mrb[5].mxu0 }
 0x124   :  { %v351_v43 = vmax.f32 %v347_v39, 0.0  ;;  %v348_v44 = vadd.f32 %v409_v36, %v337_v40  ;;  %v442_v45 = vadd.f32 %v441_v42, %v440_v41  ;;  %v443_v46 = vpop.f32.mrb[6].mxu0 }
 0x125   :  { %v444_v47 = vpop.f32.mrb[7].mxu0 }
 0x126   :  { %v414_v48 = vpack.c.bf16 %v351_v43, %v351_v43  ;;  %v352_v49 = vmax.f32 %v348_v44, 0.0  ;;  %v323_v50 = vadd.f32 %v456_v24, %v442_v45  ;;  %v445_v51 = vadd.f32 %v444_v47, %v443_v46 }
 0x128   :  { %372 = vst.msk [vmem:[%s677_s4] sm:$0xf] %vm371_vm1, %v414_v48  ;;  %v415_v52 = vpack.c.bf16 %v352_v49, %v352_v49  ;;  %v338_v53 = vmul.f32 %v408_v33, %v323_v50  ;;  %v326_v54 = vadd.f32 %v457_v26, %v445_v51 }
 0x12a   :  { %373 = vst.msk [vmem:[%s677_s4 + $0x4] sm:$0xf] %vm371_vm1, %v415_v52  ;;  %v349_v55 = vadd.f32 %v409_v36, %v338_v53  ;;  %v339_v56 = vmul.f32 %v408_v33, %v326_v54 }
 0x12c   :  { %v353_v57 = vmax.f32 %v349_v55, 0.0  ;;  %v350_v58 = vadd.f32 %v409_v36, %v339_v56 }
 0x12e   :  { %v416_v59 = vpack.c.bf16 %v353_v57, %v353_v57  ;;  %v354_v60 = vmax.f32 %v350_v58, 0.0 }
 0x130   :  { %374 = vst.msk [vmem:[%s677_s4 + $0x8] sm:$0xf] %vm371_vm1, %v416_v59  ;;  %v417_v61 = vpack.c.bf16 %v354_v60, %v354_v60 }
 0x132   :  { %375 = vst.msk [vmem:[%s677_s4 + $0xc] sm:$0xf] %vm371_vm1, %v417_v61 }
 0x133   :  { %380 = vsyncpa [#allocation3], 1 }
 0x134   :  { %381 = vsyncpa [#allocation5], 1 }

// kernel: faceboxes_forward.31
= control target key start
LH: loop header
LB: loop body
LE: loop exit
PB: predicated region body
PF: predicated region fallthrough
CT: control target
= control target key end

     0   :  { %9 = vsyncpa [#allocation3], 0  ;;  %s560_s0 = inlined_call_operand.vmem [shape: bf16[32,216], index: 0, kind: input, shape index: {}]   ;;  %s561_s1 = inlined_call_operand.vmem [shape: bf16[216,32], index: 1, kind: input, shape index: {}]   ;;  %s562_s2 = inlined_call_operand.hbm [shape: f32[1,32], index: 2, kind: input, shape index: {}]   ;;  %s563_s3 = inlined_call_operand.hbm [shape: f32[1,32], index: 3, kind: input, shape index: {}]   ;;  %s564_s4 = inlined_call_operand.vmem [shape: bf16[32,32], index: 4, kind: output, shape index: {}]  }
   0x1   :  { %10 = vsyncpa [#allocation5], 0  ;;  %s414_s15 = smov [#allocation2]   ;;  %s415_s17 = smov [#allocation4]  }
   0x2   :  { %s21_s16 = sshll.u32 %s414_s15, 4  ;;  %s31_s18 = sshll.u32 %s415_s17, 4  ;;  %s22_s16 = int_to_ptr.vmem [resolvable:$true] %s21_s16  ;;  %s32_s18 = int_to_ptr.vmem [resolvable:$true] %s31_s18 }
   0x3   :  { %s366_s21 = scalar_lea.hbm %s562_s2, 16 }
   0x4   :  { %p367_p0 = scmp.ne.s32.totalorder %s562_s2, %s366_s21  ;;  %p370_p1 = scmp.lt.u32.totalorder %s366_s21, %s562_s2 }
   0x6   :  { %p372_p2 = pnand %p370_p1, %p367_p0 }
   0x8   :  { %375 = shalt.err (!%p372_p2)
}
   0x9   :  { %s376_s26 = scalar_lea.vmem %s22_s16, 16  ;;  %s380_s27 = scalar_lea.vmem %s22_s16, 32 }
   0xa   :  { %p377_p3 = scmp.ne.s32.totalorder %s22_s16, %s376_s26  ;;  %p381_p4 = scmp.lt.s32.totalorder %s22_s16, %s22_s16 }
   0xb   :  { %p382_p5 = scmp.lt.s32.totalorder %s380_s27, %s376_s26 }
   0xd   :  { %p383_p6 = por %p382_p5, %p381_p4 }
   0xf   :  { %p384_p7 = pnand %p383_p6, %p377_p3 }
  0x11   :  { %387 = shalt.err (!%p384_p7)
}
  0x12   :  { %24 = dma.hbm_to_vmem [thread:$0]  %s562_s2, 16, %s22_s16, [#allocation3]  }
  0x13   :  { %s388_s6 = scalar_lea.hbm %s563_s3, 16 }
  0x14   :  { %p389_p8 = scmp.ne.s32.totalorder %s563_s3, %s388_s6  ;;  %p392_p9 = scmp.lt.u32.totalorder %s388_s6, %s563_s3 }
  0x16   :  { %p394_p10 = pnand %p392_p9, %p389_p8 }
  0x18   :  { %397 = shalt.err (!%p394_p10)
}
  0x19   :  { %s398_s11 = scalar_lea.vmem %s32_s18, 16  ;;  %s402_s12 = scalar_lea.vmem %s32_s18, 32 }
  0x1a   :  { %p399_p11 = scmp.ne.s32.totalorder %s32_s18, %s398_s11  ;;  %p403_p12 = scmp.lt.s32.totalorder %s32_s18, %s32_s18 }
  0x1b   :  { %p404_p13 = scmp.lt.s32.totalorder %s402_s12, %s398_s11 }
  0x1d   :  { %p405_p0 = por %p404_p13, %p403_p12 }
  0x1f   :  { %p406_p1 = pnand %p405_p0, %p399_p11 }
  0x21   :  { %409 = shalt.err (!%p406_p1)
}
  0x22   :  { %34 = dma.hbm_to_vmem [thread:$0]  %s563_s3, 16, %s32_s18, [#allocation5]  }
  0x23   :  { %410 = dma.done.wait [#allocation3], 16  }
  0x24   :  { %411 = vsyncadd [#allocation3], 4294967280 }
  0x25   :  { %412 = dma.done.wait [#allocation5], 16  }
  0x26   :  { %413 = vsyncadd [#allocation5], 4294967280  ;;  %v416_v0 = vmov 0   ;;  %v346_v1 = vld [vmem:[%s561_s1] sm:$0xff]   ;;  %v347_v2 = vld [vmem:[%s561_s1 + $0x8] sm:$0xff]   ;;  %vm172_vm0 = vcmask 719872  }
  0x27   :  { %183 = vmatprep.subr.bf16.mxu0 %v416_v0  ;;  %315 = vmatprep.subr.bf16.mxu1 %v416_v0  ;;  %v348_v3 = vld [vmem:[%s561_s1 + $0x10] sm:$0xff]   ;;  %v349_v4 = vld [vmem:[%s561_s1 + $0x18] sm:$0xff]   ;;  %v350_v5 = vld [vmem:[%s561_s1 + $0x20] sm:$0xff]   ;;  %vm179_vm1 = vcmask 1043456   ;;  %vm274_vm2 = vcmask 257024  }
  0x28   :  { %184 = vmatpush1.bf16.msra.mxu0 %v346_v1  ;;  %329 = vmatpush1.bf16.msra.mxu1 %v346_v1  ;;  %v362_v6 = vld [vmem:[%s560_s0 + $0x4] ss:$8 sps:$4 sm:$0xff]   ;;  %v365_v7 = vld [vmem:[%s560_s0 + $0x14] ss:$8 sps:$4 sm:$0xff]   ;;  %v359_v16 = vld [vmem:[%s561_s1 + $0x68] ss:$0 sps:$4 sm:$0xff]  }
  0x29   :  { %185 = vmatprep.subr.bf16.mxu0 %v416_v0  ;;  %316 = vmatprep.subr.bf16.mxu1 %v416_v0  ;;  %v351_v8 = vld [vmem:[%s561_s1 + $0x28] sm:$0xff]   ;;  %v352_v9 = vld [vmem:[%s561_s1 + $0x30] sm:$0xff]   ;;  %v353_v10 = vld [vmem:[%s561_s1 + $0x38] sm:$0xff]   ;;  %v181_v17 = vsel %vm179_vm1, %v359_v16, 0 }
  0x2a   :  { %303 = vmatprep.mubr.msk.bf16.mxu0 %vm172_vm0, %v362_v6  ;;  %304 = vmatprep.mubr.msk.bf16.mxu1 %vm172_vm0, %v365_v7  ;;  %v354_v11 = vld [vmem:[%s561_s1 + $0x40] sm:$0xff]   ;;  %v355_v12 = vld [vmem:[%s561_s1 + $0x48] sm:$0xff]   ;;  %v356_v13 = vld [vmem:[%s561_s1 + $0x50] sm:$0xff]  }
  0x2b   :  { %v357_v14 = vld [vmem:[%s561_s1 + $0x58] sm:$0xff]   ;;  %v358_v15 = vld [vmem:[%s561_s1 + $0x60] sm:$0xff]  }
  0x2c   :  { %186 = vmatpush1.bf16.msra.mxu0 %v347_v2  ;;  %330 = vmatpush1.bf16.msra.mxu1 %v347_v2  ;;  %v360_v18 = vld [vmem:[%s560_s0] ss:$8 sps:$4 sm:$0xff]   ;;  %v363_v19 = vld [vmem:[%s560_s0 + $0x10] ss:$8 sps:$4 sm:$0xff]  }
  0x2d   :  { %187 = vmatprep.subr.bf16.mxu0 %v416_v0  ;;  %317 = vmatprep.subr.bf16.mxu1 %v416_v0  ;;  %v305_v20 = vld [vmem:[#allocation2] ss:$0 sm:$0xff]  ;;  %v306_v22 = vld [vmem:[#allocation4] ss:$0 sm:$0xff] }
  0x30   :  { %188 = vmatpush1.bf16.msra.mxu0 %v348_v3  ;;  %331 = vmatpush1.bf16.msra.mxu1 %v348_v3 }
  0x31   :  { %189 = vmatprep.subr.bf16.mxu0 %v416_v0  ;;  %318 = vmatprep.subr.bf16.mxu1 %v416_v0 }
  0x34   :  { %190 = vmatpush1.bf16.msra.mxu0 %v349_v4  ;;  %332 = vmatpush1.bf16.msra.mxu1 %v349_v4 }
  0x35   :  { %191 = vmatprep.subr.bf16.mxu0 %v416_v0  ;;  %319 = vmatprep.subr.bf16.mxu1 %v416_v0 }
  0x38   :  { %192 = vmatpush1.bf16.msra.mxu0 %v350_v5  ;;  %333 = vmatpush1.bf16.msra.mxu1 %v350_v5 }
  0x39   :  { %193 = vmatprep.subr.bf16.mxu0 %v416_v0  ;;  %320 = vmatprep.subr.bf16.mxu1 %v416_v0 }
  0x3c   :  { %194 = vmatpush1.bf16.msra.mxu0 %v351_v8  ;;  %334 = vmatpush1.bf16.msra.mxu1 %v351_v8 }
  0x3d   :  { %195 = vmatprep.subr.bf16.mxu0 %v416_v0  ;;  %321 = vmatprep.subr.bf16.mxu1 %v416_v0 }
  0x40   :  { %196 = vmatpush1.bf16.msra.mxu0 %v352_v9  ;;  %335 = vmatpush1.bf16.msra.mxu1 %v352_v9 }
  0x41   :  { %197 = vmatprep.subr.bf16.mxu0 %v416_v0  ;;  %322 = vmatprep.subr.bf16.mxu1 %v416_v0 }
  0x44   :  { %198 = vmatpush1.bf16.msra.mxu0 %v353_v10  ;;  %336 = vmatpush1.bf16.msra.mxu1 %v353_v10 }
  0x45   :  { %199 = vmatprep.subr.bf16.mxu0 %v416_v0  ;;  %323 = vmatprep.subr.bf16.mxu1 %v416_v0 }
  0x48   :  { %200 = vmatpush1.bf16.msra.mxu0 %v354_v11  ;;  %337 = vmatpush1.bf16.msra.mxu1 %v354_v11 }
  0x49   :  { %201 = vmatprep.subr.bf16.mxu0 %v416_v0  ;;  %324 = vmatprep.subr.bf16.mxu1 %v416_v0 }
  0x4c   :  { %202 = vmatpush1.bf16.msra.mxu0 %v355_v12  ;;  %338 = vmatpush1.bf16.msra.mxu1 %v355_v12 }
  0x4d   :  { %203 = vmatprep.subr.bf16.mxu0 %v416_v0  ;;  %325 = vmatprep.subr.bf16.mxu1 %v416_v0 }
  0x50   :  { %204 = vmatpush1.bf16.msra.mxu0 %v356_v13  ;;  %339 = vmatpush1.bf16.msra.mxu1 %v356_v13 }
  0x51   :  { %205 = vmatprep.subr.bf16.mxu0 %v416_v0  ;;  %326 = vmatprep.subr.bf16.mxu1 %v416_v0 }
  0x54   :  { %206 = vmatpush1.bf16.msra.mxu0 %v357_v14  ;;  %340 = vmatpush1.bf16.msra.mxu1 %v357_v14 }
  0x55   :  { %207 = vmatprep.subr.bf16.mxu0 %v416_v0  ;;  %327 = vmatprep.subr.bf16.mxu1 %v416_v0 }
  0x58   :  { %208 = vmatpush1.bf16.msra.mxu0 %v358_v15  ;;  %341 = vmatpush1.bf16.msra.mxu1 %v358_v15 }
  0x59   :  { %209 = vmatprep.subr.bf16.mxu0 %v416_v0  ;;  %328 = vmatprep.subr.bf16.mxu1 %v416_v0 }
  0x5c   :  { %210 = vmatpush1.bf16.msra.mxu0 %v181_v17  ;;  %342 = vmatpush1.bf16.msra.mxu1 %v181_v17 }
  0x5f   :  { %216 = vmatmul.mubr.bf16.vlgmr.msra.gmra.mrb[0].mxu0 %v360_v18  ;;  %224 = vmatmul.mubr.bf16.vlgmr.msra.gmra.mrb[0].mxu1 %v363_v19 }
 0x132   :  { %v217_v21 = vpop.f32.mrb[0].mxu0  ;;  %v225_v23 = vpop.f32.mrb[0].mxu1 }
 0x133   :  { %v239_v24 = vmul.f32 %v305_v20, %v217_v21  ;;  %v241_v25 = vmul.f32 %v305_v20, %v225_v23  ;;  %v219_v26 = vpop.f32.mrb[1].mxu0  ;;  %v227_v27 = vpop.f32.mrb[1].mxu1 }
 0x134   :  { %v220_v28 = vpop.f32.mrb[2].mxu0  ;;  %v228_v29 = vpop.f32.mrb[2].mxu1 }
 0x135   :  { %v250_v30 = vadd.f32 %v306_v22, %v239_v24  ;;  %v252_v31 = vadd.f32 %v306_v22, %v241_v25  ;;  %v240_v32 = vmul.f32 %v305_v20, %v220_v28  ;;  %v242_v33 = vmul.f32 %v305_v20, %v228_v29  ;;  %v222_v34 = vpop.f32.mrb[3].mxu0  ;;  %v230_v35 = vpop.f32.mrb[3].mxu1 }
 0x137   :  { %v254_v36 = vmax.f32 %v250_v30, 0.0  ;;  %v256_v37 = vmax.f32 %v252_v31, 0.0  ;;  %v251_v38 = vadd.f32 %v306_v22, %v240_v32  ;;  %v253_v39 = vadd.f32 %v306_v22, %v242_v33 }
 0x139   :  { %v311_v40 = vpack.c.bf16 %v254_v36, %v254_v36  ;;  %v313_v41 = vpack.c.bf16 %v256_v37, %v256_v37  ;;  %v255_v42 = vmax.f32 %v251_v38, 0.0  ;;  %v257_v43 = vmax.f32 %v253_v39, 0.0 }
 0x13b   :  { %275 = vst.msk [vmem:[%s564_s4] sm:$0xf] %vm274_vm2, %v311_v40  ;;  %277 = vst.msk [vmem:[%s564_s4 + $0x8] sm:$0xf] %vm274_vm2, %v313_v41  ;;  %v312_v44 = vpack.c.bf16 %v255_v42, %v255_v42  ;;  %v314_v45 = vpack.c.bf16 %v257_v43, %v257_v43 }
 0x13d   :  { %276 = vst.msk [vmem:[%s564_s4 + $0x4] sm:$0xf] %vm274_vm2, %v312_v44  ;;  %278 = vst.msk [vmem:[%s564_s4 + $0xc] sm:$0xf] %vm274_vm2, %v314_v45 }
 0x13e   :  { %283 = vsyncpa [#allocation3], 1 }
 0x13f   :  { %284 = vsyncpa [#allocation5], 1 }

// kernel: faceboxes_forward.33
= control target key start
LH: loop header
LB: loop body
LE: loop exit
PB: predicated region body
PF: predicated region fallthrough
CT: control target
= control target key end

     0   :  { %9 = vsyncpa [#allocation3], 0  ;;  %s427_s0 = inlined_call_operand.vmem [shape: bf16[32,128], index: 0, kind: input, shape index: {}]   ;;  %s428_s1 = inlined_call_operand.vmem [shape: bf16[128,80], index: 1, kind: input, shape index: {}]   ;;  %s429_s2 = inlined_call_operand.hbm [shape: f32[1,80], index: 2, kind: input, shape index: {}]   ;;  %s430_s3 = inlined_call_operand.hbm [shape: f32[1,80], index: 3, kind: input, shape index: {}]   ;;  %s431_s4 = inlined_call_operand.vmem [shape: bf16[32,80], index: 4, kind: output, shape index: {}]  }
   0x1   :  { %10 = vsyncpa [#allocation5], 0  ;;  %s334_s15 = smov [#allocation2]   ;;  %s335_s17 = smov [#allocation4]  }
   0x2   :  { %s21_s16 = sshll.u32 %s334_s15, 4  ;;  %s31_s18 = sshll.u32 %s335_s17, 4  ;;  %s22_s16 = int_to_ptr.vmem [resolvable:$true] %s21_s16  ;;  %s32_s18 = int_to_ptr.vmem [resolvable:$true] %s31_s18 }
   0x3   :  { %s286_s21 = scalar_lea.hbm %s429_s2, 16 }
   0x4   :  { %p287_p0 = scmp.ne.s32.totalorder %s429_s2, %s286_s21  ;;  %p290_p1 = scmp.lt.u32.totalorder %s286_s21, %s429_s2 }
   0x6   :  { %p292_p2 = pnand %p290_p1, %p287_p0 }
   0x8   :  { %295 = shalt.err (!%p292_p2)
}
   0x9   :  { %s296_s26 = scalar_lea.vmem %s22_s16, 16  ;;  %s300_s27 = scalar_lea.vmem %s22_s16, 32 }
   0xa   :  { %p297_p3 = scmp.ne.s32.totalorder %s22_s16, %s296_s26  ;;  %p301_p4 = scmp.lt.s32.totalorder %s22_s16, %s22_s16 }
   0xb   :  { %p302_p5 = scmp.lt.s32.totalorder %s300_s27, %s296_s26 }
   0xd   :  { %p303_p6 = por %p302_p5, %p301_p4 }
   0xf   :  { %p304_p7 = pnand %p303_p6, %p297_p3 }
  0x11   :  { %307 = shalt.err (!%p304_p7)
}
  0x12   :  { %24 = dma.hbm_to_vmem [thread:$0]  %s429_s2, 16, %s22_s16, [#allocation3]  }
  0x13   :  { %s308_s6 = scalar_lea.hbm %s430_s3, 16 }
  0x14   :  { %p309_p8 = scmp.ne.s32.totalorder %s430_s3, %s308_s6  ;;  %p312_p9 = scmp.lt.u32.totalorder %s308_s6, %s430_s3 }
  0x16   :  { %p314_p10 = pnand %p312_p9, %p309_p8 }
  0x18   :  { %317 = shalt.err (!%p314_p10)
}
  0x19   :  { %s318_s11 = scalar_lea.vmem %s32_s18, 16  ;;  %s322_s12 = scalar_lea.vmem %s32_s18, 32 }
  0x1a   :  { %p319_p11 = scmp.ne.s32.totalorder %s32_s18, %s318_s11  ;;  %p323_p12 = scmp.lt.s32.totalorder %s32_s18, %s32_s18 }
  0x1b   :  { %p324_p13 = scmp.lt.s32.totalorder %s322_s12, %s318_s11 }
  0x1d   :  { %p325_p0 = por %p324_p13, %p323_p12 }
  0x1f   :  { %p326_p1 = pnand %p325_p0, %p319_p11 }
  0x21   :  { %329 = shalt.err (!%p326_p1)
}
  0x22   :  { %34 = dma.hbm_to_vmem [thread:$0]  %s430_s3, 16, %s32_s18, [#allocation5]  }
  0x23   :  { %330 = dma.done.wait [#allocation3], 16  }
  0x24   :  { %331 = vsyncadd [#allocation3], 4294967280 }
  0x25   :  { %332 = dma.done.wait [#allocation5], 16  }
  0x26   :  { %333 = vsyncadd [#allocation5], 4294967280  ;;  %v276_v0 = vld [vmem:[%s428_s1] sm:$0xff]   ;;  %v277_v1 = vld [vmem:[%s428_s1 + $0x8] sm:$0xff]   ;;  %vm213_vm0 = vcmask 650240  }
  0x27   :  { %254 = vmatprep.subr.bf16.mxu0 %v276_v0  ;;  %v278_v2 = vld [vmem:[%s428_s1 + $0x10] sm:$0xff]   ;;  %v279_v3 = vld [vmem:[%s428_s1 + $0x18] sm:$0xff]   ;;  %v284_v4 = vld [vmem:[%s427_s0] sm:$0xff]  }
  0x28   :  { %255 = vmatpush3.bf16.msra.mxu0 %v276_v0  ;;  %270 = vmatprep.mubr.bf16.mxu0 %v284_v4  ;;  %v280_v5 = vld [vmem:[%s428_s1 + $0x20] sm:$0xff]   ;;  %v281_v6 = vld [vmem:[%s428_s1 + $0x28] sm:$0xff]   ;;  %v282_v7 = vld [vmem:[%s428_s1 + $0x30] sm:$0xff]  }
  0x29   :  { %256 = vmatprep.subr.bf16.mxu0 %v277_v1  ;;  %v283_v8 = vld [vmem:[%s428_s1 + $0x38] sm:$0xff]   ;;  %v285_v9 = vld [vmem:[%s427_s0 + $0x8] sm:$0xff]   ;;  %v234_v10 = vld [vmem:[#allocation2] ss:$0 sm:$0xff] }
  0x2a   :  { %v235_v12 = vld [vmem:[#allocation4] ss:$0 sm:$0xff] }
  0x2c   :  { %257 = vmatpush3.bf16.msra.mxu0 %v277_v1 }
  0x2d   :  { %258 = vmatprep.subr.bf16.mxu0 %v278_v2 }
  0x30   :  { %259 = vmatpush3.bf16.msra.mxu0 %v278_v2 }
  0x31   :  { %260 = vmatprep.subr.bf16.mxu0 %v279_v3 }
  0x34   :  { %261 = vmatpush3.bf16.msra.mxu0 %v279_v3 }
  0x35   :  { %262 = vmatprep.subr.bf16.mxu0 %v280_v5 }
  0x38   :  { %263 = vmatpush3.bf16.msra.mxu0 %v280_v5 }
  0x39   :  { %264 = vmatprep.subr.bf16.mxu0 %v281_v6 }
  0x3c   :  { %265 = vmatpush3.bf16.msra.mxu0 %v281_v6 }
  0x3d   :  { %266 = vmatprep.subr.bf16.mxu0 %v282_v7 }
  0x40   :  { %267 = vmatpush3.bf16.msra.mxu0 %v282_v7 }
  0x41   :  { %268 = vmatprep.subr.bf16.mxu0 %v283_v8 }
  0x44   :  { %269 = vmatpush3.bf16.msra.mxu0 %v283_v8 }
  0x47   :  { %271 = vmatmul.mubr.bf16.vlgmr.msra.gmra.mrb[0].mxu0 %v285_v9 }
 0x11a   :  { %v272_v11 = vpop.f32.mrb[0].mxu0 }
 0x11b   :  { %v180_v13 = vmul.f32 %v272_v11, %v234_v10  ;;  %v156_v14 = vpop.f32.mrb[1].mxu0 }
 0x11c   :  { %v178_v15 = vmul.f32 %v234_v10, %v156_v14  ;;  %v273_v16 = vpop.f32.mrb[2].mxu0 }
 0x11d   :  { %v191_v17 = vadd.f32 %v235_v12, %v180_v13  ;;  %v181_v18 = vmul.f32 %v273_v16, %v234_v10  ;;  %v159_v19 = vpop.f32.mrb[3].mxu0 }
 0x11e   :  { %v189_v20 = vadd.f32 %v235_v12, %v178_v15  ;;  %v179_v21 = vmul.f32 %v234_v10, %v159_v19 }
 0x11f   :  { %v195_v22 = vmax.f32 %v191_v17, 0.0  ;;  %v192_v23 = vadd.f32 %v235_v12, %v181_v18 }
 0x120   :  { %v193_v24 = vmax.f32 %v189_v20, 0.0  ;;  %v190_v25 = vadd.f32 %v235_v12, %v179_v21 }
 0x121   :  { %v242_v26 = vpack.c.bf16 %v195_v22, %v195_v22  ;;  %v196_v27 = vmax.f32 %v192_v23, 0.0 }
 0x122   :  { %v240_v28 = vpack.c.bf16 %v193_v24, %v193_v24  ;;  %v194_v29 = vmax.f32 %v190_v25, 0.0 }
 0x123   :  { %216 = vst.msk [vmem:[%s431_s4 + $0x8] sm:$0xf] %vm213_vm0, %v242_v26  ;;  %v243_v30 = vpack.c.bf16 %v196_v27, %v196_v27 }
 0x124   :  { %214 = vst.msk [vmem:[%s431_s4] sm:$0xf] %vm213_vm0, %v240_v28  ;;  %v241_v31 = vpack.c.bf16 %v194_v29, %v194_v29 }
 0x125   :  { %217 = vst.msk [vmem:[%s431_s4 + $0xc] sm:$0xf] %vm213_vm0, %v243_v30 }
 0x126   :  { %215 = vst.msk [vmem:[%s431_s4 + $0x4] sm:$0xf] %vm213_vm0, %v241_v31 }
 0x127   :  { %222 = vsyncpa [#allocation3], 1 }
 0x128   :  { %223 = vsyncpa [#allocation5], 1 }

// kernel: faceboxes_forward.38
= control target key start
LH: loop header
LB: loop body
LE: loop exit
PB: predicated region body
PF: predicated region fallthrough
CT: control target
= control target key end

     0   :  { %9 = vsyncpa [#allocation3], 0  ;;  %s431_s0 = inlined_call_operand.vmem [shape: bf16[32,128], index: 0, kind: input, shape index: {}]   ;;  %s432_s1 = inlined_call_operand.vmem [shape: bf16[128,128], index: 1, kind: input, shape index: {}]   ;;  %s433_s2 = inlined_call_operand.hbm [shape: f32[1,128], index: 2, kind: input, shape index: {}]   ;;  %s434_s3 = inlined_call_operand.hbm [shape: f32[1,128], index: 3, kind: input, shape index: {}]   ;;  %s435_s4 = inlined_call_operand.vmem [shape: bf16[32,128], index: 4, kind: output, shape index: {}]  }
   0x1   :  { %10 = vsyncpa [#allocation5], 0  ;;  %s344_s15 = smov [#allocation2]   ;;  %s345_s17 = smov [#allocation4]  }
   0x2   :  { %s21_s16 = sshll.u32 %s344_s15, 4  ;;  %s31_s18 = sshll.u32 %s345_s17, 4  ;;  %s22_s16 = int_to_ptr.vmem [resolvable:$true] %s21_s16  ;;  %s32_s18 = int_to_ptr.vmem [resolvable:$true] %s31_s18 }
   0x3   :  { %s296_s21 = scalar_lea.hbm %s433_s2, 16 }
   0x4   :  { %p297_p0 = scmp.ne.s32.totalorder %s433_s2, %s296_s21  ;;  %p300_p1 = scmp.lt.u32.totalorder %s296_s21, %s433_s2 }
   0x6   :  { %p302_p2 = pnand %p300_p1, %p297_p0 }
   0x8   :  { %305 = shalt.err (!%p302_p2)
}
   0x9   :  { %s306_s26 = scalar_lea.vmem %s22_s16, 16  ;;  %s310_s27 = scalar_lea.vmem %s22_s16, 32 }
   0xa   :  { %p307_p3 = scmp.ne.s32.totalorder %s22_s16, %s306_s26  ;;  %p311_p4 = scmp.lt.s32.totalorder %s22_s16, %s22_s16 }
   0xb   :  { %p312_p5 = scmp.lt.s32.totalorder %s310_s27, %s306_s26 }
   0xd   :  { %p313_p6 = por %p312_p5, %p311_p4 }
   0xf   :  { %p314_p7 = pnand %p313_p6, %p307_p3 }
  0x11   :  { %317 = shalt.err (!%p314_p7)
}
  0x12   :  { %24 = dma.hbm_to_vmem [thread:$0]  %s433_s2, 16, %s22_s16, [#allocation3]  }
  0x13   :  { %s318_s6 = scalar_lea.hbm %s434_s3, 16 }
  0x14   :  { %p319_p8 = scmp.ne.s32.totalorder %s434_s3, %s318_s6  ;;  %p322_p9 = scmp.lt.u32.totalorder %s318_s6, %s434_s3 }
  0x16   :  { %p324_p10 = pnand %p322_p9, %p319_p8 }
  0x18   :  { %327 = shalt.err (!%p324_p10)
}
  0x19   :  { %s328_s11 = scalar_lea.vmem %s32_s18, 16  ;;  %s332_s12 = scalar_lea.vmem %s32_s18, 32 }
  0x1a   :  { %p329_p11 = scmp.ne.s32.totalorder %s32_s18, %s328_s11  ;;  %p333_p12 = scmp.lt.s32.totalorder %s32_s18, %s32_s18 }
  0x1b   :  { %p334_p13 = scmp.lt.s32.totalorder %s332_s12, %s328_s11 }
  0x1d   :  { %p335_p0 = por %p334_p13, %p333_p12 }
  0x1f   :  { %p336_p1 = pnand %p335_p0, %p329_p11 }
  0x21   :  { %339 = shalt.err (!%p336_p1)
}
  0x22   :  { %34 = dma.hbm_to_vmem [thread:$0]  %s434_s3, 16, %s32_s18, [#allocation5]  }
  0x23   :  { %340 = dma.done.wait [#allocation3], 16  }
  0x24   :  { %341 = vsyncadd [#allocation3], 4294967280 }
  0x25   :  { %342 = dma.done.wait [#allocation5], 16  }
  0x26   :  { %343 = vsyncadd [#allocation5], 4294967280  ;;  %v286_v0 = vld [vmem:[%s432_s1] sm:$0xff]   ;;  %v287_v1 = vld [vmem:[%s432_s1 + $0x8] sm:$0xff]  }
  0x27   :  { %264 = vmatprep.subr.bf16.mxu0 %v286_v0  ;;  %v288_v2 = vld [vmem:[%s432_s1 + $0x10] sm:$0xff]   ;;  %v289_v3 = vld [vmem:[%s432_s1 + $0x18] sm:$0xff]   ;;  %v294_v4 = vld [vmem:[%s431_s0] sm:$0xff]  }
  0x28   :  { %265 = vmatpush3.bf16.msra.mxu0 %v286_v0  ;;  %280 = vmatprep.mubr.bf16.mxu0 %v294_v4  ;;  %v290_v5 = vld [vmem:[%s432_s1 + $0x20] sm:$0xff]   ;;  %v291_v6 = vld [vmem:[%s432_s1 + $0x28] sm:$0xff]   ;;  %v292_v7 = vld [vmem:[%s432_s1 + $0x30] sm:$0xff]  }
  0x29   :  { %266 = vmatprep.subr.bf16.mxu0 %v287_v1  ;;  %v293_v8 = vld [vmem:[%s432_s1 + $0x38] sm:$0xff]   ;;  %v295_v9 = vld [vmem:[%s431_s0 + $0x8] sm:$0xff]   ;;  %v233_v10 = vld [vmem:[#allocation2] ss:$0 sm:$0xff] }
  0x2a   :  { %v234_v12 = vld [vmem:[#allocation4] ss:$0 sm:$0xff] }
  0x2c   :  { %267 = vmatpush3.bf16.msra.mxu0 %v287_v1 }
  0x2d   :  { %268 = vmatprep.subr.bf16.mxu0 %v288_v2 }
  0x30   :  { %269 = vmatpush3.bf16.msra.mxu0 %v288_v2 }
  0x31   :  { %270 = vmatprep.subr.bf16.mxu0 %v289_v3 }
  0x34   :  { %271 = vmatpush3.bf16.msra.mxu0 %v289_v3 }
  0x35   :  { %272 = vmatprep.subr.bf16.mxu0 %v290_v5 }
  0x38   :  { %273 = vmatpush3.bf16.msra.mxu0 %v290_v5 }
  0x39   :  { %274 = vmatprep.subr.bf16.mxu0 %v291_v6 }
  0x3c   :  { %275 = vmatpush3.bf16.msra.mxu0 %v291_v6 }
  0x3d   :  { %276 = vmatprep.subr.bf16.mxu0 %v292_v7 }
  0x40   :  { %277 = vmatpush3.bf16.msra.mxu0 %v292_v7 }
  0x41   :  { %278 = vmatprep.subr.bf16.mxu0 %v293_v8 }
  0x44   :  { %279 = vmatpush3.bf16.msra.mxu0 %v293_v8 }
  0x47   :  { %281 = vmatmul.mubr.bf16.vlgmr.msra.gmra.mrb[0].mxu0 %v295_v9 }
 0x11a   :  { %v282_v11 = vpop.f32.mrb[0].mxu0 }
 0x11b   :  { %v180_v13 = vmul.f32 %v282_v11, %v233_v10  ;;  %v156_v14 = vpop.f32.mrb[1].mxu0 }
 0x11c   :  { %v178_v15 = vmul.f32 %v233_v10, %v156_v14  ;;  %v283_v16 = vpop.f32.mrb[2].mxu0 }
 0x11d   :  { %v191_v17 = vadd.f32 %v234_v12, %v180_v13  ;;  %v181_v18 = vmul.f32 %v283_v16, %v233_v10  ;;  %v159_v19 = vpop.f32.mrb[3].mxu0 }
 0x11e   :  { %v189_v20 = vadd.f32 %v234_v12, %v178_v15  ;;  %v179_v21 = vmul.f32 %v233_v10, %v159_v19 }
 0x11f   :  { %v192_v22 = vadd.f32 %v234_v12, %v181_v18  ;;  %v195_v24 = vmax.f32 %v191_v17, 0.0 }
 0x120   :  { %v190_v23 = vadd.f32 %v234_v12, %v179_v21  ;;  %v193_v26 = vmax.f32 %v189_v20, 0.0 }
 0x121   :  { %v196_v25 = vmax.f32 %v192_v22, 0.0 }
 0x122   :  { %v194_v27 = vmax.f32 %v190_v23, 0.0 }
 0x123   :  { %v251_v28 = vpack.c.bf16 %v196_v25, %v195_v24 }
 0x124   :  { %v246_v29 = vpack.c.bf16 %v194_v27, %v193_v26 }
 0x125   :  { %253 = vst [vmem:[%s435_s4 + $0x8] sm:$0xff] %v251_v28  }
 0x126   :  { %247 = vst [vmem:[%s435_s4] sm:$0xff] %v246_v29  }
 0x127   :  { %221 = vsyncpa [#allocation3], 1 }
 0x128   :  { %222 = vsyncpa [#allocation5], 1 }

// kernel: faceboxes_forward.34
= control target key start
LH: loop header
LB: loop body
LE: loop exit
PB: predicated region body
PF: predicated region fallthrough
CT: control target
= control target key end

     0   :  { %9 = vsyncpa [#allocation3], 0  ;;  %s427_s0 = inlined_call_operand.vmem [shape: bf16[32,128], index: 0, kind: input, shape index: {}]   ;;  %s428_s1 = inlined_call_operand.vmem [shape: bf16[128,32], index: 1, kind: input, shape index: {}]   ;;  %s429_s2 = inlined_call_operand.hbm [shape: f32[1,32], index: 2, kind: input, shape index: {}]   ;;  %s430_s3 = inlined_call_operand.hbm [shape: f32[1,32], index: 3, kind: input, shape index: {}]   ;;  %s431_s4 = inlined_call_operand.vmem [shape: bf16[32,32], index: 4, kind: output, shape index: {}]  }
   0x1   :  { %10 = vsyncpa [#allocation5], 0  ;;  %s334_s15 = smov [#allocation2]   ;;  %s335_s17 = smov [#allocation4]  }
   0x2   :  { %s21_s16 = sshll.u32 %s334_s15, 4  ;;  %s31_s18 = sshll.u32 %s335_s17, 4  ;;  %s22_s16 = int_to_ptr.vmem [resolvable:$true] %s21_s16  ;;  %s32_s18 = int_to_ptr.vmem [resolvable:$true] %s31_s18 }
   0x3   :  { %s286_s21 = scalar_lea.hbm %s429_s2, 16 }
   0x4   :  { %p287_p0 = scmp.ne.s32.totalorder %s429_s2, %s286_s21  ;;  %p290_p1 = scmp.lt.u32.totalorder %s286_s21, %s429_s2 }
   0x6   :  { %p292_p2 = pnand %p290_p1, %p287_p0 }
   0x8   :  { %295 = shalt.err (!%p292_p2)
}
   0x9   :  { %s296_s26 = scalar_lea.vmem %s22_s16, 16  ;;  %s300_s27 = scalar_lea.vmem %s22_s16, 32 }
   0xa   :  { %p297_p3 = scmp.ne.s32.totalorder %s22_s16, %s296_s26  ;;  %p301_p4 = scmp.lt.s32.totalorder %s22_s16, %s22_s16 }
   0xb   :  { %p302_p5 = scmp.lt.s32.totalorder %s300_s27, %s296_s26 }
   0xd   :  { %p303_p6 = por %p302_p5, %p301_p4 }
   0xf   :  { %p304_p7 = pnand %p303_p6, %p297_p3 }
  0x11   :  { %307 = shalt.err (!%p304_p7)
}
  0x12   :  { %24 = dma.hbm_to_vmem [thread:$0]  %s429_s2, 16, %s22_s16, [#allocation3]  }
  0x13   :  { %s308_s6 = scalar_lea.hbm %s430_s3, 16 }
  0x14   :  { %p309_p8 = scmp.ne.s32.totalorder %s430_s3, %s308_s6  ;;  %p312_p9 = scmp.lt.u32.totalorder %s308_s6, %s430_s3 }
  0x16   :  { %p314_p10 = pnand %p312_p9, %p309_p8 }
  0x18   :  { %317 = shalt.err (!%p314_p10)
}
  0x19   :  { %s318_s11 = scalar_lea.vmem %s32_s18, 16  ;;  %s322_s12 = scalar_lea.vmem %s32_s18, 32 }
  0x1a   :  { %p319_p11 = scmp.ne.s32.totalorder %s32_s18, %s318_s11  ;;  %p323_p12 = scmp.lt.s32.totalorder %s32_s18, %s32_s18 }
  0x1b   :  { %p324_p13 = scmp.lt.s32.totalorder %s322_s12, %s318_s11 }
  0x1d   :  { %p325_p0 = por %p324_p13, %p323_p12 }
  0x1f   :  { %p326_p1 = pnand %p325_p0, %p319_p11 }
  0x21   :  { %329 = shalt.err (!%p326_p1)
}
  0x22   :  { %34 = dma.hbm_to_vmem [thread:$0]  %s430_s3, 16, %s32_s18, [#allocation5]  }
  0x23   :  { %330 = dma.done.wait [#allocation3], 16  }
  0x24   :  { %331 = vsyncadd [#allocation3], 4294967280 }
  0x25   :  { %332 = dma.done.wait [#allocation5], 16  }
  0x26   :  { %333 = vsyncadd [#allocation5], 4294967280  ;;  %v276_v0 = vld [vmem:[%s428_s1] sm:$0xff]   ;;  %v277_v1 = vld [vmem:[%s428_s1 + $0x8] sm:$0xff]   ;;  %vm213_vm0 = vcmask 257024  }
  0x27   :  { %254 = vmatprep.subr.bf16.mxu0 %v276_v0  ;;  %v278_v2 = vld [vmem:[%s428_s1 + $0x10] sm:$0xff]   ;;  %v279_v3 = vld [vmem:[%s428_s1 + $0x18] sm:$0xff]   ;;  %v284_v4 = vld [vmem:[%s427_s0] sm:$0xff]  }
  0x28   :  { %255 = vmatpush3.bf16.msra.mxu0 %v276_v0  ;;  %270 = vmatprep.mubr.bf16.mxu0 %v284_v4  ;;  %v280_v5 = vld [vmem:[%s428_s1 + $0x20] sm:$0xff]   ;;  %v281_v6 = vld [vmem:[%s428_s1 + $0x28] sm:$0xff]   ;;  %v282_v7 = vld [vmem:[%s428_s1 + $0x30] sm:$0xff]  }
  0x29   :  { %256 = vmatprep.subr.bf16.mxu0 %v277_v1  ;;  %v283_v8 = vld [vmem:[%s428_s1 + $0x38] sm:$0xff]   ;;  %v285_v9 = vld [vmem:[%s427_s0 + $0x8] sm:$0xff]   ;;  %v234_v10 = vld [vmem:[#allocation2] ss:$0 sm:$0xff] }
  0x2a   :  { %v235_v12 = vld [vmem:[#allocation4] ss:$0 sm:$0xff] }
  0x2c   :  { %257 = vmatpush3.bf16.msra.mxu0 %v277_v1 }
  0x2d   :  { %258 = vmatprep.subr.bf16.mxu0 %v278_v2 }
  0x30   :  { %259 = vmatpush3.bf16.msra.mxu0 %v278_v2 }
  0x31   :  { %260 = vmatprep.subr.bf16.mxu0 %v279_v3 }
  0x34   :  { %261 = vmatpush3.bf16.msra.mxu0 %v279_v3 }
  0x35   :  { %262 = vmatprep.subr.bf16.mxu0 %v280_v5 }
  0x38   :  { %263 = vmatpush3.bf16.msra.mxu0 %v280_v5 }
  0x39   :  { %264 = vmatprep.subr.bf16.mxu0 %v281_v6 }
  0x3c   :  { %265 = vmatpush3.bf16.msra.mxu0 %v281_v6 }
  0x3d   :  { %266 = vmatprep.subr.bf16.mxu0 %v282_v7 }
  0x40   :  { %267 = vmatpush3.bf16.msra.mxu0 %v282_v7 }
  0x41   :  { %268 = vmatprep.subr.bf16.mxu0 %v283_v8 }
  0x44   :  { %269 = vmatpush3.bf16.msra.mxu0 %v283_v8 }
  0x47   :  { %271 = vmatmul.mubr.bf16.vlgmr.msra.gmra.mrb[0].mxu0 %v285_v9 }
 0x11a   :  { %v272_v11 = vpop.f32.mrb[0].mxu0 }
 0x11b   :  { %v180_v13 = vmul.f32 %v272_v11, %v234_v10  ;;  %v156_v14 = vpop.f32.mrb[1].mxu0 }
 0x11c   :  { %v178_v15 = vmul.f32 %v234_v10, %v156_v14  ;;  %v273_v16 = vpop.f32.mrb[2].mxu0 }
 0x11d   :  { %v191_v17 = vadd.f32 %v235_v12, %v180_v13  ;;  %v181_v18 = vmul.f32 %v273_v16, %v234_v10  ;;  %v159_v19 = vpop.f32.mrb[3].mxu0 }
 0x11e   :  { %v189_v20 = vadd.f32 %v235_v12, %v178_v15  ;;  %v179_v21 = vmul.f32 %v234_v10, %v159_v19 }
 0x11f   :  { %v195_v22 = vmax.f32 %v191_v17, 0.0  ;;  %v192_v23 = vadd.f32 %v235_v12, %v181_v18 }
 0x120   :  { %v193_v24 = vmax.f32 %v189_v20, 0.0  ;;  %v190_v25 = vadd.f32 %v235_v12, %v179_v21 }
 0x121   :  { %v242_v26 = vpack.c.bf16 %v195_v22, %v195_v22  ;;  %v196_v27 = vmax.f32 %v192_v23, 0.0 }
 0x122   :  { %v240_v28 = vpack.c.bf16 %v193_v24, %v193_v24  ;;  %v194_v29 = vmax.f32 %v190_v25, 0.0 }
 0x123   :  { %216 = vst.msk [vmem:[%s431_s4 + $0x8] sm:$0xf] %vm213_vm0, %v242_v26  ;;  %v243_v30 = vpack.c.bf16 %v196_v27, %v196_v27 }
 0x124   :  { %214 = vst.msk [vmem:[%s431_s4] sm:$0xf] %vm213_vm0, %v240_v28  ;;  %v241_v31 = vpack.c.bf16 %v194_v29, %v194_v29 }
 0x125   :  { %217 = vst.msk [vmem:[%s431_s4 + $0xc] sm:$0xf] %vm213_vm0, %v243_v30 }
 0x126   :  { %215 = vst.msk [vmem:[%s431_s4 + $0x4] sm:$0xf] %vm213_vm0, %v241_v31 }
 0x127   :  { %222 = vsyncpa [#allocation3], 1 }
 0x128   :  { %223 = vsyncpa [#allocation5], 1 }

// kernel: faceboxes_forward.40
= control target key start
LH: loop header
LB: loop body
LE: loop exit
PB: predicated region body
PF: predicated region fallthrough
CT: control target
= control target key end

     0   :  { %9 = vsyncpa [#allocation3], 0  ;;  %s315_s15 = smov [#allocation2]   ;;  %s410_s0 = inlined_call_operand.vmem [shape: bf16[8,256], index: 0, kind: input, shape index: {}]   ;;  %s411_s1 = inlined_call_operand.vmem [shape: bf16[256,128], index: 1, kind: input, shape index: {}]   ;;  %s412_s2 = inlined_call_operand.vmem [shape: f32[1,128], index: 2, kind: input, shape index: {}]   ;;  %s413_s3 = inlined_call_operand.hbm [shape: f32[1,128], index: 3, kind: input, shape index: {}]   ;;  %s414_s4 = inlined_call_operand.vmem [shape: bf16[8,128], index: 4, kind: output, shape index: {}]  }
   0x1   :  { %s22_s16 = sshll.u32 %s315_s15, 4  ;;  %s291_s19 = scalar_lea.hbm %s413_s3, 16  ;;  %s23_s16 = int_to_ptr.vmem [resolvable:$true] %s22_s16 }
   0x2   :  { %p292_p0 = scmp.ne.s32.totalorder %s413_s3, %s291_s19  ;;  %p295_p1 = scmp.lt.u32.totalorder %s291_s19, %s413_s3 }
   0x4   :  { %p297_p2 = pnand %p295_p1, %p292_p0 }
   0x6   :  { %300 = shalt.err (!%p297_p2)
}
   0x7   :  { %s301_s24 = scalar_lea.vmem %s23_s16, 16  ;;  %s305_s25 = scalar_lea.vmem %s23_s16, 32 }
   0x8   :  { %p302_p3 = scmp.ne.s32.totalorder %s23_s16, %s301_s24  ;;  %p306_p4 = scmp.lt.s32.totalorder %s23_s16, %s23_s16 }
   0x9   :  { %p307_p5 = scmp.lt.s32.totalorder %s305_s25, %s301_s24 }
   0xb   :  { %p308_p6 = por %p307_p5, %p306_p4 }
   0xd   :  { %p309_p7 = pnand %p308_p6, %p302_p3 }
   0xf   :  { %312 = shalt.err (!%p309_p7)
}
  0x10   :  { %25 = dma.hbm_to_vmem [thread:$0]  %s413_s3, 16, %s23_s16, [#allocation3]  }
  0x11   :  { %313 = dma.done.wait [#allocation3], 16  }
  0x12   :  { %314 = vsyncadd [#allocation3], 4294967280  ;;  %v273_v0 = vld [vmem:[%s411_s1 + $0x40] sm:$0xff]   ;;  %v275_v2 = vld [vmem:[%s411_s1 + $0x48] sm:$0xff]  }
  0x13   :  { %v274_v1 = vld [vmem:[%s411_s1] sm:$0xff]   ;;  %250 = vmatprep.subr.bf16.mxu0 %v273_v0  ;;  %v276_v3 = vld [vmem:[%s411_s1 + $0x8] sm:$0xff]   ;;  %v277_v4 = vld [vmem:[%s411_s1 + $0x50] sm:$0xff]  }
  0x14   :  { %251 = vmatpush3.bf16.msra.mxu0 %v274_v1  ;;  %v278_v5 = vld [vmem:[%s411_s1 + $0x10] sm:$0xff]   ;;  %v279_v6 = vld [vmem:[%s411_s1 + $0x58] sm:$0xff]   ;;  %v281_v8 = vld [vmem:[%s411_s1 + $0x60] sm:$0xff]  }
  0x15   :  { %252 = vmatprep.subr.bf16.mxu0 %v275_v2  ;;  %v280_v7 = vld [vmem:[%s411_s1 + $0x18] sm:$0xff]   ;;  %v282_v9 = vld [vmem:[%s411_s1 + $0x20] sm:$0xff]   ;;  %v283_v10 = vld [vmem:[%s411_s1 + $0x68] sm:$0xff]  }
  0x16   :  { %v30_v11 = vld [vmem:[%s410_s0] sm:$0xff]  ;;  %v284_v13 = vld [vmem:[%s411_s1 + $0x28] sm:$0xff]   ;;  %v285_v14 = vld [vmem:[%s411_s1 + $0x70] sm:$0xff]  }
  0x17   :  { %v231_v12 = vcombine.high %v30_v11, %v30_v11  ;;  %v286_v15 = vld [vmem:[%s411_s1 + $0x30] sm:$0xff]   ;;  %v287_v16 = vld [vmem:[%s411_s1 + $0x78] sm:$0xff]   ;;  %v230_v18 = vcombine.low %v30_v11, %v30_v11  ;;  %v248_v21 = vld [vmem:[%s412_s2] ss:$0 sm:$0xff] }
  0x18   :  { %253 = vmatpush3.bf16.msra.mxu0 %v276_v3  ;;  %v288_v17 = vld [vmem:[%s411_s1 + $0x38] sm:$0xff]   ;;  %v249_v24 = vld [vmem:[#allocation2] ss:$0 sm:$0xff] }
  0x19   :  { %254 = vmatprep.subr.bf16.mxu0 %v277_v4  ;;  %198 = vmatprep.mubr.bf16.mxu0 %v231_v12 }
  0x1c   :  { %255 = vmatpush3.bf16.msra.mxu0 %v278_v5 }
  0x1d   :  { %256 = vmatprep.subr.bf16.mxu0 %v279_v6 }
  0x20   :  { %257 = vmatpush3.bf16.msra.mxu0 %v280_v7 }
  0x21   :  { %258 = vmatprep.subr.bf16.mxu0 %v281_v8 }
  0x24   :  { %259 = vmatpush3.bf16.msra.mxu0 %v282_v9 }
  0x25   :  { %260 = vmatprep.subr.bf16.mxu0 %v283_v10 }
  0x28   :  { %261 = vmatpush3.bf16.msra.mxu0 %v284_v13 }
  0x29   :  { %262 = vmatprep.subr.bf16.mxu0 %v285_v14 }
  0x2c   :  { %263 = vmatpush3.bf16.msra.mxu0 %v286_v15 }
  0x2d   :  { %264 = vmatprep.subr.bf16.mxu0 %v287_v16 }
  0x30   :  { %265 = vmatpush3.bf16.msra.mxu0 %v288_v17 }
  0x33   :  { %199 = vmatmul.mubr.bf16.vlgmr.msra.gmra.mrb[0].mxu0 %v230_v18 }
 0x106   :  { %v266_v19 = vpop.f32.mrb[0].mxu0 }
 0x107   :  { %v267_v20 = vpop.f32.mrb[1].mxu0 }
 0x108   :  { %v268_v22 = vadd.f32 %v267_v20, %v266_v19  ;;  %v269_v23 = vpop.f32.mrb[2].mxu0 }
 0x109   :  { %v270_v25 = vpop.f32.mrb[3].mxu0 }
 0x10a   :  { %v213_v26 = vmul.f32 %v268_v22, %v248_v21 }
 0x10c   :  { %v221_v27 = vadd.f32 %v249_v24, %v213_v26 }
 0x10e   :  { %v222_v28 = vmax.f32 %v221_v27, 0.0 }
 0x110   :  { %v223_v29 = vpack.c.bf16 %v222_v28, %v222_v28 }
 0x112   :  { %224 = vst [vmem:[%s414_s4] sm:$0xf] %v223_v29 }
 0x113   :  { %229 = vsyncpa [#allocation3], 1 }

// kernel: faceboxes_forward.39
= control target key start
LH: loop header
LB: loop body
LE: loop exit
PB: predicated region body
PF: predicated region fallthrough
CT: control target
= control target key end

     0   :  { %s2056_s1 = inlined_call_operand.vmem [shape: bf16[1152,256], index: 1, kind: input, shape index: {}]   ;;  %s2057_s0 = inlined_call_operand.vmem [shape: bf16[8,1152], index: 0, kind: input, shape index: {}]   ;;  %s2058_s2 = inlined_call_operand.vmem [shape: f32[1,256], index: 2, kind: input, shape index: {}]   ;;  %s2059_s3 = inlined_call_operand.vmem [shape: f32[1,256], index: 3, kind: input, shape index: {}]   ;;  %s2060_s4 = inlined_call_operand.vmem [shape: bf16[8,256], index: 4, kind: output, shape index: {}]  }
   0x1   :  { %v1337_v0 = vld [vmem:[%s2056_s1 + $0x4] ss:$8 sps:$4 sm:$0xff]   ;;  %v1341_v2 = vld [vmem:[%s2056_s1] ss:$8 sps:$4 sm:$0xff]   ;;  %v1343_v4 = vld [vmem:[%s2056_s1 + $0x14] ss:$8 sps:$4 sm:$0xff]  }
   0x2   :  { %v1339_v1 = vld [vmem:[%s2056_s1 + $0x204] ss:$8 sps:$4 sm:$0xff]   ;;  %919 = vmatprep.subr.bf16.mxu1 %v1337_v0  ;;  %v1342_v3 = vld [vmem:[%s2056_s1 + $0x200] ss:$8 sps:$4 sm:$0xff]   ;;  %v1345_v5 = vld [vmem:[%s2056_s1 + $0x214] ss:$8 sps:$4 sm:$0xff]  }
   0x3   :  { %1001 = vmatprep.subr.bf16.mxu0 %v1339_v1  ;;  %920 = vmatpush1.bf16.msra.mxu1 %v1341_v2  ;;  %v1347_v6 = vld [vmem:[%s2056_s1 + $0x10] ss:$8 sps:$4 sm:$0xff]   ;;  %v1349_v8 = vld [vmem:[%s2056_s1 + $0x24] ss:$8 sps:$4 sm:$0xff]   ;;  %v1353_v10 = vld [vmem:[%s2056_s1 + $0x20] ss:$8 sps:$4 sm:$0xff]  }
   0x4   :  { %1002 = vmatpush1.bf16.msra.mxu0 %v1342_v3  ;;  %921 = vmatprep.subr.bf16.mxu1 %v1343_v4  ;;  %v1348_v7 = vld [vmem:[%s2056_s1 + $0x210] ss:$8 sps:$4 sm:$0xff]   ;;  %v1351_v9 = vld [vmem:[%s2056_s1 + $0x224] ss:$8 sps:$4 sm:$0xff]   ;;  %v1354_v11 = vld [vmem:[%s2056_s1 + $0x220] ss:$8 sps:$4 sm:$0xff]  }
   0x5   :  { %1003 = vmatprep.subr.bf16.mxu0 %v1345_v5  ;;  %v1355_v12 = vld [vmem:[%s2056_s1 + $0x34] ss:$8 sps:$4 sm:$0xff]   ;;  %v1359_v14 = vld [vmem:[%s2056_s1 + $0x30] ss:$8 sps:$4 sm:$0xff]   ;;  %v1361_v16 = vld [vmem:[%s2056_s1 + $0x44] ss:$8 sps:$4 sm:$0xff]  }
   0x6   :  { %v1357_v13 = vld [vmem:[%s2056_s1 + $0x234] ss:$8 sps:$4 sm:$0xff]   ;;  %v1360_v15 = vld [vmem:[%s2056_s1 + $0x230] ss:$8 sps:$4 sm:$0xff]   ;;  %v1363_v17 = vld [vmem:[%s2056_s1 + $0x244] ss:$8 sps:$4 sm:$0xff]  }
   0x7   :  { %922 = vmatpush1.bf16.msra.mxu1 %v1347_v6  ;;  %v1365_v18 = vld [vmem:[%s2056_s1 + $0x40] ss:$8 sps:$4 sm:$0xff]   ;;  %v1367_v20 = vld [vmem:[%s2056_s1 + $0x54] ss:$8 sps:$4 sm:$0xff]   ;;  %v1371_v22 = vld [vmem:[%s2056_s1 + $0x50] ss:$8 sps:$4 sm:$0xff]  }
   0x8   :  { %1004 = vmatpush1.bf16.msra.mxu0 %v1348_v7  ;;  %923 = vmatprep.subr.bf16.mxu1 %v1349_v8  ;;  %v1366_v19 = vld [vmem:[%s2056_s1 + $0x240] ss:$8 sps:$4 sm:$0xff]   ;;  %v1369_v21 = vld [vmem:[%s2056_s1 + $0x254] ss:$8 sps:$4 sm:$0xff]   ;;  %v1372_v23 = vld [vmem:[%s2056_s1 + $0x250] ss:$8 sps:$4 sm:$0xff]  }
   0x9   :  { %1005 = vmatprep.subr.bf16.mxu0 %v1351_v9  ;;  %v1373_v24 = vld [vmem:[%s2056_s1 + $0x64] ss:$8 sps:$4 sm:$0xff]   ;;  %v1377_v26 = vld [vmem:[%s2056_s1 + $0x60] ss:$8 sps:$4 sm:$0xff]   ;;  %v1379_v28 = vld [vmem:[%s2056_s1 + $0x74] ss:$8 sps:$4 sm:$0xff]  }
   0xa   :  { %v1375_v25 = vld [vmem:[%s2056_s1 + $0x264] ss:$8 sps:$4 sm:$0xff]   ;;  %v1378_v27 = vld [vmem:[%s2056_s1 + $0x260] ss:$8 sps:$4 sm:$0xff]   ;;  %v1381_v29 = vld [vmem:[%s2056_s1 + $0x274] ss:$8 sps:$4 sm:$0xff]  }
   0xb   :  { %924 = vmatpush1.bf16.msra.mxu1 %v1353_v10  ;;  %v1383_v30 = vld [vmem:[%s2056_s1 + $0x70] ss:$8 sps:$4 sm:$0xff]   ;;  %v1385_v32 = vld [vmem:[%s2056_s1 + $0x84] ss:$8 sps:$4 sm:$0xff]   ;;  %v1389_v34 = vld [vmem:[%s2056_s1 + $0x80] ss:$8 sps:$4 sm:$0xff]  }
   0xc   :  { %1006 = vmatpush1.bf16.msra.mxu0 %v1354_v11  ;;  %925 = vmatprep.subr.bf16.mxu1 %v1355_v12  ;;  %v1384_v31 = vld [vmem:[%s2056_s1 + $0x270] ss:$8 sps:$4 sm:$0xff]   ;;  %v1387_v33 = vld [vmem:[%s2056_s1 + $0x284] ss:$8 sps:$4 sm:$0xff]   ;;  %v1390_v35 = vld [vmem:[%s2056_s1 + $0x280] ss:$8 sps:$4 sm:$0xff]  }
   0xd   :  { %1007 = vmatprep.subr.bf16.mxu0 %v1357_v13  ;;  %v1391_v36 = vld [vmem:[%s2056_s1 + $0x94] ss:$8 sps:$4 sm:$0xff]   ;;  %v1395_v38 = vld [vmem:[%s2056_s1 + $0x90] ss:$8 sps:$4 sm:$0xff]   ;;  %v1397_v40 = vld [vmem:[%s2056_s1 + $0xa4] ss:$8 sps:$4 sm:$0xff]  }
   0xe   :  { %v1393_v37 = vld [vmem:[%s2056_s1 + $0x294] ss:$8 sps:$4 sm:$0xff]   ;;  %v1396_v39 = vld [vmem:[%s2056_s1 + $0x290] ss:$8 sps:$4 sm:$0xff]   ;;  %v1399_v41 = vld [vmem:[%s2056_s1 + $0x2a4] ss:$8 sps:$4 sm:$0xff]  }
   0xf   :  { %926 = vmatpush1.bf16.msra.mxu1 %v1359_v14  ;;  %v1401_v42 = vld [vmem:[%s2056_s1 + $0xa0] ss:$8 sps:$4 sm:$0xff]   ;;  %v1403_v44 = vld [vmem:[%s2056_s1 + $0xb4] ss:$8 sps:$4 sm:$0xff]   ;;  %v1407_v47 = vld [vmem:[%s2056_s1 + $0xb0] ss:$8 sps:$4 sm:$0xff]  }
  0x10   :  { %1008 = vmatpush1.bf16.msra.mxu0 %v1360_v15  ;;  %927 = vmatprep.subr.bf16.mxu1 %v1361_v16  ;;  %v1402_v43 = vld [vmem:[%s2056_s1 + $0x2a0] ss:$8 sps:$4 sm:$0xff]   ;;  %v1405_v45 = vld [vmem:[%s2056_s1 + $0x2b4] ss:$8 sps:$4 sm:$0xff]   ;;  %v1408_v49 = vld [vmem:[%s2056_s1 + $0x2b0] ss:$8 sps:$4 sm:$0xff]  }
  0x11   :  { %1009 = vmatprep.subr.bf16.mxu0 %v1363_v17  ;;  %v18_v46 = vld [vmem:[%s2057_s0] sm:$0xff]  ;;  %v20_v50 = vld [vmem:[%s2057_s0 + $0x10] sm:$0xff] }
  0x12   :  { %v1168_v48 = vcombine.high %v18_v46, %v18_v46  ;;  %v1409_v51 = vld [vmem:[%s2056_s1 + $0xc4] ss:$8 sps:$4 sm:$0xff]   ;;  %v1172_v53 = vcombine.high %v20_v50, %v20_v50  ;;  %v1413_v54 = vld [vmem:[%s2056_s1 + $0xc0] ss:$8 sps:$4 sm:$0xff]   ;;  %v1415_v56 = vld [vmem:[%s2056_s1 + $0xd4] ss:$8 sps:$4 sm:$0xff]   ;;  %v1167_v6 = vcombine.low %v18_v46, %v18_v46  ;;  %v1171_v7 = vcombine.low %v20_v50, %v20_v50 }
  0x13   :  { %928 = vmatpush1.bf16.msra.mxu1 %v1365_v18  ;;  %v1411_v52 = vld [vmem:[%s2056_s1 + $0x2c4] ss:$8 sps:$4 sm:$0xff]   ;;  %v1414_v55 = vld [vmem:[%s2056_s1 + $0x2c0] ss:$8 sps:$4 sm:$0xff]   ;;  %v1417_v57 = vld [vmem:[%s2056_s1 + $0x2d4] ss:$8 sps:$4 sm:$0xff]  }
  0x14   :  { %1010 = vmatpush1.bf16.msra.mxu0 %v1366_v19  ;;  %929 = vmatprep.subr.bf16.mxu1 %v1367_v20  ;;  %v1419_v58 = vld [vmem:[%s2056_s1 + $0xd0] ss:$8 sps:$4 sm:$0xff]   ;;  %v1421_v60 = vld [vmem:[%s2056_s1 + $0xe4] ss:$8 sps:$4 sm:$0xff]   ;;  %v1425_v62 = vld [vmem:[%s2056_s1 + $0xe0] ss:$8 sps:$4 sm:$0xff]  }
  0x15   :  { %1011 = vmatprep.subr.bf16.mxu0 %v1369_v21  ;;  %951 = vmatprep.mubr.bf16.mxu1 %v1168_v48  ;;  %v1420_v59 = vld [vmem:[%s2056_s1 + $0x2d0] ss:$8 sps:$4 sm:$0xff]   ;;  %v1423_v61 = vld [vmem:[%s2056_s1 + $0x2e4] ss:$8 sps:$4 sm:$0xff]   ;;  %v1426_v63 = vld [vmem:[%s2056_s1 + $0x2e0] ss:$8 sps:$4 sm:$0xff]  }
  0x16   :  { %1033 = vmatprep.mubr.bf16.mxu0 %v1172_v53  ;;  %v1427_v0 = vld [vmem:[%s2056_s1 + $0xf4] ss:$8 sps:$4 sm:$0xff]   ;;  %v1431_v2 = vld [vmem:[%s2056_s1 + $0xf0] ss:$8 sps:$4 sm:$0xff]   ;;  %v1437_v4 = vld [vmem:[%s2056_s1 + $0x104] ss:$8 sps:$4 sm:$0xff]  }
  0x17   :  { %930 = vmatpush1.bf16.msra.mxu1 %v1371_v22  ;;  %v1429_v1 = vld [vmem:[%s2056_s1 + $0x2f4] ss:$8 sps:$4 sm:$0xff]   ;;  %v1432_v3 = vld [vmem:[%s2056_s1 + $0x2f0] ss:$8 sps:$4 sm:$0xff]   ;;  %v1442_v5 = vld [vmem:[%s2056_s1 + $0x304] ss:$8 sps:$4 sm:$0xff]  }
  0x18   :  { %1012 = vmatpush1.bf16.msra.mxu0 %v1372_v23  ;;  %931 = vmatprep.subr.bf16.mxu1 %v1373_v24  ;;  %v1435_v8 = vld [vmem:[%s2056_s1 + $0x100] ss:$8 sps:$4 sm:$0xff]   ;;  %v1445_v10 = vld [vmem:[%s2056_s1 + $0x114] ss:$8 sps:$4 sm:$0xff]   ;;  %v1443_v12 = vld [vmem:[%s2056_s1 + $0x110] ss:$8 sps:$4 sm:$0xff]  }
  0x19   :  { %1013 = vmatprep.subr.bf16.mxu0 %v1375_v25  ;;  %v1440_v9 = vld [vmem:[%s2056_s1 + $0x300] ss:$8 sps:$4 sm:$0xff]   ;;  %v1448_v11 = vld [vmem:[%s2056_s1 + $0x314] ss:$8 sps:$4 sm:$0xff]   ;;  %v1446_v13 = vld [vmem:[%s2056_s1 + $0x310] ss:$8 sps:$4 sm:$0xff]  }
  0x1a   :  { %v1451_v14 = vld [vmem:[%s2056_s1 + $0x124] ss:$8 sps:$4 sm:$0xff]   ;;  %v1449_v16 = vld [vmem:[%s2056_s1 + $0x120] ss:$8 sps:$4 sm:$0xff]   ;;  %v1457_v18 = vld [vmem:[%s2056_s1 + $0x134] ss:$8 sps:$4 sm:$0xff]  }
  0x1b   :  { %932 = vmatpush1.bf16.msra.mxu1 %v1377_v26  ;;  %v1454_v15 = vld [vmem:[%s2056_s1 + $0x324] ss:$8 sps:$4 sm:$0xff]   ;;  %v1452_v17 = vld [vmem:[%s2056_s1 + $0x320] ss:$8 sps:$4 sm:$0xff]   ;;  %v1460_v19 = vld [vmem:[%s2056_s1 + $0x334] ss:$8 sps:$4 sm:$0xff]  }
  0x1c   :  { %1014 = vmatpush1.bf16.msra.mxu0 %v1378_v27  ;;  %933 = vmatprep.subr.bf16.mxu1 %v1379_v28  ;;  %v1455_v20 = vld [vmem:[%s2056_s1 + $0x130] ss:$8 sps:$4 sm:$0xff]   ;;  %v1463_v22 = vld [vmem:[%s2056_s1 + $0x144] ss:$8 sps:$4 sm:$0xff]   ;;  %v1461_v24 = vld [vmem:[%s2056_s1 + $0x140] ss:$8 sps:$4 sm:$0xff]  }
  0x1d   :  { %1015 = vmatprep.subr.bf16.mxu0 %v1381_v29  ;;  %v1458_v21 = vld [vmem:[%s2056_s1 + $0x330] ss:$8 sps:$4 sm:$0xff]   ;;  %v1466_v23 = vld [vmem:[%s2056_s1 + $0x344] ss:$8 sps:$4 sm:$0xff]   ;;  %v1464_v25 = vld [vmem:[%s2056_s1 + $0x340] ss:$8 sps:$4 sm:$0xff]  }
  0x1e   :  { %v1469_v26 = vld [vmem:[%s2056_s1 + $0x154] ss:$8 sps:$4 sm:$0xff]   ;;  %v1467_v28 = vld [vmem:[%s2056_s1 + $0x150] ss:$8 sps:$4 sm:$0xff]   ;;  %v1499_v50 = vld [vmem:[%s2056_s1 + $0x1a4] ss:$8 sps:$4 sm:$0xff]  }
  0x1f   :  { %934 = vmatpush1.bf16.msra.mxu1 %v1383_v30  ;;  %v1472_v27 = vld [vmem:[%s2056_s1 + $0x354] ss:$8 sps:$4 sm:$0xff]   ;;  %v1470_v29 = vld [vmem:[%s2056_s1 + $0x350] ss:$8 sps:$4 sm:$0xff]   ;;  %v1475_v30 = vld [vmem:[%s2056_s1 + $0x164] ss:$8 sps:$4 sm:$0xff]  }
  0x20   :  { %1016 = vmatpush1.bf16.msra.mxu0 %v1384_v31  ;;  %935 = vmatprep.subr.bf16.mxu1 %v1385_v32  ;;  %v1478_v31 = vld [vmem:[%s2056_s1 + $0x364] ss:$8 sps:$4 sm:$0xff]   ;;  %v1493_v46 = vld [vmem:[%s2056_s1 + $0x194] ss:$8 sps:$4 sm:$0xff]   ;;  %v1491_v48 = vld [vmem:[%s2056_s1 + $0x190] ss:$8 sps:$4 sm:$0xff]  }
  0x21   :  { %1017 = vmatprep.subr.bf16.mxu0 %v1387_v33  ;;  %v1867_v32 = vld [vmem:[%s2057_s0 + $0x8] sm:$0xff]  ;;  %v1872_v33 = vld [vmem:[%s2057_s0 + $0x18] sm:$0xff] }
  0x22   :  { %v1500_v53 = vld [vmem:[%s2056_s1 + $0x3a0] ss:$8 sps:$4 sm:$0xff]  }
  0x23   :  { %936 = vmatpush1.bf16.msra.mxu1 %v1389_v34  ;;  %v1473_v34 = vld [vmem:[%s2056_s1 + $0x160] ss:$8 sps:$4 sm:$0xff]  }
  0x24   :  { %1018 = vmatpush1.bf16.msra.mxu0 %v1390_v35  ;;  %937 = vmatprep.subr.bf16.mxu1 %v1391_v36  ;;  %v1476_v35 = vld [vmem:[%s2056_s1 + $0x360] ss:$8 sps:$4 sm:$0xff]   ;;  %v1170_v36 = vcombine.high %v1867_v32, %v1867_v32 }
  0x25   :  { %1019 = vmatprep.subr.bf16.mxu0 %v1393_v37  ;;  %v1174_v37 = vcombine.high %v1872_v33, %v1872_v33 }
  0x27   :  { %938 = vmatpush1.bf16.msra.mxu1 %v1395_v38  ;;  %v1481_v38 = vld [vmem:[%s2056_s1 + $0x174] ss:$8 sps:$4 sm:$0xff]  }
  0x28   :  { %1020 = vmatpush1.bf16.msra.mxu0 %v1396_v39  ;;  %939 = vmatprep.subr.bf16.mxu1 %v1397_v40  ;;  %v1484_v39 = vld [vmem:[%s2056_s1 + $0x374] ss:$8 sps:$4 sm:$0xff]   ;;  %v1479_v40 = vld [vmem:[%s2056_s1 + $0x170] ss:$8 sps:$4 sm:$0xff]  }
  0x29   :  { %1021 = vmatprep.subr.bf16.mxu0 %v1399_v41  ;;  %v1482_v41 = vld [vmem:[%s2056_s1 + $0x370] ss:$8 sps:$4 sm:$0xff]  }
  0x2b   :  { %940 = vmatpush1.bf16.msra.mxu1 %v1401_v42  ;;  %v1487_v42 = vld [vmem:[%s2056_s1 + $0x184] ss:$8 sps:$4 sm:$0xff]  }
  0x2c   :  { %1022 = vmatpush1.bf16.msra.mxu0 %v1402_v43  ;;  %941 = vmatprep.subr.bf16.mxu1 %v1403_v44  ;;  %v1490_v43 = vld [vmem:[%s2056_s1 + $0x384] ss:$8 sps:$4 sm:$0xff]   ;;  %v1485_v44 = vld [vmem:[%s2056_s1 + $0x180] ss:$8 sps:$4 sm:$0xff]  }
  0x2d   :  { %1023 = vmatprep.subr.bf16.mxu0 %v1405_v45  ;;  %v1488_v45 = vld [vmem:[%s2056_s1 + $0x380] ss:$8 sps:$4 sm:$0xff]  }
  0x2f   :  { %942 = vmatpush1.bf16.msra.mxu1 %v1407_v47  ;;  %v1496_v47 = vld [vmem:[%s2056_s1 + $0x394] ss:$8 sps:$4 sm:$0xff]  }
  0x30   :  { %1024 = vmatpush1.bf16.msra.mxu0 %v1408_v49  ;;  %943 = vmatprep.subr.bf16.mxu1 %v1409_v51  ;;  %v1494_v49 = vld [vmem:[%s2056_s1 + $0x390] ss:$8 sps:$4 sm:$0xff]   ;;  %v1502_v51 = vld [vmem:[%s2056_s1 + $0x3a4] ss:$8 sps:$4 sm:$0xff]  }
  0x31   :  { %1025 = vmatprep.subr.bf16.mxu0 %v1411_v52  ;;  %v1497_v52 = vld [vmem:[%s2056_s1 + $0x1a0] ss:$8 sps:$4 sm:$0xff]  }
  0x33   :  { %944 = vmatpush1.bf16.msra.mxu1 %v1413_v54  ;;  %v1505_v54 = vld [vmem:[%s2056_s1 + $0x1b4] ss:$8 sps:$4 sm:$0xff]  }
  0x34   :  { %1026 = vmatpush1.bf16.msra.mxu0 %v1414_v55  ;;  %945 = vmatprep.subr.bf16.mxu1 %v1415_v56  ;;  %v1508_v55 = vld [vmem:[%s2056_s1 + $0x3b4] ss:$8 sps:$4 sm:$0xff]   ;;  %v1503_v56 = vld [vmem:[%s2056_s1 + $0x1b0] ss:$8 sps:$4 sm:$0xff]  }
  0x35   :  { %1027 = vmatprep.subr.bf16.mxu0 %v1417_v57  ;;  %v1506_v57 = vld [vmem:[%s2056_s1 + $0x3b0] ss:$8 sps:$4 sm:$0xff]  }
  0x37   :  { %946 = vmatpush1.bf16.msra.mxu1 %v1419_v58  ;;  %v1511_v58 = vld [vmem:[%s2056_s1 + $0x1c4] ss:$8 sps:$4 sm:$0xff]  }
  0x38   :  { %1028 = vmatpush1.bf16.msra.mxu0 %v1420_v59  ;;  %947 = vmatprep.subr.bf16.mxu1 %v1421_v60  ;;  %v1514_v59 = vld [vmem:[%s2056_s1 + $0x3c4] ss:$8 sps:$4 sm:$0xff]   ;;  %v1509_v60 = vld [vmem:[%s2056_s1 + $0x1c0] ss:$8 sps:$4 sm:$0xff]  }
  0x39   :  { %1029 = vmatprep.subr.bf16.mxu0 %v1423_v61  ;;  %v1512_v61 = vld [vmem:[%s2056_s1 + $0x3c0] ss:$8 sps:$4 sm:$0xff]  }
  0x3b   :  { %948 = vmatpush1.bf16.msra.mxu1 %v1425_v62  ;;  %v1517_v62 = vld [vmem:[%s2056_s1 + $0x1d4] ss:$8 sps:$4 sm:$0xff]  }
  0x3c   :  { %1030 = vmatpush1.bf16.msra.mxu0 %v1426_v63  ;;  %949 = vmatprep.subr.bf16.mxu1 %v1427_v0  ;;  %v1520_v63 = vld [vmem:[%s2056_s1 + $0x3d4] ss:$8 sps:$4 sm:$0xff]   ;;  %v1515_v0 = vld [vmem:[%s2056_s1 + $0x1d0] ss:$8 sps:$4 sm:$0xff]  }
  0x3d   :  { %1031 = vmatprep.subr.bf16.mxu0 %v1429_v1  ;;  %v1518_v1 = vld [vmem:[%s2056_s1 + $0x3d0] ss:$8 sps:$4 sm:$0xff]  }
  0x3f   :  { %950 = vmatpush1.bf16.msra.mxu1 %v1431_v2  ;;  %v1523_v2 = vld [vmem:[%s2056_s1 + $0x1e4] ss:$8 sps:$4 sm:$0xff]  }
  0x40   :  { %1032 = vmatpush1.bf16.msra.mxu0 %v1432_v3  ;;  %960 = vmatprep.subr.bf16.mxu1 %v1437_v4  ;;  %v1526_v3 = vld [vmem:[%s2056_s1 + $0x3e4] ss:$8 sps:$4 sm:$0xff]   ;;  %v1521_v4 = vld [vmem:[%s2056_s1 + $0x1e0] ss:$8 sps:$4 sm:$0xff]  }
  0x41   :  { %1042 = vmatprep.subr.bf16.mxu0 %v1442_v5  ;;  %v1524_v5 = vld [vmem:[%s2056_s1 + $0x3e0] ss:$8 sps:$4 sm:$0xff]  }
  0x42   :  { %952 = vmatmul.mubr.bf16.vlgmr.msra.gmra.mrb[0].mxu1 %v1167_v6  ;;  %v1529_v6 = vld [vmem:[%s2056_s1 + $0x1f4] ss:$8 sps:$4 sm:$0xff]  }
  0x43   :  { %1034 = vmatmul.mubr.bf16.vlgmr.msra.gmra.mrb[0].mxu0 %v1171_v7  ;;  %961 = vmatpush1.bf16.msra.mxu1 %v1435_v8  ;;  %v1532_v7 = vld [vmem:[%s2056_s1 + $0x3f4] ss:$8 sps:$4 sm:$0xff]   ;;  %v1527_v8 = vld [vmem:[%s2056_s1 + $0x1f0] ss:$8 sps:$4 sm:$0xff]  }
  0x44   :  { %1043 = vmatpush1.bf16.msra.mxu0 %v1440_v9  ;;  %962 = vmatprep.subr.bf16.mxu1 %v1445_v10  ;;  %v1530_v9 = vld [vmem:[%s2056_s1 + $0x3f0] ss:$8 sps:$4 sm:$0xff]   ;;  %v1539_v10 = vld [vmem:[%s2056_s1 + $0x404] ss:$8 sps:$4 sm:$0xff]  }
  0x45   :  { %1044 = vmatprep.subr.bf16.mxu0 %v1448_v11  ;;  %992 = vmatprep.mubr.bf16.mxu1 %v1170_v36  ;;  %v1169_v11 = vcombine.low %v1867_v32, %v1867_v32 }
  0x46   :  { %1074 = vmatprep.mubr.bf16.mxu0 %v1174_v37  ;;  %v1124_v37 = vld [vmem:[%s2058_s2] sm:$0x3] }
  0x47   :  { %963 = vmatpush1.bf16.msra.mxu1 %v1443_v12  ;;  %v1173_v12 = vcombine.low %v1872_v33, %v1872_v33 }
  0x48   :  { %1045 = vmatpush1.bf16.msra.mxu0 %v1446_v13  ;;  %964 = vmatprep.subr.bf16.mxu1 %v1451_v14  ;;  %v1537_v13 = vld [vmem:[%s2056_s1 + $0x400] ss:$8 sps:$4 sm:$0xff]   ;;  %v1542_v14 = vld [vmem:[%s2056_s1 + $0x414] ss:$8 sps:$4 sm:$0xff]  }
  0x49   :  { %1046 = vmatprep.subr.bf16.mxu0 %v1454_v15  ;;  %v1540_v15 = vld [vmem:[%s2056_s1 + $0x410] ss:$8 sps:$4 sm:$0xff]  }
  0x4b   :  { %965 = vmatpush1.bf16.msra.mxu1 %v1449_v16  ;;  %v1562_v16 = vmov 0  }
  0x4c   :  { %1047 = vmatpush1.bf16.msra.mxu0 %v1452_v17  ;;  %966 = vmatprep.subr.bf16.mxu1 %v1457_v18  ;;  %v1545_v17 = vld [vmem:[%s2056_s1 + $0x424] ss:$8 sps:$4 sm:$0xff]   ;;  %v1543_v18 = vld [vmem:[%s2056_s1 + $0x420] ss:$8 sps:$4 sm:$0xff]  }
  0x4d   :  { %1048 = vmatprep.subr.bf16.mxu0 %v1460_v19  ;;  %v1548_v19 = vld [vmem:[%s2056_s1 + $0x434] ss:$8 sps:$4 sm:$0xff]  }
  0x4f   :  { %967 = vmatpush1.bf16.msra.mxu1 %v1455_v20  ;;  %v1546_v20 = vld [vmem:[%s2056_s1 + $0x430] ss:$8 sps:$4 sm:$0xff]  }
  0x50   :  { %1049 = vmatpush1.bf16.msra.mxu0 %v1458_v21  ;;  %968 = vmatprep.subr.bf16.mxu1 %v1463_v22  ;;  %v1551_v21 = vld [vmem:[%s2056_s1 + $0x444] ss:$8 sps:$4 sm:$0xff]   ;;  %v1549_v22 = vld [vmem:[%s2056_s1 + $0x440] ss:$8 sps:$4 sm:$0xff]  }
  0x51   :  { %1050 = vmatprep.subr.bf16.mxu0 %v1466_v23  ;;  %v1554_v23 = vld [vmem:[%s2056_s1 + $0x454] ss:$8 sps:$4 sm:$0xff]  }
  0x53   :  { %969 = vmatpush1.bf16.msra.mxu1 %v1461_v24  ;;  %v1552_v24 = vld [vmem:[%s2056_s1 + $0x450] ss:$8 sps:$4 sm:$0xff]  }
  0x54   :  { %1051 = vmatpush1.bf16.msra.mxu0 %v1464_v25  ;;  %970 = vmatprep.subr.bf16.mxu1 %v1469_v26  ;;  %v1557_v25 = vld [vmem:[%s2056_s1 + $0x464] ss:$8 sps:$4 sm:$0xff]   ;;  %v1555_v26 = vld [vmem:[%s2056_s1 + $0x460] ss:$8 sps:$4 sm:$0xff]  }
  0x55   :  { %1052 = vmatprep.subr.bf16.mxu0 %v1472_v27  ;;  %v1560_v27 = vld [vmem:[%s2056_s1 + $0x474] ss:$8 sps:$4 sm:$0xff]  }
  0x57   :  { %971 = vmatpush1.bf16.msra.mxu1 %v1467_v28  ;;  %v1558_v28 = vld [vmem:[%s2056_s1 + $0x470] ss:$8 sps:$4 sm:$0xff]  }
  0x58   :  { %1053 = vmatpush1.bf16.msra.mxu0 %v1470_v29  ;;  %972 = vmatprep.subr.bf16.mxu1 %v1475_v30  ;;  %v1561_v29 = vld [vmem:[%s2057_s0 + $0x20] ss:$0 sps:$4 sm:$0xff]  }
  0x59   :  { %1054 = vmatprep.subr.bf16.mxu0 %v1478_v31 }
  0x5b   :  { %973 = vmatpush1.bf16.msra.mxu1 %v1473_v34  ;;  %v1126_v34 = vlaneseq }
  0x5c   :  { %1055 = vmatpush1.bf16.msra.mxu0 %v1476_v35  ;;  %974 = vmatprep.subr.bf16.mxu1 %v1481_v38 }
  0x5d   :  { %1056 = vmatprep.subr.bf16.mxu0 %v1484_v39  ;;  %v1127_v35 = vshrl.u32 %v1126_v34, 7  ;;  %v1138_v39 = vld [vmem:[%s2059_s3] sm:$0x3] }
  0x5f   :  { %975 = vmatpush1.bf16.msra.mxu1 %v1479_v40  ;;  %v1128_v36 = vsub.s32 0, %v1127_v35  ;;  %v1132_v38 = vsub.s32 1, %v1127_v35 }
  0x60   :  { %1057 = vmatpush1.bf16.msra.mxu0 %v1482_v41  ;;  %976 = vmatprep.subr.bf16.mxu1 %v1487_v42 }
  0x61   :  { %1058 = vmatprep.subr.bf16.mxu0 %v1490_v43  ;;  %v1129_v40 = vrot.slane %v1124_v37, %v1128_v36  ;;  %v1133_v42 = vrot.slane %v1124_v37, %v1132_v38 }
  0x63   :  { %977 = vmatpush1.bf16.msra.mxu1 %v1485_v44  ;;  %v1143_v44 = vrot.slane %v1138_v39, %v1128_v36 }
  0x64   :  { %1059 = vmatpush1.bf16.msra.mxu0 %v1488_v45  ;;  %978 = vmatprep.subr.bf16.mxu1 %v1493_v46 }
  0x65   :  { %1060 = vmatprep.subr.bf16.mxu0 %v1496_v47  ;;  %v1147_v47 = vrot.slane %v1138_v39, %v1132_v38 }
  0x67   :  { %979 = vmatpush1.bf16.msra.mxu1 %v1491_v48 }
  0x68   :  { %1061 = vmatpush1.bf16.msra.mxu0 %v1494_v49  ;;  %980 = vmatprep.subr.bf16.mxu1 %v1499_v50 }
  0x69   :  { %1062 = vmatprep.subr.bf16.mxu0 %v1502_v51 }
  0x6b   :  { %981 = vmatpush1.bf16.msra.mxu1 %v1497_v52 }
  0x6c   :  { %1063 = vmatpush1.bf16.msra.mxu0 %v1500_v53  ;;  %982 = vmatprep.subr.bf16.mxu1 %v1505_v54 }
  0x6d   :  { %1064 = vmatprep.subr.bf16.mxu0 %v1508_v55 }
  0x6f   :  { %983 = vmatpush1.bf16.msra.mxu1 %v1503_v56 }
  0x70   :  { %1065 = vmatpush1.bf16.msra.mxu0 %v1506_v57  ;;  %984 = vmatprep.subr.bf16.mxu1 %v1511_v58 }
  0x71   :  { %1066 = vmatprep.subr.bf16.mxu0 %v1514_v59 }
  0x73   :  { %985 = vmatpush1.bf16.msra.mxu1 %v1509_v60 }
  0x74   :  { %1067 = vmatpush1.bf16.msra.mxu0 %v1512_v61  ;;  %986 = vmatprep.subr.bf16.mxu1 %v1517_v62 }
  0x75   :  { %1068 = vmatprep.subr.bf16.mxu0 %v1520_v63 }
  0x77   :  { %987 = vmatpush1.bf16.msra.mxu1 %v1515_v0 }
  0x78   :  { %1069 = vmatpush1.bf16.msra.mxu0 %v1518_v1  ;;  %988 = vmatprep.subr.bf16.mxu1 %v1523_v2 }
  0x79   :  { %1070 = vmatprep.subr.bf16.mxu0 %v1526_v3 }
  0x7b   :  { %989 = vmatpush1.bf16.msra.mxu1 %v1521_v4 }
  0x7c   :  { %1071 = vmatpush1.bf16.msra.mxu0 %v1524_v5  ;;  %990 = vmatprep.subr.bf16.mxu1 %v1529_v6 }
  0x7d   :  { %1072 = vmatprep.subr.bf16.mxu0 %v1532_v7 }
  0x7f   :  { %991 = vmatpush1.bf16.msra.mxu1 %v1527_v8 }
  0x80   :  { %1073 = vmatpush1.bf16.msra.mxu0 %v1530_v9 }
  0x81   :  { %1083 = vmatprep.subr.bf16.mxu0 %v1539_v10 }
  0x82   :  { %993 = vmatmul.mubr.bf16.vlgmr.msra.gmra.mrb[0].mxu1 %v1169_v11 }
  0x83   :  { %1075 = vmatmul.mubr.bf16.vlgmr.msra.gmra.mrb[0].mxu0 %v1173_v12 }
  0x84   :  { %1084 = vmatpush1.bf16.msra.mxu0 %v1537_v13  ;;  %1115 = vmatprep.mubr.bf16.mxu0 %v1562_v16 }
  0x85   :  { %1085 = vmatprep.subr.bf16.mxu0 %v1542_v14 }
  0x88   :  { %1086 = vmatpush1.bf16.msra.mxu0 %v1540_v15 }
  0x89   :  { %1087 = vmatprep.subr.bf16.mxu0 %v1545_v17 }
  0x8c   :  { %1088 = vmatpush1.bf16.msra.mxu0 %v1543_v18 }
  0x8d   :  { %1089 = vmatprep.subr.bf16.mxu0 %v1548_v19 }
  0x90   :  { %1090 = vmatpush1.bf16.msra.mxu0 %v1546_v20 }
  0x91   :  { %1091 = vmatprep.subr.bf16.mxu0 %v1551_v21 }
  0x94   :  { %1092 = vmatpush1.bf16.msra.mxu0 %v1549_v22 }
  0x95   :  { %1093 = vmatprep.subr.bf16.mxu0 %v1554_v23 }
  0x98   :  { %1094 = vmatpush1.bf16.msra.mxu0 %v1552_v24 }
  0x99   :  { %1095 = vmatprep.subr.bf16.mxu0 %v1557_v25 }
  0x9c   :  { %1096 = vmatpush1.bf16.msra.mxu0 %v1555_v26 }
  0x9d   :  { %1097 = vmatprep.subr.bf16.mxu0 %v1560_v27 }
  0xa0   :  { %1098 = vmatpush1.bf16.msra.mxu0 %v1558_v28 }
  0xa3   :  { %1116 = vmatmul.mubr.bf16.vlgmr.msra.gmra.mrb[0].mxu0 %v1561_v29 }
 0x155   :  { %v994_v30 = vpop.f32.mrb[0].mxu1 }
 0x156   :  { %v996_v31 = vpop.f32.mrb[1].mxu1 }
 0x157   :  { %v998_v32 = vpop.f32.mrb[2].mxu1 }
 0x158   :  { %v999_v33 = vpop.f32.mrb[3].mxu1 }
 0x176   :  { %v1117_v41 = vpop.f32.mrb[0].mxu0 }
 0x177   :  { %v1322_v43 = vadd.f32 %v1117_v41, %v994_v30  ;;  %v1119_v45 = vpop.f32.mrb[1].mxu0 }
 0x178   :  { %v1323_v46 = vadd.f32 %v1119_v45, %v996_v31  ;;  %v1121_v48 = vpop.f32.mrb[2].mxu0 }
 0x179   :  { %v1136_v49 = vmul.f32 %v1322_v43, %v1129_v40  ;;  %v1122_v50 = vpop.f32.mrb[3].mxu0 }
 0x17a   :  { %v1137_v51 = vmul.f32 %v1323_v46, %v1133_v42 }
 0x17b   :  { %v1150_v52 = vadd.f32 %v1143_v44, %v1136_v49 }
 0x17c   :  { %v1151_v53 = vadd.f32 %v1147_v47, %v1137_v51 }
 0x17d   :  { %v1152_v54 = vmax.f32 %v1150_v52, 0.0 }
 0x17e   :  { %v1153_v55 = vmax.f32 %v1151_v53, 0.0 }
 0x180   :  { %v1321_v56 = vpack.c.bf16 %v1153_v55, %v1152_v54 }
 0x182   :  { %1162 = vst [vmem:[%s2060_s4] sm:$0xff] %v1321_v56 }

// kernel: faceboxes_forward.41
= control target key start
LH: loop header
LB: loop body
LE: loop exit
PB: predicated region body
PF: predicated region fallthrough
CT: control target
= control target key end

     0   :  { %v1598_v36 = vmov 1966171168   ;;  %v170_v38 = vlaneseq  ;;  %s2097_s1 = inlined_call_operand.vmem [shape: bf16[1152,256], index: 1, kind: input, shape index: {}]   ;;  %s2098_s0 = inlined_call_operand.vmem [shape: bf16[2,1152], index: 0, kind: input, shape index: {}]   ;;  %s2099_s2 = inlined_call_operand.vmem [shape: f32[1,256], index: 2, kind: input, shape index: {}]   ;;  %s2100_s3 = inlined_call_operand.vmem [shape: f32[1,256], index: 3, kind: input, shape index: {}]   ;;  %s2101_s4 = inlined_call_operand.vmem [shape: bf16[2,256], index: 4, kind: output, shape index: {}]  }
   0x1   :  { %v1381_v0 = vld [vmem:[%s2097_s1 + $0x4] ss:$8 sps:$4 sm:$0xff]   ;;  %v1385_v2 = vld [vmem:[%s2097_s1] ss:$8 sps:$4 sm:$0xff]   ;;  %v1387_v4 = vld [vmem:[%s2097_s1 + $0x14] ss:$8 sps:$4 sm:$0xff]   ;;  %v168_v37 = vunpack.c.l.s4 %v1598_v36 }
   0x2   :  { %v1383_v1 = vld [vmem:[%s2097_s1 + $0x204] ss:$8 sps:$4 sm:$0xff]   ;;  %958 = vmatprep.subr.bf16.mxu1 %v1381_v0  ;;  %v1386_v3 = vld [vmem:[%s2097_s1 + $0x200] ss:$8 sps:$4 sm:$0xff]   ;;  %v1389_v5 = vld [vmem:[%s2097_s1 + $0x214] ss:$8 sps:$4 sm:$0xff]  }
   0x3   :  { %1040 = vmatprep.subr.bf16.mxu0 %v1383_v1  ;;  %959 = vmatpush1.bf16.msra.mxu1 %v1385_v2  ;;  %v1391_v6 = vld [vmem:[%s2097_s1 + $0x10] ss:$8 sps:$4 sm:$0xff]   ;;  %v1393_v8 = vld [vmem:[%s2097_s1 + $0x24] ss:$8 sps:$4 sm:$0xff]   ;;  %v1397_v10 = vld [vmem:[%s2097_s1 + $0x20] ss:$8 sps:$4 sm:$0xff]   ;;  %v169_v42 = vunpack.c.0.s8 %v168_v37 }
   0x4   :  { %1041 = vmatpush1.bf16.msra.mxu0 %v1386_v3  ;;  %960 = vmatprep.subr.bf16.mxu1 %v1387_v4  ;;  %v1392_v7 = vld [vmem:[%s2097_s1 + $0x210] ss:$8 sps:$4 sm:$0xff]   ;;  %v1395_v9 = vld [vmem:[%s2097_s1 + $0x224] ss:$8 sps:$4 sm:$0xff]   ;;  %v1398_v11 = vld [vmem:[%s2097_s1 + $0x220] ss:$8 sps:$4 sm:$0xff]  }
   0x5   :  { %1042 = vmatprep.subr.bf16.mxu0 %v1389_v5  ;;  %v1399_v12 = vld [vmem:[%s2097_s1 + $0x34] ss:$8 sps:$4 sm:$0xff]   ;;  %v1403_v14 = vld [vmem:[%s2097_s1 + $0x30] ss:$8 sps:$4 sm:$0xff]   ;;  %v1405_v16 = vld [vmem:[%s2097_s1 + $0x44] ss:$8 sps:$4 sm:$0xff]  }
   0x6   :  { %v1401_v13 = vld [vmem:[%s2097_s1 + $0x234] ss:$8 sps:$4 sm:$0xff]   ;;  %v1404_v15 = vld [vmem:[%s2097_s1 + $0x230] ss:$8 sps:$4 sm:$0xff]   ;;  %v1407_v17 = vld [vmem:[%s2097_s1 + $0x244] ss:$8 sps:$4 sm:$0xff]  }
   0x7   :  { %961 = vmatpush1.bf16.msra.mxu1 %v1391_v6  ;;  %v1409_v18 = vld [vmem:[%s2097_s1 + $0x40] ss:$8 sps:$4 sm:$0xff]   ;;  %v1411_v20 = vld [vmem:[%s2097_s1 + $0x54] ss:$8 sps:$4 sm:$0xff]   ;;  %v1415_v22 = vld [vmem:[%s2097_s1 + $0x50] ss:$8 sps:$4 sm:$0xff]  }
   0x8   :  { %1043 = vmatpush1.bf16.msra.mxu0 %v1392_v7  ;;  %962 = vmatprep.subr.bf16.mxu1 %v1393_v8  ;;  %v1410_v19 = vld [vmem:[%s2097_s1 + $0x240] ss:$8 sps:$4 sm:$0xff]   ;;  %v1413_v21 = vld [vmem:[%s2097_s1 + $0x254] ss:$8 sps:$4 sm:$0xff]   ;;  %v1416_v23 = vld [vmem:[%s2097_s1 + $0x250] ss:$8 sps:$4 sm:$0xff]  }
   0x9   :  { %1044 = vmatprep.subr.bf16.mxu0 %v1395_v9  ;;  %v1417_v24 = vld [vmem:[%s2097_s1 + $0x64] ss:$8 sps:$4 sm:$0xff]   ;;  %v1421_v26 = vld [vmem:[%s2097_s1 + $0x60] ss:$8 sps:$4 sm:$0xff]   ;;  %v1423_v28 = vld [vmem:[%s2097_s1 + $0x74] ss:$8 sps:$4 sm:$0xff]  }
   0xa   :  { %v1419_v25 = vld [vmem:[%s2097_s1 + $0x264] ss:$8 sps:$4 sm:$0xff]   ;;  %v1422_v27 = vld [vmem:[%s2097_s1 + $0x260] ss:$8 sps:$4 sm:$0xff]   ;;  %v1425_v29 = vld [vmem:[%s2097_s1 + $0x274] ss:$8 sps:$4 sm:$0xff]  }
   0xb   :  { %963 = vmatpush1.bf16.msra.mxu1 %v1397_v10  ;;  %v1427_v30 = vld [vmem:[%s2097_s1 + $0x70] ss:$8 sps:$4 sm:$0xff]   ;;  %v1429_v32 = vld [vmem:[%s2097_s1 + $0x84] ss:$8 sps:$4 sm:$0xff]   ;;  %v1433_v34 = vld [vmem:[%s2097_s1 + $0x80] ss:$8 sps:$4 sm:$0xff]  }
   0xc   :  { %1045 = vmatpush1.bf16.msra.mxu0 %v1398_v11  ;;  %964 = vmatprep.subr.bf16.mxu1 %v1399_v12  ;;  %v1428_v31 = vld [vmem:[%s2097_s1 + $0x270] ss:$8 sps:$4 sm:$0xff]   ;;  %v1431_v33 = vld [vmem:[%s2097_s1 + $0x284] ss:$8 sps:$4 sm:$0xff]   ;;  %v1434_v35 = vld [vmem:[%s2097_s1 + $0x280] ss:$8 sps:$4 sm:$0xff]  }
   0xd   :  { %1046 = vmatprep.subr.bf16.mxu0 %v1401_v13  ;;  %v1435_v39 = vld [vmem:[%s2097_s1 + $0x94] ss:$8 sps:$4 sm:$0xff]   ;;  %v1439_v41 = vld [vmem:[%s2097_s1 + $0x90] ss:$8 sps:$4 sm:$0xff]   ;;  %v1742_v43 = vshrl.u32 %v170_v38, 7  ;;  %v18_v52 = vld [vmem:[%s2098_s0] sm:$0xff] }
   0xe   :  { %v1437_v40 = vld [vmem:[%s2097_s1 + $0x294] ss:$8 sps:$4 sm:$0xff]   ;;  %v1440_v44 = vld [vmem:[%s2097_s1 + $0x290] ss:$8 sps:$4 sm:$0xff]   ;;  %v1441_v45 = vld [vmem:[%s2097_s1 + $0xa4] ss:$8 sps:$4 sm:$0xff]   ;;  %v166_v55 = vcombine.high %v18_v52, %v18_v52 }
   0xf   :  { %965 = vmatpush1.bf16.msra.mxu1 %v1403_v14  ;;  %v1443_v46 = vld [vmem:[%s2097_s1 + $0x2a4] ss:$8 sps:$4 sm:$0xff]   ;;  %v1445_v47 = vld [vmem:[%s2097_s1 + $0xa0] ss:$8 sps:$4 sm:$0xff]   ;;  %v1760_v49 = vsub.s32 %v169_v42, %v1742_v43  ;;  %v1447_v50 = vld [vmem:[%s2097_s1 + $0xb4] ss:$8 sps:$4 sm:$0xff]  }
  0x10   :  { %1047 = vmatpush1.bf16.msra.mxu0 %v1404_v15  ;;  %966 = vmatprep.subr.bf16.mxu1 %v1405_v16  ;;  %v1446_v48 = vld [vmem:[%s2097_s1 + $0x2a0] ss:$8 sps:$4 sm:$0xff]   ;;  %v1449_v51 = vld [vmem:[%s2097_s1 + $0x2b4] ss:$8 sps:$4 sm:$0xff]   ;;  %v1451_v53 = vld [vmem:[%s2097_s1 + $0xb0] ss:$8 sps:$4 sm:$0xff]  }
  0x11   :  { %1048 = vmatprep.subr.bf16.mxu0 %v1407_v17  ;;  %v173_v54 = vrot.slane %v18_v52, %v1760_v49  ;;  %v1452_v56 = vld [vmem:[%s2097_s1 + $0x2b0] ss:$8 sps:$4 sm:$0xff]   ;;  %v1453_v57 = vld [vmem:[%s2097_s1 + $0xc4] ss:$8 sps:$4 sm:$0xff]   ;;  %v180_v60 = vrot.slane %v166_v55, %v1760_v49  ;;  %v1457_v61 = vld [vmem:[%s2097_s1 + $0xc0] ss:$8 sps:$4 sm:$0xff]  }
  0x12   :  { %v1455_v58 = vld [vmem:[%s2097_s1 + $0x2c4] ss:$8 sps:$4 sm:$0xff]   ;;  %v1458_v0 = vld [vmem:[%s2097_s1 + $0x2c0] ss:$8 sps:$4 sm:$0xff]   ;;  %v1459_v1 = vld [vmem:[%s2097_s1 + $0xd4] ss:$8 sps:$4 sm:$0xff]  }
  0x13   :  { %967 = vmatpush1.bf16.msra.mxu1 %v1409_v18  ;;  %v181_v59 = vcombine.high %v173_v54, %v173_v54  ;;  %v182_v63 = vcombine.high %v180_v60, %v180_v60  ;;  %v1461_v2 = vld [vmem:[%s2097_s1 + $0x2d4] ss:$8 sps:$4 sm:$0xff]   ;;  %v1463_v4 = vld [vmem:[%s2097_s1 + $0xd0] ss:$8 sps:$4 sm:$0xff]   ;;  %v1465_v6 = vld [vmem:[%s2097_s1 + $0xe4] ss:$8 sps:$4 sm:$0xff]   ;;  %v1839_v17 = vrot.slane %v173_v54, %v1760_v49  ;;  %v1842_v18 = vrot.slane %v180_v60, %v1760_v49 }
  0x14   :  { %1049 = vmatpush1.bf16.msra.mxu0 %v1410_v19  ;;  %968 = vmatprep.subr.bf16.mxu1 %v1411_v20  ;;  %v1464_v5 = vld [vmem:[%s2097_s1 + $0x2d0] ss:$8 sps:$4 sm:$0xff]   ;;  %v1467_v7 = vld [vmem:[%s2097_s1 + $0x2e4] ss:$8 sps:$4 sm:$0xff]   ;;  %v1469_v8 = vld [vmem:[%s2097_s1 + $0xe0] ss:$8 sps:$4 sm:$0xff]  }
  0x15   :  { %1050 = vmatprep.subr.bf16.mxu0 %v1413_v21  ;;  %v203_v62 = vrot.slane %v181_v59, %v1760_v49  ;;  %v210_v3 = vrot.slane %v182_v63, %v1760_v49  ;;  %v1470_v9 = vld [vmem:[%s2097_s1 + $0x2e0] ss:$8 sps:$4 sm:$0xff]   ;;  %v1471_v10 = vld [vmem:[%s2097_s1 + $0xf4] ss:$8 sps:$4 sm:$0xff]   ;;  %v1475_v12 = vld [vmem:[%s2097_s1 + $0xf0] ss:$8 sps:$4 sm:$0xff]  }
  0x16   :  { %v1473_v11 = vld [vmem:[%s2097_s1 + $0x2f4] ss:$8 sps:$4 sm:$0xff]   ;;  %v1476_v13 = vld [vmem:[%s2097_s1 + $0x2f0] ss:$8 sps:$4 sm:$0xff]   ;;  %v1479_v14 = vld [vmem:[%s2097_s1 + $0x104] ss:$8 sps:$4 sm:$0xff]  }
  0x17   :  { %969 = vmatpush1.bf16.msra.mxu1 %v1415_v22  ;;  %990 = vmatprep.mubr.bf16.mxu1 %v203_v62  ;;  %v1483_v15 = vld [vmem:[%s2097_s1 + $0x304] ss:$8 sps:$4 sm:$0xff]   ;;  %v1477_v16 = vld [vmem:[%s2097_s1 + $0x100] ss:$8 sps:$4 sm:$0xff]   ;;  %v1486_v20 = vld [vmem:[%s2097_s1 + $0x114] ss:$8 sps:$4 sm:$0xff]   ;;  %v213_v22 = vcombine.high %v203_v62, %v203_v62 }
  0x18   :  { %1051 = vmatpush1.bf16.msra.mxu0 %v1416_v23  ;;  %970 = vmatprep.subr.bf16.mxu1 %v1417_v24  ;;  %v1481_v19 = vld [vmem:[%s2097_s1 + $0x300] ss:$8 sps:$4 sm:$0xff]   ;;  %v1489_v21 = vld [vmem:[%s2097_s1 + $0x314] ss:$8 sps:$4 sm:$0xff]   ;;  %v214_v23 = vcombine.high %v210_v3, %v210_v3  ;;  %v1484_v24 = vld [vmem:[%s2097_s1 + $0x110] ss:$8 sps:$4 sm:$0xff]  }
  0x19   :  { %1052 = vmatprep.subr.bf16.mxu0 %v1419_v25  ;;  %1072 = vmatprep.mubr.bf16.mxu0 %v210_v3  ;;  %v1487_v25 = vld [vmem:[%s2097_s1 + $0x310] ss:$8 sps:$4 sm:$0xff]   ;;  %v1502_v36 = vld [vmem:[%s2097_s1 + $0x140] ss:$8 sps:$4 sm:$0xff]   ;;  %v1510_v38 = vld [vmem:[%s2097_s1 + $0x154] ss:$8 sps:$4 sm:$0xff]  }
  0x1a   :  { %v1505_v37 = vld [vmem:[%s2097_s1 + $0x340] ss:$8 sps:$4 sm:$0xff]   ;;  %v1516_v42 = vld [vmem:[%s2097_s1 + $0x164] ss:$8 sps:$4 sm:$0xff]   ;;  %v1535_v59 = vld [vmem:[%s2097_s1 + $0x390] ss:$8 sps:$4 sm:$0xff]  }
  0x1b   :  { %971 = vmatpush1.bf16.msra.mxu1 %v1421_v26  ;;  %v1492_v26 = vld [vmem:[%s2097_s1 + $0x124] ss:$8 sps:$4 sm:$0xff]   ;;  %v1526_v54 = vld [vmem:[%s2097_s1 + $0x180] ss:$8 sps:$4 sm:$0xff]   ;;  %v1547_v3 = vld [vmem:[%s2097_s1 + $0x3b0] ss:$8 sps:$4 sm:$0xff]  }
  0x1c   :  { %1053 = vmatpush1.bf16.msra.mxu0 %v1422_v27  ;;  %972 = vmatprep.subr.bf16.mxu1 %v1423_v28  ;;  %v1495_v27 = vld [vmem:[%s2097_s1 + $0x324] ss:$8 sps:$4 sm:$0xff]   ;;  %v1490_v28 = vld [vmem:[%s2097_s1 + $0x120] ss:$8 sps:$4 sm:$0xff]  }
  0x1d   :  { %1054 = vmatprep.subr.bf16.mxu0 %v1425_v29  ;;  %v1493_v29 = vld [vmem:[%s2097_s1 + $0x320] ss:$8 sps:$4 sm:$0xff]   ;;  %v1528_v52 = vld [vmem:[%s2097_s1 + $0x184] ss:$8 sps:$4 sm:$0xff]  }
  0x1e   :  { %v1529_v55 = vld [vmem:[%s2097_s1 + $0x380] ss:$8 sps:$4 sm:$0xff]   ;;  %v1540_v60 = vld [vmem:[%s2097_s1 + $0x1a4] ss:$8 sps:$4 sm:$0xff]  }
  0x1f   :  { %973 = vmatpush1.bf16.msra.mxu1 %v1427_v30  ;;  %v1498_v30 = vld [vmem:[%s2097_s1 + $0x134] ss:$8 sps:$4 sm:$0xff]   ;;  %v1538_v62 = vld [vmem:[%s2097_s1 + $0x1a0] ss:$8 sps:$4 sm:$0xff]  }
  0x20   :  { %1055 = vmatpush1.bf16.msra.mxu0 %v1428_v31  ;;  %974 = vmatprep.subr.bf16.mxu1 %v1429_v32  ;;  %v1501_v31 = vld [vmem:[%s2097_s1 + $0x334] ss:$8 sps:$4 sm:$0xff]   ;;  %v1496_v32 = vld [vmem:[%s2097_s1 + $0x130] ss:$8 sps:$4 sm:$0xff]   ;;  %v1541_v63 = vld [vmem:[%s2097_s1 + $0x3a0] ss:$8 sps:$4 sm:$0xff]  }
  0x21   :  { %1056 = vmatprep.subr.bf16.mxu0 %v1431_v33  ;;  %v1499_v33 = vld [vmem:[%s2097_s1 + $0x330] ss:$8 sps:$4 sm:$0xff]  }
  0x23   :  { %975 = vmatpush1.bf16.msra.mxu1 %v1433_v34  ;;  %v1504_v34 = vld [vmem:[%s2097_s1 + $0x144] ss:$8 sps:$4 sm:$0xff]  }
  0x24   :  { %1057 = vmatpush1.bf16.msra.mxu0 %v1434_v35  ;;  %976 = vmatprep.subr.bf16.mxu1 %v1435_v39  ;;  %v1507_v35 = vld [vmem:[%s2097_s1 + $0x344] ss:$8 sps:$4 sm:$0xff]   ;;  %v1513_v39 = vld [vmem:[%s2097_s1 + $0x354] ss:$8 sps:$4 sm:$0xff]  }
  0x25   :  { %1058 = vmatprep.subr.bf16.mxu0 %v1437_v40  ;;  %v1508_v40 = vld [vmem:[%s2097_s1 + $0x150] ss:$8 sps:$4 sm:$0xff]  }
  0x27   :  { %977 = vmatpush1.bf16.msra.mxu1 %v1439_v41  ;;  %v1511_v41 = vld [vmem:[%s2097_s1 + $0x350] ss:$8 sps:$4 sm:$0xff]  }
  0x28   :  { %1059 = vmatpush1.bf16.msra.mxu0 %v1440_v44  ;;  %978 = vmatprep.subr.bf16.mxu1 %v1441_v45  ;;  %v1519_v44 = vld [vmem:[%s2097_s1 + $0x364] ss:$8 sps:$4 sm:$0xff]   ;;  %v1514_v45 = vld [vmem:[%s2097_s1 + $0x160] ss:$8 sps:$4 sm:$0xff]  }
  0x29   :  { %1060 = vmatprep.subr.bf16.mxu0 %v1443_v46  ;;  %v1517_v46 = vld [vmem:[%s2097_s1 + $0x360] ss:$8 sps:$4 sm:$0xff]  }
  0x2b   :  { %979 = vmatpush1.bf16.msra.mxu1 %v1445_v47  ;;  %v1522_v47 = vld [vmem:[%s2097_s1 + $0x174] ss:$8 sps:$4 sm:$0xff]  }
  0x2c   :  { %1061 = vmatpush1.bf16.msra.mxu0 %v1446_v48  ;;  %980 = vmatprep.subr.bf16.mxu1 %v1447_v50  ;;  %v1525_v48 = vld [vmem:[%s2097_s1 + $0x374] ss:$8 sps:$4 sm:$0xff]   ;;  %v1520_v50 = vld [vmem:[%s2097_s1 + $0x170] ss:$8 sps:$4 sm:$0xff]  }
  0x2d   :  { %1062 = vmatprep.subr.bf16.mxu0 %v1449_v51  ;;  %v1523_v51 = vld [vmem:[%s2097_s1 + $0x370] ss:$8 sps:$4 sm:$0xff]  }
  0x2f   :  { %981 = vmatpush1.bf16.msra.mxu1 %v1451_v53  ;;  %v1531_v53 = vld [vmem:[%s2097_s1 + $0x384] ss:$8 sps:$4 sm:$0xff]  }
  0x30   :  { %1063 = vmatpush1.bf16.msra.mxu0 %v1452_v56  ;;  %982 = vmatprep.subr.bf16.mxu1 %v1453_v57  ;;  %v1534_v56 = vld [vmem:[%s2097_s1 + $0x194] ss:$8 sps:$4 sm:$0xff]  }
  0x31   :  { %1064 = vmatprep.subr.bf16.mxu0 %v1455_v58  ;;  %v1537_v57 = vld [vmem:[%s2097_s1 + $0x394] ss:$8 sps:$4 sm:$0xff]   ;;  %v1532_v58 = vld [vmem:[%s2097_s1 + $0x190] ss:$8 sps:$4 sm:$0xff]  }
  0x33   :  { %983 = vmatpush1.bf16.msra.mxu1 %v1457_v61  ;;  %v1543_v61 = vld [vmem:[%s2097_s1 + $0x3a4] ss:$8 sps:$4 sm:$0xff]  }
  0x34   :  { %1065 = vmatpush1.bf16.msra.mxu0 %v1458_v0  ;;  %984 = vmatprep.subr.bf16.mxu1 %v1459_v1  ;;  %v1546_v0 = vld [vmem:[%s2097_s1 + $0x1b4] ss:$8 sps:$4 sm:$0xff]  }
  0x35   :  { %1066 = vmatprep.subr.bf16.mxu0 %v1461_v2  ;;  %v1549_v1 = vld [vmem:[%s2097_s1 + $0x3b4] ss:$8 sps:$4 sm:$0xff]   ;;  %v1544_v2 = vld [vmem:[%s2097_s1 + $0x1b0] ss:$8 sps:$4 sm:$0xff]  }
  0x37   :  { %985 = vmatpush1.bf16.msra.mxu1 %v1463_v4  ;;  %v1552_v4 = vld [vmem:[%s2097_s1 + $0x1c4] ss:$8 sps:$4 sm:$0xff]  }
  0x38   :  { %1067 = vmatpush1.bf16.msra.mxu0 %v1464_v5  ;;  %986 = vmatprep.subr.bf16.mxu1 %v1465_v6  ;;  %v1555_v5 = vld [vmem:[%s2097_s1 + $0x3c4] ss:$8 sps:$4 sm:$0xff]   ;;  %v1550_v6 = vld [vmem:[%s2097_s1 + $0x1c0] ss:$8 sps:$4 sm:$0xff]  }
  0x39   :  { %1068 = vmatprep.subr.bf16.mxu0 %v1467_v7  ;;  %v1553_v7 = vld [vmem:[%s2097_s1 + $0x3c0] ss:$8 sps:$4 sm:$0xff]  }
  0x3b   :  { %987 = vmatpush1.bf16.msra.mxu1 %v1469_v8  ;;  %v1558_v8 = vld [vmem:[%s2097_s1 + $0x1d4] ss:$8 sps:$4 sm:$0xff]  }
  0x3c   :  { %1069 = vmatpush1.bf16.msra.mxu0 %v1470_v9  ;;  %988 = vmatprep.subr.bf16.mxu1 %v1471_v10  ;;  %v1561_v9 = vld [vmem:[%s2097_s1 + $0x3d4] ss:$8 sps:$4 sm:$0xff]   ;;  %v1556_v10 = vld [vmem:[%s2097_s1 + $0x1d0] ss:$8 sps:$4 sm:$0xff]  }
  0x3d   :  { %1070 = vmatprep.subr.bf16.mxu0 %v1473_v11  ;;  %v1559_v11 = vld [vmem:[%s2097_s1 + $0x3d0] ss:$8 sps:$4 sm:$0xff]  }
  0x3f   :  { %989 = vmatpush1.bf16.msra.mxu1 %v1475_v12  ;;  %v1564_v12 = vld [vmem:[%s2097_s1 + $0x1e4] ss:$8 sps:$4 sm:$0xff]  }
  0x40   :  { %1071 = vmatpush1.bf16.msra.mxu0 %v1476_v13  ;;  %999 = vmatprep.subr.bf16.mxu1 %v1479_v14  ;;  %v1567_v13 = vld [vmem:[%s2097_s1 + $0x3e4] ss:$8 sps:$4 sm:$0xff]   ;;  %v1562_v14 = vld [vmem:[%s2097_s1 + $0x1e0] ss:$8 sps:$4 sm:$0xff]  }
  0x41   :  { %1081 = vmatprep.subr.bf16.mxu0 %v1483_v15  ;;  %v1565_v15 = vld [vmem:[%s2097_s1 + $0x3e0] ss:$8 sps:$4 sm:$0xff]  }
  0x42   :  { %991 = vmatmul.mubr.bf16.vlgmr.msra.gmra.mrb[0].mxu1 %v1839_v17 }
  0x43   :  { %1073 = vmatmul.mubr.bf16.vlgmr.msra.gmra.mrb[0].mxu0 %v1842_v18  ;;  %1000 = vmatpush1.bf16.msra.mxu1 %v1477_v16  ;;  %v1570_v16 = vld [vmem:[%s2097_s1 + $0x1f4] ss:$8 sps:$4 sm:$0xff]  }
  0x44   :  { %1082 = vmatpush1.bf16.msra.mxu0 %v1481_v19  ;;  %1001 = vmatprep.subr.bf16.mxu1 %v1486_v20  ;;  %v1573_v19 = vld [vmem:[%s2097_s1 + $0x3f4] ss:$8 sps:$4 sm:$0xff]   ;;  %v1568_v20 = vld [vmem:[%s2097_s1 + $0x1f0] ss:$8 sps:$4 sm:$0xff]  }
  0x45   :  { %1083 = vmatprep.subr.bf16.mxu0 %v1489_v21  ;;  %1031 = vmatprep.mubr.bf16.mxu1 %v213_v22  ;;  %v1571_v21 = vld [vmem:[%s2097_s1 + $0x3f0] ss:$8 sps:$4 sm:$0xff]   ;;  %v1576_v22 = vld [vmem:[%s2097_s1 + $0x404] ss:$8 sps:$4 sm:$0xff]  }
  0x46   :  { %1113 = vmatprep.mubr.bf16.mxu0 %v214_v23  ;;  %v211_v23 = vcombine.high %v1839_v17, %v1839_v17  ;;  %v1577_v17 = vld [vmem:[%s2097_s1 + $0x410] ss:$8 sps:$4 sm:$0xff]  }
  0x47   :  { %1002 = vmatpush1.bf16.msra.mxu1 %v1484_v24  ;;  %v212_v24 = vcombine.high %v1842_v18, %v1842_v18  ;;  %v1582_v18 = vld [vmem:[%s2097_s1 + $0x424] ss:$8 sps:$4 sm:$0xff]  }
  0x48   :  { %1084 = vmatpush1.bf16.msra.mxu0 %v1487_v25  ;;  %1003 = vmatprep.subr.bf16.mxu1 %v1492_v26  ;;  %v1574_v25 = vld [vmem:[%s2097_s1 + $0x400] ss:$8 sps:$4 sm:$0xff]   ;;  %v1579_v26 = vld [vmem:[%s2097_s1 + $0x414] ss:$8 sps:$4 sm:$0xff]  }
  0x49   :  { %1085 = vmatprep.subr.bf16.mxu0 %v1495_v27  ;;  %v1599_v27 = vmov 0  }
  0x4b   :  { %1004 = vmatpush1.bf16.msra.mxu1 %v1490_v28  ;;  %v1580_v28 = vld [vmem:[%s2097_s1 + $0x420] ss:$8 sps:$4 sm:$0xff]  }
  0x4c   :  { %1086 = vmatpush1.bf16.msra.mxu0 %v1493_v29  ;;  %1005 = vmatprep.subr.bf16.mxu1 %v1498_v30  ;;  %v1585_v29 = vld [vmem:[%s2097_s1 + $0x434] ss:$8 sps:$4 sm:$0xff]   ;;  %v1583_v30 = vld [vmem:[%s2097_s1 + $0x430] ss:$8 sps:$4 sm:$0xff]  }
  0x4d   :  { %1087 = vmatprep.subr.bf16.mxu0 %v1501_v31  ;;  %v1588_v31 = vld [vmem:[%s2097_s1 + $0x444] ss:$8 sps:$4 sm:$0xff]  }
  0x4f   :  { %1006 = vmatpush1.bf16.msra.mxu1 %v1496_v32  ;;  %v1586_v32 = vld [vmem:[%s2097_s1 + $0x440] ss:$8 sps:$4 sm:$0xff]  }
  0x50   :  { %1088 = vmatpush1.bf16.msra.mxu0 %v1499_v33  ;;  %1007 = vmatprep.subr.bf16.mxu1 %v1504_v34  ;;  %v1591_v33 = vld [vmem:[%s2097_s1 + $0x454] ss:$8 sps:$4 sm:$0xff]   ;;  %v1589_v34 = vld [vmem:[%s2097_s1 + $0x450] ss:$8 sps:$4 sm:$0xff]  }
  0x51   :  { %1089 = vmatprep.subr.bf16.mxu0 %v1507_v35  ;;  %v1594_v35 = vld [vmem:[%s2097_s1 + $0x464] ss:$8 sps:$4 sm:$0xff]  }
  0x53   :  { %1008 = vmatpush1.bf16.msra.mxu1 %v1502_v36  ;;  %v1592_v36 = vld [vmem:[%s2097_s1 + $0x460] ss:$8 sps:$4 sm:$0xff]  }
  0x54   :  { %1090 = vmatpush1.bf16.msra.mxu0 %v1505_v37  ;;  %1009 = vmatprep.subr.bf16.mxu1 %v1510_v38  ;;  %v1597_v37 = vld [vmem:[%s2097_s1 + $0x474] ss:$8 sps:$4 sm:$0xff]   ;;  %v1595_v38 = vld [vmem:[%s2097_s1 + $0x470] ss:$8 sps:$4 sm:$0xff]  }
  0x55   :  { %1091 = vmatprep.subr.bf16.mxu0 %v1513_v39  ;;  %v1218_v39 = vld.sshfl [vmem:[%s2098_s0 + $0x8] sm:$0x1 pattern:$0x75316420] }
  0x57   :  { %1010 = vmatpush1.bf16.msra.mxu1 %v1508_v40  ;;  %v228_v40 = vrot.slane %v1218_v39, %v1760_v49 }
  0x58   :  { %1092 = vmatpush1.bf16.msra.mxu0 %v1511_v41  ;;  %1011 = vmatprep.subr.bf16.mxu1 %v1516_v42 }
  0x59   :  { %1093 = vmatprep.subr.bf16.mxu0 %v1519_v44 }
  0x5b   :  { %1012 = vmatpush1.bf16.msra.mxu1 %v1514_v45 }
  0x5c   :  { %1094 = vmatpush1.bf16.msra.mxu0 %v1517_v46  ;;  %1013 = vmatprep.subr.bf16.mxu1 %v1522_v47  ;;  %v1167_v46 = vsub.s32 0, %v1742_v43  ;;  %v1163_v47 = vld [vmem:[%s2099_s2] sm:$0x3] }
  0x5d   :  { %1095 = vmatprep.subr.bf16.mxu0 %v1525_v48  ;;  %v1171_v48 = vsub.s32 1, %v1742_v43 }
  0x5f   :  { %1014 = vmatpush1.bf16.msra.mxu1 %v1520_v50  ;;  %v1177_v50 = vld [vmem:[%s2100_s3] sm:$0x3] }
  0x60   :  { %1096 = vmatpush1.bf16.msra.mxu0 %v1523_v51  ;;  %1015 = vmatprep.subr.bf16.mxu1 %v1528_v52  ;;  %v1168_v51 = vrot.slane %v1163_v47, %v1167_v46 }
  0x61   :  { %1097 = vmatprep.subr.bf16.mxu0 %v1531_v53  ;;  %v1172_v53 = vrot.slane %v1163_v47, %v1171_v48 }
  0x63   :  { %1016 = vmatpush1.bf16.msra.mxu1 %v1526_v54 }
  0x64   :  { %1098 = vmatpush1.bf16.msra.mxu0 %v1529_v55  ;;  %1017 = vmatprep.subr.bf16.mxu1 %v1534_v56  ;;  %v1182_v55 = vrot.slane %v1177_v50, %v1167_v46 }
  0x65   :  { %1099 = vmatprep.subr.bf16.mxu0 %v1537_v57 }
  0x67   :  { %1018 = vmatpush1.bf16.msra.mxu1 %v1532_v58  ;;  %v1186_v58 = vrot.slane %v1177_v50, %v1171_v48 }
  0x68   :  { %1100 = vmatpush1.bf16.msra.mxu0 %v1535_v59  ;;  %1019 = vmatprep.subr.bf16.mxu1 %v1540_v60 }
  0x69   :  { %1101 = vmatprep.subr.bf16.mxu0 %v1543_v61 }
  0x6b   :  { %1020 = vmatpush1.bf16.msra.mxu1 %v1538_v62 }
  0x6c   :  { %1102 = vmatpush1.bf16.msra.mxu0 %v1541_v63  ;;  %1021 = vmatprep.subr.bf16.mxu1 %v1546_v0 }
  0x6d   :  { %1103 = vmatprep.subr.bf16.mxu0 %v1549_v1 }
  0x6f   :  { %1022 = vmatpush1.bf16.msra.mxu1 %v1544_v2 }
  0x70   :  { %1104 = vmatpush1.bf16.msra.mxu0 %v1547_v3  ;;  %1023 = vmatprep.subr.bf16.mxu1 %v1552_v4 }
  0x71   :  { %1105 = vmatprep.subr.bf16.mxu0 %v1555_v5 }
  0x73   :  { %1024 = vmatpush1.bf16.msra.mxu1 %v1550_v6 }
  0x74   :  { %1106 = vmatpush1.bf16.msra.mxu0 %v1553_v7  ;;  %1025 = vmatprep.subr.bf16.mxu1 %v1558_v8 }
  0x75   :  { %1107 = vmatprep.subr.bf16.mxu0 %v1561_v9 }
  0x77   :  { %1026 = vmatpush1.bf16.msra.mxu1 %v1556_v10 }
  0x78   :  { %1108 = vmatpush1.bf16.msra.mxu0 %v1559_v11  ;;  %1027 = vmatprep.subr.bf16.mxu1 %v1564_v12 }
  0x79   :  { %1109 = vmatprep.subr.bf16.mxu0 %v1567_v13 }
  0x7b   :  { %1028 = vmatpush1.bf16.msra.mxu1 %v1562_v14 }
  0x7c   :  { %1110 = vmatpush1.bf16.msra.mxu0 %v1565_v15  ;;  %1029 = vmatprep.subr.bf16.mxu1 %v1570_v16 }
  0x7d   :  { %1111 = vmatprep.subr.bf16.mxu0 %v1573_v19 }
  0x7f   :  { %1030 = vmatpush1.bf16.msra.mxu1 %v1568_v20 }
  0x80   :  { %1112 = vmatpush1.bf16.msra.mxu0 %v1571_v21 }
  0x81   :  { %1122 = vmatprep.subr.bf16.mxu0 %v1576_v22 }
  0x82   :  { %1032 = vmatmul.mubr.bf16.vlgmr.msra.gmra.mrb[0].mxu1 %v211_v23 }
  0x83   :  { %1114 = vmatmul.mubr.bf16.vlgmr.msra.gmra.mrb[0].mxu0 %v212_v24 }
  0x84   :  { %1123 = vmatpush1.bf16.msra.mxu0 %v1574_v25  ;;  %1154 = vmatprep.mubr.bf16.mxu0 %v1599_v27 }
  0x85   :  { %1124 = vmatprep.subr.bf16.mxu0 %v1579_v26 }
  0x88   :  { %1125 = vmatpush1.bf16.msra.mxu0 %v1577_v17 }
  0x89   :  { %1126 = vmatprep.subr.bf16.mxu0 %v1582_v18 }
  0x8c   :  { %1127 = vmatpush1.bf16.msra.mxu0 %v1580_v28 }
  0x8d   :  { %1128 = vmatprep.subr.bf16.mxu0 %v1585_v29 }
  0x90   :  { %1129 = vmatpush1.bf16.msra.mxu0 %v1583_v30 }
  0x91   :  { %1130 = vmatprep.subr.bf16.mxu0 %v1588_v31 }
  0x94   :  { %1131 = vmatpush1.bf16.msra.mxu0 %v1586_v32 }
  0x95   :  { %1132 = vmatprep.subr.bf16.mxu0 %v1591_v33 }
  0x98   :  { %1133 = vmatpush1.bf16.msra.mxu0 %v1589_v34 }
  0x99   :  { %1134 = vmatprep.subr.bf16.mxu0 %v1594_v35 }
  0x9c   :  { %1135 = vmatpush1.bf16.msra.mxu0 %v1592_v36 }
  0x9d   :  { %1136 = vmatprep.subr.bf16.mxu0 %v1597_v37 }
  0xa0   :  { %1137 = vmatpush1.bf16.msra.mxu0 %v1595_v38 }
  0xa3   :  { %1155 = vmatmul.mubr.bf16.vlgmr.msra.gmra.mrb[0].mxu0 %v228_v40 }
 0x155   :  { %v1033_v41 = vpop.f32.mrb[0].mxu1 }
 0x156   :  { %v1035_v42 = vpop.f32.mrb[1].mxu1 }
 0x157   :  { %v1037_v44 = vpop.f32.mrb[2].mxu1 }
 0x158   :  { %v1038_v45 = vpop.f32.mrb[3].mxu1 }
 0x176   :  { %v1156_v52 = vpop.f32.mrb[0].mxu0 }
 0x177   :  { %v1365_v54 = vadd.f32 %v1156_v52, %v1033_v41  ;;  %v1158_v56 = vpop.f32.mrb[1].mxu0 }
 0x178   :  { %v1366_v57 = vadd.f32 %v1158_v56, %v1035_v42  ;;  %v1160_v59 = vpop.f32.mrb[2].mxu0 }
 0x179   :  { %v1175_v60 = vmul.f32 %v1365_v54, %v1168_v51  ;;  %v1161_v61 = vpop.f32.mrb[3].mxu0 }
 0x17a   :  { %v1176_v62 = vmul.f32 %v1366_v57, %v1172_v53 }
 0x17b   :  { %v1189_v63 = vadd.f32 %v1182_v55, %v1175_v60 }
 0x17c   :  { %v1190_v0 = vadd.f32 %v1186_v58, %v1176_v62 }
 0x17d   :  { %v1191_v1 = vmax.f32 %v1189_v63, 0.0 }
 0x17e   :  { %v1192_v43 = vmax.f32 %v1190_v0, 0.0 }
 0x180   :  { %v1363_v2 = vpack.c.bf16 %v1192_v43, %v1191_v1 }
 0x182   :  { %v1204_v3 = vrot.slane %v1363_v2, %v1760_v49 }
 0x184   :  { %1364 = vst.sshfl [vmem:[%s2101_s4] sm:$0x5 pattern:$0x73625140] %v1204_v3 }

</bundles_post_ra>
